<compile_context>
chip_gen: v5e
topology: v5e:2x2
jax: 0.10.0
libtpu: 0.0.40
codegen_flags: <defaults>
</compile_context>

<pallas_src>
import functools

import jax
import jax.numpy as jnp
from jax.experimental import pallas as pl
from jax.experimental.pallas import tpu as pltpu


_LANE = 128                      # lane width: pad Cout to a multiple of this
_VMEM_LIMIT = 48 * 1024 * 1024   # fits v5e/v6e (128 MiB) and v7x (64 MiB) parts
_BLOCK_BUDGET = 6 * 1024 * 1024  # single-copy (input+output) block budget, bytes


def _round_up(x, m):
    return (x + m - 1) // m * m


def _apply_act(acc, activation):
    if activation == "relu":
        return jnp.maximum(acc, 0.0)
    if activation == "sigmoid":
        return jax.nn.sigmoid(acc)
    if activation == "none":
        return acc
    raise ValueError(activation)


# ---------------------------------------------------------------------------
# Fused direct convolution (stride == 1, any dilation): tap loop inside the
# kernel, per-tap MXU GEMMs accumulated in f32 — no im2col in HBM.
# ---------------------------------------------------------------------------
def _direct_conv_kernel(x_ref, w_ref, b_ref, o_ref, *,
                        kh, kw, dil, tile_h, ow, activation):
    # x_ref: (tile_h + halo_h, Wp, Cin)  bf16   (row tile of padded input)
    # w_ref: (kh, kw, Cin, Cout_p)       bf16
    # b_ref: (1, Cout_p)                 f32
    # o_ref: (tile_h, ow, Cout_p)        out_dtype
    cout_p = o_ref.shape[-1]

    def row_body(h, carry):
        acc = jnp.zeros((ow, cout_p), jnp.float32)
        for ki in range(kh):
            x_row = x_ref[h + ki * dil]                       # (Wp, Cin)
            for kj in range(kw):
                lhs = x_row[kj * dil:kj * dil + ow, :]        # (ow, Cin)
                acc = acc + jnp.dot(lhs, w_ref[ki, kj],
                                    preferred_element_type=jnp.float32)
        acc = _apply_act(acc + b_ref[...], activation)
        o_ref[h] = acc.astype(o_ref.dtype)
        return carry

    jax.lax.fori_loop(0, tile_h, row_body, 0)


def _direct_conv(x, w, b, padding, dilation, activation, out_dtype):
    """stride-1 conv.  x: (N,H,W,Cin) NHWC; w: (Cout,Cin,KH,KW) (PyTorch layout)."""
    n, h, wd, cin = x.shape
    cout, _, kh, kw = w.shape
    halo_h = dilation * (kh - 1)
    halo_w = dilation * (kw - 1)
    oh = h + 2 * padding - halo_h
    ow = wd + 2 * padding - halo_w
    wp = wd + 2 * padding
    cout_p = _round_up(cout, _LANE)

    # Output-row tile: as many rows as fit the per-block VMEM budget.
    tile_h = oh
    while tile_h > 1:
        blk = ((tile_h + halo_h) * wp * cin + tile_h * ow * cout_p) * 2  # bf16
        if blk <= _BLOCK_BUDGET:
            break
        tile_h = (tile_h + 1) // 2
    num_t = -(-oh // tile_h)
    oh_pad = num_t * tile_h
    extra_h = oh_pad - oh

    x_pad = jnp.pad(
        x, ((0, 0), (padding, padding + extra_h), (padding, padding), (0, 0)))
    x_pad = x_pad.astype(jnp.bfloat16)

    # Row tiles with halo (duplication factor (tile_h+halo)/tile_h << im2col's kh*kw).
    if num_t == 1:
        xt = x_pad[:, None]
    else:
        xt = jnp.stack(
            [x_pad[:, i * tile_h:i * tile_h + tile_h + halo_h]
             for i in range(num_t)], axis=1)
    # xt: (N, num_t, tile_h + halo_h, Wp, Cin)

    w_k = jnp.transpose(w, (2, 3, 1, 0)).astype(jnp.bfloat16)       # (KH,KW,Cin,Cout)
    w_k = jnp.pad(w_k, ((0, 0), (0, 0), (0, 0), (0, cout_p - cout)))
    b_k = jnp.pad(b.astype(jnp.float32), (0, cout_p - cout)).reshape(1, cout_p)

    kernel = functools.partial(
        _direct_conv_kernel, kh=kh, kw=kw, dil=dilation,
        tile_h=tile_h, ow=ow, activation=activation)

    out = pl.pallas_call(
        kernel,
        out_shape=jax.ShapeDtypeStruct((n, num_t, tile_h, ow, cout_p), out_dtype),
        grid=(n, num_t),
        in_specs=[
            pl.BlockSpec((None, None, tile_h + halo_h, wp, cin),
                         lambda bi, ti: (bi, ti, 0, 0, 0)),
            pl.BlockSpec((kh, kw, cin, cout_p), lambda bi, ti: (0, 0, 0, 0)),
            pl.BlockSpec((1, cout_p), lambda bi, ti: (0, 0)),
        ],
        out_specs=pl.BlockSpec((None, None, tile_h, ow, cout_p),
                               lambda bi, ti: (bi, ti, 0, 0, 0)),
        compiler_params=pltpu.CompilerParams(
            dimension_semantics=("parallel", "parallel"),
            vmem_limit_bytes=_VMEM_LIMIT),
    )(xt, w_k, b_k)

    out = out.reshape(n, oh_pad, ow, cout_p)[:, :oh, :, :cout]
    return out


# ---------------------------------------------------------------------------
# Tiled GEMM + bias + activation kernel (used only for the two stride-2 convs).
# ---------------------------------------------------------------------------
def _matmul_bias_act_kernel(a_ref, w_ref, b_ref, o_ref, *, activation):
    acc = jnp.dot(a_ref[...], w_ref[...], preferred_element_type=jnp.float32)
    acc = _apply_act(acc + b_ref[...], activation)
    o_ref[...] = acc.astype(o_ref.dtype)


def _matmul_bias_act(a, w, b, activation, out_dtype):
    """a: (M,K), w: (K,N), b: (N,) -> (M,N) in out_dtype (bf16 MXU, f32 accum)."""
    m, k = a.shape
    _, n_out = w.shape
    n_pad = _round_up(n_out, _LANE)

    # cdiv-tiled M (no single-giant-block fallback); >=2 grid steps when possible.
    if m >= 1024:
        tile_m = 512
    else:
        tile_m = max(8, _round_up(-(-m // 2), 8))
    m_pad = _round_up(m, tile_m)

    a_p = jnp.pad(a.astype(jnp.bfloat16), ((0, m_pad - m), (0, 0)))
    w_p = jnp.pad(w.astype(jnp.bfloat16), ((0, 0), (0, n_pad - n_out)))
    b_p = jnp.pad(b.astype(jnp.float32), (0, n_pad - n_out)).reshape(1, n_pad)

    out = pl.pallas_call(
        functools.partial(_matmul_bias_act_kernel, activation=activation),
        out_shape=jax.ShapeDtypeStruct((m_pad, n_pad), out_dtype),
        grid=(m_pad // tile_m,),
        in_specs=[
            pl.BlockSpec((tile_m, k), lambda i: (i, 0)),
            pl.BlockSpec((k, n_pad), lambda i: (0, 0)),
            pl.BlockSpec((1, n_pad), lambda i: (0, 0)),
        ],
        out_specs=pl.BlockSpec((tile_m, n_pad), lambda i: (i, 0)),
        compiler_params=pltpu.CompilerParams(
            dimension_semantics=("parallel",),
            vmem_limit_bytes=_VMEM_LIMIT),
    )(a_p, w_p, b_p)
    return out[:m, :n_out]


def _im2col(x_pad, kh, kw, stride, dilation, oh, ow):
    cols = []
    for i in range(kh):
        for j in range(kw):
            hs = i * dilation
            ws = j * dilation
            sl = x_pad[:, hs:hs + (oh - 1) * stride + 1:stride,
                          ws:ws + (ow - 1) * stride + 1:stride, :]
            cols.append(sl)
    return jnp.concatenate(cols, axis=-1)


# ---------------------------------------------------------------------------
# Conv / transposed-conv wrappers
# ---------------------------------------------------------------------------
def conv2d(x, w, b, stride, padding, dilation, activation,
           out_dtype=jnp.bfloat16):
    """x: (N,H,W,Cin) NHWC;  w: (Cout,Cin,KH,KW) (PyTorch Conv2d layout)."""
    n, h, wd, cin = x.shape
    cout, _, kh, kw = w.shape
    if stride == 1:
        return _direct_conv(x, w, b, padding, dilation, activation, out_dtype)

    # TODO(synk): the two stride-2 layers still use im2col + GEMM; a
    # space-to-depth (stride^2 sub-kernel) rewrite would remove the patch blowup.
    oh = (h + 2 * padding - dilation * (kh - 1) - 1) // stride + 1
    ow = (wd + 2 * padding - dilation * (kw - 1) - 1) // stride + 1
    x_pad = jnp.pad(
        x, ((0, 0), (padding, padding), (padding, padding), (0, 0))
    ).astype(jnp.bfloat16)
    patches = _im2col(x_pad, kh, kw, stride, dilation, oh, ow)
    patches = patches.reshape(n * oh * ow, kh * kw * cin)
    wmat = jnp.transpose(w, (2, 3, 1, 0)).reshape(kh * kw * cin, cout)
    out = _matmul_bias_act(patches, wmat, b, activation, out_dtype)
    return out.reshape(n, oh, ow, cout)


def deconv2d(x, w, b, stride, padding, activation, out_dtype=jnp.bfloat16):
    """x: (N,H,W,Cin) NHWC;  w: (Cin,Cout,KH,KW) (PyTorch ConvTranspose2d layout)."""
    cin, cout, kh, kw = w.shape
    n, h, wd, _ = x.shape
    # TODO(synk): replace the zero-dilated lowering with a stride^2 pixel-shuffle
    # decomposition to avoid the MXU work spent on the inserted zeros.
    xd = jnp.zeros((n, (h - 1) * stride + 1, (wd - 1) * stride + 1, cin), x.dtype)
    xd = xd.at[:, ::stride, ::stride, :].set(x)
    pad = kh - 1 - padding
    w_conv = jnp.transpose(jnp.flip(w, axis=(2, 3)), (1, 0, 2, 3))  # (Cout,Cin,KH,KW)
    return conv2d(xd, w_conv, b, stride=1, padding=pad, dilation=1,
                  activation=activation, out_dtype=out_dtype)


# ---------------------------------------------------------------------------
# CompletionNetwork: deterministic param init + forward
# ---------------------------------------------------------------------------
def _layer_specs(in_channels, out_channels, features):
    f = features
    s = []
    # _downscale
    s.append(("conv", in_channels, f, 5, 1, 2, 1, "relu"))
    s.append(("conv", f, 2 * f, 3, 2, 1, 1, "relu"))
    s.append(("conv", 2 * f, 2 * f, 3, 1, 1, 1, "relu"))
    # _bottleneck
    s.append(("conv", 2 * f, 4 * f, 3, 2, 1, 1, "relu"))
    s.append(("conv", 4 * f, 4 * f, 3, 1, 1, 1, "relu"))
    s.append(("conv", 4 * f, 4 * f, 3, 1, 1, 1, "relu"))
    s.append(("conv", 4 * f, 4 * f, 3, 1, 2, 2, "relu"))
    s.append(("conv", 4 * f, 4 * f, 3, 1, 4, 4, "relu"))
    s.append(("conv", 4 * f, 4 * f, 3, 1, 8, 8, "relu"))
    s.append(("conv", 4 * f, 4 * f, 3, 1, 16, 16, "relu"))
    s.append(("conv", 4 * f, 4 * f, 3, 1, 1, 1, "relu"))
    s.append(("conv", 4 * f, 4 * f, 3, 1, 1, 1, "relu"))
    # _upscale
    s.append(("deconv", 4 * f, 2 * f, 4, 2, 1, 1, "relu"))
    s.append(("conv", 2 * f, 2 * f, 3, 1, 1, 1, "relu"))
    s.append(("deconv", 2 * f, f, 4, 2, 1, 1, "relu"))
    s.append(("conv", f, f // 2, 3, 1, 1, 1, "relu"))
    # _head
    s.append(("conv", f // 2, out_channels, 3, 1, 1, 1, "sigmoid"))
    return s


def init_params(key, in_channels, out_channels=3, features=64):
    if features % 2 != 0:
        raise ValueError("Hidden features must be divisible by 2.")
    specs = _layer_specs(in_channels, out_channels, features)
    params = []
    for spec in specs:
        kind, cin, cout, k, stride, pad, dil, act = spec
        key, wk, bk = jax.random.split(key, 3)
        fan_in = cin * k * k
        scale = 1.0 / jnp.sqrt(jnp.float32(fan_in))
        if kind == "conv":
            w = jax.random.normal(wk, (cout, cin, k, k), jnp.float32) * scale
        else:  # deconv -> PyTorch ConvTranspose2d weight layout (Cin, Cout, K, K)
            w = jax.random.normal(wk, (cin, cout, k, k), jnp.float32) * scale
        b = jax.random.normal(bk, (cout,), jnp.float32) * 0.01
        params.append({"kind": kind, "w": w, "b": b, "stride": stride,
                       "pad": pad, "dil": dil, "act": act})
    return params


def completion_network_forward(x_nchw, params):
    """x_nchw: (N, C, H, W) float32 -> (N, out_channels, H, W) float32."""
    x = jnp.transpose(x_nchw, (0, 2, 3, 1))  # NCHW -> NHWC
    n_layers = len(params)
    for idx, p in enumerate(params):
        out_dtype = jnp.float32 if idx == n_layers - 1 else jnp.bfloat16
        if p["kind"] == "conv":
            x = conv2d(x, p["w"], p["b"], p["stride"], p["pad"], p["dil"],
                       p["act"], out_dtype)
        else:
            x = deconv2d(x, p["w"], p["b"], p["stride"], p["pad"],
                         p["act"], out_dtype)
    return jnp.transpose(x, (0, 3, 1, 2))  # NHWC -> NCHW


# ---------------------------------------------------------------------------
if __name__ == "__main__":
    key = jax.random.PRNGKey(0)
    k_in, k_params = jax.random.split(key)

    # small shapes: batch=2, in_channels=4, spatial=16x16, features=8
    in_channels, out_channels, features = 4, 3, 8
    x = jax.random.normal(k_in, (2, in_channels, 16, 16), jnp.float32)

    params = init_params(k_params, in_channels, out_channels, features)

    fwd = jax.jit(lambda inp: completion_network_forward(inp, params))
    y = fwd(x)
    jax.block_until_ready(y)

    assert y.shape == (2, out_channels, 16, 16), y.shape
    assert y.dtype == jnp.float32
    assert bool(jnp.all(jnp.isfinite(y)))
    assert bool(jnp.all((y >= 0.0) & (y <= 1.0)))  # sigmoid head
    print("KERNEL_OK")
</pallas_src>

<mosaic_0001>
module attributes {stable_mosaic.version = 11 : i64} {
  func.func @_direct_conv_kernel(%arg0: i32, %arg1: i32, %arg2: memref<1x1x20x20x4xbf16, #tpu.memory_space<vmem>>, %arg3: memref<5x5x4x128xbf16, #tpu.memory_space<vmem>>, %arg4: memref<1x128xf32, #tpu.memory_space<vmem>>, %arg5: memref<1x1x16x16x128xbf16, #tpu.memory_space<vmem>>) attributes {dimension_semantics = [#tpu.dimension_semantics<parallel>, #tpu.dimension_semantics<parallel>], iteration_bounds = array<i64: 2, 1>, scalar_prefetch = 0 : i64, scratch_operands = 0 : i64, tpu.core_type = #tpu.core_type<tc>, window_params = [{transform_indices = @transform_0, window_bounds = array<i64: 1, 1, 20, 20, 4>}, {pipeline_mode = #tpu.pipeline_mode<synchronous>, transform_indices = @transform_1, window_bounds = array<i64: 5, 5, 4, 128>}, {pipeline_mode = #tpu.pipeline_mode<synchronous>, transform_indices = @transform_2, window_bounds = array<i64: 1, 128>}, {transform_indices = @transform_3, window_bounds = array<i64: 1, 1, 16, 16, 128>}]} {
    %c0_i32 = arith.constant 0 : i32
    %c16_i32 = arith.constant 16 : i32
    %0 = arith.addi %c0_i32, %c16_i32 : i32
    %c1_i32 = arith.constant 1 : i32
    scf.for %arg6 = %c0_i32 to %0 step %c1_i32  : i32 {
      %cst = arith.constant 0.000000e+00 : f32
      %1 = vector.broadcast %cst : f32 to vector<16x128xf32>
      %c0_i32_1 = arith.constant 0 : i32
      %2 = arith.addi %arg6, %c0_i32_1 : i32
      %c0 = arith.constant 0 : index
      %c0_2 = arith.constant 0 : index
      %3 = arith.index_cast %2 : i32 to index
      %c0_3 = arith.constant 0 : index
      %c0_4 = arith.constant 0 : index
      %4 = vector.load %arg2[%c0, %c0_2, %3, %c0_3, %c0_4] : memref<1x1x20x20x4xbf16, #tpu.memory_space<vmem>>, vector<1x1x1x20x4xbf16>
      %5 = vector.shape_cast %4 : vector<1x1x1x20x4xbf16> to vector<20x4xbf16>
      %6 = vector.extract_strided_slice %5 {offsets = [0, 0], sizes = [16, 4], strides = [1, 1]} : vector<20x4xbf16> to vector<16x4xbf16>
      %c0_5 = arith.constant 0 : index
      %c0_6 = arith.constant 0 : index
      %c0_7 = arith.constant 0 : index
      %c0_8 = arith.constant 0 : index
      %7 = vector.load %arg3[%c0_5, %c0_6, %c0_7, %c0_8] : memref<5x5x4x128xbf16, #tpu.memory_space<vmem>>, vector<1x1x4x128xbf16>
      %8 = vector.shape_cast %7 : vector<1x1x4x128xbf16> to vector<4x128xbf16>
      %cst_9 = arith.constant dense<0.000000e+00> : vector<16x128xf32>
      %9 = tpu.matmul %6, %8, %cst_9 {dimension_numbers = #tpu.dot_dimension_numbers<[1], [0], [0], [1], [0, 0, 1, 1], [], []>} : vector<16x4xbf16>, vector<4x128xbf16>, vector<16x128xf32> -> vector<16x128xf32>
      %10 = arith.addf %1, %9 : vector<16x128xf32>
      %11 = vector.extract_strided_slice %5 {offsets = [1, 0], sizes = [16, 4], strides = [1, 1]} : vector<20x4xbf16> to vector<16x4xbf16>
      %c0_10 = arith.constant 0 : index
      %c1 = arith.constant 1 : index
      %c0_11 = arith.constant 0 : index
      %c0_12 = arith.constant 0 : index
      %12 = vector.load %arg3[%c0_10, %c1, %c0_11, %c0_12] : memref<5x5x4x128xbf16, #tpu.memory_space<vmem>>, vector<1x1x4x128xbf16>
      %13 = vector.shape_cast %12 : vector<1x1x4x128xbf16> to vector<4x128xbf16>
      %cst_13 = arith.constant dense<0.000000e+00> : vector<16x128xf32>
      %14 = tpu.matmul %11, %13, %cst_13 {dimension_numbers = #tpu.dot_dimension_numbers<[1], [0], [0], [1], [0, 0, 1, 1], [], []>} : vector<16x4xbf16>, vector<4x128xbf16>, vector<16x128xf32> -> vector<16x128xf32>
      %15 = arith.addf %10, %14 : vector<16x128xf32>
      %16 = vector.extract_strided_slice %5 {offsets = [2, 0], sizes = [16, 4], strides = [1, 1]} : vector<20x4xbf16> to vector<16x4xbf16>
      %c0_14 = arith.constant 0 : index
      %c2 = arith.constant 2 : index
      %c0_15 = arith.constant 0 : index
      %c0_16 = arith.constant 0 : index
      %17 = vector.load %arg3[%c0_14, %c2, %c0_15, %c0_16] : memref<5x5x4x128xbf16, #tpu.memory_space<vmem>>, vector<1x1x4x128xbf16>
      %18 = vector.shape_cast %17 : vector<1x1x4x128xbf16> to vector<4x128xbf16>
      %cst_17 = arith.constant dense<0.000000e+00> : vector<16x128xf32>
      %19 = tpu.matmul %16, %18, %cst_17 {dimension_numbers = #tpu.dot_dimension_numbers<[1], [0], [0], [1], [0, 0, 1, 1], [], []>} : vector<16x4xbf16>, vector<4x128xbf16>, vector<16x128xf32> -> vector<16x128xf32>
      %20 = arith.addf %15, %19 : vector<16x128xf32>
      %21 = vector.extract_strided_slice %5 {offsets = [3, 0], sizes = [16, 4], strides = [1, 1]} : vector<20x4xbf16> to vector<16x4xbf16>
      %c0_18 = arith.constant 0 : index
      %c3 = arith.constant 3 : index
      %c0_19 = arith.constant 0 : index
      %c0_20 = arith.constant 0 : index
      %22 = vector.load %arg3[%c0_18, %c3, %c0_19, %c0_20] : memref<5x5x4x128xbf16, #tpu.memory_space<vmem>>, vector<1x1x4x128xbf16>
      %23 = vector.shape_cast %22 : vector<1x1x4x128xbf16> to vector<4x128xbf16>
      %cst_21 = arith.constant dense<0.000000e+00> : vector<16x128xf32>
      %24 = tpu.matmul %21, %23, %cst_21 {dimension_numbers = #tpu.dot_dimension_numbers<[1], [0], [0], [1], [0, 0, 1, 1], [], []>} : vector<16x4xbf16>, vector<4x128xbf16>, vector<16x128xf32> -> vector<16x128xf32>
      %25 = arith.addf %20, %24 : vector<16x128xf32>
      %26 = vector.extract_strided_slice %5 {offsets = [4, 0], sizes = [16, 4], strides = [1, 1]} : vector<20x4xbf16> to vector<16x4xbf16>
      %c0_22 = arith.constant 0 : index
      %c4 = arith.constant 4 : index
      %c0_23 = arith.constant 0 : index
      %c0_24 = arith.constant 0 : index
      %27 = vector.load %arg3[%c0_22, %c4, %c0_23, %c0_24] : memref<5x5x4x128xbf16, #tpu.memory_space<vmem>>, vector<1x1x4x128xbf16>
      %28 = vector.shape_cast %27 : vector<1x1x4x128xbf16> to vector<4x128xbf16>
      %cst_25 = arith.constant dense<0.000000e+00> : vector<16x128xf32>
      %29 = tpu.matmul %26, %28, %cst_25 {dimension_numbers = #tpu.dot_dimension_numbers<[1], [0], [0], [1], [0, 0, 1, 1], [], []>} : vector<16x4xbf16>, vector<4x128xbf16>, vector<16x128xf32> -> vector<16x128xf32>
      %30 = arith.addf %25, %29 : vector<16x128xf32>
      %c1_i32_26 = arith.constant 1 : i32
      %31 = arith.addi %arg6, %c1_i32_26 : i32
      %c0_27 = arith.constant 0 : index
      %c0_28 = arith.constant 0 : index
      %32 = arith.index_cast %31 : i32 to index
      %c0_29 = arith.constant 0 : index
      %c0_30 = arith.constant 0 : index
      %33 = vector.load %arg2[%c0_27, %c0_28, %32, %c0_29, %c0_30] : memref<1x1x20x20x4xbf16, #tpu.memory_space<vmem>>, vector<1x1x1x20x4xbf16>
      %34 = vector.shape_cast %33 : vector<1x1x1x20x4xbf16> to vector<20x4xbf16>
      %35 = vector.extract_strided_slice %34 {offsets = [0, 0], sizes = [16, 4], strides = [1, 1]} : vector<20x4xbf16> to vector<16x4xbf16>
      %c1_31 = arith.constant 1 : index
      %c0_32 = arith.constant 0 : index
      %c0_33 = arith.constant 0 : index
      %c0_34 = arith.constant 0 : index
      %36 = vector.load %arg3[%c1_31, %c0_32, %c0_33, %c0_34] : memref<5x5x4x128xbf16, #tpu.memory_space<vmem>>, vector<1x1x4x128xbf16>
      %37 = vector.shape_cast %36 : vector<1x1x4x128xbf16> to vector<4x128xbf16>
      %cst_35 = arith.constant dense<0.000000e+00> : vector<16x128xf32>
      %38 = tpu.matmul %35, %37, %cst_35 {dimension_numbers = #tpu.dot_dimension_numbers<[1], [0], [0], [1], [0, 0, 1, 1], [], []>} : vector<16x4xbf16>, vector<4x128xbf16>, vector<16x128xf32> -> vector<16x128xf32>
      %39 = arith.addf %30, %38 : vector<16x128xf32>
      %40 = vector.extract_strided_slice %34 {offsets = [1, 0], sizes = [16, 4], strides = [1, 1]} : vector<20x4xbf16> to vector<16x4xbf16>
      %c1_36 = arith.constant 1 : index
      %c1_37 = arith.constant 1 : index
      %c0_38 = arith.constant 0 : index
      %c0_39 = arith.constant 0 : index
      %41 = vector.load %arg3[%c1_36, %c1_37, %c0_38, %c0_39] : memref<5x5x4x128xbf16, #tpu.memory_space<vmem>>, vector<1x1x4x128xbf16>
      %42 = vector.shape_cast %41 : vector<1x1x4x128xbf16> to vector<4x128xbf16>
      %cst_40 = arith.constant dense<0.000000e+00> : vector<16x128xf32>
      %43 = tpu.matmul %40, %42, %cst_40 {dimension_numbers = #tpu.dot_dimension_numbers<[1], [0], [0], [1], [0, 0, 1, 1], [], []>} : vector<16x4xbf16>, vector<4x128xbf16>, vector<16x128xf32> -> vector<16x128xf32>
      %44 = arith.addf %39, %43 : vector<16x128xf32>
      %45 = vector.extract_strided_slice %34 {offsets = [2, 0], sizes = [16, 4], strides = [1, 1]} : vector<20x4xbf16> to vector<16x4xbf16>
      %c1_41 = arith.constant 1 : index
      %c2_42 = arith.constant 2 : index
      %c0_43 = arith.constant 0 : index
      %c0_44 = arith.constant 0 : index
      %46 = vector.load %arg3[%c1_41, %c2_42, %c0_43, %c0_44] : memref<5x5x4x128xbf16, #tpu.memory_space<vmem>>, vector<1x1x4x128xbf16>
      %47 = vector.shape_cast %46 : vector<1x1x4x128xbf16> to vector<4x128xbf16>
      %cst_45 = arith.constant dense<0.000000e+00> : vector<16x128xf32>
      %48 = tpu.matmul %45, %47, %cst_45 {dimension_numbers = #tpu.dot_dimension_numbers<[1], [0], [0], [1], [0, 0, 1, 1], [], []>} : vector<16x4xbf16>, vector<4x128xbf16>, vector<16x128xf32> -> vector<16x128xf32>
      %49 = arith.addf %44, %48 : vector<16x128xf32>
      %50 = vector.extract_strided_slice %34 {offsets = [3, 0], sizes = [16, 4], strides = [1, 1]} : vector<20x4xbf16> to vector<16x4xbf16>
      %c1_46 = arith.constant 1 : index
      %c3_47 = arith.constant 3 : index
      %c0_48 = arith.constant 0 : index
      %c0_49 = arith.constant 0 : index
      %51 = vector.load %arg3[%c1_46, %c3_47, %c0_48, %c0_49] : memref<5x5x4x128xbf16, #tpu.memory_space<vmem>>, vector<1x1x4x128xbf16>
      %52 = vector.shape_cast %51 : vector<1x1x4x128xbf16> to vector<4x128xbf16>
      %cst_50 = arith.constant dense<0.000000e+00> : vector<16x128xf32>
      %53 = tpu.matmul %50, %52, %cst_50 {dimension_numbers = #tpu.dot_dimension_numbers<[1], [0], [0], [1], [0, 0, 1, 1], [], []>} : vector<16x4xbf16>, vector<4x128xbf16>, vector<16x128xf32> -> vector<16x128xf32>
      %54 = arith.addf %49, %53 : vector<16x128xf32>
      %55 = vector.extract_strided_slice %34 {offsets = [4, 0], sizes = [16, 4], strides = [1, 1]} : vector<20x4xbf16> to vector<16x4xbf16>
      %c1_51 = arith.constant 1 : index
      %c4_52 = arith.constant 4 : index
      %c0_53 = arith.constant 0 : index
      %c0_54 = arith.constant 0 : index
      %56 = vector.load %arg3[%c1_51, %c4_52, %c0_53, %c0_54] : memref<5x5x4x128xbf16, #tpu.memory_space<vmem>>, vector<1x1x4x128xbf16>
      %57 = vector.shape_cast %56 : vector<1x1x4x128xbf16> to vector<4x128xbf16>
      %cst_55 = arith.constant dense<0.000000e+00> : vector<16x128xf32>
      %58 = tpu.matmul %55, %57, %cst_55 {dimension_numbers = #tpu.dot_dimension_numbers<[1], [0], [0], [1], [0, 0, 1, 1], [], []>} : vector<16x4xbf16>, vector<4x128xbf16>, vector<16x128xf32> -> vector<16x128xf32>
      %59 = arith.addf %54, %58 : vector<16x128xf32>
      %c2_i32 = arith.constant 2 : i32
      %60 = arith.addi %arg6, %c2_i32 : i32
      %c0_56 = arith.constant 0 : index
      %c0_57 = arith.constant 0 : index
      %61 = arith.index_cast %60 : i32 to index
      %c0_58 = arith.constant 0 : index
      %c0_59 = arith.constant 0 : index
      %62 = vector.load %arg2[%c0_56, %c0_57, %61, %c0_58, %c0_59] : memref<1x1x20x20x4xbf16, #tpu.memory_space<vmem>>, vector<1x1x1x20x4xbf16>
      %63 = vector.shape_cast %62 : vector<1x1x1x20x4xbf16> to vector<20x4xbf16>
      %64 = vector.extract_strided_slice %63 {offsets = [0, 0], sizes = [16, 4], strides = [1, 1]} : vector<20x4xbf16> to vector<16x4xbf16>
      %c2_60 = arith.constant 2 : index
      %c0_61 = arith.constant 0 : index
      %c0_62 = arith.constant 0 : index
      %c0_63 = arith.constant 0 : index
      %65 = vector.load %arg3[%c2_60, %c0_61, %c0_62, %c0_63] : memref<5x5x4x128xbf16, #tpu.memory_space<vmem>>, vector<1x1x4x128xbf16>
      %66 = vector.shape_cast %65 : vector<1x1x4x128xbf16> to vector<4x128xbf16>
      %cst_64 = arith.constant dense<0.000000e+00> : vector<16x128xf32>
      %67 = tpu.matmul %64, %66, %cst_64 {dimension_numbers = #tpu.dot_dimension_numbers<[1], [0], [0], [1], [0, 0, 1, 1], [], []>} : vector<16x4xbf16>, vector<4x128xbf16>, vector<16x128xf32> -> vector<16x128xf32>
      %68 = arith.addf %59, %67 : vector<16x128xf32>
      %69 = vector.extract_strided_slice %63 {offsets = [1, 0], sizes = [16, 4], strides = [1, 1]} : vector<20x4xbf16> to vector<16x4xbf16>
      %c2_65 = arith.constant 2 : index
      %c1_66 = arith.constant 1 : index
      %c0_67 = arith.constant 0 : index
      %c0_68 = arith.constant 0 : index
      %70 = vector.load %arg3[%c2_65, %c1_66, %c0_67, %c0_68] : memref<5x5x4x128xbf16, #tpu.memory_space<vmem>>, vector<1x1x4x128xbf16>
      %71 = vector.shape_cast %70 : vector<1x1x4x128xbf16> to vector<4x128xbf16>
      %cst_69 = arith.constant dense<0.000000e+00> : vector<16x128xf32>
      %72 = tpu.matmul %69, %71, %cst_69 {dimension_numbers = #tpu.dot_dimension_numbers<[1], [0], [0], [1], [0, 0, 1, 1], [], []>} : vector<16x4xbf16>, vector<4x128xbf16>, vector<16x128xf32> -> vector<16x128xf32>
      %73 = arith.addf %68, %72 : vector<16x128xf32>
      %74 = vector.extract_strided_slice %63 {offsets = [2, 0], sizes = [16, 4], strides = [1, 1]} : vector<20x4xbf16> to vector<16x4xbf16>
      %c2_70 = arith.constant 2 : index
      %c2_71 = arith.constant 2 : index
      %c0_72 = arith.constant 0 : index
      %c0_73 = arith.constant 0 : index
      %75 = vector.load %arg3[%c2_70, %c2_71, %c0_72, %c0_73] : memref<5x5x4x128xbf16, #tpu.memory_space<vmem>>, vector<1x1x4x128xbf16>
      %76 = vector.shape_cast %75 : vector<1x1x4x128xbf16> to vector<4x128xbf16>
      %cst_74 = arith.constant dense<0.000000e+00> : vector<16x128xf32>
      %77 = tpu.matmul %74, %76, %cst_74 {dimension_numbers = #tpu.dot_dimension_numbers<[1], [0], [0], [1], [0, 0, 1, 1], [], []>} : vector<16x4xbf16>, vector<4x128xbf16>, vector<16x128xf32> -> vector<16x128xf32>
      %78 = arith.addf %73, %77 : vector<16x128xf32>
      %79 = vector.extract_strided_slice %63 {offsets = [3, 0], sizes = [16, 4], strides = [1, 1]} : vector<20x4xbf16> to vector<16x4xbf16>
      %c2_75 = arith.constant 2 : index
      %c3_76 = arith.constant 3 : index
      %c0_77 = arith.constant 0 : index
      %c0_78 = arith.constant 0 : index
      %80 = vector.load %arg3[%c2_75, %c3_76, %c0_77, %c0_78] : memref<5x5x4x128xbf16, #tpu.memory_space<vmem>>, vector<1x1x4x128xbf16>
      %81 = vector.shape_cast %80 : vector<1x1x4x128xbf16> to vector<4x128xbf16>
      %cst_79 = arith.constant dense<0.000000e+00> : vector<16x128xf32>
      %82 = tpu.matmul %79, %81, %cst_79 {dimension_numbers = #tpu.dot_dimension_numbers<[1], [0], [0], [1], [0, 0, 1, 1], [], []>} : vector<16x4xbf16>, vector<4x128xbf16>, vector<16x128xf32> -> vector<16x128xf32>
      %83 = arith.addf %78, %82 : vector<16x128xf32>
      %84 = vector.extract_strided_slice %63 {offsets = [4, 0], sizes = [16, 4], strides = [1, 1]} : vector<20x4xbf16> to vector<16x4xbf16>
      %c2_80 = arith.constant 2 : index
      %c4_81 = arith.constant 4 : index
      %c0_82 = arith.constant 0 : index
      %c0_83 = arith.constant 0 : index
      %85 = vector.load %arg3[%c2_80, %c4_81, %c0_82, %c0_83] : memref<5x5x4x128xbf16, #tpu.memory_space<vmem>>, vector<1x1x4x128xbf16>
      %86 = vector.shape_cast %85 : vector<1x1x4x128xbf16> to vector<4x128xbf16>
      %cst_84 = arith.constant dense<0.000000e+00> : vector<16x128xf32>
      %87 = tpu.matmul %84, %86, %cst_84 {dimension_numbers = #tpu.dot_dimension_numbers<[1], [0], [0], [1], [0, 0, 1, 1], [], []>} : vector<16x4xbf16>, vector<4x128xbf16>, vector<16x128xf32> -> vector<16x128xf32>
      %88 = arith.addf %83, %87 : vector<16x128xf32>
      %c3_i32 = arith.constant 3 : i32
      %89 = arith.addi %arg6, %c3_i32 : i32
      %c0_85 = arith.constant 0 : index
      %c0_86 = arith.constant 0 : index
      %90 = arith.index_cast %89 : i32 to index
      %c0_87 = arith.constant 0 : index
      %c0_88 = arith.constant 0 : index
      %91 = vector.load %arg2[%c0_85, %c0_86, %90, %c0_87, %c0_88] : memref<1x1x20x20x4xbf16, #tpu.memory_space<vmem>>, vector<1x1x1x20x4xbf16>
      %92 = vector.shape_cast %91 : vector<1x1x1x20x4xbf16> to vector<20x4xbf16>
      %93 = vector.extract_strided_slice %92 {offsets = [0, 0], sizes = [16, 4], strides = [1, 1]} : vector<20x4xbf16> to vector<16x4xbf16>
      %c3_89 = arith.constant 3 : index
      %c0_90 = arith.constant 0 : index
      %c0_91 = arith.constant 0 : index
      %c0_92 = arith.constant 0 : index
      %94 = vector.load %arg3[%c3_89, %c0_90, %c0_91, %c0_92] : memref<5x5x4x128xbf16, #tpu.memory_space<vmem>>, vector<1x1x4x128xbf16>
      %95 = vector.shape_cast %94 : vector<1x1x4x128xbf16> to vector<4x128xbf16>
      %cst_93 = arith.constant dense<0.000000e+00> : vector<16x128xf32>
      %96 = tpu.matmul %93, %95, %cst_93 {dimension_numbers = #tpu.dot_dimension_numbers<[1], [0], [0], [1], [0, 0, 1, 1], [], []>} : vector<16x4xbf16>, vector<4x128xbf16>, vector<16x128xf32> -> vector<16x128xf32>
      %97 = arith.addf %88, %96 : vector<16x128xf32>
      %98 = vector.extract_strided_slice %92 {offsets = [1, 0], sizes = [16, 4], strides = [1, 1]} : vector<20x4xbf16> to vector<16x4xbf16>
      %c3_94 = arith.constant 3 : index
      %c1_95 = arith.constant 1 : index
      %c0_96 = arith.constant 0 : index
      %c0_97 = arith.constant 0 : index
      %99 = vector.load %arg3[%c3_94, %c1_95, %c0_96, %c0_97] : memref<5x5x4x128xbf16, #tpu.memory_space<vmem>>, vector<1x1x4x128xbf16>
      %100 = vector.shape_cast %99 : vector<1x1x4x128xbf16> to vector<4x128xbf16>
      %cst_98 = arith.constant dense<0.000000e+00> : vector<16x128xf32>
      %101 = tpu.matmul %98, %100, %cst_98 {dimension_numbers = #tpu.dot_dimension_numbers<[1], [0], [0], [1], [0, 0, 1, 1], [], []>} : vector<16x4xbf16>, vector<4x128xbf16>, vector<16x128xf32> -> vector<16x128xf32>
      %102 = arith.addf %97, %101 : vector<16x128xf32>
      %103 = vector.extract_strided_slice %92 {offsets = [2, 0], sizes = [16, 4], strides = [1, 1]} : vector<20x4xbf16> to vector<16x4xbf16>
      %c3_99 = arith.constant 3 : index
      %c2_100 = arith.constant 2 : index
      %c0_101 = arith.constant 0 : index
      %c0_102 = arith.constant 0 : index
      %104 = vector.load %arg3[%c3_99, %c2_100, %c0_101, %c0_102] : memref<5x5x4x128xbf16, #tpu.memory_space<vmem>>, vector<1x1x4x128xbf16>
      %105 = vector.shape_cast %104 : vector<1x1x4x128xbf16> to vector<4x128xbf16>
      %cst_103 = arith.constant dense<0.000000e+00> : vector<16x128xf32>
      %106 = tpu.matmul %103, %105, %cst_103 {dimension_numbers = #tpu.dot_dimension_numbers<[1], [0], [0], [1], [0, 0, 1, 1], [], []>} : vector<16x4xbf16>, vector<4x128xbf16>, vector<16x128xf32> -> vector<16x128xf32>
      %107 = arith.addf %102, %106 : vector<16x128xf32>
      %108 = vector.extract_strided_slice %92 {offsets = [3, 0], sizes = [16, 4], strides = [1, 1]} : vector<20x4xbf16> to vector<16x4xbf16>
      %c3_104 = arith.constant 3 : index
      %c3_105 = arith.constant 3 : index
      %c0_106 = arith.constant 0 : index
      %c0_107 = arith.constant 0 : index
      %109 = vector.load %arg3[%c3_104, %c3_105, %c0_106, %c0_107] : memref<5x5x4x128xbf16, #tpu.memory_space<vmem>>, vector<1x1x4x128xbf16>
      %110 = vector.shape_cast %109 : vector<1x1x4x128xbf16> to vector<4x128xbf16>
      %cst_108 = arith.constant dense<0.000000e+00> : vector<16x128xf32>
      %111 = tpu.matmul %108, %110, %cst_108 {dimension_numbers = #tpu.dot_dimension_numbers<[1], [0], [0], [1], [0, 0, 1, 1], [], []>} : vector<16x4xbf16>, vector<4x128xbf16>, vector<16x128xf32> -> vector<16x128xf32>
      %112 = arith.addf %107, %111 : vector<16x128xf32>
      %113 = vector.extract_strided_slice %92 {offsets = [4, 0], sizes = [16, 4], strides = [1, 1]} : vector<20x4xbf16> to vector<16x4xbf16>
      %c3_109 = arith.constant 3 : index
      %c4_110 = arith.constant 4 : index
      %c0_111 = arith.constant 0 : index
      %c0_112 = arith.constant 0 : index
      %114 = vector.load %arg3[%c3_109, %c4_110, %c0_111, %c0_112] : memref<5x5x4x128xbf16, #tpu.memory_space<vmem>>, vector<1x1x4x128xbf16>
      %115 = vector.shape_cast %114 : vector<1x1x4x128xbf16> to vector<4x128xbf16>
      %cst_113 = arith.constant dense<0.000000e+00> : vector<16x128xf32>
      %116 = tpu.matmul %113, %115, %cst_113 {dimension_numbers = #tpu.dot_dimension_numbers<[1], [0], [0], [1], [0, 0, 1, 1], [], []>} : vector<16x4xbf16>, vector<4x128xbf16>, vector<16x128xf32> -> vector<16x128xf32>
      %117 = arith.addf %112, %116 : vector<16x128xf32>
      %c4_i32 = arith.constant 4 : i32
      %118 = arith.addi %arg6, %c4_i32 : i32
      %c0_114 = arith.constant 0 : index
      %c0_115 = arith.constant 0 : index
      %119 = arith.index_cast %118 : i32 to index
      %c0_116 = arith.constant 0 : index
      %c0_117 = arith.constant 0 : index
      %120 = vector.load %arg2[%c0_114, %c0_115, %119, %c0_116, %c0_117] : memref<1x1x20x20x4xbf16, #tpu.memory_space<vmem>>, vector<1x1x1x20x4xbf16>
      %121 = vector.shape_cast %120 : vector<1x1x1x20x4xbf16> to vector<20x4xbf16>
      %122 = vector.extract_strided_slice %121 {offsets = [0, 0], sizes = [16, 4], strides = [1, 1]} : vector<20x4xbf16> to vector<16x4xbf16>
      %c4_118 = arith.constant 4 : index
      %c0_119 = arith.constant 0 : index
      %c0_120 = arith.constant 0 : index
      %c0_121 = arith.constant 0 : index
      %123 = vector.load %arg3[%c4_118, %c0_119, %c0_120, %c0_121] : memref<5x5x4x128xbf16, #tpu.memory_space<vmem>>, vector<1x1x4x128xbf16>
      %124 = vector.shape_cast %123 : vector<1x1x4x128xbf16> to vector<4x128xbf16>
      %cst_122 = arith.constant dense<0.000000e+00> : vector<16x128xf32>
      %125 = tpu.matmul %122, %124, %cst_122 {dimension_numbers = #tpu.dot_dimension_numbers<[1], [0], [0], [1], [0, 0, 1, 1], [], []>} : vector<16x4xbf16>, vector<4x128xbf16>, vector<16x128xf32> -> vector<16x128xf32>
      %126 = arith.addf %117, %125 : vector<16x128xf32>
      %127 = vector.extract_strided_slice %121 {offsets = [1, 0], sizes = [16, 4], strides = [1, 1]} : vector<20x4xbf16> to vector<16x4xbf16>
      %c4_123 = arith.constant 4 : index
      %c1_124 = arith.constant 1 : index
      %c0_125 = arith.constant 0 : index
      %c0_126 = arith.constant 0 : index
      %128 = vector.load %arg3[%c4_123, %c1_124, %c0_125, %c0_126] : memref<5x5x4x128xbf16, #tpu.memory_space<vmem>>, vector<1x1x4x128xbf16>
      %129 = vector.shape_cast %128 : vector<1x1x4x128xbf16> to vector<4x128xbf16>
      %cst_127 = arith.constant dense<0.000000e+00> : vector<16x128xf32>
      %130 = tpu.matmul %127, %129, %cst_127 {dimension_numbers = #tpu.dot_dimension_numbers<[1], [0], [0], [1], [0, 0, 1, 1], [], []>} : vector<16x4xbf16>, vector<4x128xbf16>, vector<16x128xf32> -> vector<16x128xf32>
      %131 = arith.addf %126, %130 : vector<16x128xf32>
      %132 = vector.extract_strided_slice %121 {offsets = [2, 0], sizes = [16, 4], strides = [1, 1]} : vector<20x4xbf16> to vector<16x4xbf16>
      %c4_128 = arith.constant 4 : index
      %c2_129 = arith.constant 2 : index
      %c0_130 = arith.constant 0 : index
      %c0_131 = arith.constant 0 : index
      %133 = vector.load %arg3[%c4_128, %c2_129, %c0_130, %c0_131] : memref<5x5x4x128xbf16, #tpu.memory_space<vmem>>, vector<1x1x4x128xbf16>
      %134 = vector.shape_cast %133 : vector<1x1x4x128xbf16> to vector<4x128xbf16>
      %cst_132 = arith.constant dense<0.000000e+00> : vector<16x128xf32>
      %135 = tpu.matmul %132, %134, %cst_132 {dimension_numbers = #tpu.dot_dimension_numbers<[1], [0], [0], [1], [0, 0, 1, 1], [], []>} : vector<16x4xbf16>, vector<4x128xbf16>, vector<16x128xf32> -> vector<16x128xf32>
      %136 = arith.addf %131, %135 : vector<16x128xf32>
      %137 = vector.extract_strided_slice %121 {offsets = [3, 0], sizes = [16, 4], strides = [1, 1]} : vector<20x4xbf16> to vector<16x4xbf16>
      %c4_133 = arith.constant 4 : index
      %c3_134 = arith.constant 3 : index
      %c0_135 = arith.constant 0 : index
      %c0_136 = arith.constant 0 : index
      %138 = vector.load %arg3[%c4_133, %c3_134, %c0_135, %c0_136] : memref<5x5x4x128xbf16, #tpu.memory_space<vmem>>, vector<1x1x4x128xbf16>
      %139 = vector.shape_cast %138 : vector<1x1x4x128xbf16> to vector<4x128xbf16>
      %cst_137 = arith.constant dense<0.000000e+00> : vector<16x128xf32>
      %140 = tpu.matmul %137, %139, %cst_137 {dimension_numbers = #tpu.dot_dimension_numbers<[1], [0], [0], [1], [0, 0, 1, 1], [], []>} : vector<16x4xbf16>, vector<4x128xbf16>, vector<16x128xf32> -> vector<16x128xf32>
      %141 = arith.addf %136, %140 : vector<16x128xf32>
      %142 = vector.extract_strided_slice %121 {offsets = [4, 0], sizes = [16, 4], strides = [1, 1]} : vector<20x4xbf16> to vector<16x4xbf16>
      %c4_138 = arith.constant 4 : index
      %c4_139 = arith.constant 4 : index
      %c0_140 = arith.constant 0 : index
      %c0_141 = arith.constant 0 : index
      %143 = vector.load %arg3[%c4_138, %c4_139, %c0_140, %c0_141] : memref<5x5x4x128xbf16, #tpu.memory_space<vmem>>, vector<1x1x4x128xbf16>
      %144 = vector.shape_cast %143 : vector<1x1x4x128xbf16> to vector<4x128xbf16>
      %cst_142 = arith.constant dense<0.000000e+00> : vector<16x128xf32>
      %145 = tpu.matmul %142, %144, %cst_142 {dimension_numbers = #tpu.dot_dimension_numbers<[1], [0], [0], [1], [0, 0, 1, 1], [], []>} : vector<16x4xbf16>, vector<4x128xbf16>, vector<16x128xf32> -> vector<16x128xf32>
      %146 = arith.addf %141, %145 : vector<16x128xf32>
      %c0_143 = arith.constant 0 : index
      %c0_144 = arith.constant 0 : index
      %147 = vector.load %arg4[%c0_143, %c0_144] : memref<1x128xf32, #tpu.memory_space<vmem>>, vector<1x128xf32>
      %148 = vector.broadcast %147 : vector<1x128xf32> to vector<16x128xf32>
      %149 = arith.addf %146, %148 : vector<16x128xf32>
      %cst_145 = arith.constant 0.000000e+00 : f32
      %150 = vector.broadcast %cst_145 : f32 to vector<16x128xf32>
      %151 = arith.maximumf %149, %150 : vector<16x128xf32>
      %152 = arith.truncf %151 : vector<16x128xf32> to vector<16x128xbf16>
      %c0_146 = arith.constant 0 : index
      %c0_147 = arith.constant 0 : index
      %153 = arith.index_cast %arg6 : i32 to index
      %c0_148 = arith.constant 0 : index
      %c0_149 = arith.constant 0 : index
      %154 = vector.load %arg5[%c0_146, %c0_147, %153, %c0_148, %c0_149] : memref<1x1x16x16x128xbf16, #tpu.memory_space<vmem>>, vector<1x1x1x16x128xbf16>
      %155 = vector.shape_cast %154 : vector<1x1x1x16x128xbf16> to vector<16x128xbf16>
      %156 = vector.shape_cast %152 : vector<16x128xbf16> to vector<1x1x1x16x128xbf16>
      tpu.vector_store %arg5[%c0_146, %c0_147, %153, %c0_148, %c0_149], %156 {strides = array<i32>} : memref<1x1x16x16x128xbf16, #tpu.memory_space<vmem>>, vector<1x1x1x16x128xbf16>,
    }
    %c16_i32_0 = arith.constant 16 : i32
    return
  }
  func.func @transform_0(%arg0: i32, %arg1: i32) -> (i32, i32, i32, i32, i32) {
    %c0_i32 = arith.constant 0 : i32
    %c0_i32_0 = arith.constant 0 : i32
    %c0_i32_1 = arith.constant 0 : i32
    %c0_i32_2 = arith.constant 0 : i32
    return %arg0, %arg1, %c0_i32, %c0_i32_0, %c0_i32_1 : i32, i32, i32, i32, i32
  }
  func.func @transform_1(%arg0: i32, %arg1: i32) -> (i32, i32, i32, i32) {
    %c0_i32 = arith.constant 0 : i32
    %c0_i32_0 = arith.constant 0 : i32
    %c0_i32_1 = arith.constant 0 : i32
    %c0_i32_2 = arith.constant 0 : i32
    %c0_i32_3 = arith.constant 0 : i32
    return %c0_i32, %c0_i32_0, %c0_i32_1, %c0_i32_2 : i32, i32, i32, i32
  }
  func.func @transform_2(%arg0: i32, %arg1: i32) -> (i32, i32) {
    %c0_i32 = arith.constant 0 : i32
    %c0_i32_0 = arith.constant 0 : i32
    %c0_i32_1 = arith.constant 0 : i32
    return %c0_i32, %c0_i32_0 : i32, i32
  }
  func.func @transform_3(%arg0: i32, %arg1: i32) -> (i32, i32, i32, i32, i32) {
    %c0_i32 = arith.constant 0 : i32
    %c0_i32_0 = arith.constant 0 : i32
    %c0_i32_1 = arith.constant 0 : i32
    %c0_i32_2 = arith.constant 0 : i32
    return %arg0, %arg1, %c0_i32, %c0_i32_0, %c0_i32_1 : i32, i32, i32, i32, i32
  }
}

module attributes {stable_mosaic.version = 11 : i64} {
  func.func @_matmul_bias_act_kernel(%arg0: i32, %arg1: memref<64x72xbf16, #tpu.memory_space<vmem>>, %arg2: memref<72x128xbf16, #tpu.memory_space<vmem>>, %arg3: memref<1x128xf32, #tpu.memory_space<vmem>>, %arg4: memref<64x128xbf16, #tpu.memory_space<vmem>>) attributes {dimension_semantics = [#tpu.dimension_semantics<parallel>], iteration_bounds = array<i64: 2>, scalar_prefetch = 0 : i64, scratch_operands = 0 : i64, tpu.core_type = #tpu.core_type<tc>, window_params = [{transform_indices = @transform_0, window_bounds = array<i64: 64, 72>}, {pipeline_mode = #tpu.pipeline_mode<synchronous>, transform_indices = @transform_1, window_bounds = array<i64: 72, 128>}, {pipeline_mode = #tpu.pipeline_mode<synchronous>, transform_indices = @transform_2, window_bounds = array<i64: 1, 128>}, {transform_indices = @transform_3, window_bounds = array<i64: 64, 128>}]} {
    %c0 = arith.constant 0 : index
    %c0_0 = arith.constant 0 : index
    %0 = vector.load %arg1[%c0, %c0_0] : memref<64x72xbf16, #tpu.memory_space<vmem>>, vector<64x72xbf16>
    %c0_1 = arith.constant 0 : index
    %c0_2 = arith.constant 0 : index
    %1 = vector.load %arg2[%c0_1, %c0_2] : memref<72x128xbf16, #tpu.memory_space<vmem>>, vector<72x128xbf16>
    %cst = arith.constant dense<0.000000e+00> : vector<64x128xf32>
    %2 = tpu.matmul %0, %1, %cst {dimension_numbers = #tpu.dot_dimension_numbers<[1], [0], [0], [1], [0, 0, 1, 1], [], []>} : vector<64x72xbf16>, vector<72x128xbf16>, vector<64x128xf32> -> vector<64x128xf32>
    %c0_3 = arith.constant 0 : index
    %c0_4 = arith.constant 0 : index
    %3 = vector.load %arg3[%c0_3, %c0_4] : memref<1x128xf32, #tpu.memory_space<vmem>>, vector<1x128xf32>
    %4 = vector.broadcast %3 : vector<1x128xf32> to vector<64x128xf32>
    %5 = arith.addf %2, %4 : vector<64x128xf32>
    %cst_5 = arith.constant 0.000000e+00 : f32
    %6 = vector.broadcast %cst_5 : f32 to vector<64x128xf32>
    %7 = arith.maximumf %5, %6 : vector<64x128xf32>
    %8 = arith.truncf %7 : vector<64x128xf32> to vector<64x128xbf16>
    %c0_6 = arith.constant 0 : index
    %c0_7 = arith.constant 0 : index
    %9 = vector.load %arg4[%c0_6, %c0_7] : memref<64x128xbf16, #tpu.memory_space<vmem>>, vector<64x128xbf16>
    tpu.vector_store %arg4[%c0_6, %c0_7], %8 {strides = array<i32>} : memref<64x128xbf16, #tpu.memory_space<vmem>>, vector<64x128xbf16>,
    return
  }
  func.func @transform_0(%arg0: i32) -> (i32, i32) {
    %c0_i32 = arith.constant 0 : i32
    %c0_i32_0 = arith.constant 0 : i32
    return %arg0, %c0_i32 : i32, i32
  }
  func.func @transform_1(%arg0: i32) -> (i32, i32) {
    %c0_i32 = arith.constant 0 : i32
    %c0_i32_0 = arith.constant 0 : i32
    %c0_i32_1 = arith.constant 0 : i32
    return %c0_i32, %c0_i32_0 : i32, i32
  }
  func.func @transform_2(%arg0: i32) -> (i32, i32) {
    %c0_i32 = arith.constant 0 : i32
    %c0_i32_0 = arith.constant 0 : i32
    %c0_i32_1 = arith.constant 0 : i32
    return %c0_i32, %c0_i32_0 : i32, i32
  }
  func.func @transform_3(%arg0: i32) -> (i32, i32) {
    %c0_i32 = arith.constant 0 : i32
    %c0_i32_0 = arith.constant 0 : i32
    return %arg0, %c0_i32 : i32, i32
  }
}

module attributes {stable_mosaic.version = 11 : i64} {
  func.func @_direct_conv_kernel(%arg0: i32, %arg1: i32, %arg2: memref<1x1x10x10x16xbf16, #tpu.memory_space<vmem>>, %arg3: memref<3x3x16x128xbf16, #tpu.memory_space<vmem>>, %arg4: memref<1x128xf32, #tpu.memory_space<vmem>>, %arg5: memref<1x1x8x8x128xbf16, #tpu.memory_space<vmem>>) attributes {dimension_semantics = [#tpu.dimension_semantics<parallel>, #tpu.dimension_semantics<parallel>], iteration_bounds = array<i64: 2, 1>, scalar_prefetch = 0 : i64, scratch_operands = 0 : i64, tpu.core_type = #tpu.core_type<tc>, window_params = [{transform_indices = @transform_0, window_bounds = array<i64: 1, 1, 10, 10, 16>}, {pipeline_mode = #tpu.pipeline_mode<synchronous>, transform_indices = @transform_1, window_bounds = array<i64: 3, 3, 16, 128>}, {pipeline_mode = #tpu.pipeline_mode<synchronous>, transform_indices = @transform_2, window_bounds = array<i64: 1, 128>}, {transform_indices = @transform_3, window_bounds = array<i64: 1, 1, 8, 8, 128>}]} {
    %c0_i32 = arith.constant 0 : i32
    %c8_i32 = arith.constant 8 : i32
    %0 = arith.addi %c0_i32, %c8_i32 : i32
    %c1_i32 = arith.constant 1 : i32
    scf.for %arg6 = %c0_i32 to %0 step %c1_i32  : i32 {
      %cst = arith.constant 0.000000e+00 : f32
      %1 = vector.broadcast %cst : f32 to vector<8x128xf32>
      %c0_i32_1 = arith.constant 0 : i32
      %2 = arith.addi %arg6, %c0_i32_1 : i32
      %c0 = arith.constant 0 : index
      %c0_2 = arith.constant 0 : index
      %3 = arith.index_cast %2 : i32 to index
      %c0_3 = arith.constant 0 : index
      %c0_4 = arith.constant 0 : index
      %4 = vector.load %arg2[%c0, %c0_2, %3, %c0_3, %c0_4] : memref<1x1x10x10x16xbf16, #tpu.memory_space<vmem>>, vector<1x1x1x10x16xbf16>
      %5 = vector.shape_cast %4 : vector<1x1x1x10x16xbf16> to vector<10x16xbf16>
      %6 = vector.extract_strided_slice %5 {offsets = [0, 0], sizes = [8, 16], strides = [1, 1]} : vector<10x16xbf16> to vector<8x16xbf16>
      %c0_5 = arith.constant 0 : index
      %c0_6 = arith.constant 0 : index
      %c0_7 = arith.constant 0 : index
      %c0_8 = arith.constant 0 : index
      %7 = vector.load %arg3[%c0_5, %c0_6, %c0_7, %c0_8] : memref<3x3x16x128xbf16, #tpu.memory_space<vmem>>, vector<1x1x16x128xbf16>
      %8 = vector.shape_cast %7 : vector<1x1x16x128xbf16> to vector<16x128xbf16>
      %cst_9 = arith.constant dense<0.000000e+00> : vector<8x128xf32>
      %9 = tpu.matmul %6, %8, %cst_9 {dimension_numbers = #tpu.dot_dimension_numbers<[1], [0], [0], [1], [0, 0, 1, 1], [], []>} : vector<8x16xbf16>, vector<16x128xbf16>, vector<8x128xf32> -> vector<8x128xf32>
      %10 = arith.addf %1, %9 : vector<8x128xf32>
      %11 = vector.extract_strided_slice %5 {offsets = [1, 0], sizes = [8, 16], strides = [1, 1]} : vector<10x16xbf16> to vector<8x16xbf16>
      %c0_10 = arith.constant 0 : index
      %c1 = arith.constant 1 : index
      %c0_11 = arith.constant 0 : index
      %c0_12 = arith.constant 0 : index
      %12 = vector.load %arg3[%c0_10, %c1, %c0_11, %c0_12] : memref<3x3x16x128xbf16, #tpu.memory_space<vmem>>, vector<1x1x16x128xbf16>
      %13 = vector.shape_cast %12 : vector<1x1x16x128xbf16> to vector<16x128xbf16>
      %cst_13 = arith.constant dense<0.000000e+00> : vector<8x128xf32>
      %14 = tpu.matmul %11, %13, %cst_13 {dimension_numbers = #tpu.dot_dimension_numbers<[1], [0], [0], [1], [0, 0, 1, 1], [], []>} : vector<8x16xbf16>, vector<16x128xbf16>, vector<8x128xf32> -> vector<8x128xf32>
      %15 = arith.addf %10, %14 : vector<8x128xf32>
      %16 = vector.extract_strided_slice %5 {offsets = [2, 0], sizes = [8, 16], strides = [1, 1]} : vector<10x16xbf16> to vector<8x16xbf16>
      %c0_14 = arith.constant 0 : index
      %c2 = arith.constant 2 : index
      %c0_15 = arith.constant 0 : index
      %c0_16 = arith.constant 0 : index
      %17 = vector.load %arg3[%c0_14, %c2, %c0_15, %c0_16] : memref<3x3x16x128xbf16, #tpu.memory_space<vmem>>, vector<1x1x16x128xbf16>
      %18 = vector.shape_cast %17 : vector<1x1x16x128xbf16> to vector<16x128xbf16>
      %cst_17 = arith.constant dense<0.000000e+00> : vector<8x128xf32>
      %19 = tpu.matmul %16, %18, %cst_17 {dimension_numbers = #tpu.dot_dimension_numbers<[1], [0], [0], [1], [0, 0, 1, 1], [], []>} : vector<8x16xbf16>, vector<16x128xbf16>, vector<8x128xf32> -> vector<8x128xf32>
      %20 = arith.addf %15, %19 : vector<8x128xf32>
      %c1_i32_18 = arith.constant 1 : i32
      %21 = arith.addi %arg6, %c1_i32_18 : i32
      %c0_19 = arith.constant 0 : index
      %c0_20 = arith.constant 0 : index
      %22 = arith.index_cast %21 : i32 to index
      %c0_21 = arith.constant 0 : index
      %c0_22 = arith.constant 0 : index
      %23 = vector.load %arg2[%c0_19, %c0_20, %22, %c0_21, %c0_22] : memref<1x1x10x10x16xbf16, #tpu.memory_space<vmem>>, vector<1x1x1x10x16xbf16>
      %24 = vector.shape_cast %23 : vector<1x1x1x10x16xbf16> to vector<10x16xbf16>
      %25 = vector.extract_strided_slice %24 {offsets = [0, 0], sizes = [8, 16], strides = [1, 1]} : vector<10x16xbf16> to vector<8x16xbf16>
      %c1_23 = arith.constant 1 : index
      %c0_24 = arith.constant 0 : index
      %c0_25 = arith.constant 0 : index
      %c0_26 = arith.constant 0 : index
      %26 = vector.load %arg3[%c1_23, %c0_24, %c0_25, %c0_26] : memref<3x3x16x128xbf16, #tpu.memory_space<vmem>>, vector<1x1x16x128xbf16>
      %27 = vector.shape_cast %26 : vector<1x1x16x128xbf16> to vector<16x128xbf16>
      %cst_27 = arith.constant dense<0.000000e+00> : vector<8x128xf32>
      %28 = tpu.matmul %25, %27, %cst_27 {dimension_numbers = #tpu.dot_dimension_numbers<[1], [0], [0], [1], [0, 0, 1, 1], [], []>} : vector<8x16xbf16>, vector<16x128xbf16>, vector<8x128xf32> -> vector<8x128xf32>
      %29 = arith.addf %20, %28 : vector<8x128xf32>
      %30 = vector.extract_strided_slice %24 {offsets = [1, 0], sizes = [8, 16], strides = [1, 1]} : vector<10x16xbf16> to vector<8x16xbf16>
      %c1_28 = arith.constant 1 : index
      %c1_29 = arith.constant 1 : index
      %c0_30 = arith.constant 0 : index
      %c0_31 = arith.constant 0 : index
      %31 = vector.load %arg3[%c1_28, %c1_29, %c0_30, %c0_31] : memref<3x3x16x128xbf16, #tpu.memory_space<vmem>>, vector<1x1x16x128xbf16>
      %32 = vector.shape_cast %31 : vector<1x1x16x128xbf16> to vector<16x128xbf16>
      %cst_32 = arith.constant dense<0.000000e+00> : vector<8x128xf32>
      %33 = tpu.matmul %30, %32, %cst_32 {dimension_numbers = #tpu.dot_dimension_numbers<[1], [0], [0], [1], [0, 0, 1, 1], [], []>} : vector<8x16xbf16>, vector<16x128xbf16>, vector<8x128xf32> -> vector<8x128xf32>
      %34 = arith.addf %29, %33 : vector<8x128xf32>
      %35 = vector.extract_strided_slice %24 {offsets = [2, 0], sizes = [8, 16], strides = [1, 1]} : vector<10x16xbf16> to vector<8x16xbf16>
      %c1_33 = arith.constant 1 : index
      %c2_34 = arith.constant 2 : index
      %c0_35 = arith.constant 0 : index
      %c0_36 = arith.constant 0 : index
      %36 = vector.load %arg3[%c1_33, %c2_34, %c0_35, %c0_36] : memref<3x3x16x128xbf16, #tpu.memory_space<vmem>>, vector<1x1x16x128xbf16>
      %37 = vector.shape_cast %36 : vector<1x1x16x128xbf16> to vector<16x128xbf16>
      %cst_37 = arith.constant dense<0.000000e+00> : vector<8x128xf32>
      %38 = tpu.matmul %35, %37, %cst_37 {dimension_numbers = #tpu.dot_dimension_numbers<[1], [0], [0], [1], [0, 0, 1, 1], [], []>} : vector<8x16xbf16>, vector<16x128xbf16>, vector<8x128xf32> -> vector<8x128xf32>
      %39 = arith.addf %34, %38 : vector<8x128xf32>
      %c2_i32 = arith.constant 2 : i32
      %40 = arith.addi %arg6, %c2_i32 : i32
      %c0_38 = arith.constant 0 : index
      %c0_39 = arith.constant 0 : index
      %41 = arith.index_cast %40 : i32 to index
      %c0_40 = arith.constant 0 : index
      %c0_41 = arith.constant 0 : index
      %42 = vector.load %arg2[%c0_38, %c0_39, %41, %c0_40, %c0_41] : memref<1x1x10x10x16xbf16, #tpu.memory_space<vmem>>, vector<1x1x1x10x16xbf16>
      %43 = vector.shape_cast %42 : vector<1x1x1x10x16xbf16> to vector<10x16xbf16>
      %44 = vector.extract_strided_slice %43 {offsets = [0, 0], sizes = [8, 16], strides = [1, 1]} : vector<10x16xbf16> to vector<8x16xbf16>
      %c2_42 = arith.constant 2 : index
      %c0_43 = arith.constant 0 : index
      %c0_44 = arith.constant 0 : index
      %c0_45 = arith.constant 0 : index
      %45 = vector.load %arg3[%c2_42, %c0_43, %c0_44, %c0_45] : memref<3x3x16x128xbf16, #tpu.memory_space<vmem>>, vector<1x1x16x128xbf16>
      %46 = vector.shape_cast %45 : vector<1x1x16x128xbf16> to vector<16x128xbf16>
      %cst_46 = arith.constant dense<0.000000e+00> : vector<8x128xf32>
      %47 = tpu.matmul %44, %46, %cst_46 {dimension_numbers = #tpu.dot_dimension_numbers<[1], [0], [0], [1], [0, 0, 1, 1], [], []>} : vector<8x16xbf16>, vector<16x128xbf16>, vector<8x128xf32> -> vector<8x128xf32>
      %48 = arith.addf %39, %47 : vector<8x128xf32>
      %49 = vector.extract_strided_slice %43 {offsets = [1, 0], sizes = [8, 16], strides = [1, 1]} : vector<10x16xbf16> to vector<8x16xbf16>
      %c2_47 = arith.constant 2 : index
      %c1_48 = arith.constant 1 : index
      %c0_49 = arith.constant 0 : index
      %c0_50 = arith.constant 0 : index
      %50 = vector.load %arg3[%c2_47, %c1_48, %c0_49, %c0_50] : memref<3x3x16x128xbf16, #tpu.memory_space<vmem>>, vector<1x1x16x128xbf16>
      %51 = vector.shape_cast %50 : vector<1x1x16x128xbf16> to vector<16x128xbf16>
      %cst_51 = arith.constant dense<0.000000e+00> : vector<8x128xf32>
      %52 = tpu.matmul %49, %51, %cst_51 {dimension_numbers = #tpu.dot_dimension_numbers<[1], [0], [0], [1], [0, 0, 1, 1], [], []>} : vector<8x16xbf16>, vector<16x128xbf16>, vector<8x128xf32> -> vector<8x128xf32>
      %53 = arith.addf %48, %52 : vector<8x128xf32>
      %54 = vector.extract_strided_slice %43 {offsets = [2, 0], sizes = [8, 16], strides = [1, 1]} : vector<10x16xbf16> to vector<8x16xbf16>
      %c2_52 = arith.constant 2 : index
      %c2_53 = arith.constant 2 : index
      %c0_54 = arith.constant 0 : index
      %c0_55 = arith.constant 0 : index
      %55 = vector.load %arg3[%c2_52, %c2_53, %c0_54, %c0_55] : memref<3x3x16x128xbf16, #tpu.memory_space<vmem>>, vector<1x1x16x128xbf16>
      %56 = vector.shape_cast %55 : vector<1x1x16x128xbf16> to vector<16x128xbf16>
      %cst_56 = arith.constant dense<0.000000e+00> : vector<8x128xf32>
      %57 = tpu.matmul %54, %56, %cst_56 {dimension_numbers = #tpu.dot_dimension_numbers<[1], [0], [0], [1], [0, 0, 1, 1], [], []>} : vector<8x16xbf16>, vector<16x128xbf16>, vector<8x128xf32> -> vector<8x128xf32>
      %58 = arith.addf %53, %57 : vector<8x128xf32>
      %c0_57 = arith.constant 0 : index
      %c0_58 = arith.constant 0 : index
      %59 = vector.load %arg4[%c0_57, %c0_58] : memref<1x128xf32, #tpu.memory_space<vmem>>, vector<1x128xf32>
      %60 = vector.broadcast %59 : vector<1x128xf32> to vector<8x128xf32>
      %61 = arith.addf %58, %60 : vector<8x128xf32>
      %cst_59 = arith.constant 0.000000e+00 : f32
      %62 = vector.broadcast %cst_59 : f32 to vector<8x128xf32>
      %63 = arith.maximumf %61, %62 : vector<8x128xf32>
      %64 = arith.truncf %63 : vector<8x128xf32> to vector<8x128xbf16>
      %c0_60 = arith.constant 0 : index
      %c0_61 = arith.constant 0 : index
      %65 = arith.index_cast %arg6 : i32 to index
      %c0_62 = arith.constant 0 : index
      %c0_63 = arith.constant 0 : index
      %66 = vector.load %arg5[%c0_60, %c0_61, %65, %c0_62, %c0_63] : memref<1x1x8x8x128xbf16, #tpu.memory_space<vmem>>, vector<1x1x1x8x128xbf16>
      %67 = vector.shape_cast %66 : vector<1x1x1x8x128xbf16> to vector<8x128xbf16>
      %68 = vector.shape_cast %64 : vector<8x128xbf16> to vector<1x1x1x8x128xbf16>
      tpu.vector_store %arg5[%c0_60, %c0_61, %65, %c0_62, %c0_63], %68 {strides = array<i32>} : memref<1x1x8x8x128xbf16, #tpu.memory_space<vmem>>, vector<1x1x1x8x128xbf16>,
    }
    %c8_i32_0 = arith.constant 8 : i32
    return
  }
  func.func @transform_0(%arg0: i32, %arg1: i32) -> (i32, i32, i32, i32, i32) {
    %c0_i32 = arith.constant 0 : i32
    %c0_i32_0 = arith.constant 0 : i32
    %c0_i32_1 = arith.constant 0 : i32
    %c0_i32_2 = arith.constant 0 : i32
    return %arg0, %arg1, %c0_i32, %c0_i32_0, %c0_i32_1 : i32, i32, i32, i32, i32
  }
  func.func @transform_1(%arg0: i32, %arg1: i32) -> (i32, i32, i32, i32) {
    %c0_i32 = arith.constant 0 : i32
    %c0_i32_0 = arith.constant 0 : i32
    %c0_i32_1 = arith.constant 0 : i32
    %c0_i32_2 = arith.constant 0 : i32
    %c0_i32_3 = arith.constant 0 : i32
    return %c0_i32, %c0_i32_0, %c0_i32_1, %c0_i32_2 : i32, i32, i32, i32
  }
  func.func @transform_2(%arg0: i32, %arg1: i32) -> (i32, i32) {
    %c0_i32 = arith.constant 0 : i32
    %c0_i32_0 = arith.constant 0 : i32
    %c0_i32_1 = arith.constant 0 : i32
    return %c0_i32, %c0_i32_0 : i32, i32
  }
  func.func @transform_3(%arg0: i32, %arg1: i32) -> (i32, i32, i32, i32, i32) {
    %c0_i32 = arith.constant 0 : i32
    %c0_i32_0 = arith.constant 0 : i32
    %c0_i32_1 = arith.constant 0 : i32
    %c0_i32_2 = arith.constant 0 : i32
    return %arg0, %arg1, %c0_i32, %c0_i32_0, %c0_i32_1 : i32, i32, i32, i32, i32
  }
}

module attributes {stable_mosaic.version = 11 : i64} {
  func.func @_direct_conv_kernel(%arg0: i32, %arg1: i32, %arg2: memref<1x1x6x6x32xbf16, #tpu.memory_space<vmem>>, %arg3: memref<3x3x32x128xbf16, #tpu.memory_space<vmem>>, %arg4: memref<1x128xf32, #tpu.memory_space<vmem>>, %arg5: memref<1x1x4x4x128xbf16, #tpu.memory_space<vmem>>) attributes {dimension_semantics = [#tpu.dimension_semantics<parallel>, #tpu.dimension_semantics<parallel>], iteration_bounds = array<i64: 2, 1>, scalar_prefetch = 0 : i64, scratch_operands = 0 : i64, tpu.core_type = #tpu.core_type<tc>, window_params = [{transform_indices = @transform_0, window_bounds = array<i64: 1, 1, 6, 6, 32>}, {pipeline_mode = #tpu.pipeline_mode<synchronous>, transform_indices = @transform_1, window_bounds = array<i64: 3, 3, 32, 128>}, {pipeline_mode = #tpu.pipeline_mode<synchronous>, transform_indices = @transform_2, window_bounds = array<i64: 1, 128>}, {transform_indices = @transform_3, window_bounds = array<i64: 1, 1, 4, 4, 128>}]} {
    %c0_i32 = arith.constant 0 : i32
    %c4_i32 = arith.constant 4 : i32
    %0 = arith.addi %c0_i32, %c4_i32 : i32
    %c1_i32 = arith.constant 1 : i32
    scf.for %arg6 = %c0_i32 to %0 step %c1_i32  : i32 {
      %cst = arith.constant 0.000000e+00 : f32
      %1 = vector.broadcast %cst : f32 to vector<4x128xf32>
      %c0_i32_1 = arith.constant 0 : i32
      %2 = arith.addi %arg6, %c0_i32_1 : i32
      %c0 = arith.constant 0 : index
      %c0_2 = arith.constant 0 : index
      %3 = arith.index_cast %2 : i32 to index
      %c0_3 = arith.constant 0 : index
      %c0_4 = arith.constant 0 : index
      %4 = vector.load %arg2[%c0, %c0_2, %3, %c0_3, %c0_4] : memref<1x1x6x6x32xbf16, #tpu.memory_space<vmem>>, vector<1x1x1x6x32xbf16>
      %5 = vector.shape_cast %4 : vector<1x1x1x6x32xbf16> to vector<6x32xbf16>
      %6 = vector.extract_strided_slice %5 {offsets = [0, 0], sizes = [4, 32], strides = [1, 1]} : vector<6x32xbf16> to vector<4x32xbf16>
      %c0_5 = arith.constant 0 : index
      %c0_6 = arith.constant 0 : index
      %c0_7 = arith.constant 0 : index
      %c0_8 = arith.constant 0 : index
      %7 = vector.load %arg3[%c0_5, %c0_6, %c0_7, %c0_8] : memref<3x3x32x128xbf16, #tpu.memory_space<vmem>>, vector<1x1x32x128xbf16>
      %8 = vector.shape_cast %7 : vector<1x1x32x128xbf16> to vector<32x128xbf16>
      %cst_9 = arith.constant dense<0.000000e+00> : vector<4x128xf32>
      %9 = tpu.matmul %6, %8, %cst_9 {dimension_numbers = #tpu.dot_dimension_numbers<[1], [0], [0], [1], [0, 0, 1, 1], [], []>} : vector<4x32xbf16>, vector<32x128xbf16>, vector<4x128xf32> -> vector<4x128xf32>
      %10 = arith.addf %1, %9 : vector<4x128xf32>
      %11 = vector.extract_strided_slice %5 {offsets = [1, 0], sizes = [4, 32], strides = [1, 1]} : vector<6x32xbf16> to vector<4x32xbf16>
      %c0_10 = arith.constant 0 : index
      %c1 = arith.constant 1 : index
      %c0_11 = arith.constant 0 : index
      %c0_12 = arith.constant 0 : index
      %12 = vector.load %arg3[%c0_10, %c1, %c0_11, %c0_12] : memref<3x3x32x128xbf16, #tpu.memory_space<vmem>>, vector<1x1x32x128xbf16>
      %13 = vector.shape_cast %12 : vector<1x1x32x128xbf16> to vector<32x128xbf16>
      %cst_13 = arith.constant dense<0.000000e+00> : vector<4x128xf32>
      %14 = tpu.matmul %11, %13, %cst_13 {dimension_numbers = #tpu.dot_dimension_numbers<[1], [0], [0], [1], [0, 0, 1, 1], [], []>} : vector<4x32xbf16>, vector<32x128xbf16>, vector<4x128xf32> -> vector<4x128xf32>
      %15 = arith.addf %10, %14 : vector<4x128xf32>
      %16 = vector.extract_strided_slice %5 {offsets = [2, 0], sizes = [4, 32], strides = [1, 1]} : vector<6x32xbf16> to vector<4x32xbf16>
      %c0_14 = arith.constant 0 : index
      %c2 = arith.constant 2 : index
      %c0_15 = arith.constant 0 : index
      %c0_16 = arith.constant 0 : index
      %17 = vector.load %arg3[%c0_14, %c2, %c0_15, %c0_16] : memref<3x3x32x128xbf16, #tpu.memory_space<vmem>>, vector<1x1x32x128xbf16>
      %18 = vector.shape_cast %17 : vector<1x1x32x128xbf16> to vector<32x128xbf16>
      %cst_17 = arith.constant dense<0.000000e+00> : vector<4x128xf32>
      %19 = tpu.matmul %16, %18, %cst_17 {dimension_numbers = #tpu.dot_dimension_numbers<[1], [0], [0], [1], [0, 0, 1, 1], [], []>} : vector<4x32xbf16>, vector<32x128xbf16>, vector<4x128xf32> -> vector<4x128xf32>
      %20 = arith.addf %15, %19 : vector<4x128xf32>
      %c1_i32_18 = arith.constant 1 : i32
      %21 = arith.addi %arg6, %c1_i32_18 : i32
      %c0_19 = arith.constant 0 : index
      %c0_20 = arith.constant 0 : index
      %22 = arith.index_cast %21 : i32 to index
      %c0_21 = arith.constant 0 : index
      %c0_22 = arith.constant 0 : index
      %23 = vector.load %arg2[%c0_19, %c0_20, %22, %c0_21, %c0_22] : memref<1x1x6x6x32xbf16, #tpu.memory_space<vmem>>, vector<1x1x1x6x32xbf16>
      %24 = vector.shape_cast %23 : vector<1x1x1x6x32xbf16> to vector<6x32xbf16>
      %25 = vector.extract_strided_slice %24 {offsets = [0, 0], sizes = [4, 32], strides = [1, 1]} : vector<6x32xbf16> to vector<4x32xbf16>
      %c1_23 = arith.constant 1 : index
      %c0_24 = arith.constant 0 : index
      %c0_25 = arith.constant 0 : index
      %c0_26 = arith.constant 0 : index
      %26 = vector.load %arg3[%c1_23, %c0_24, %c0_25, %c0_26] : memref<3x3x32x128xbf16, #tpu.memory_space<vmem>>, vector<1x1x32x128xbf16>
      %27 = vector.shape_cast %26 : vector<1x1x32x128xbf16> to vector<32x128xbf16>
      %cst_27 = arith.constant dense<0.000000e+00> : vector<4x128xf32>
      %28 = tpu.matmul %25, %27, %cst_27 {dimension_numbers = #tpu.dot_dimension_numbers<[1], [0], [0], [1], [0, 0, 1, 1], [], []>} : vector<4x32xbf16>, vector<32x128xbf16>, vector<4x128xf32> -> vector<4x128xf32>
      %29 = arith.addf %20, %28 : vector<4x128xf32>
      %30 = vector.extract_strided_slice %24 {offsets = [1, 0], sizes = [4, 32], strides = [1, 1]} : vector<6x32xbf16> to vector<4x32xbf16>
      %c1_28 = arith.constant 1 : index
      %c1_29 = arith.constant 1 : index
      %c0_30 = arith.constant 0 : index
      %c0_31 = arith.constant 0 : index
      %31 = vector.load %arg3[%c1_28, %c1_29, %c0_30, %c0_31] : memref<3x3x32x128xbf16, #tpu.memory_space<vmem>>, vector<1x1x32x128xbf16>
      %32 = vector.shape_cast %31 : vector<1x1x32x128xbf16> to vector<32x128xbf16>
      %cst_32 = arith.constant dense<0.000000e+00> : vector<4x128xf32>
      %33 = tpu.matmul %30, %32, %cst_32 {dimension_numbers = #tpu.dot_dimension_numbers<[1], [0], [0], [1], [0, 0, 1, 1], [], []>} : vector<4x32xbf16>, vector<32x128xbf16>, vector<4x128xf32> -> vector<4x128xf32>
      %34 = arith.addf %29, %33 : vector<4x128xf32>
      %35 = vector.extract_strided_slice %24 {offsets = [2, 0], sizes = [4, 32], strides = [1, 1]} : vector<6x32xbf16> to vector<4x32xbf16>
      %c1_33 = arith.constant 1 : index
      %c2_34 = arith.constant 2 : index
      %c0_35 = arith.constant 0 : index
      %c0_36 = arith.constant 0 : index
      %36 = vector.load %arg3[%c1_33, %c2_34, %c0_35, %c0_36] : memref<3x3x32x128xbf16, #tpu.memory_space<vmem>>, vector<1x1x32x128xbf16>
      %37 = vector.shape_cast %36 : vector<1x1x32x128xbf16> to vector<32x128xbf16>
      %cst_37 = arith.constant dense<0.000000e+00> : vector<4x128xf32>
      %38 = tpu.matmul %35, %37, %cst_37 {dimension_numbers = #tpu.dot_dimension_numbers<[1], [0], [0], [1], [0, 0, 1, 1], [], []>} : vector<4x32xbf16>, vector<32x128xbf16>, vector<4x128xf32> -> vector<4x128xf32>
      %39 = arith.addf %34, %38 : vector<4x128xf32>
      %c2_i32 = arith.constant 2 : i32
      %40 = arith.addi %arg6, %c2_i32 : i32
      %c0_38 = arith.constant 0 : index
      %c0_39 = arith.constant 0 : index
      %41 = arith.index_cast %40 : i32 to index
      %c0_40 = arith.constant 0 : index
      %c0_41 = arith.constant 0 : index
      %42 = vector.load %arg2[%c0_38, %c0_39, %41, %c0_40, %c0_41] : memref<1x1x6x6x32xbf16, #tpu.memory_space<vmem>>, vector<1x1x1x6x32xbf16>
      %43 = vector.shape_cast %42 : vector<1x1x1x6x32xbf16> to vector<6x32xbf16>
      %44 = vector.extract_strided_slice %43 {offsets = [0, 0], sizes = [4, 32], strides = [1, 1]} : vector<6x32xbf16> to vector<4x32xbf16>
      %c2_42 = arith.constant 2 : index
      %c0_43 = arith.constant 0 : index
      %c0_44 = arith.constant 0 : index
      %c0_45 = arith.constant 0 : index
      %45 = vector.load %arg3[%c2_42, %c0_43, %c0_44, %c0_45] : memref<3x3x32x128xbf16, #tpu.memory_space<vmem>>, vector<1x1x32x128xbf16>
      %46 = vector.shape_cast %45 : vector<1x1x32x128xbf16> to vector<32x128xbf16>
      %cst_46 = arith.constant dense<0.000000e+00> : vector<4x128xf32>
      %47 = tpu.matmul %44, %46, %cst_46 {dimension_numbers = #tpu.dot_dimension_numbers<[1], [0], [0], [1], [0, 0, 1, 1], [], []>} : vector<4x32xbf16>, vector<32x128xbf16>, vector<4x128xf32> -> vector<4x128xf32>
      %48 = arith.addf %39, %47 : vector<4x128xf32>
      %49 = vector.extract_strided_slice %43 {offsets = [1, 0], sizes = [4, 32], strides = [1, 1]} : vector<6x32xbf16> to vector<4x32xbf16>
      %c2_47 = arith.constant 2 : index
      %c1_48 = arith.constant 1 : index
      %c0_49 = arith.constant 0 : index
      %c0_50 = arith.constant 0 : index
      %50 = vector.load %arg3[%c2_47, %c1_48, %c0_49, %c0_50] : memref<3x3x32x128xbf16, #tpu.memory_space<vmem>>, vector<1x1x32x128xbf16>
      %51 = vector.shape_cast %50 : vector<1x1x32x128xbf16> to vector<32x128xbf16>
      %cst_51 = arith.constant dense<0.000000e+00> : vector<4x128xf32>
      %52 = tpu.matmul %49, %51, %cst_51 {dimension_numbers = #tpu.dot_dimension_numbers<[1], [0], [0], [1], [0, 0, 1, 1], [], []>} : vector<4x32xbf16>, vector<32x128xbf16>, vector<4x128xf32> -> vector<4x128xf32>
      %53 = arith.addf %48, %52 : vector<4x128xf32>
      %54 = vector.extract_strided_slice %43 {offsets = [2, 0], sizes = [4, 32], strides = [1, 1]} : vector<6x32xbf16> to vector<4x32xbf16>
      %c2_52 = arith.constant 2 : index
      %c2_53 = arith.constant 2 : index
      %c0_54 = arith.constant 0 : index
      %c0_55 = arith.constant 0 : index
      %55 = vector.load %arg3[%c2_52, %c2_53, %c0_54, %c0_55] : memref<3x3x32x128xbf16, #tpu.memory_space<vmem>>, vector<1x1x32x128xbf16>
      %56 = vector.shape_cast %55 : vector<1x1x32x128xbf16> to vector<32x128xbf16>
      %cst_56 = arith.constant dense<0.000000e+00> : vector<4x128xf32>
      %57 = tpu.matmul %54, %56, %cst_56 {dimension_numbers = #tpu.dot_dimension_numbers<[1], [0], [0], [1], [0, 0, 1, 1], [], []>} : vector<4x32xbf16>, vector<32x128xbf16>, vector<4x128xf32> -> vector<4x128xf32>
      %58 = arith.addf %53, %57 : vector<4x128xf32>
      %c0_57 = arith.constant 0 : index
      %c0_58 = arith.constant 0 : index
      %59 = vector.load %arg4[%c0_57, %c0_58] : memref<1x128xf32, #tpu.memory_space<vmem>>, vector<1x128xf32>
      %60 = vector.broadcast %59 : vector<1x128xf32> to vector<4x128xf32>
      %61 = arith.addf %58, %60 : vector<4x128xf32>
      %cst_59 = arith.constant 0.000000e+00 : f32
      %62 = vector.broadcast %cst_59 : f32 to vector<4x128xf32>
      %63 = arith.maximumf %61, %62 : vector<4x128xf32>
      %64 = arith.truncf %63 : vector<4x128xf32> to vector<4x128xbf16>
      %c0_60 = arith.constant 0 : index
      %c0_61 = arith.constant 0 : index
      %65 = arith.index_cast %arg6 : i32 to index
      %c0_62 = arith.constant 0 : index
      %c0_63 = arith.constant 0 : index
      %66 = vector.load %arg5[%c0_60, %c0_61, %65, %c0_62, %c0_63] : memref<1x1x4x4x128xbf16, #tpu.memory_space<vmem>>, vector<1x1x1x4x128xbf16>
      %67 = vector.shape_cast %66 : vector<1x1x1x4x128xbf16> to vector<4x128xbf16>
      %68 = vector.shape_cast %64 : vector<4x128xbf16> to vector<1x1x1x4x128xbf16>
      tpu.vector_store %arg5[%c0_60, %c0_61, %65, %c0_62, %c0_63], %68 {strides = array<i32>} : memref<1x1x4x4x128xbf16, #tpu.memory_space<vmem>>, vector<1x1x1x4x128xbf16>,
    }
    %c4_i32_0 = arith.constant 4 : i32
    return
  }
  func.func @transform_0(%arg0: i32, %arg1: i32) -> (i32, i32, i32, i32, i32) {
    %c0_i32 = arith.constant 0 : i32
    %c0_i32_0 = arith.constant 0 : i32
    %c0_i32_1 = arith.constant 0 : i32
    %c0_i32_2 = arith.constant 0 : i32
    return %arg0, %arg1, %c0_i32, %c0_i32_0, %c0_i32_1 : i32, i32, i32, i32, i32
  }
  func.func @transform_1(%arg0: i32, %arg1: i32) -> (i32, i32, i32, i32) {
    %c0_i32 = arith.constant 0 : i32
    %c0_i32_0 = arith.constant 0 : i32
    %c0_i32_1 = arith.constant 0 : i32
    %c0_i32_2 = arith.constant 0 : i32
    %c0_i32_3 = arith.constant 0 : i32
    return %c0_i32, %c0_i32_0, %c0_i32_1, %c0_i32_2 : i32, i32, i32, i32
  }
  func.func @transform_2(%arg0: i32, %arg1: i32) -> (i32, i32) {
    %c0_i32 = arith.constant 0 : i32
    %c0_i32_0 = arith.constant 0 : i32
    %c0_i32_1 = arith.constant 0 : i32
    return %c0_i32, %c0_i32_0 : i32, i32
  }
  func.func @transform_3(%arg0: i32, %arg1: i32) -> (i32, i32, i32, i32, i32) {
    %c0_i32 = arith.constant 0 : i32
    %c0_i32_0 = arith.constant 0 : i32
    %c0_i32_1 = arith.constant 0 : i32
    %c0_i32_2 = arith.constant 0 : i32
    return %arg0, %arg1, %c0_i32, %c0_i32_0, %c0_i32_1 : i32, i32, i32, i32, i32
  }
}

module attributes {stable_mosaic.version = 11 : i64} {
  func.func @_matmul_bias_act_kernel(%arg0: i32, %arg1: memref<16x144xbf16, #tpu.memory_space<vmem>>, %arg2: memref<144x128xbf16, #tpu.memory_space<vmem>>, %arg3: memref<1x128xf32, #tpu.memory_space<vmem>>, %arg4: memref<16x128xbf16, #tpu.memory_space<vmem>>) attributes {dimension_semantics = [#tpu.dimension_semantics<parallel>], iteration_bounds = array<i64: 2>, scalar_prefetch = 0 : i64, scratch_operands = 0 : i64, tpu.core_type = #tpu.core_type<tc>, window_params = [{transform_indices = @transform_0, window_bounds = array<i64: 16, 144>}, {pipeline_mode = #tpu.pipeline_mode<synchronous>, transform_indices = @transform_1, window_bounds = array<i64: 144, 128>}, {pipeline_mode = #tpu.pipeline_mode<synchronous>, transform_indices = @transform_2, window_bounds = array<i64: 1, 128>}, {transform_indices = @transform_3, window_bounds = array<i64: 16, 128>}]} {
    %c0 = arith.constant 0 : index
    %c0_0 = arith.constant 0 : index
    %0 = vector.load %arg1[%c0, %c0_0] : memref<16x144xbf16, #tpu.memory_space<vmem>>, vector<16x144xbf16>
    %c0_1 = arith.constant 0 : index
    %c0_2 = arith.constant 0 : index
    %1 = vector.load %arg2[%c0_1, %c0_2] : memref<144x128xbf16, #tpu.memory_space<vmem>>, vector<144x128xbf16>
    %cst = arith.constant dense<0.000000e+00> : vector<16x128xf32>
    %2 = tpu.matmul %0, %1, %cst {dimension_numbers = #tpu.dot_dimension_numbers<[1], [0], [0], [1], [0, 0, 1, 1], [], []>} : vector<16x144xbf16>, vector<144x128xbf16>, vector<16x128xf32> -> vector<16x128xf32>
    %c0_3 = arith.constant 0 : index
    %c0_4 = arith.constant 0 : index
    %3 = vector.load %arg3[%c0_3, %c0_4] : memref<1x128xf32, #tpu.memory_space<vmem>>, vector<1x128xf32>
    %4 = vector.broadcast %3 : vector<1x128xf32> to vector<16x128xf32>
    %5 = arith.addf %2, %4 : vector<16x128xf32>
    %cst_5 = arith.constant 0.000000e+00 : f32
    %6 = vector.broadcast %cst_5 : f32 to vector<16x128xf32>
    %7 = arith.maximumf %5, %6 : vector<16x128xf32>
    %8 = arith.truncf %7 : vector<16x128xf32> to vector<16x128xbf16>
    %c0_6 = arith.constant 0 : index
    %c0_7 = arith.constant 0 : index
    %9 = vector.load %arg4[%c0_6, %c0_7] : memref<16x128xbf16, #tpu.memory_space<vmem>>, vector<16x128xbf16>
    tpu.vector_store %arg4[%c0_6, %c0_7], %8 {strides = array<i32>} : memref<16x128xbf16, #tpu.memory_space<vmem>>, vector<16x128xbf16>,
    return
  }
  func.func @transform_0(%arg0: i32) -> (i32, i32) {
    %c0_i32 = arith.constant 0 : i32
    %c0_i32_0 = arith.constant 0 : i32
    return %arg0, %c0_i32 : i32, i32
  }
  func.func @transform_1(%arg0: i32) -> (i32, i32) {
    %c0_i32 = arith.constant 0 : i32
    %c0_i32_0 = arith.constant 0 : i32
    %c0_i32_1 = arith.constant 0 : i32
    return %c0_i32, %c0_i32_0 : i32, i32
  }
  func.func @transform_2(%arg0: i32) -> (i32, i32) {
    %c0_i32 = arith.constant 0 : i32
    %c0_i32_0 = arith.constant 0 : i32
    %c0_i32_1 = arith.constant 0 : i32
    return %c0_i32, %c0_i32_0 : i32, i32
  }
  func.func @transform_3(%arg0: i32) -> (i32, i32) {
    %c0_i32 = arith.constant 0 : i32
    %c0_i32_0 = arith.constant 0 : i32
    return %arg0, %c0_i32 : i32, i32
  }
}

module attributes {stable_mosaic.version = 11 : i64} {
  func.func @_direct_conv_kernel(%arg0: i32, %arg1: i32, %arg2: memref<1x1x8x8x32xbf16, #tpu.memory_space<vmem>>, %arg3: memref<3x3x32x128xbf16, #tpu.memory_space<vmem>>, %arg4: memref<1x128xf32, #tpu.memory_space<vmem>>, %arg5: memref<1x1x4x4x128xbf16, #tpu.memory_space<vmem>>) attributes {dimension_semantics = [#tpu.dimension_semantics<parallel>, #tpu.dimension_semantics<parallel>], iteration_bounds = array<i64: 2, 1>, scalar_prefetch = 0 : i64, scratch_operands = 0 : i64, tpu.core_type = #tpu.core_type<tc>, window_params = [{transform_indices = @transform_0, window_bounds = array<i64: 1, 1, 8, 8, 32>}, {pipeline_mode = #tpu.pipeline_mode<synchronous>, transform_indices = @transform_1, window_bounds = array<i64: 3, 3, 32, 128>}, {pipeline_mode = #tpu.pipeline_mode<synchronous>, transform_indices = @transform_2, window_bounds = array<i64: 1, 128>}, {transform_indices = @transform_3, window_bounds = array<i64: 1, 1, 4, 4, 128>}]} {
    %c0_i32 = arith.constant 0 : i32
    %c4_i32 = arith.constant 4 : i32
    %0 = arith.addi %c0_i32, %c4_i32 : i32
    %c1_i32 = arith.constant 1 : i32
    scf.for %arg6 = %c0_i32 to %0 step %c1_i32  : i32 {
      %cst = arith.constant 0.000000e+00 : f32
      %1 = vector.broadcast %cst : f32 to vector<4x128xf32>
      %c0_i32_1 = arith.constant 0 : i32
      %2 = arith.addi %arg6, %c0_i32_1 : i32
      %c0 = arith.constant 0 : index
      %c0_2 = arith.constant 0 : index
      %3 = arith.index_cast %2 : i32 to index
      %c0_3 = arith.constant 0 : index
      %c0_4 = arith.constant 0 : index
      %4 = vector.load %arg2[%c0, %c0_2, %3, %c0_3, %c0_4] : memref<1x1x8x8x32xbf16, #tpu.memory_space<vmem>>, vector<1x1x1x8x32xbf16>
      %5 = vector.shape_cast %4 : vector<1x1x1x8x32xbf16> to vector<8x32xbf16>
      %6 = vector.extract_strided_slice %5 {offsets = [0, 0], sizes = [4, 32], strides = [1, 1]} : vector<8x32xbf16> to vector<4x32xbf16>
      %c0_5 = arith.constant 0 : index
      %c0_6 = arith.constant 0 : index
      %c0_7 = arith.constant 0 : index
      %c0_8 = arith.constant 0 : index
      %7 = vector.load %arg3[%c0_5, %c0_6, %c0_7, %c0_8] : memref<3x3x32x128xbf16, #tpu.memory_space<vmem>>, vector<1x1x32x128xbf16>
      %8 = vector.shape_cast %7 : vector<1x1x32x128xbf16> to vector<32x128xbf16>
      %cst_9 = arith.constant dense<0.000000e+00> : vector<4x128xf32>
      %9 = tpu.matmul %6, %8, %cst_9 {dimension_numbers = #tpu.dot_dimension_numbers<[1], [0], [0], [1], [0, 0, 1, 1], [], []>} : vector<4x32xbf16>, vector<32x128xbf16>, vector<4x128xf32> -> vector<4x128xf32>
      %10 = arith.addf %1, %9 : vector<4x128xf32>
      %11 = vector.extract_strided_slice %5 {offsets = [2, 0], sizes = [4, 32], strides = [1, 1]} : vector<8x32xbf16> to vector<4x32xbf16>
      %c0_10 = arith.constant 0 : index
      %c1 = arith.constant 1 : index
      %c0_11 = arith.constant 0 : index
      %c0_12 = arith.constant 0 : index
      %12 = vector.load %arg3[%c0_10, %c1, %c0_11, %c0_12] : memref<3x3x32x128xbf16, #tpu.memory_space<vmem>>, vector<1x1x32x128xbf16>
      %13 = vector.shape_cast %12 : vector<1x1x32x128xbf16> to vector<32x128xbf16>
      %cst_13 = arith.constant dense<0.000000e+00> : vector<4x128xf32>
      %14 = tpu.matmul %11, %13, %cst_13 {dimension_numbers = #tpu.dot_dimension_numbers<[1], [0], [0], [1], [0, 0, 1, 1], [], []>} : vector<4x32xbf16>, vector<32x128xbf16>, vector<4x128xf32> -> vector<4x128xf32>
      %15 = arith.addf %10, %14 : vector<4x128xf32>
      %16 = vector.extract_strided_slice %5 {offsets = [4, 0], sizes = [4, 32], strides = [1, 1]} : vector<8x32xbf16> to vector<4x32xbf16>
      %c0_14 = arith.constant 0 : index
      %c2 = arith.constant 2 : index
      %c0_15 = arith.constant 0 : index
      %c0_16 = arith.constant 0 : index
      %17 = vector.load %arg3[%c0_14, %c2, %c0_15, %c0_16] : memref<3x3x32x128xbf16, #tpu.memory_space<vmem>>, vector<1x1x32x128xbf16>
      %18 = vector.shape_cast %17 : vector<1x1x32x128xbf16> to vector<32x128xbf16>
      %cst_17 = arith.constant dense<0.000000e+00> : vector<4x128xf32>
      %19 = tpu.matmul %16, %18, %cst_17 {dimension_numbers = #tpu.dot_dimension_numbers<[1], [0], [0], [1], [0, 0, 1, 1], [], []>} : vector<4x32xbf16>, vector<32x128xbf16>, vector<4x128xf32> -> vector<4x128xf32>
      %20 = arith.addf %15, %19 : vector<4x128xf32>
      %c2_i32 = arith.constant 2 : i32
      %21 = arith.addi %arg6, %c2_i32 : i32
      %c0_18 = arith.constant 0 : index
      %c0_19 = arith.constant 0 : index
      %22 = arith.index_cast %21 : i32 to index
      %c0_20 = arith.constant 0 : index
      %c0_21 = arith.constant 0 : index
      %23 = vector.load %arg2[%c0_18, %c0_19, %22, %c0_20, %c0_21] : memref<1x1x8x8x32xbf16, #tpu.memory_space<vmem>>, vector<1x1x1x8x32xbf16>
      %24 = vector.shape_cast %23 : vector<1x1x1x8x32xbf16> to vector<8x32xbf16>
      %25 = vector.extract_strided_slice %24 {offsets = [0, 0], sizes = [4, 32], strides = [1, 1]} : vector<8x32xbf16> to vector<4x32xbf16>
      %c1_22 = arith.constant 1 : index
      %c0_23 = arith.constant 0 : index
      %c0_24 = arith.constant 0 : index
      %c0_25 = arith.constant 0 : index
      %26 = vector.load %arg3[%c1_22, %c0_23, %c0_24, %c0_25] : memref<3x3x32x128xbf16, #tpu.memory_space<vmem>>, vector<1x1x32x128xbf16>
      %27 = vector.shape_cast %26 : vector<1x1x32x128xbf16> to vector<32x128xbf16>
      %cst_26 = arith.constant dense<0.000000e+00> : vector<4x128xf32>
      %28 = tpu.matmul %25, %27, %cst_26 {dimension_numbers = #tpu.dot_dimension_numbers<[1], [0], [0], [1], [0, 0, 1, 1], [], []>} : vector<4x32xbf16>, vector<32x128xbf16>, vector<4x128xf32> -> vector<4x128xf32>
      %29 = arith.addf %20, %28 : vector<4x128xf32>
      %30 = vector.extract_strided_slice %24 {offsets = [2, 0], sizes = [4, 32], strides = [1, 1]} : vector<8x32xbf16> to vector<4x32xbf16>
      %c1_27 = arith.constant 1 : index
      %c1_28 = arith.constant 1 : index
      %c0_29 = arith.constant 0 : index
      %c0_30 = arith.constant 0 : index
      %31 = vector.load %arg3[%c1_27, %c1_28, %c0_29, %c0_30] : memref<3x3x32x128xbf16, #tpu.memory_space<vmem>>, vector<1x1x32x128xbf16>
      %32 = vector.shape_cast %31 : vector<1x1x32x128xbf16> to vector<32x128xbf16>
      %cst_31 = arith.constant dense<0.000000e+00> : vector<4x128xf32>
      %33 = tpu.matmul %30, %32, %cst_31 {dimension_numbers = #tpu.dot_dimension_numbers<[1], [0], [0], [1], [0, 0, 1, 1], [], []>} : vector<4x32xbf16>, vector<32x128xbf16>, vector<4x128xf32> -> vector<4x128xf32>
      %34 = arith.addf %29, %33 : vector<4x128xf32>
      %35 = vector.extract_strided_slice %24 {offsets = [4, 0], sizes = [4, 32], strides = [1, 1]} : vector<8x32xbf16> to vector<4x32xbf16>
      %c1_32 = arith.constant 1 : index
      %c2_33 = arith.constant 2 : index
      %c0_34 = arith.constant 0 : index
      %c0_35 = arith.constant 0 : index
      %36 = vector.load %arg3[%c1_32, %c2_33, %c0_34, %c0_35] : memref<3x3x32x128xbf16, #tpu.memory_space<vmem>>, vector<1x1x32x128xbf16>
      %37 = vector.shape_cast %36 : vector<1x1x32x128xbf16> to vector<32x128xbf16>
      %cst_36 = arith.constant dense<0.000000e+00> : vector<4x128xf32>
      %38 = tpu.matmul %35, %37, %cst_36 {dimension_numbers = #tpu.dot_dimension_numbers<[1], [0], [0], [1], [0, 0, 1, 1], [], []>} : vector<4x32xbf16>, vector<32x128xbf16>, vector<4x128xf32> -> vector<4x128xf32>
      %39 = arith.addf %34, %38 : vector<4x128xf32>
      %c4_i32_37 = arith.constant 4 : i32
      %40 = arith.addi %arg6, %c4_i32_37 : i32
      %c0_38 = arith.constant 0 : index
      %c0_39 = arith.constant 0 : index
      %41 = arith.index_cast %40 : i32 to index
      %c0_40 = arith.constant 0 : index
      %c0_41 = arith.constant 0 : index
      %42 = vector.load %arg2[%c0_38, %c0_39, %41, %c0_40, %c0_41] : memref<1x1x8x8x32xbf16, #tpu.memory_space<vmem>>, vector<1x1x1x8x32xbf16>
      %43 = vector.shape_cast %42 : vector<1x1x1x8x32xbf16> to vector<8x32xbf16>
      %44 = vector.extract_strided_slice %43 {offsets = [0, 0], sizes = [4, 32], strides = [1, 1]} : vector<8x32xbf16> to vector<4x32xbf16>
      %c2_42 = arith.constant 2 : index
      %c0_43 = arith.constant 0 : index
      %c0_44 = arith.constant 0 : index
      %c0_45 = arith.constant 0 : index
      %45 = vector.load %arg3[%c2_42, %c0_43, %c0_44, %c0_45] : memref<3x3x32x128xbf16, #tpu.memory_space<vmem>>, vector<1x1x32x128xbf16>
      %46 = vector.shape_cast %45 : vector<1x1x32x128xbf16> to vector<32x128xbf16>
      %cst_46 = arith.constant dense<0.000000e+00> : vector<4x128xf32>
      %47 = tpu.matmul %44, %46, %cst_46 {dimension_numbers = #tpu.dot_dimension_numbers<[1], [0], [0], [1], [0, 0, 1, 1], [], []>} : vector<4x32xbf16>, vector<32x128xbf16>, vector<4x128xf32> -> vector<4x128xf32>
      %48 = arith.addf %39, %47 : vector<4x128xf32>
      %49 = vector.extract_strided_slice %43 {offsets = [2, 0], sizes = [4, 32], strides = [1, 1]} : vector<8x32xbf16> to vector<4x32xbf16>
      %c2_47 = arith.constant 2 : index
      %c1_48 = arith.constant 1 : index
      %c0_49 = arith.constant 0 : index
      %c0_50 = arith.constant 0 : index
      %50 = vector.load %arg3[%c2_47, %c1_48, %c0_49, %c0_50] : memref<3x3x32x128xbf16, #tpu.memory_space<vmem>>, vector<1x1x32x128xbf16>
      %51 = vector.shape_cast %50 : vector<1x1x32x128xbf16> to vector<32x128xbf16>
      %cst_51 = arith.constant dense<0.000000e+00> : vector<4x128xf32>
      %52 = tpu.matmul %49, %51, %cst_51 {dimension_numbers = #tpu.dot_dimension_numbers<[1], [0], [0], [1], [0, 0, 1, 1], [], []>} : vector<4x32xbf16>, vector<32x128xbf16>, vector<4x128xf32> -> vector<4x128xf32>
      %53 = arith.addf %48, %52 : vector<4x128xf32>
      %54 = vector.extract_strided_slice %43 {offsets = [4, 0], sizes = [4, 32], strides = [1, 1]} : vector<8x32xbf16> to vector<4x32xbf16>
      %c2_52 = arith.constant 2 : index
      %c2_53 = arith.constant 2 : index
      %c0_54 = arith.constant 0 : index
      %c0_55 = arith.constant 0 : index
      %55 = vector.load %arg3[%c2_52, %c2_53, %c0_54, %c0_55] : memref<3x3x32x128xbf16, #tpu.memory_space<vmem>>, vector<1x1x32x128xbf16>
      %56 = vector.shape_cast %55 : vector<1x1x32x128xbf16> to vector<32x128xbf16>
      %cst_56 = arith.constant dense<0.000000e+00> : vector<4x128xf32>
      %57 = tpu.matmul %54, %56, %cst_56 {dimension_numbers = #tpu.dot_dimension_numbers<[1], [0], [0], [1], [0, 0, 1, 1], [], []>} : vector<4x32xbf16>, vector<32x128xbf16>, vector<4x128xf32> -> vector<4x128xf32>
      %58 = arith.addf %53, %57 : vector<4x128xf32>
      %c0_57 = arith.constant 0 : index
      %c0_58 = arith.constant 0 : index
      %59 = vector.load %arg4[%c0_57, %c0_58] : memref<1x128xf32, #tpu.memory_space<vmem>>, vector<1x128xf32>
      %60 = vector.broadcast %59 : vector<1x128xf32> to vector<4x128xf32>
      %61 = arith.addf %58, %60 : vector<4x128xf32>
      %cst_59 = arith.constant 0.000000e+00 : f32
      %62 = vector.broadcast %cst_59 : f32 to vector<4x128xf32>
      %63 = arith.maximumf %61, %62 : vector<4x128xf32>
      %64 = arith.truncf %63 : vector<4x128xf32> to vector<4x128xbf16>
      %c0_60 = arith.constant 0 : index
      %c0_61 = arith.constant 0 : index
      %65 = arith.index_cast %arg6 : i32 to index
      %c0_62 = arith.constant 0 : index
      %c0_63 = arith.constant 0 : index
      %66 = vector.load %arg5[%c0_60, %c0_61, %65, %c0_62, %c0_63] : memref<1x1x4x4x128xbf16, #tpu.memory_space<vmem>>, vector<1x1x1x4x128xbf16>
      %67 = vector.shape_cast %66 : vector<1x1x1x4x128xbf16> to vector<4x128xbf16>
      %68 = vector.shape_cast %64 : vector<4x128xbf16> to vector<1x1x1x4x128xbf16>
      tpu.vector_store %arg5[%c0_60, %c0_61, %65, %c0_62, %c0_63], %68 {strides = array<i32>} : memref<1x1x4x4x128xbf16, #tpu.memory_space<vmem>>, vector<1x1x1x4x128xbf16>,
    }
    %c4_i32_0 = arith.constant 4 : i32
    return
  }
  func.func @transform_0(%arg0: i32, %arg1: i32) -> (i32, i32, i32, i32, i32) {
    %c0_i32 = arith.constant 0 : i32
    %c0_i32_0 = arith.constant 0 : i32
    %c0_i32_1 = arith.constant 0 : i32
    %c0_i32_2 = arith.constant 0 : i32
    return %arg0, %arg1, %c0_i32, %c0_i32_0, %c0_i32_1 : i32, i32, i32, i32, i32
  }
  func.func @transform_1(%arg0: i32, %arg1: i32) -> (i32, i32, i32, i32) {
    %c0_i32 = arith.constant 0 : i32
    %c0_i32_0 = arith.constant 0 : i32
    %c0_i32_1 = arith.constant 0 : i32
    %c0_i32_2 = arith.constant 0 : i32
    %c0_i32_3 = arith.constant 0 : i32
    return %c0_i32, %c0_i32_0, %c0_i32_1, %c0_i32_2 : i32, i32, i32, i32
  }
  func.func @transform_2(%arg0: i32, %arg1: i32) -> (i32, i32) {
    %c0_i32 = arith.constant 0 : i32
    %c0_i32_0 = arith.constant 0 : i32
    %c0_i32_1 = arith.constant 0 : i32
    return %c0_i32, %c0_i32_0 : i32, i32
  }
  func.func @transform_3(%arg0: i32, %arg1: i32) -> (i32, i32, i32, i32, i32) {
    %c0_i32 = arith.constant 0 : i32
    %c0_i32_0 = arith.constant 0 : i32
    %c0_i32_1 = arith.constant 0 : i32
    %c0_i32_2 = arith.constant 0 : i32
    return %arg0, %arg1, %c0_i32, %c0_i32_0, %c0_i32_1 : i32, i32, i32, i32, i32
  }
}

module attributes {stable_mosaic.version = 11 : i64} {
  func.func @_direct_conv_kernel(%arg0: i32, %arg1: i32, %arg2: memref<1x1x12x12x32xbf16, #tpu.memory_space<vmem>>, %arg3: memref<3x3x32x128xbf16, #tpu.memory_space<vmem>>, %arg4: memref<1x128xf32, #tpu.memory_space<vmem>>, %arg5: memref<1x1x4x4x128xbf16, #tpu.memory_space<vmem>>) attributes {dimension_semantics = [#tpu.dimension_semantics<parallel>, #tpu.dimension_semantics<parallel>], iteration_bounds = array<i64: 2, 1>, scalar_prefetch = 0 : i64, scratch_operands = 0 : i64, tpu.core_type = #tpu.core_type<tc>, window_params = [{transform_indices = @transform_0, window_bounds = array<i64: 1, 1, 12, 12, 32>}, {pipeline_mode = #tpu.pipeline_mode<synchronous>, transform_indices = @transform_1, window_bounds = array<i64: 3, 3, 32, 128>}, {pipeline_mode = #tpu.pipeline_mode<synchronous>, transform_indices = @transform_2, window_bounds = array<i64: 1, 128>}, {transform_indices = @transform_3, window_bounds = array<i64: 1, 1, 4, 4, 128>}]} {
    %c0_i32 = arith.constant 0 : i32
    %c4_i32 = arith.constant 4 : i32
    %0 = arith.addi %c0_i32, %c4_i32 : i32
    %c1_i32 = arith.constant 1 : i32
    scf.for %arg6 = %c0_i32 to %0 step %c1_i32  : i32 {
      %cst = arith.constant 0.000000e+00 : f32
      %1 = vector.broadcast %cst : f32 to vector<4x128xf32>
      %c0_i32_1 = arith.constant 0 : i32
      %2 = arith.addi %arg6, %c0_i32_1 : i32
      %c0 = arith.constant 0 : index
      %c0_2 = arith.constant 0 : index
      %3 = arith.index_cast %2 : i32 to index
      %c0_3 = arith.constant 0 : index
      %c0_4 = arith.constant 0 : index
      %4 = vector.load %arg2[%c0, %c0_2, %3, %c0_3, %c0_4] : memref<1x1x12x12x32xbf16, #tpu.memory_space<vmem>>, vector<1x1x1x12x32xbf16>
      %5 = vector.shape_cast %4 : vector<1x1x1x12x32xbf16> to vector<12x32xbf16>
      %6 = vector.extract_strided_slice %5 {offsets = [0, 0], sizes = [4, 32], strides = [1, 1]} : vector<12x32xbf16> to vector<4x32xbf16>
      %c0_5 = arith.constant 0 : index
      %c0_6 = arith.constant 0 : index
      %c0_7 = arith.constant 0 : index
      %c0_8 = arith.constant 0 : index
      %7 = vector.load %arg3[%c0_5, %c0_6, %c0_7, %c0_8] : memref<3x3x32x128xbf16, #tpu.memory_space<vmem>>, vector<1x1x32x128xbf16>
      %8 = vector.shape_cast %7 : vector<1x1x32x128xbf16> to vector<32x128xbf16>
      %cst_9 = arith.constant dense<0.000000e+00> : vector<4x128xf32>
      %9 = tpu.matmul %6, %8, %cst_9 {dimension_numbers = #tpu.dot_dimension_numbers<[1], [0], [0], [1], [0, 0, 1, 1], [], []>} : vector<4x32xbf16>, vector<32x128xbf16>, vector<4x128xf32> -> vector<4x128xf32>
      %10 = arith.addf %1, %9 : vector<4x128xf32>
      %11 = vector.extract_strided_slice %5 {offsets = [4, 0], sizes = [4, 32], strides = [1, 1]} : vector<12x32xbf16> to vector<4x32xbf16>
      %c0_10 = arith.constant 0 : index
      %c1 = arith.constant 1 : index
      %c0_11 = arith.constant 0 : index
      %c0_12 = arith.constant 0 : index
      %12 = vector.load %arg3[%c0_10, %c1, %c0_11, %c0_12] : memref<3x3x32x128xbf16, #tpu.memory_space<vmem>>, vector<1x1x32x128xbf16>
      %13 = vector.shape_cast %12 : vector<1x1x32x128xbf16> to vector<32x128xbf16>
      %cst_13 = arith.constant dense<0.000000e+00> : vector<4x128xf32>
      %14 = tpu.matmul %11, %13, %cst_13 {dimension_numbers = #tpu.dot_dimension_numbers<[1], [0], [0], [1], [0, 0, 1, 1], [], []>} : vector<4x32xbf16>, vector<32x128xbf16>, vector<4x128xf32> -> vector<4x128xf32>
      %15 = arith.addf %10, %14 : vector<4x128xf32>
      %16 = vector.extract_strided_slice %5 {offsets = [8, 0], sizes = [4, 32], strides = [1, 1]} : vector<12x32xbf16> to vector<4x32xbf16>
      %c0_14 = arith.constant 0 : index
      %c2 = arith.constant 2 : index
      %c0_15 = arith.constant 0 : index
      %c0_16 = arith.constant 0 : index
      %17 = vector.load %arg3[%c0_14, %c2, %c0_15, %c0_16] : memref<3x3x32x128xbf16, #tpu.memory_space<vmem>>, vector<1x1x32x128xbf16>
      %18 = vector.shape_cast %17 : vector<1x1x32x128xbf16> to vector<32x128xbf16>
      %cst_17 = arith.constant dense<0.000000e+00> : vector<4x128xf32>
      %19 = tpu.matmul %16, %18, %cst_17 {dimension_numbers = #tpu.dot_dimension_numbers<[1], [0], [0], [1], [0, 0, 1, 1], [], []>} : vector<4x32xbf16>, vector<32x128xbf16>, vector<4x128xf32> -> vector<4x128xf32>
      %20 = arith.addf %15, %19 : vector<4x128xf32>
      %c4_i32_18 = arith.constant 4 : i32
      %21 = arith.addi %arg6, %c4_i32_18 : i32
      %c0_19 = arith.constant 0 : index
      %c0_20 = arith.constant 0 : index
      %22 = arith.index_cast %21 : i32 to index
      %c0_21 = arith.constant 0 : index
      %c0_22 = arith.constant 0 : index
      %23 = vector.load %arg2[%c0_19, %c0_20, %22, %c0_21, %c0_22] : memref<1x1x12x12x32xbf16, #tpu.memory_space<vmem>>, vector<1x1x1x12x32xbf16>
      %24 = vector.shape_cast %23 : vector<1x1x1x12x32xbf16> to vector<12x32xbf16>
      %25 = vector.extract_strided_slice %24 {offsets = [0, 0], sizes = [4, 32], strides = [1, 1]} : vector<12x32xbf16> to vector<4x32xbf16>
      %c1_23 = arith.constant 1 : index
      %c0_24 = arith.constant 0 : index
      %c0_25 = arith.constant 0 : index
      %c0_26 = arith.constant 0 : index
      %26 = vector.load %arg3[%c1_23, %c0_24, %c0_25, %c0_26] : memref<3x3x32x128xbf16, #tpu.memory_space<vmem>>, vector<1x1x32x128xbf16>
      %27 = vector.shape_cast %26 : vector<1x1x32x128xbf16> to vector<32x128xbf16>
      %cst_27 = arith.constant dense<0.000000e+00> : vector<4x128xf32>
      %28 = tpu.matmul %25, %27, %cst_27 {dimension_numbers = #tpu.dot_dimension_numbers<[1], [0], [0], [1], [0, 0, 1, 1], [], []>} : vector<4x32xbf16>, vector<32x128xbf16>, vector<4x128xf32> -> vector<4x128xf32>
      %29 = arith.addf %20, %28 : vector<4x128xf32>
      %30 = vector.extract_strided_slice %24 {offsets = [4, 0], sizes = [4, 32], strides = [1, 1]} : vector<12x32xbf16> to vector<4x32xbf16>
      %c1_28 = arith.constant 1 : index
      %c1_29 = arith.constant 1 : index
      %c0_30 = arith.constant 0 : index
      %c0_31 = arith.constant 0 : index
      %31 = vector.load %arg3[%c1_28, %c1_29, %c0_30, %c0_31] : memref<3x3x32x128xbf16, #tpu.memory_space<vmem>>, vector<1x1x32x128xbf16>
      %32 = vector.shape_cast %31 : vector<1x1x32x128xbf16> to vector<32x128xbf16>
      %cst_32 = arith.constant dense<0.000000e+00> : vector<4x128xf32>
      %33 = tpu.matmul %30, %32, %cst_32 {dimension_numbers = #tpu.dot_dimension_numbers<[1], [0], [0], [1], [0, 0, 1, 1], [], []>} : vector<4x32xbf16>, vector<32x128xbf16>, vector<4x128xf32> -> vector<4x128xf32>
      %34 = arith.addf %29, %33 : vector<4x128xf32>
      %35 = vector.extract_strided_slice %24 {offsets = [8, 0], sizes = [4, 32], strides = [1, 1]} : vector<12x32xbf16> to vector<4x32xbf16>
      %c1_33 = arith.constant 1 : index
      %c2_34 = arith.constant 2 : index
      %c0_35 = arith.constant 0 : index
      %c0_36 = arith.constant 0 : index
      %36 = vector.load %arg3[%c1_33, %c2_34, %c0_35, %c0_36] : memref<3x3x32x128xbf16, #tpu.memory_space<vmem>>, vector<1x1x32x128xbf16>
      %37 = vector.shape_cast %36 : vector<1x1x32x128xbf16> to vector<32x128xbf16>
      %cst_37 = arith.constant dense<0.000000e+00> : vector<4x128xf32>
      %38 = tpu.matmul %35, %37, %cst_37 {dimension_numbers = #tpu.dot_dimension_numbers<[1], [0], [0], [1], [0, 0, 1, 1], [], []>} : vector<4x32xbf16>, vector<32x128xbf16>, vector<4x128xf32> -> vector<4x128xf32>
      %39 = arith.addf %34, %38 : vector<4x128xf32>
      %c8_i32 = arith.constant 8 : i32
      %40 = arith.addi %arg6, %c8_i32 : i32
      %c0_38 = arith.constant 0 : index
      %c0_39 = arith.constant 0 : index
      %41 = arith.index_cast %40 : i32 to index
      %c0_40 = arith.constant 0 : index
      %c0_41 = arith.constant 0 : index
      %42 = vector.load %arg2[%c0_38, %c0_39, %41, %c0_40, %c0_41] : memref<1x1x12x12x32xbf16, #tpu.memory_space<vmem>>, vector<1x1x1x12x32xbf16>
      %43 = vector.shape_cast %42 : vector<1x1x1x12x32xbf16> to vector<12x32xbf16>
      %44 = vector.extract_strided_slice %43 {offsets = [0, 0], sizes = [4, 32], strides = [1, 1]} : vector<12x32xbf16> to vector<4x32xbf16>
      %c2_42 = arith.constant 2 : index
      %c0_43 = arith.constant 0 : index
      %c0_44 = arith.constant 0 : index
      %c0_45 = arith.constant 0 : index
      %45 = vector.load %arg3[%c2_42, %c0_43, %c0_44, %c0_45] : memref<3x3x32x128xbf16, #tpu.memory_space<vmem>>, vector<1x1x32x128xbf16>
      %46 = vector.shape_cast %45 : vector<1x1x32x128xbf16> to vector<32x128xbf16>
      %cst_46 = arith.constant dense<0.000000e+00> : vector<4x128xf32>
      %47 = tpu.matmul %44, %46, %cst_46 {dimension_numbers = #tpu.dot_dimension_numbers<[1], [0], [0], [1], [0, 0, 1, 1], [], []>} : vector<4x32xbf16>, vector<32x128xbf16>, vector<4x128xf32> -> vector<4x128xf32>
      %48 = arith.addf %39, %47 : vector<4x128xf32>
      %49 = vector.extract_strided_slice %43 {offsets = [4, 0], sizes = [4, 32], strides = [1, 1]} : vector<12x32xbf16> to vector<4x32xbf16>
      %c2_47 = arith.constant 2 : index
      %c1_48 = arith.constant 1 : index
      %c0_49 = arith.constant 0 : index
      %c0_50 = arith.constant 0 : index
      %50 = vector.load %arg3[%c2_47, %c1_48, %c0_49, %c0_50] : memref<3x3x32x128xbf16, #tpu.memory_space<vmem>>, vector<1x1x32x128xbf16>
      %51 = vector.shape_cast %50 : vector<1x1x32x128xbf16> to vector<32x128xbf16>
      %cst_51 = arith.constant dense<0.000000e+00> : vector<4x128xf32>
      %52 = tpu.matmul %49, %51, %cst_51 {dimension_numbers = #tpu.dot_dimension_numbers<[1], [0], [0], [1], [0, 0, 1, 1], [], []>} : vector<4x32xbf16>, vector<32x128xbf16>, vector<4x128xf32> -> vector<4x128xf32>
      %53 = arith.addf %48, %52 : vector<4x128xf32>
      %54 = vector.extract_strided_slice %43 {offsets = [8, 0], sizes = [4, 32], strides = [1, 1]} : vector<12x32xbf16> to vector<4x32xbf16>
      %c2_52 = arith.constant 2 : index
      %c2_53 = arith.constant 2 : index
      %c0_54 = arith.constant 0 : index
      %c0_55 = arith.constant 0 : index
      %55 = vector.load %arg3[%c2_52, %c2_53, %c0_54, %c0_55] : memref<3x3x32x128xbf16, #tpu.memory_space<vmem>>, vector<1x1x32x128xbf16>
      %56 = vector.shape_cast %55 : vector<1x1x32x128xbf16> to vector<32x128xbf16>
      %cst_56 = arith.constant dense<0.000000e+00> : vector<4x128xf32>
      %57 = tpu.matmul %54, %56, %cst_56 {dimension_numbers = #tpu.dot_dimension_numbers<[1], [0], [0], [1], [0, 0, 1, 1], [], []>} : vector<4x32xbf16>, vector<32x128xbf16>, vector<4x128xf32> -> vector<4x128xf32>
      %58 = arith.addf %53, %57 : vector<4x128xf32>
      %c0_57 = arith.constant 0 : index
      %c0_58 = arith.constant 0 : index
      %59 = vector.load %arg4[%c0_57, %c0_58] : memref<1x128xf32, #tpu.memory_space<vmem>>, vector<1x128xf32>
      %60 = vector.broadcast %59 : vector<1x128xf32> to vector<4x128xf32>
      %61 = arith.addf %58, %60 : vector<4x128xf32>
      %cst_59 = arith.constant 0.000000e+00 : f32
      %62 = vector.broadcast %cst_59 : f32 to vector<4x128xf32>
      %63 = arith.maximumf %61, %62 : vector<4x128xf32>
      %64 = arith.truncf %63 : vector<4x128xf32> to vector<4x128xbf16>
      %c0_60 = arith.constant 0 : index
      %c0_61 = arith.constant 0 : index
      %65 = arith.index_cast %arg6 : i32 to index
      %c0_62 = arith.constant 0 : index
      %c0_63 = arith.constant 0 : index
      %66 = vector.load %arg5[%c0_60, %c0_61, %65, %c0_62, %c0_63] : memref<1x1x4x4x128xbf16, #tpu.memory_space<vmem>>, vector<1x1x1x4x128xbf16>
      %67 = vector.shape_cast %66 : vector<1x1x1x4x128xbf16> to vector<4x128xbf16>
      %68 = vector.shape_cast %64 : vector<4x128xbf16> to vector<1x1x1x4x128xbf16>
      tpu.vector_store %arg5[%c0_60, %c0_61, %65, %c0_62, %c0_63], %68 {strides = array<i32>} : memref<1x1x4x4x128xbf16, #tpu.memory_space<vmem>>, vector<1x1x1x4x128xbf16>,
    }
    %c4_i32_0 = arith.constant 4 : i32
    return
  }
  func.func @transform_0(%arg0: i32, %arg1: i32) -> (i32, i32, i32, i32, i32) {
    %c0_i32 = arith.constant 0 : i32
    %c0_i32_0 = arith.constant 0 : i32
    %c0_i32_1 = arith.constant 0 : i32
    %c0_i32_2 = arith.constant 0 : i32
    return %arg0, %arg1, %c0_i32, %c0_i32_0, %c0_i32_1 : i32, i32, i32, i32, i32
  }
  func.func @transform_1(%arg0: i32, %arg1: i32) -> (i32, i32, i32, i32) {
    %c0_i32 = arith.constant 0 : i32
    %c0_i32_0 = arith.constant 0 : i32
    %c0_i32_1 = arith.constant 0 : i32
    %c0_i32_2 = arith.constant 0 : i32
    %c0_i32_3 = arith.constant 0 : i32
    return %c0_i32, %c0_i32_0, %c0_i32_1, %c0_i32_2 : i32, i32, i32, i32
  }
  func.func @transform_2(%arg0: i32, %arg1: i32) -> (i32, i32) {
    %c0_i32 = arith.constant 0 : i32
    %c0_i32_0 = arith.constant 0 : i32
    %c0_i32_1 = arith.constant 0 : i32
    return %c0_i32, %c0_i32_0 : i32, i32
  }
  func.func @transform_3(%arg0: i32, %arg1: i32) -> (i32, i32, i32, i32, i32) {
    %c0_i32 = arith.constant 0 : i32
    %c0_i32_0 = arith.constant 0 : i32
    %c0_i32_1 = arith.constant 0 : i32
    %c0_i32_2 = arith.constant 0 : i32
    return %arg0, %arg1, %c0_i32, %c0_i32_0, %c0_i32_1 : i32, i32, i32, i32, i32
  }
}

module attributes {stable_mosaic.version = 11 : i64} {
  func.func @_direct_conv_kernel(%arg0: i32, %arg1: i32, %arg2: memref<1x1x20x20x32xbf16, #tpu.memory_space<vmem>>, %arg3: memref<3x3x32x128xbf16, #tpu.memory_space<vmem>>, %arg4: memref<1x128xf32, #tpu.memory_space<vmem>>, %arg5: memref<1x1x4x4x128xbf16, #tpu.memory_space<vmem>>) attributes {dimension_semantics = [#tpu.dimension_semantics<parallel>, #tpu.dimension_semantics<parallel>], iteration_bounds = array<i64: 2, 1>, scalar_prefetch = 0 : i64, scratch_operands = 0 : i64, tpu.core_type = #tpu.core_type<tc>, window_params = [{transform_indices = @transform_0, window_bounds = array<i64: 1, 1, 20, 20, 32>}, {pipeline_mode = #tpu.pipeline_mode<synchronous>, transform_indices = @transform_1, window_bounds = array<i64: 3, 3, 32, 128>}, {pipeline_mode = #tpu.pipeline_mode<synchronous>, transform_indices = @transform_2, window_bounds = array<i64: 1, 128>}, {transform_indices = @transform_3, window_bounds = array<i64: 1, 1, 4, 4, 128>}]} {
    %c0_i32 = arith.constant 0 : i32
    %c4_i32 = arith.constant 4 : i32
    %0 = arith.addi %c0_i32, %c4_i32 : i32
    %c1_i32 = arith.constant 1 : i32
    scf.for %arg6 = %c0_i32 to %0 step %c1_i32  : i32 {
      %cst = arith.constant 0.000000e+00 : f32
      %1 = vector.broadcast %cst : f32 to vector<4x128xf32>
      %c0_i32_1 = arith.constant 0 : i32
      %2 = arith.addi %arg6, %c0_i32_1 : i32
      %c0 = arith.constant 0 : index
      %c0_2 = arith.constant 0 : index
      %3 = arith.index_cast %2 : i32 to index
      %c0_3 = arith.constant 0 : index
      %c0_4 = arith.constant 0 : index
      %4 = vector.load %arg2[%c0, %c0_2, %3, %c0_3, %c0_4] : memref<1x1x20x20x32xbf16, #tpu.memory_space<vmem>>, vector<1x1x1x20x32xbf16>
      %5 = vector.shape_cast %4 : vector<1x1x1x20x32xbf16> to vector<20x32xbf16>
      %6 = vector.extract_strided_slice %5 {offsets = [0, 0], sizes = [4, 32], strides = [1, 1]} : vector<20x32xbf16> to vector<4x32xbf16>
      %c0_5 = arith.constant 0 : index
      %c0_6 = arith.constant 0 : index
      %c0_7 = arith.constant 0 : index
      %c0_8 = arith.constant 0 : index
      %7 = vector.load %arg3[%c0_5, %c0_6, %c0_7, %c0_8] : memref<3x3x32x128xbf16, #tpu.memory_space<vmem>>, vector<1x1x32x128xbf16>
      %8 = vector.shape_cast %7 : vector<1x1x32x128xbf16> to vector<32x128xbf16>
      %cst_9 = arith.constant dense<0.000000e+00> : vector<4x128xf32>
      %9 = tpu.matmul %6, %8, %cst_9 {dimension_numbers = #tpu.dot_dimension_numbers<[1], [0], [0], [1], [0, 0, 1, 1], [], []>} : vector<4x32xbf16>, vector<32x128xbf16>, vector<4x128xf32> -> vector<4x128xf32>
      %10 = arith.addf %1, %9 : vector<4x128xf32>
      %11 = vector.extract_strided_slice %5 {offsets = [8, 0], sizes = [4, 32], strides = [1, 1]} : vector<20x32xbf16> to vector<4x32xbf16>
      %c0_10 = arith.constant 0 : index
      %c1 = arith.constant 1 : index
      %c0_11 = arith.constant 0 : index
      %c0_12 = arith.constant 0 : index
      %12 = vector.load %arg3[%c0_10, %c1, %c0_11, %c0_12] : memref<3x3x32x128xbf16, #tpu.memory_space<vmem>>, vector<1x1x32x128xbf16>
      %13 = vector.shape_cast %12 : vector<1x1x32x128xbf16> to vector<32x128xbf16>
      %cst_13 = arith.constant dense<0.000000e+00> : vector<4x128xf32>
      %14 = tpu.matmul %11, %13, %cst_13 {dimension_numbers = #tpu.dot_dimension_numbers<[1], [0], [0], [1], [0, 0, 1, 1], [], []>} : vector<4x32xbf16>, vector<32x128xbf16>, vector<4x128xf32> -> vector<4x128xf32>
      %15 = arith.addf %10, %14 : vector<4x128xf32>
      %16 = vector.extract_strided_slice %5 {offsets = [16, 0], sizes = [4, 32], strides = [1, 1]} : vector<20x32xbf16> to vector<4x32xbf16>
      %c0_14 = arith.constant 0 : index
      %c2 = arith.constant 2 : index
      %c0_15 = arith.constant 0 : index
      %c0_16 = arith.constant 0 : index
      %17 = vector.load %arg3[%c0_14, %c2, %c0_15, %c0_16] : memref<3x3x32x128xbf16, #tpu.memory_space<vmem>>, vector<1x1x32x128xbf16>
      %18 = vector.shape_cast %17 : vector<1x1x32x128xbf16> to vector<32x128xbf16>
      %cst_17 = arith.constant dense<0.000000e+00> : vector<4x128xf32>
      %19 = tpu.matmul %16, %18, %cst_17 {dimension_numbers = #tpu.dot_dimension_numbers<[1], [0], [0], [1], [0, 0, 1, 1], [], []>} : vector<4x32xbf16>, vector<32x128xbf16>, vector<4x128xf32> -> vector<4x128xf32>
      %20 = arith.addf %15, %19 : vector<4x128xf32>
      %c8_i32 = arith.constant 8 : i32
      %21 = arith.addi %arg6, %c8_i32 : i32
      %c0_18 = arith.constant 0 : index
      %c0_19 = arith.constant 0 : index
      %22 = arith.index_cast %21 : i32 to index
      %c0_20 = arith.constant 0 : index
      %c0_21 = arith.constant 0 : index
      %23 = vector.load %arg2[%c0_18, %c0_19, %22, %c0_20, %c0_21] : memref<1x1x20x20x32xbf16, #tpu.memory_space<vmem>>, vector<1x1x1x20x32xbf16>
      %24 = vector.shape_cast %23 : vector<1x1x1x20x32xbf16> to vector<20x32xbf16>
      %25 = vector.extract_strided_slice %24 {offsets = [0, 0], sizes = [4, 32], strides = [1, 1]} : vector<20x32xbf16> to vector<4x32xbf16>
      %c1_22 = arith.constant 1 : index
      %c0_23 = arith.constant 0 : index
      %c0_24 = arith.constant 0 : index
      %c0_25 = arith.constant 0 : index
      %26 = vector.load %arg3[%c1_22, %c0_23, %c0_24, %c0_25] : memref<3x3x32x128xbf16, #tpu.memory_space<vmem>>, vector<1x1x32x128xbf16>
      %27 = vector.shape_cast %26 : vector<1x1x32x128xbf16> to vector<32x128xbf16>
      %cst_26 = arith.constant dense<0.000000e+00> : vector<4x128xf32>
      %28 = tpu.matmul %25, %27, %cst_26 {dimension_numbers = #tpu.dot_dimension_numbers<[1], [0], [0], [1], [0, 0, 1, 1], [], []>} : vector<4x32xbf16>, vector<32x128xbf16>, vector<4x128xf32> -> vector<4x128xf32>
      %29 = arith.addf %20, %28 : vector<4x128xf32>
      %30 = vector.extract_strided_slice %24 {offsets = [8, 0], sizes = [4, 32], strides = [1, 1]} : vector<20x32xbf16> to vector<4x32xbf16>
      %c1_27 = arith.constant 1 : index
      %c1_28 = arith.constant 1 : index
      %c0_29 = arith.constant 0 : index
      %c0_30 = arith.constant 0 : index
      %31 = vector.load %arg3[%c1_27, %c1_28, %c0_29, %c0_30] : memref<3x3x32x128xbf16, #tpu.memory_space<vmem>>, vector<1x1x32x128xbf16>
      %32 = vector.shape_cast %31 : vector<1x1x32x128xbf16> to vector<32x128xbf16>
      %cst_31 = arith.constant dense<0.000000e+00> : vector<4x128xf32>
      %33 = tpu.matmul %30, %32, %cst_31 {dimension_numbers = #tpu.dot_dimension_numbers<[1], [0], [0], [1], [0, 0, 1, 1], [], []>} : vector<4x32xbf16>, vector<32x128xbf16>, vector<4x128xf32> -> vector<4x128xf32>
      %34 = arith.addf %29, %33 : vector<4x128xf32>
      %35 = vector.extract_strided_slice %24 {offsets = [16, 0], sizes = [4, 32], strides = [1, 1]} : vector<20x32xbf16> to vector<4x32xbf16>
      %c1_32 = arith.constant 1 : index
      %c2_33 = arith.constant 2 : index
      %c0_34 = arith.constant 0 : index
      %c0_35 = arith.constant 0 : index
      %36 = vector.load %arg3[%c1_32, %c2_33, %c0_34, %c0_35] : memref<3x3x32x128xbf16, #tpu.memory_space<vmem>>, vector<1x1x32x128xbf16>
      %37 = vector.shape_cast %36 : vector<1x1x32x128xbf16> to vector<32x128xbf16>
      %cst_36 = arith.constant dense<0.000000e+00> : vector<4x128xf32>
      %38 = tpu.matmul %35, %37, %cst_36 {dimension_numbers = #tpu.dot_dimension_numbers<[1], [0], [0], [1], [0, 0, 1, 1], [], []>} : vector<4x32xbf16>, vector<32x128xbf16>, vector<4x128xf32> -> vector<4x128xf32>
      %39 = arith.addf %34, %38 : vector<4x128xf32>
      %c16_i32 = arith.constant 16 : i32
      %40 = arith.addi %arg6, %c16_i32 : i32
      %c0_37 = arith.constant 0 : index
      %c0_38 = arith.constant 0 : index
      %41 = arith.index_cast %40 : i32 to index
      %c0_39 = arith.constant 0 : index
      %c0_40 = arith.constant 0 : index
      %42 = vector.load %arg2[%c0_37, %c0_38, %41, %c0_39, %c0_40] : memref<1x1x20x20x32xbf16, #tpu.memory_space<vmem>>, vector<1x1x1x20x32xbf16>
      %43 = vector.shape_cast %42 : vector<1x1x1x20x32xbf16> to vector<20x32xbf16>
      %44 = vector.extract_strided_slice %43 {offsets = [0, 0], sizes = [4, 32], strides = [1, 1]} : vector<20x32xbf16> to vector<4x32xbf16>
      %c2_41 = arith.constant 2 : index
      %c0_42 = arith.constant 0 : index
      %c0_43 = arith.constant 0 : index
      %c0_44 = arith.constant 0 : index
      %45 = vector.load %arg3[%c2_41, %c0_42, %c0_43, %c0_44] : memref<3x3x32x128xbf16, #tpu.memory_space<vmem>>, vector<1x1x32x128xbf16>
      %46 = vector.shape_cast %45 : vector<1x1x32x128xbf16> to vector<32x128xbf16>
      %cst_45 = arith.constant dense<0.000000e+00> : vector<4x128xf32>
      %47 = tpu.matmul %44, %46, %cst_45 {dimension_numbers = #tpu.dot_dimension_numbers<[1], [0], [0], [1], [0, 0, 1, 1], [], []>} : vector<4x32xbf16>, vector<32x128xbf16>, vector<4x128xf32> -> vector<4x128xf32>
      %48 = arith.addf %39, %47 : vector<4x128xf32>
      %49 = vector.extract_strided_slice %43 {offsets = [8, 0], sizes = [4, 32], strides = [1, 1]} : vector<20x32xbf16> to vector<4x32xbf16>
      %c2_46 = arith.constant 2 : index
      %c1_47 = arith.constant 1 : index
      %c0_48 = arith.constant 0 : index
      %c0_49 = arith.constant 0 : index
      %50 = vector.load %arg3[%c2_46, %c1_47, %c0_48, %c0_49] : memref<3x3x32x128xbf16, #tpu.memory_space<vmem>>, vector<1x1x32x128xbf16>
      %51 = vector.shape_cast %50 : vector<1x1x32x128xbf16> to vector<32x128xbf16>
      %cst_50 = arith.constant dense<0.000000e+00> : vector<4x128xf32>
      %52 = tpu.matmul %49, %51, %cst_50 {dimension_numbers = #tpu.dot_dimension_numbers<[1], [0], [0], [1], [0, 0, 1, 1], [], []>} : vector<4x32xbf16>, vector<32x128xbf16>, vector<4x128xf32> -> vector<4x128xf32>
      %53 = arith.addf %48, %52 : vector<4x128xf32>
      %54 = vector.extract_strided_slice %43 {offsets = [16, 0], sizes = [4, 32], strides = [1, 1]} : vector<20x32xbf16> to vector<4x32xbf16>
      %c2_51 = arith.constant 2 : index
      %c2_52 = arith.constant 2 : index
      %c0_53 = arith.constant 0 : index
      %c0_54 = arith.constant 0 : index
      %55 = vector.load %arg3[%c2_51, %c2_52, %c0_53, %c0_54] : memref<3x3x32x128xbf16, #tpu.memory_space<vmem>>, vector<1x1x32x128xbf16>
      %56 = vector.shape_cast %55 : vector<1x1x32x128xbf16> to vector<32x128xbf16>
      %cst_55 = arith.constant dense<0.000000e+00> : vector<4x128xf32>
      %57 = tpu.matmul %54, %56, %cst_55 {dimension_numbers = #tpu.dot_dimension_numbers<[1], [0], [0], [1], [0, 0, 1, 1], [], []>} : vector<4x32xbf16>, vector<32x128xbf16>, vector<4x128xf32> -> vector<4x128xf32>
      %58 = arith.addf %53, %57 : vector<4x128xf32>
      %c0_56 = arith.constant 0 : index
      %c0_57 = arith.constant 0 : index
      %59 = vector.load %arg4[%c0_56, %c0_57] : memref<1x128xf32, #tpu.memory_space<vmem>>, vector<1x128xf32>
      %60 = vector.broadcast %59 : vector<1x128xf32> to vector<4x128xf32>
      %61 = arith.addf %58, %60 : vector<4x128xf32>
      %cst_58 = arith.constant 0.000000e+00 : f32
      %62 = vector.broadcast %cst_58 : f32 to vector<4x128xf32>
      %63 = arith.maximumf %61, %62 : vector<4x128xf32>
      %64 = arith.truncf %63 : vector<4x128xf32> to vector<4x128xbf16>
      %c0_59 = arith.constant 0 : index
      %c0_60 = arith.constant 0 : index
      %65 = arith.index_cast %arg6 : i32 to index
      %c0_61 = arith.constant 0 : index
      %c0_62 = arith.constant 0 : index
      %66 = vector.load %arg5[%c0_59, %c0_60, %65, %c0_61, %c0_62] : memref<1x1x4x4x128xbf16, #tpu.memory_space<vmem>>, vector<1x1x1x4x128xbf16>
      %67 = vector.shape_cast %66 : vector<1x1x1x4x128xbf16> to vector<4x128xbf16>
      %68 = vector.shape_cast %64 : vector<4x128xbf16> to vector<1x1x1x4x128xbf16>
      tpu.vector_store %arg5[%c0_59, %c0_60, %65, %c0_61, %c0_62], %68 {strides = array<i32>} : memref<1x1x4x4x128xbf16, #tpu.memory_space<vmem>>, vector<1x1x1x4x128xbf16>,
    }
    %c4_i32_0 = arith.constant 4 : i32
    return
  }
  func.func @transform_0(%arg0: i32, %arg1: i32) -> (i32, i32, i32, i32, i32) {
    %c0_i32 = arith.constant 0 : i32
    %c0_i32_0 = arith.constant 0 : i32
    %c0_i32_1 = arith.constant 0 : i32
    %c0_i32_2 = arith.constant 0 : i32
    return %arg0, %arg1, %c0_i32, %c0_i32_0, %c0_i32_1 : i32, i32, i32, i32, i32
  }
  func.func @transform_1(%arg0: i32, %arg1: i32) -> (i32, i32, i32, i32) {
    %c0_i32 = arith.constant 0 : i32
    %c0_i32_0 = arith.constant 0 : i32
    %c0_i32_1 = arith.constant 0 : i32
    %c0_i32_2 = arith.constant 0 : i32
    %c0_i32_3 = arith.constant 0 : i32
    return %c0_i32, %c0_i32_0, %c0_i32_1, %c0_i32_2 : i32, i32, i32, i32
  }
  func.func @transform_2(%arg0: i32, %arg1: i32) -> (i32, i32) {
    %c0_i32 = arith.constant 0 : i32
    %c0_i32_0 = arith.constant 0 : i32
    %c0_i32_1 = arith.constant 0 : i32
    return %c0_i32, %c0_i32_0 : i32, i32
  }
  func.func @transform_3(%arg0: i32, %arg1: i32) -> (i32, i32, i32, i32, i32) {
    %c0_i32 = arith.constant 0 : i32
    %c0_i32_0 = arith.constant 0 : i32
    %c0_i32_1 = arith.constant 0 : i32
    %c0_i32_2 = arith.constant 0 : i32
    return %arg0, %arg1, %c0_i32, %c0_i32_0, %c0_i32_1 : i32, i32, i32, i32, i32
  }
}

module attributes {stable_mosaic.version = 11 : i64} {
  func.func @_direct_conv_kernel(%arg0: i32, %arg1: i32, %arg2: memref<1x1x36x36x32xbf16, #tpu.memory_space<vmem>>, %arg3: memref<3x3x32x128xbf16, #tpu.memory_space<vmem>>, %arg4: memref<1x128xf32, #tpu.memory_space<vmem>>, %arg5: memref<1x1x4x4x128xbf16, #tpu.memory_space<vmem>>) attributes {dimension_semantics = [#tpu.dimension_semantics<parallel>, #tpu.dimension_semantics<parallel>], iteration_bounds = array<i64: 2, 1>, scalar_prefetch = 0 : i64, scratch_operands = 0 : i64, tpu.core_type = #tpu.core_type<tc>, window_params = [{transform_indices = @transform_0, window_bounds = array<i64: 1, 1, 36, 36, 32>}, {pipeline_mode = #tpu.pipeline_mode<synchronous>, transform_indices = @transform_1, window_bounds = array<i64: 3, 3, 32, 128>}, {pipeline_mode = #tpu.pipeline_mode<synchronous>, transform_indices = @transform_2, window_bounds = array<i64: 1, 128>}, {transform_indices = @transform_3, window_bounds = array<i64: 1, 1, 4, 4, 128>}]} {
    %c0_i32 = arith.constant 0 : i32
    %c4_i32 = arith.constant 4 : i32
    %0 = arith.addi %c0_i32, %c4_i32 : i32
    %c1_i32 = arith.constant 1 : i32
    scf.for %arg6 = %c0_i32 to %0 step %c1_i32  : i32 {
      %cst = arith.constant 0.000000e+00 : f32
      %1 = vector.broadcast %cst : f32 to vector<4x128xf32>
      %c0_i32_1 = arith.constant 0 : i32
      %2 = arith.addi %arg6, %c0_i32_1 : i32
      %c0 = arith.constant 0 : index
      %c0_2 = arith.constant 0 : index
      %3 = arith.index_cast %2 : i32 to index
      %c0_3 = arith.constant 0 : index
      %c0_4 = arith.constant 0 : index
      %4 = vector.load %arg2[%c0, %c0_2, %3, %c0_3, %c0_4] : memref<1x1x36x36x32xbf16, #tpu.memory_space<vmem>>, vector<1x1x1x36x32xbf16>
      %5 = vector.shape_cast %4 : vector<1x1x1x36x32xbf16> to vector<36x32xbf16>
      %6 = vector.extract_strided_slice %5 {offsets = [0, 0], sizes = [4, 32], strides = [1, 1]} : vector<36x32xbf16> to vector<4x32xbf16>
      %c0_5 = arith.constant 0 : index
      %c0_6 = arith.constant 0 : index
      %c0_7 = arith.constant 0 : index
      %c0_8 = arith.constant 0 : index
      %7 = vector.load %arg3[%c0_5, %c0_6, %c0_7, %c0_8] : memref<3x3x32x128xbf16, #tpu.memory_space<vmem>>, vector<1x1x32x128xbf16>
      %8 = vector.shape_cast %7 : vector<1x1x32x128xbf16> to vector<32x128xbf16>
      %cst_9 = arith.constant dense<0.000000e+00> : vector<4x128xf32>
      %9 = tpu.matmul %6, %8, %cst_9 {dimension_numbers = #tpu.dot_dimension_numbers<[1], [0], [0], [1], [0, 0, 1, 1], [], []>} : vector<4x32xbf16>, vector<32x128xbf16>, vector<4x128xf32> -> vector<4x128xf32>
      %10 = arith.addf %1, %9 : vector<4x128xf32>
      %11 = vector.extract_strided_slice %5 {offsets = [16, 0], sizes = [4, 32], strides = [1, 1]} : vector<36x32xbf16> to vector<4x32xbf16>
      %c0_10 = arith.constant 0 : index
      %c1 = arith.constant 1 : index
      %c0_11 = arith.constant 0 : index
      %c0_12 = arith.constant 0 : index
      %12 = vector.load %arg3[%c0_10, %c1, %c0_11, %c0_12] : memref<3x3x32x128xbf16, #tpu.memory_space<vmem>>, vector<1x1x32x128xbf16>
      %13 = vector.shape_cast %12 : vector<1x1x32x128xbf16> to vector<32x128xbf16>
      %cst_13 = arith.constant dense<0.000000e+00> : vector<4x128xf32>
      %14 = tpu.matmul %11, %13, %cst_13 {dimension_numbers = #tpu.dot_dimension_numbers<[1], [0], [0], [1], [0, 0, 1, 1], [], []>} : vector<4x32xbf16>, vector<32x128xbf16>, vector<4x128xf32> -> vector<4x128xf32>
      %15 = arith.addf %10, %14 : vector<4x128xf32>
      %16 = vector.extract_strided_slice %5 {offsets = [32, 0], sizes = [4, 32], strides = [1, 1]} : vector<36x32xbf16> to vector<4x32xbf16>
      %c0_14 = arith.constant 0 : index
      %c2 = arith.constant 2 : index
      %c0_15 = arith.constant 0 : index
      %c0_16 = arith.constant 0 : index
      %17 = vector.load %arg3[%c0_14, %c2, %c0_15, %c0_16] : memref<3x3x32x128xbf16, #tpu.memory_space<vmem>>, vector<1x1x32x128xbf16>
      %18 = vector.shape_cast %17 : vector<1x1x32x128xbf16> to vector<32x128xbf16>
      %cst_17 = arith.constant dense<0.000000e+00> : vector<4x128xf32>
      %19 = tpu.matmul %16, %18, %cst_17 {dimension_numbers = #tpu.dot_dimension_numbers<[1], [0], [0], [1], [0, 0, 1, 1], [], []>} : vector<4x32xbf16>, vector<32x128xbf16>, vector<4x128xf32> -> vector<4x128xf32>
      %20 = arith.addf %15, %19 : vector<4x128xf32>
      %c16_i32 = arith.constant 16 : i32
      %21 = arith.addi %arg6, %c16_i32 : i32
      %c0_18 = arith.constant 0 : index
      %c0_19 = arith.constant 0 : index
      %22 = arith.index_cast %21 : i32 to index
      %c0_20 = arith.constant 0 : index
      %c0_21 = arith.constant 0 : index
      %23 = vector.load %arg2[%c0_18, %c0_19, %22, %c0_20, %c0_21] : memref<1x1x36x36x32xbf16, #tpu.memory_space<vmem>>, vector<1x1x1x36x32xbf16>
      %24 = vector.shape_cast %23 : vector<1x1x1x36x32xbf16> to vector<36x32xbf16>
      %25 = vector.extract_strided_slice %24 {offsets = [0, 0], sizes = [4, 32], strides = [1, 1]} : vector<36x32xbf16> to vector<4x32xbf16>
      %c1_22 = arith.constant 1 : index
      %c0_23 = arith.constant 0 : index
      %c0_24 = arith.constant 0 : index
      %c0_25 = arith.constant 0 : index
      %26 = vector.load %arg3[%c1_22, %c0_23, %c0_24, %c0_25] : memref<3x3x32x128xbf16, #tpu.memory_space<vmem>>, vector<1x1x32x128xbf16>
      %27 = vector.shape_cast %26 : vector<1x1x32x128xbf16> to vector<32x128xbf16>
      %cst_26 = arith.constant dense<0.000000e+00> : vector<4x128xf32>
      %28 = tpu.matmul %25, %27, %cst_26 {dimension_numbers = #tpu.dot_dimension_numbers<[1], [0], [0], [1], [0, 0, 1, 1], [], []>} : vector<4x32xbf16>, vector<32x128xbf16>, vector<4x128xf32> -> vector<4x128xf32>
      %29 = arith.addf %20, %28 : vector<4x128xf32>
      %30 = vector.extract_strided_slice %24 {offsets = [16, 0], sizes = [4, 32], strides = [1, 1]} : vector<36x32xbf16> to vector<4x32xbf16>
      %c1_27 = arith.constant 1 : index
      %c1_28 = arith.constant 1 : index
      %c0_29 = arith.constant 0 : index
      %c0_30 = arith.constant 0 : index
      %31 = vector.load %arg3[%c1_27, %c1_28, %c0_29, %c0_30] : memref<3x3x32x128xbf16, #tpu.memory_space<vmem>>, vector<1x1x32x128xbf16>
      %32 = vector.shape_cast %31 : vector<1x1x32x128xbf16> to vector<32x128xbf16>
      %cst_31 = arith.constant dense<0.000000e+00> : vector<4x128xf32>
      %33 = tpu.matmul %30, %32, %cst_31 {dimension_numbers = #tpu.dot_dimension_numbers<[1], [0], [0], [1], [0, 0, 1, 1], [], []>} : vector<4x32xbf16>, vector<32x128xbf16>, vector<4x128xf32> -> vector<4x128xf32>
      %34 = arith.addf %29, %33 : vector<4x128xf32>
      %35 = vector.extract_strided_slice %24 {offsets = [32, 0], sizes = [4, 32], strides = [1, 1]} : vector<36x32xbf16> to vector<4x32xbf16>
      %c1_32 = arith.constant 1 : index
      %c2_33 = arith.constant 2 : index
      %c0_34 = arith.constant 0 : index
      %c0_35 = arith.constant 0 : index
      %36 = vector.load %arg3[%c1_32, %c2_33, %c0_34, %c0_35] : memref<3x3x32x128xbf16, #tpu.memory_space<vmem>>, vector<1x1x32x128xbf16>
      %37 = vector.shape_cast %36 : vector<1x1x32x128xbf16> to vector<32x128xbf16>
      %cst_36 = arith.constant dense<0.000000e+00> : vector<4x128xf32>
      %38 = tpu.matmul %35, %37, %cst_36 {dimension_numbers = #tpu.dot_dimension_numbers<[1], [0], [0], [1], [0, 0, 1, 1], [], []>} : vector<4x32xbf16>, vector<32x128xbf16>, vector<4x128xf32> -> vector<4x128xf32>
      %39 = arith.addf %34, %38 : vector<4x128xf32>
      %c32_i32 = arith.constant 32 : i32
      %40 = arith.addi %arg6, %c32_i32 : i32
      %c0_37 = arith.constant 0 : index
      %c0_38 = arith.constant 0 : index
      %41 = arith.index_cast %40 : i32 to index
      %c0_39 = arith.constant 0 : index
      %c0_40 = arith.constant 0 : index
      %42 = vector.load %arg2[%c0_37, %c0_38, %41, %c0_39, %c0_40] : memref<1x1x36x36x32xbf16, #tpu.memory_space<vmem>>, vector<1x1x1x36x32xbf16>
      %43 = vector.shape_cast %42 : vector<1x1x1x36x32xbf16> to vector<36x32xbf16>
      %44 = vector.extract_strided_slice %43 {offsets = [0, 0], sizes = [4, 32], strides = [1, 1]} : vector<36x32xbf16> to vector<4x32xbf16>
      %c2_41 = arith.constant 2 : index
      %c0_42 = arith.constant 0 : index
      %c0_43 = arith.constant 0 : index
      %c0_44 = arith.constant 0 : index
      %45 = vector.load %arg3[%c2_41, %c0_42, %c0_43, %c0_44] : memref<3x3x32x128xbf16, #tpu.memory_space<vmem>>, vector<1x1x32x128xbf16>
      %46 = vector.shape_cast %45 : vector<1x1x32x128xbf16> to vector<32x128xbf16>
      %cst_45 = arith.constant dense<0.000000e+00> : vector<4x128xf32>
      %47 = tpu.matmul %44, %46, %cst_45 {dimension_numbers = #tpu.dot_dimension_numbers<[1], [0], [0], [1], [0, 0, 1, 1], [], []>} : vector<4x32xbf16>, vector<32x128xbf16>, vector<4x128xf32> -> vector<4x128xf32>
      %48 = arith.addf %39, %47 : vector<4x128xf32>
      %49 = vector.extract_strided_slice %43 {offsets = [16, 0], sizes = [4, 32], strides = [1, 1]} : vector<36x32xbf16> to vector<4x32xbf16>
      %c2_46 = arith.constant 2 : index
      %c1_47 = arith.constant 1 : index
      %c0_48 = arith.constant 0 : index
      %c0_49 = arith.constant 0 : index
      %50 = vector.load %arg3[%c2_46, %c1_47, %c0_48, %c0_49] : memref<3x3x32x128xbf16, #tpu.memory_space<vmem>>, vector<1x1x32x128xbf16>
      %51 = vector.shape_cast %50 : vector<1x1x32x128xbf16> to vector<32x128xbf16>
      %cst_50 = arith.constant dense<0.000000e+00> : vector<4x128xf32>
      %52 = tpu.matmul %49, %51, %cst_50 {dimension_numbers = #tpu.dot_dimension_numbers<[1], [0], [0], [1], [0, 0, 1, 1], [], []>} : vector<4x32xbf16>, vector<32x128xbf16>, vector<4x128xf32> -> vector<4x128xf32>
      %53 = arith.addf %48, %52 : vector<4x128xf32>
      %54 = vector.extract_strided_slice %43 {offsets = [32, 0], sizes = [4, 32], strides = [1, 1]} : vector<36x32xbf16> to vector<4x32xbf16>
      %c2_51 = arith.constant 2 : index
      %c2_52 = arith.constant 2 : index
      %c0_53 = arith.constant 0 : index
      %c0_54 = arith.constant 0 : index
      %55 = vector.load %arg3[%c2_51, %c2_52, %c0_53, %c0_54] : memref<3x3x32x128xbf16, #tpu.memory_space<vmem>>, vector<1x1x32x128xbf16>
      %56 = vector.shape_cast %55 : vector<1x1x32x128xbf16> to vector<32x128xbf16>
      %cst_55 = arith.constant dense<0.000000e+00> : vector<4x128xf32>
      %57 = tpu.matmul %54, %56, %cst_55 {dimension_numbers = #tpu.dot_dimension_numbers<[1], [0], [0], [1], [0, 0, 1, 1], [], []>} : vector<4x32xbf16>, vector<32x128xbf16>, vector<4x128xf32> -> vector<4x128xf32>
      %58 = arith.addf %53, %57 : vector<4x128xf32>
      %c0_56 = arith.constant 0 : index
      %c0_57 = arith.constant 0 : index
      %59 = vector.load %arg4[%c0_56, %c0_57] : memref<1x128xf32, #tpu.memory_space<vmem>>, vector<1x128xf32>
      %60 = vector.broadcast %59 : vector<1x128xf32> to vector<4x128xf32>
      %61 = arith.addf %58, %60 : vector<4x128xf32>
      %cst_58 = arith.constant 0.000000e+00 : f32
      %62 = vector.broadcast %cst_58 : f32 to vector<4x128xf32>
      %63 = arith.maximumf %61, %62 : vector<4x128xf32>
      %64 = arith.truncf %63 : vector<4x128xf32> to vector<4x128xbf16>
      %c0_59 = arith.constant 0 : index
      %c0_60 = arith.constant 0 : index
      %65 = arith.index_cast %arg6 : i32 to index
      %c0_61 = arith.constant 0 : index
      %c0_62 = arith.constant 0 : index
      %66 = vector.load %arg5[%c0_59, %c0_60, %65, %c0_61, %c0_62] : memref<1x1x4x4x128xbf16, #tpu.memory_space<vmem>>, vector<1x1x1x4x128xbf16>
      %67 = vector.shape_cast %66 : vector<1x1x1x4x128xbf16> to vector<4x128xbf16>
      %68 = vector.shape_cast %64 : vector<4x128xbf16> to vector<1x1x1x4x128xbf16>
      tpu.vector_store %arg5[%c0_59, %c0_60, %65, %c0_61, %c0_62], %68 {strides = array<i32>} : memref<1x1x4x4x128xbf16, #tpu.memory_space<vmem>>, vector<1x1x1x4x128xbf16>,
    }
    %c4_i32_0 = arith.constant 4 : i32
    return
  }
  func.func @transform_0(%arg0: i32, %arg1: i32) -> (i32, i32, i32, i32, i32) {
    %c0_i32 = arith.constant 0 : i32
    %c0_i32_0 = arith.constant 0 : i32
    %c0_i32_1 = arith.constant 0 : i32
    %c0_i32_2 = arith.constant 0 : i32
    return %arg0, %arg1, %c0_i32, %c0_i32_0, %c0_i32_1 : i32, i32, i32, i32, i32
  }
  func.func @transform_1(%arg0: i32, %arg1: i32) -> (i32, i32, i32, i32) {
    %c0_i32 = arith.constant 0 : i32
    %c0_i32_0 = arith.constant 0 : i32
    %c0_i32_1 = arith.constant 0 : i32
    %c0_i32_2 = arith.constant 0 : i32
    %c0_i32_3 = arith.constant 0 : i32
    return %c0_i32, %c0_i32_0, %c0_i32_1, %c0_i32_2 : i32, i32, i32, i32
  }
  func.func @transform_2(%arg0: i32, %arg1: i32) -> (i32, i32) {
    %c0_i32 = arith.constant 0 : i32
    %c0_i32_0 = arith.constant 0 : i32
    %c0_i32_1 = arith.constant 0 : i32
    return %c0_i32, %c0_i32_0 : i32, i32
  }
  func.func @transform_3(%arg0: i32, %arg1: i32) -> (i32, i32, i32, i32, i32) {
    %c0_i32 = arith.constant 0 : i32
    %c0_i32_0 = arith.constant 0 : i32
    %c0_i32_1 = arith.constant 0 : i32
    %c0_i32_2 = arith.constant 0 : i32
    return %arg0, %arg1, %c0_i32, %c0_i32_0, %c0_i32_1 : i32, i32, i32, i32, i32
  }
}

module attributes {stable_mosaic.version = 11 : i64} {
  func.func @_direct_conv_kernel(%arg0: i32, %arg1: i32, %arg2: memref<1x1x11x11x32xbf16, #tpu.memory_space<vmem>>, %arg3: memref<4x4x32x128xbf16, #tpu.memory_space<vmem>>, %arg4: memref<1x128xf32, #tpu.memory_space<vmem>>, %arg5: memref<1x1x8x8x128xbf16, #tpu.memory_space<vmem>>) attributes {dimension_semantics = [#tpu.dimension_semantics<parallel>, #tpu.dimension_semantics<parallel>], iteration_bounds = array<i64: 2, 1>, scalar_prefetch = 0 : i64, scratch_operands = 0 : i64, tpu.core_type = #tpu.core_type<tc>, window_params = [{transform_indices = @transform_0, window_bounds = array<i64: 1, 1, 11, 11, 32>}, {pipeline_mode = #tpu.pipeline_mode<synchronous>, transform_indices = @transform_1, window_bounds = array<i64: 4, 4, 32, 128>}, {pipeline_mode = #tpu.pipeline_mode<synchronous>, transform_indices = @transform_2, window_bounds = array<i64: 1, 128>}, {transform_indices = @transform_3, window_bounds = array<i64: 1, 1, 8, 8, 128>}]} {
    %c0_i32 = arith.constant 0 : i32
    %c8_i32 = arith.constant 8 : i32
    %0 = arith.addi %c0_i32, %c8_i32 : i32
    %c1_i32 = arith.constant 1 : i32
    scf.for %arg6 = %c0_i32 to %0 step %c1_i32  : i32 {
      %cst = arith.constant 0.000000e+00 : f32
      %1 = vector.broadcast %cst : f32 to vector<8x128xf32>
      %c0_i32_1 = arith.constant 0 : i32
      %2 = arith.addi %arg6, %c0_i32_1 : i32
      %c0 = arith.constant 0 : index
      %c0_2 = arith.constant 0 : index
      %3 = arith.index_cast %2 : i32 to index
      %c0_3 = arith.constant 0 : index
      %c0_4 = arith.constant 0 : index
      %4 = vector.load %arg2[%c0, %c0_2, %3, %c0_3, %c0_4] : memref<1x1x11x11x32xbf16, #tpu.memory_space<vmem>>, vector<1x1x1x11x32xbf16>
      %5 = vector.shape_cast %4 : vector<1x1x1x11x32xbf16> to vector<11x32xbf16>
      %6 = vector.extract_strided_slice %5 {offsets = [0, 0], sizes = [8, 32], strides = [1, 1]} : vector<11x32xbf16> to vector<8x32xbf16>
      %c0_5 = arith.constant 0 : index
      %c0_6 = arith.constant 0 : index
      %c0_7 = arith.constant 0 : index
      %c0_8 = arith.constant 0 : index
      %7 = vector.load %arg3[%c0_5, %c0_6, %c0_7, %c0_8] : memref<4x4x32x128xbf16, #tpu.memory_space<vmem>>, vector<1x1x32x128xbf16>
      %8 = vector.shape_cast %7 : vector<1x1x32x128xbf16> to vector<32x128xbf16>
      %cst_9 = arith.constant dense<0.000000e+00> : vector<8x128xf32>
      %9 = tpu.matmul %6, %8, %cst_9 {dimension_numbers = #tpu.dot_dimension_numbers<[1], [0], [0], [1], [0, 0, 1, 1], [], []>} : vector<8x32xbf16>, vector<32x128xbf16>, vector<8x128xf32> -> vector<8x128xf32>
      %10 = arith.addf %1, %9 : vector<8x128xf32>
      %11 = vector.extract_strided_slice %5 {offsets = [1, 0], sizes = [8, 32], strides = [1, 1]} : vector<11x32xbf16> to vector<8x32xbf16>
      %c0_10 = arith.constant 0 : index
      %c1 = arith.constant 1 : index
      %c0_11 = arith.constant 0 : index
      %c0_12 = arith.constant 0 : index
      %12 = vector.load %arg3[%c0_10, %c1, %c0_11, %c0_12] : memref<4x4x32x128xbf16, #tpu.memory_space<vmem>>, vector<1x1x32x128xbf16>
      %13 = vector.shape_cast %12 : vector<1x1x32x128xbf16> to vector<32x128xbf16>
      %cst_13 = arith.constant dense<0.000000e+00> : vector<8x128xf32>
      %14 = tpu.matmul %11, %13, %cst_13 {dimension_numbers = #tpu.dot_dimension_numbers<[1], [0], [0], [1], [0, 0, 1, 1], [], []>} : vector<8x32xbf16>, vector<32x128xbf16>, vector<8x128xf32> -> vector<8x128xf32>
      %15 = arith.addf %10, %14 : vector<8x128xf32>
      %16 = vector.extract_strided_slice %5 {offsets = [2, 0], sizes = [8, 32], strides = [1, 1]} : vector<11x32xbf16> to vector<8x32xbf16>
      %c0_14 = arith.constant 0 : index
      %c2 = arith.constant 2 : index
      %c0_15 = arith.constant 0 : index
      %c0_16 = arith.constant 0 : index
      %17 = vector.load %arg3[%c0_14, %c2, %c0_15, %c0_16] : memref<4x4x32x128xbf16, #tpu.memory_space<vmem>>, vector<1x1x32x128xbf16>
      %18 = vector.shape_cast %17 : vector<1x1x32x128xbf16> to vector<32x128xbf16>
      %cst_17 = arith.constant dense<0.000000e+00> : vector<8x128xf32>
      %19 = tpu.matmul %16, %18, %cst_17 {dimension_numbers = #tpu.dot_dimension_numbers<[1], [0], [0], [1], [0, 0, 1, 1], [], []>} : vector<8x32xbf16>, vector<32x128xbf16>, vector<8x128xf32> -> vector<8x128xf32>
      %20 = arith.addf %15, %19 : vector<8x128xf32>
      %21 = vector.extract_strided_slice %5 {offsets = [3, 0], sizes = [8, 32], strides = [1, 1]} : vector<11x32xbf16> to vector<8x32xbf16>
      %c0_18 = arith.constant 0 : index
      %c3 = arith.constant 3 : index
      %c0_19 = arith.constant 0 : index
      %c0_20 = arith.constant 0 : index
      %22 = vector.load %arg3[%c0_18, %c3, %c0_19, %c0_20] : memref<4x4x32x128xbf16, #tpu.memory_space<vmem>>, vector<1x1x32x128xbf16>
      %23 = vector.shape_cast %22 : vector<1x1x32x128xbf16> to vector<32x128xbf16>
      %cst_21 = arith.constant dense<0.000000e+00> : vector<8x128xf32>
      %24 = tpu.matmul %21, %23, %cst_21 {dimension_numbers = #tpu.dot_dimension_numbers<[1], [0], [0], [1], [0, 0, 1, 1], [], []>} : vector<8x32xbf16>, vector<32x128xbf16>, vector<8x128xf32> -> vector<8x128xf32>
      %25 = arith.addf %20, %24 : vector<8x128xf32>
      %c1_i32_22 = arith.constant 1 : i32
      %26 = arith.addi %arg6, %c1_i32_22 : i32
      %c0_23 = arith.constant 0 : index
      %c0_24 = arith.constant 0 : index
      %27 = arith.index_cast %26 : i32 to index
      %c0_25 = arith.constant 0 : index
      %c0_26 = arith.constant 0 : index
      %28 = vector.load %arg2[%c0_23, %c0_24, %27, %c0_25, %c0_26] : memref<1x1x11x11x32xbf16, #tpu.memory_space<vmem>>, vector<1x1x1x11x32xbf16>
      %29 = vector.shape_cast %28 : vector<1x1x1x11x32xbf16> to vector<11x32xbf16>
      %30 = vector.extract_strided_slice %29 {offsets = [0, 0], sizes = [8, 32], strides = [1, 1]} : vector<11x32xbf16> to vector<8x32xbf16>
      %c1_27 = arith.constant 1 : index
      %c0_28 = arith.constant 0 : index
      %c0_29 = arith.constant 0 : index
      %c0_30 = arith.constant 0 : index
      %31 = vector.load %arg3[%c1_27, %c0_28, %c0_29, %c0_30] : memref<4x4x32x128xbf16, #tpu.memory_space<vmem>>, vector<1x1x32x128xbf16>
      %32 = vector.shape_cast %31 : vector<1x1x32x128xbf16> to vector<32x128xbf16>
      %cst_31 = arith.constant dense<0.000000e+00> : vector<8x128xf32>
      %33 = tpu.matmul %30, %32, %cst_31 {dimension_numbers = #tpu.dot_dimension_numbers<[1], [0], [0], [1], [0, 0, 1, 1], [], []>} : vector<8x32xbf16>, vector<32x128xbf16>, vector<8x128xf32> -> vector<8x128xf32>
      %34 = arith.addf %25, %33 : vector<8x128xf32>
      %35 = vector.extract_strided_slice %29 {offsets = [1, 0], sizes = [8, 32], strides = [1, 1]} : vector<11x32xbf16> to vector<8x32xbf16>
      %c1_32 = arith.constant 1 : index
      %c1_33 = arith.constant 1 : index
      %c0_34 = arith.constant 0 : index
      %c0_35 = arith.constant 0 : index
      %36 = vector.load %arg3[%c1_32, %c1_33, %c0_34, %c0_35] : memref<4x4x32x128xbf16, #tpu.memory_space<vmem>>, vector<1x1x32x128xbf16>
      %37 = vector.shape_cast %36 : vector<1x1x32x128xbf16> to vector<32x128xbf16>
      %cst_36 = arith.constant dense<0.000000e+00> : vector<8x128xf32>
      %38 = tpu.matmul %35, %37, %cst_36 {dimension_numbers = #tpu.dot_dimension_numbers<[1], [0], [0], [1], [0, 0, 1, 1], [], []>} : vector<8x32xbf16>, vector<32x128xbf16>, vector<8x128xf32> -> vector<8x128xf32>
      %39 = arith.addf %34, %38 : vector<8x128xf32>
      %40 = vector.extract_strided_slice %29 {offsets = [2, 0], sizes = [8, 32], strides = [1, 1]} : vector<11x32xbf16> to vector<8x32xbf16>
      %c1_37 = arith.constant 1 : index
      %c2_38 = arith.constant 2 : index
      %c0_39 = arith.constant 0 : index
      %c0_40 = arith.constant 0 : index
      %41 = vector.load %arg3[%c1_37, %c2_38, %c0_39, %c0_40] : memref<4x4x32x128xbf16, #tpu.memory_space<vmem>>, vector<1x1x32x128xbf16>
      %42 = vector.shape_cast %41 : vector<1x1x32x128xbf16> to vector<32x128xbf16>
      %cst_41 = arith.constant dense<0.000000e+00> : vector<8x128xf32>
      %43 = tpu.matmul %40, %42, %cst_41 {dimension_numbers = #tpu.dot_dimension_numbers<[1], [0], [0], [1], [0, 0, 1, 1], [], []>} : vector<8x32xbf16>, vector<32x128xbf16>, vector<8x128xf32> -> vector<8x128xf32>
      %44 = arith.addf %39, %43 : vector<8x128xf32>
      %45 = vector.extract_strided_slice %29 {offsets = [3, 0], sizes = [8, 32], strides = [1, 1]} : vector<11x32xbf16> to vector<8x32xbf16>
      %c1_42 = arith.constant 1 : index
      %c3_43 = arith.constant 3 : index
      %c0_44 = arith.constant 0 : index
      %c0_45 = arith.constant 0 : index
      %46 = vector.load %arg3[%c1_42, %c3_43, %c0_44, %c0_45] : memref<4x4x32x128xbf16, #tpu.memory_space<vmem>>, vector<1x1x32x128xbf16>
      %47 = vector.shape_cast %46 : vector<1x1x32x128xbf16> to vector<32x128xbf16>
      %cst_46 = arith.constant dense<0.000000e+00> : vector<8x128xf32>
      %48 = tpu.matmul %45, %47, %cst_46 {dimension_numbers = #tpu.dot_dimension_numbers<[1], [0], [0], [1], [0, 0, 1, 1], [], []>} : vector<8x32xbf16>, vector<32x128xbf16>, vector<8x128xf32> -> vector<8x128xf32>
      %49 = arith.addf %44, %48 : vector<8x128xf32>
      %c2_i32 = arith.constant 2 : i32
      %50 = arith.addi %arg6, %c2_i32 : i32
      %c0_47 = arith.constant 0 : index
      %c0_48 = arith.constant 0 : index
      %51 = arith.index_cast %50 : i32 to index
      %c0_49 = arith.constant 0 : index
      %c0_50 = arith.constant 0 : index
      %52 = vector.load %arg2[%c0_47, %c0_48, %51, %c0_49, %c0_50] : memref<1x1x11x11x32xbf16, #tpu.memory_space<vmem>>, vector<1x1x1x11x32xbf16>
      %53 = vector.shape_cast %52 : vector<1x1x1x11x32xbf16> to vector<11x32xbf16>
      %54 = vector.extract_strided_slice %53 {offsets = [0, 0], sizes = [8, 32], strides = [1, 1]} : vector<11x32xbf16> to vector<8x32xbf16>
      %c2_51 = arith.constant 2 : index
      %c0_52 = arith.constant 0 : index
      %c0_53 = arith.constant 0 : index
      %c0_54 = arith.constant 0 : index
      %55 = vector.load %arg3[%c2_51, %c0_52, %c0_53, %c0_54] : memref<4x4x32x128xbf16, #tpu.memory_space<vmem>>, vector<1x1x32x128xbf16>
      %56 = vector.shape_cast %55 : vector<1x1x32x128xbf16> to vector<32x128xbf16>
      %cst_55 = arith.constant dense<0.000000e+00> : vector<8x128xf32>
      %57 = tpu.matmul %54, %56, %cst_55 {dimension_numbers = #tpu.dot_dimension_numbers<[1], [0], [0], [1], [0, 0, 1, 1], [], []>} : vector<8x32xbf16>, vector<32x128xbf16>, vector<8x128xf32> -> vector<8x128xf32>
      %58 = arith.addf %49, %57 : vector<8x128xf32>
      %59 = vector.extract_strided_slice %53 {offsets = [1, 0], sizes = [8, 32], strides = [1, 1]} : vector<11x32xbf16> to vector<8x32xbf16>
      %c2_56 = arith.constant 2 : index
      %c1_57 = arith.constant 1 : index
      %c0_58 = arith.constant 0 : index
      %c0_59 = arith.constant 0 : index
      %60 = vector.load %arg3[%c2_56, %c1_57, %c0_58, %c0_59] : memref<4x4x32x128xbf16, #tpu.memory_space<vmem>>, vector<1x1x32x128xbf16>
      %61 = vector.shape_cast %60 : vector<1x1x32x128xbf16> to vector<32x128xbf16>
      %cst_60 = arith.constant dense<0.000000e+00> : vector<8x128xf32>
      %62 = tpu.matmul %59, %61, %cst_60 {dimension_numbers = #tpu.dot_dimension_numbers<[1], [0], [0], [1], [0, 0, 1, 1], [], []>} : vector<8x32xbf16>, vector<32x128xbf16>, vector<8x128xf32> -> vector<8x128xf32>
      %63 = arith.addf %58, %62 : vector<8x128xf32>
      %64 = vector.extract_strided_slice %53 {offsets = [2, 0], sizes = [8, 32], strides = [1, 1]} : vector<11x32xbf16> to vector<8x32xbf16>
      %c2_61 = arith.constant 2 : index
      %c2_62 = arith.constant 2 : index
      %c0_63 = arith.constant 0 : index
      %c0_64 = arith.constant 0 : index
      %65 = vector.load %arg3[%c2_61, %c2_62, %c0_63, %c0_64] : memref<4x4x32x128xbf16, #tpu.memory_space<vmem>>, vector<1x1x32x128xbf16>
      %66 = vector.shape_cast %65 : vector<1x1x32x128xbf16> to vector<32x128xbf16>
      %cst_65 = arith.constant dense<0.000000e+00> : vector<8x128xf32>
      %67 = tpu.matmul %64, %66, %cst_65 {dimension_numbers = #tpu.dot_dimension_numbers<[1], [0], [0], [1], [0, 0, 1, 1], [], []>} : vector<8x32xbf16>, vector<32x128xbf16>, vector<8x128xf32> -> vector<8x128xf32>
      %68 = arith.addf %63, %67 : vector<8x128xf32>
      %69 = vector.extract_strided_slice %53 {offsets = [3, 0], sizes = [8, 32], strides = [1, 1]} : vector<11x32xbf16> to vector<8x32xbf16>
      %c2_66 = arith.constant 2 : index
      %c3_67 = arith.constant 3 : index
      %c0_68 = arith.constant 0 : index
      %c0_69 = arith.constant 0 : index
      %70 = vector.load %arg3[%c2_66, %c3_67, %c0_68, %c0_69] : memref<4x4x32x128xbf16, #tpu.memory_space<vmem>>, vector<1x1x32x128xbf16>
      %71 = vector.shape_cast %70 : vector<1x1x32x128xbf16> to vector<32x128xbf16>
      %cst_70 = arith.constant dense<0.000000e+00> : vector<8x128xf32>
      %72 = tpu.matmul %69, %71, %cst_70 {dimension_numbers = #tpu.dot_dimension_numbers<[1], [0], [0], [1], [0, 0, 1, 1], [], []>} : vector<8x32xbf16>, vector<32x128xbf16>, vector<8x128xf32> -> vector<8x128xf32>
      %73 = arith.addf %68, %72 : vector<8x128xf32>
      %c3_i32 = arith.constant 3 : i32
      %74 = arith.addi %arg6, %c3_i32 : i32
      %c0_71 = arith.constant 0 : index
      %c0_72 = arith.constant 0 : index
      %75 = arith.index_cast %74 : i32 to index
      %c0_73 = arith.constant 0 : index
      %c0_74 = arith.constant 0 : index
      %76 = vector.load %arg2[%c0_71, %c0_72, %75, %c0_73, %c0_74] : memref<1x1x11x11x32xbf16, #tpu.memory_space<vmem>>, vector<1x1x1x11x32xbf16>
      %77 = vector.shape_cast %76 : vector<1x1x1x11x32xbf16> to vector<11x32xbf16>
      %78 = vector.extract_strided_slice %77 {offsets = [0, 0], sizes = [8, 32], strides = [1, 1]} : vector<11x32xbf16> to vector<8x32xbf16>
      %c3_75 = arith.constant 3 : index
      %c0_76 = arith.constant 0 : index
      %c0_77 = arith.constant 0 : index
      %c0_78 = arith.constant 0 : index
      %79 = vector.load %arg3[%c3_75, %c0_76, %c0_77, %c0_78] : memref<4x4x32x128xbf16, #tpu.memory_space<vmem>>, vector<1x1x32x128xbf16>
      %80 = vector.shape_cast %79 : vector<1x1x32x128xbf16> to vector<32x128xbf16>
      %cst_79 = arith.constant dense<0.000000e+00> : vector<8x128xf32>
      %81 = tpu.matmul %78, %80, %cst_79 {dimension_numbers = #tpu.dot_dimension_numbers<[1], [0], [0], [1], [0, 0, 1, 1], [], []>} : vector<8x32xbf16>, vector<32x128xbf16>, vector<8x128xf32> -> vector<8x128xf32>
      %82 = arith.addf %73, %81 : vector<8x128xf32>
      %83 = vector.extract_strided_slice %77 {offsets = [1, 0], sizes = [8, 32], strides = [1, 1]} : vector<11x32xbf16> to vector<8x32xbf16>
      %c3_80 = arith.constant 3 : index
      %c1_81 = arith.constant 1 : index
      %c0_82 = arith.constant 0 : index
      %c0_83 = arith.constant 0 : index
      %84 = vector.load %arg3[%c3_80, %c1_81, %c0_82, %c0_83] : memref<4x4x32x128xbf16, #tpu.memory_space<vmem>>, vector<1x1x32x128xbf16>
      %85 = vector.shape_cast %84 : vector<1x1x32x128xbf16> to vector<32x128xbf16>
      %cst_84 = arith.constant dense<0.000000e+00> : vector<8x128xf32>
      %86 = tpu.matmul %83, %85, %cst_84 {dimension_numbers = #tpu.dot_dimension_numbers<[1], [0], [0], [1], [0, 0, 1, 1], [], []>} : vector<8x32xbf16>, vector<32x128xbf16>, vector<8x128xf32> -> vector<8x128xf32>
      %87 = arith.addf %82, %86 : vector<8x128xf32>
      %88 = vector.extract_strided_slice %77 {offsets = [2, 0], sizes = [8, 32], strides = [1, 1]} : vector<11x32xbf16> to vector<8x32xbf16>
      %c3_85 = arith.constant 3 : index
      %c2_86 = arith.constant 2 : index
      %c0_87 = arith.constant 0 : index
      %c0_88 = arith.constant 0 : index
      %89 = vector.load %arg3[%c3_85, %c2_86, %c0_87, %c0_88] : memref<4x4x32x128xbf16, #tpu.memory_space<vmem>>, vector<1x1x32x128xbf16>
      %90 = vector.shape_cast %89 : vector<1x1x32x128xbf16> to vector<32x128xbf16>
      %cst_89 = arith.constant dense<0.000000e+00> : vector<8x128xf32>
      %91 = tpu.matmul %88, %90, %cst_89 {dimension_numbers = #tpu.dot_dimension_numbers<[1], [0], [0], [1], [0, 0, 1, 1], [], []>} : vector<8x32xbf16>, vector<32x128xbf16>, vector<8x128xf32> -> vector<8x128xf32>
      %92 = arith.addf %87, %91 : vector<8x128xf32>
      %93 = vector.extract_strided_slice %77 {offsets = [3, 0], sizes = [8, 32], strides = [1, 1]} : vector<11x32xbf16> to vector<8x32xbf16>
      %c3_90 = arith.constant 3 : index
      %c3_91 = arith.constant 3 : index
      %c0_92 = arith.constant 0 : index
      %c0_93 = arith.constant 0 : index
      %94 = vector.load %arg3[%c3_90, %c3_91, %c0_92, %c0_93] : memref<4x4x32x128xbf16, #tpu.memory_space<vmem>>, vector<1x1x32x128xbf16>
      %95 = vector.shape_cast %94 : vector<1x1x32x128xbf16> to vector<32x128xbf16>
      %cst_94 = arith.constant dense<0.000000e+00> : vector<8x128xf32>
      %96 = tpu.matmul %93, %95, %cst_94 {dimension_numbers = #tpu.dot_dimension_numbers<[1], [0], [0], [1], [0, 0, 1, 1], [], []>} : vector<8x32xbf16>, vector<32x128xbf16>, vector<8x128xf32> -> vector<8x128xf32>
      %97 = arith.addf %92, %96 : vector<8x128xf32>
      %c0_95 = arith.constant 0 : index
      %c0_96 = arith.constant 0 : index
      %98 = vector.load %arg4[%c0_95, %c0_96] : memref<1x128xf32, #tpu.memory_space<vmem>>, vector<1x128xf32>
      %99 = vector.broadcast %98 : vector<1x128xf32> to vector<8x128xf32>
      %100 = arith.addf %97, %99 : vector<8x128xf32>
      %cst_97 = arith.constant 0.000000e+00 : f32
      %101 = vector.broadcast %cst_97 : f32 to vector<8x128xf32>
      %102 = arith.maximumf %100, %101 : vector<8x128xf32>
      %103 = arith.truncf %102 : vector<8x128xf32> to vector<8x128xbf16>
      %c0_98 = arith.constant 0 : index
      %c0_99 = arith.constant 0 : index
      %104 = arith.index_cast %arg6 : i32 to index
      %c0_100 = arith.constant 0 : index
      %c0_101 = arith.constant 0 : index
      %105 = vector.load %arg5[%c0_98, %c0_99, %104, %c0_100, %c0_101] : memref<1x1x8x8x128xbf16, #tpu.memory_space<vmem>>, vector<1x1x1x8x128xbf16>
      %106 = vector.shape_cast %105 : vector<1x1x1x8x128xbf16> to vector<8x128xbf16>
      %107 = vector.shape_cast %103 : vector<8x128xbf16> to vector<1x1x1x8x128xbf16>
      tpu.vector_store %arg5[%c0_98, %c0_99, %104, %c0_100, %c0_101], %107 {strides = array<i32>} : memref<1x1x8x8x128xbf16, #tpu.memory_space<vmem>>, vector<1x1x1x8x128xbf16>,
    }
    %c8_i32_0 = arith.constant 8 : i32
    return
  }
  func.func @transform_0(%arg0: i32, %arg1: i32) -> (i32, i32, i32, i32, i32) {
    %c0_i32 = arith.constant 0 : i32
    %c0_i32_0 = arith.constant 0 : i32
    %c0_i32_1 = arith.constant 0 : i32
    %c0_i32_2 = arith.constant 0 : i32
    return %arg0, %arg1, %c0_i32, %c0_i32_0, %c0_i32_1 : i32, i32, i32, i32, i32
  }
  func.func @transform_1(%arg0: i32, %arg1: i32) -> (i32, i32, i32, i32) {
    %c0_i32 = arith.constant 0 : i32
    %c0_i32_0 = arith.constant 0 : i32
    %c0_i32_1 = arith.constant 0 : i32
    %c0_i32_2 = arith.constant 0 : i32
    %c0_i32_3 = arith.constant 0 : i32
    return %c0_i32, %c0_i32_0, %c0_i32_1, %c0_i32_2 : i32, i32, i32, i32
  }
  func.func @transform_2(%arg0: i32, %arg1: i32) -> (i32, i32) {
    %c0_i32 = arith.constant 0 : i32
    %c0_i32_0 = arith.constant 0 : i32
    %c0_i32_1 = arith.constant 0 : i32
    return %c0_i32, %c0_i32_0 : i32, i32
  }
  func.func @transform_3(%arg0: i32, %arg1: i32) -> (i32, i32, i32, i32, i32) {
    %c0_i32 = arith.constant 0 : i32
    %c0_i32_0 = arith.constant 0 : i32
    %c0_i32_1 = arith.constant 0 : i32
    %c0_i32_2 = arith.constant 0 : i32
    return %arg0, %arg1, %c0_i32, %c0_i32_0, %c0_i32_1 : i32, i32, i32, i32, i32
  }
}

module attributes {stable_mosaic.version = 11 : i64} {
  func.func @_direct_conv_kernel(%arg0: i32, %arg1: i32, %arg2: memref<1x1x19x19x16xbf16, #tpu.memory_space<vmem>>, %arg3: memref<4x4x16x128xbf16, #tpu.memory_space<vmem>>, %arg4: memref<1x128xf32, #tpu.memory_space<vmem>>, %arg5: memref<1x1x16x16x128xbf16, #tpu.memory_space<vmem>>) attributes {dimension_semantics = [#tpu.dimension_semantics<parallel>, #tpu.dimension_semantics<parallel>], iteration_bounds = array<i64: 2, 1>, scalar_prefetch = 0 : i64, scratch_operands = 0 : i64, tpu.core_type = #tpu.core_type<tc>, window_params = [{transform_indices = @transform_0, window_bounds = array<i64: 1, 1, 19, 19, 16>}, {pipeline_mode = #tpu.pipeline_mode<synchronous>, transform_indices = @transform_1, window_bounds = array<i64: 4, 4, 16, 128>}, {pipeline_mode = #tpu.pipeline_mode<synchronous>, transform_indices = @transform_2, window_bounds = array<i64: 1, 128>}, {transform_indices = @transform_3, window_bounds = array<i64: 1, 1, 16, 16, 128>}]} {
    %c0_i32 = arith.constant 0 : i32
    %c16_i32 = arith.constant 16 : i32
    %0 = arith.addi %c0_i32, %c16_i32 : i32
    %c1_i32 = arith.constant 1 : i32
    scf.for %arg6 = %c0_i32 to %0 step %c1_i32  : i32 {
      %cst = arith.constant 0.000000e+00 : f32
      %1 = vector.broadcast %cst : f32 to vector<16x128xf32>
      %c0_i32_1 = arith.constant 0 : i32
      %2 = arith.addi %arg6, %c0_i32_1 : i32
      %c0 = arith.constant 0 : index
      %c0_2 = arith.constant 0 : index
      %3 = arith.index_cast %2 : i32 to index
      %c0_3 = arith.constant 0 : index
      %c0_4 = arith.constant 0 : index
      %4 = vector.load %arg2[%c0, %c0_2, %3, %c0_3, %c0_4] : memref<1x1x19x19x16xbf16, #tpu.memory_space<vmem>>, vector<1x1x1x19x16xbf16>
      %5 = vector.shape_cast %4 : vector<1x1x1x19x16xbf16> to vector<19x16xbf16>
      %6 = vector.extract_strided_slice %5 {offsets = [0, 0], sizes = [16, 16], strides = [1, 1]} : vector<19x16xbf16> to vector<16x16xbf16>
      %c0_5 = arith.constant 0 : index
      %c0_6 = arith.constant 0 : index
      %c0_7 = arith.constant 0 : index
      %c0_8 = arith.constant 0 : index
      %7 = vector.load %arg3[%c0_5, %c0_6, %c0_7, %c0_8] : memref<4x4x16x128xbf16, #tpu.memory_space<vmem>>, vector<1x1x16x128xbf16>
      %8 = vector.shape_cast %7 : vector<1x1x16x128xbf16> to vector<16x128xbf16>
      %cst_9 = arith.constant dense<0.000000e+00> : vector<16x128xf32>
      %9 = tpu.matmul %6, %8, %cst_9 {dimension_numbers = #tpu.dot_dimension_numbers<[1], [0], [0], [1], [0, 0, 1, 1], [], []>} : vector<16x16xbf16>, vector<16x128xbf16>, vector<16x128xf32> -> vector<16x128xf32>
      %10 = arith.addf %1, %9 : vector<16x128xf32>
      %11 = vector.extract_strided_slice %5 {offsets = [1, 0], sizes = [16, 16], strides = [1, 1]} : vector<19x16xbf16> to vector<16x16xbf16>
      %c0_10 = arith.constant 0 : index
      %c1 = arith.constant 1 : index
      %c0_11 = arith.constant 0 : index
      %c0_12 = arith.constant 0 : index
      %12 = vector.load %arg3[%c0_10, %c1, %c0_11, %c0_12] : memref<4x4x16x128xbf16, #tpu.memory_space<vmem>>, vector<1x1x16x128xbf16>
      %13 = vector.shape_cast %12 : vector<1x1x16x128xbf16> to vector<16x128xbf16>
      %cst_13 = arith.constant dense<0.000000e+00> : vector<16x128xf32>
      %14 = tpu.matmul %11, %13, %cst_13 {dimension_numbers = #tpu.dot_dimension_numbers<[1], [0], [0], [1], [0, 0, 1, 1], [], []>} : vector<16x16xbf16>, vector<16x128xbf16>, vector<16x128xf32> -> vector<16x128xf32>
      %15 = arith.addf %10, %14 : vector<16x128xf32>
      %16 = vector.extract_strided_slice %5 {offsets = [2, 0], sizes = [16, 16], strides = [1, 1]} : vector<19x16xbf16> to vector<16x16xbf16>
      %c0_14 = arith.constant 0 : index
      %c2 = arith.constant 2 : index
      %c0_15 = arith.constant 0 : index
      %c0_16 = arith.constant 0 : index
      %17 = vector.load %arg3[%c0_14, %c2, %c0_15, %c0_16] : memref<4x4x16x128xbf16, #tpu.memory_space<vmem>>, vector<1x1x16x128xbf16>
      %18 = vector.shape_cast %17 : vector<1x1x16x128xbf16> to vector<16x128xbf16>
      %cst_17 = arith.constant dense<0.000000e+00> : vector<16x128xf32>
      %19 = tpu.matmul %16, %18, %cst_17 {dimension_numbers = #tpu.dot_dimension_numbers<[1], [0], [0], [1], [0, 0, 1, 1], [], []>} : vector<16x16xbf16>, vector<16x128xbf16>, vector<16x128xf32> -> vector<16x128xf32>
      %20 = arith.addf %15, %19 : vector<16x128xf32>
      %21 = vector.extract_strided_slice %5 {offsets = [3, 0], sizes = [16, 16], strides = [1, 1]} : vector<19x16xbf16> to vector<16x16xbf16>
      %c0_18 = arith.constant 0 : index
      %c3 = arith.constant 3 : index
      %c0_19 = arith.constant 0 : index
      %c0_20 = arith.constant 0 : index
      %22 = vector.load %arg3[%c0_18, %c3, %c0_19, %c0_20] : memref<4x4x16x128xbf16, #tpu.memory_space<vmem>>, vector<1x1x16x128xbf16>
      %23 = vector.shape_cast %22 : vector<1x1x16x128xbf16> to vector<16x128xbf16>
      %cst_21 = arith.constant dense<0.000000e+00> : vector<16x128xf32>
      %24 = tpu.matmul %21, %23, %cst_21 {dimension_numbers = #tpu.dot_dimension_numbers<[1], [0], [0], [1], [0, 0, 1, 1], [], []>} : vector<16x16xbf16>, vector<16x128xbf16>, vector<16x128xf32> -> vector<16x128xf32>
      %25 = arith.addf %20, %24 : vector<16x128xf32>
      %c1_i32_22 = arith.constant 1 : i32
      %26 = arith.addi %arg6, %c1_i32_22 : i32
      %c0_23 = arith.constant 0 : index
      %c0_24 = arith.constant 0 : index
      %27 = arith.index_cast %26 : i32 to index
      %c0_25 = arith.constant 0 : index
      %c0_26 = arith.constant 0 : index
      %28 = vector.load %arg2[%c0_23, %c0_24, %27, %c0_25, %c0_26] : memref<1x1x19x19x16xbf16, #tpu.memory_space<vmem>>, vector<1x1x1x19x16xbf16>
      %29 = vector.shape_cast %28 : vector<1x1x1x19x16xbf16> to vector<19x16xbf16>
      %30 = vector.extract_strided_slice %29 {offsets = [0, 0], sizes = [16, 16], strides = [1, 1]} : vector<19x16xbf16> to vector<16x16xbf16>
      %c1_27 = arith.constant 1 : index
      %c0_28 = arith.constant 0 : index
      %c0_29 = arith.constant 0 : index
      %c0_30 = arith.constant 0 : index
      %31 = vector.load %arg3[%c1_27, %c0_28, %c0_29, %c0_30] : memref<4x4x16x128xbf16, #tpu.memory_space<vmem>>, vector<1x1x16x128xbf16>
      %32 = vector.shape_cast %31 : vector<1x1x16x128xbf16> to vector<16x128xbf16>
      %cst_31 = arith.constant dense<0.000000e+00> : vector<16x128xf32>
      %33 = tpu.matmul %30, %32, %cst_31 {dimension_numbers = #tpu.dot_dimension_numbers<[1], [0], [0], [1], [0, 0, 1, 1], [], []>} : vector<16x16xbf16>, vector<16x128xbf16>, vector<16x128xf32> -> vector<16x128xf32>
      %34 = arith.addf %25, %33 : vector<16x128xf32>
      %35 = vector.extract_strided_slice %29 {offsets = [1, 0], sizes = [16, 16], strides = [1, 1]} : vector<19x16xbf16> to vector<16x16xbf16>
      %c1_32 = arith.constant 1 : index
      %c1_33 = arith.constant 1 : index
      %c0_34 = arith.constant 0 : index
      %c0_35 = arith.constant 0 : index
      %36 = vector.load %arg3[%c1_32, %c1_33, %c0_34, %c0_35] : memref<4x4x16x128xbf16, #tpu.memory_space<vmem>>, vector<1x1x16x128xbf16>
      %37 = vector.shape_cast %36 : vector<1x1x16x128xbf16> to vector<16x128xbf16>
      %cst_36 = arith.constant dense<0.000000e+00> : vector<16x128xf32>
      %38 = tpu.matmul %35, %37, %cst_36 {dimension_numbers = #tpu.dot_dimension_numbers<[1], [0], [0], [1], [0, 0, 1, 1], [], []>} : vector<16x16xbf16>, vector<16x128xbf16>, vector<16x128xf32> -> vector<16x128xf32>
      %39 = arith.addf %34, %38 : vector<16x128xf32>
      %40 = vector.extract_strided_slice %29 {offsets = [2, 0], sizes = [16, 16], strides = [1, 1]} : vector<19x16xbf16> to vector<16x16xbf16>
      %c1_37 = arith.constant 1 : index
      %c2_38 = arith.constant 2 : index
      %c0_39 = arith.constant 0 : index
      %c0_40 = arith.constant 0 : index
      %41 = vector.load %arg3[%c1_37, %c2_38, %c0_39, %c0_40] : memref<4x4x16x128xbf16, #tpu.memory_space<vmem>>, vector<1x1x16x128xbf16>
      %42 = vector.shape_cast %41 : vector<1x1x16x128xbf16> to vector<16x128xbf16>
      %cst_41 = arith.constant dense<0.000000e+00> : vector<16x128xf32>
      %43 = tpu.matmul %40, %42, %cst_41 {dimension_numbers = #tpu.dot_dimension_numbers<[1], [0], [0], [1], [0, 0, 1, 1], [], []>} : vector<16x16xbf16>, vector<16x128xbf16>, vector<16x128xf32> -> vector<16x128xf32>
      %44 = arith.addf %39, %43 : vector<16x128xf32>
      %45 = vector.extract_strided_slice %29 {offsets = [3, 0], sizes = [16, 16], strides = [1, 1]} : vector<19x16xbf16> to vector<16x16xbf16>
      %c1_42 = arith.constant 1 : index
      %c3_43 = arith.constant 3 : index
      %c0_44 = arith.constant 0 : index
      %c0_45 = arith.constant 0 : index
      %46 = vector.load %arg3[%c1_42, %c3_43, %c0_44, %c0_45] : memref<4x4x16x128xbf16, #tpu.memory_space<vmem>>, vector<1x1x16x128xbf16>
      %47 = vector.shape_cast %46 : vector<1x1x16x128xbf16> to vector<16x128xbf16>
      %cst_46 = arith.constant dense<0.000000e+00> : vector<16x128xf32>
      %48 = tpu.matmul %45, %47, %cst_46 {dimension_numbers = #tpu.dot_dimension_numbers<[1], [0], [0], [1], [0, 0, 1, 1], [], []>} : vector<16x16xbf16>, vector<16x128xbf16>, vector<16x128xf32> -> vector<16x128xf32>
      %49 = arith.addf %44, %48 : vector<16x128xf32>
      %c2_i32 = arith.constant 2 : i32
      %50 = arith.addi %arg6, %c2_i32 : i32
      %c0_47 = arith.constant 0 : index
      %c0_48 = arith.constant 0 : index
      %51 = arith.index_cast %50 : i32 to index
      %c0_49 = arith.constant 0 : index
      %c0_50 = arith.constant 0 : index
      %52 = vector.load %arg2[%c0_47, %c0_48, %51, %c0_49, %c0_50] : memref<1x1x19x19x16xbf16, #tpu.memory_space<vmem>>, vector<1x1x1x19x16xbf16>
      %53 = vector.shape_cast %52 : vector<1x1x1x19x16xbf16> to vector<19x16xbf16>
      %54 = vector.extract_strided_slice %53 {offsets = [0, 0], sizes = [16, 16], strides = [1, 1]} : vector<19x16xbf16> to vector<16x16xbf16>
      %c2_51 = arith.constant 2 : index
      %c0_52 = arith.constant 0 : index
      %c0_53 = arith.constant 0 : index
      %c0_54 = arith.constant 0 : index
      %55 = vector.load %arg3[%c2_51, %c0_52, %c0_53, %c0_54] : memref<4x4x16x128xbf16, #tpu.memory_space<vmem>>, vector<1x1x16x128xbf16>
      %56 = vector.shape_cast %55 : vector<1x1x16x128xbf16> to vector<16x128xbf16>
      %cst_55 = arith.constant dense<0.000000e+00> : vector<16x128xf32>
      %57 = tpu.matmul %54, %56, %cst_55 {dimension_numbers = #tpu.dot_dimension_numbers<[1], [0], [0], [1], [0, 0, 1, 1], [], []>} : vector<16x16xbf16>, vector<16x128xbf16>, vector<16x128xf32> -> vector<16x128xf32>
      %58 = arith.addf %49, %57 : vector<16x128xf32>
      %59 = vector.extract_strided_slice %53 {offsets = [1, 0], sizes = [16, 16], strides = [1, 1]} : vector<19x16xbf16> to vector<16x16xbf16>
      %c2_56 = arith.constant 2 : index
      %c1_57 = arith.constant 1 : index
      %c0_58 = arith.constant 0 : index
      %c0_59 = arith.constant 0 : index
      %60 = vector.load %arg3[%c2_56, %c1_57, %c0_58, %c0_59] : memref<4x4x16x128xbf16, #tpu.memory_space<vmem>>, vector<1x1x16x128xbf16>
      %61 = vector.shape_cast %60 : vector<1x1x16x128xbf16> to vector<16x128xbf16>
      %cst_60 = arith.constant dense<0.000000e+00> : vector<16x128xf32>
      %62 = tpu.matmul %59, %61, %cst_60 {dimension_numbers = #tpu.dot_dimension_numbers<[1], [0], [0], [1], [0, 0, 1, 1], [], []>} : vector<16x16xbf16>, vector<16x128xbf16>, vector<16x128xf32> -> vector<16x128xf32>
      %63 = arith.addf %58, %62 : vector<16x128xf32>
      %64 = vector.extract_strided_slice %53 {offsets = [2, 0], sizes = [16, 16], strides = [1, 1]} : vector<19x16xbf16> to vector<16x16xbf16>
      %c2_61 = arith.constant 2 : index
      %c2_62 = arith.constant 2 : index
      %c0_63 = arith.constant 0 : index
      %c0_64 = arith.constant 0 : index
      %65 = vector.load %arg3[%c2_61, %c2_62, %c0_63, %c0_64] : memref<4x4x16x128xbf16, #tpu.memory_space<vmem>>, vector<1x1x16x128xbf16>
      %66 = vector.shape_cast %65 : vector<1x1x16x128xbf16> to vector<16x128xbf16>
      %cst_65 = arith.constant dense<0.000000e+00> : vector<16x128xf32>
      %67 = tpu.matmul %64, %66, %cst_65 {dimension_numbers = #tpu.dot_dimension_numbers<[1], [0], [0], [1], [0, 0, 1, 1], [], []>} : vector<16x16xbf16>, vector<16x128xbf16>, vector<16x128xf32> -> vector<16x128xf32>
      %68 = arith.addf %63, %67 : vector<16x128xf32>
      %69 = vector.extract_strided_slice %53 {offsets = [3, 0], sizes = [16, 16], strides = [1, 1]} : vector<19x16xbf16> to vector<16x16xbf16>
      %c2_66 = arith.constant 2 : index
      %c3_67 = arith.constant 3 : index
      %c0_68 = arith.constant 0 : index
      %c0_69 = arith.constant 0 : index
      %70 = vector.load %arg3[%c2_66, %c3_67, %c0_68, %c0_69] : memref<4x4x16x128xbf16, #tpu.memory_space<vmem>>, vector<1x1x16x128xbf16>
      %71 = vector.shape_cast %70 : vector<1x1x16x128xbf16> to vector<16x128xbf16>
      %cst_70 = arith.constant dense<0.000000e+00> : vector<16x128xf32>
      %72 = tpu.matmul %69, %71, %cst_70 {dimension_numbers = #tpu.dot_dimension_numbers<[1], [0], [0], [1], [0, 0, 1, 1], [], []>} : vector<16x16xbf16>, vector<16x128xbf16>, vector<16x128xf32> -> vector<16x128xf32>
      %73 = arith.addf %68, %72 : vector<16x128xf32>
      %c3_i32 = arith.constant 3 : i32
      %74 = arith.addi %arg6, %c3_i32 : i32
      %c0_71 = arith.constant 0 : index
      %c0_72 = arith.constant 0 : index
      %75 = arith.index_cast %74 : i32 to index
      %c0_73 = arith.constant 0 : index
      %c0_74 = arith.constant 0 : index
      %76 = vector.load %arg2[%c0_71, %c0_72, %75, %c0_73, %c0_74] : memref<1x1x19x19x16xbf16, #tpu.memory_space<vmem>>, vector<1x1x1x19x16xbf16>
      %77 = vector.shape_cast %76 : vector<1x1x1x19x16xbf16> to vector<19x16xbf16>
      %78 = vector.extract_strided_slice %77 {offsets = [0, 0], sizes = [16, 16], strides = [1, 1]} : vector<19x16xbf16> to vector<16x16xbf16>
      %c3_75 = arith.constant 3 : index
      %c0_76 = arith.constant 0 : index
      %c0_77 = arith.constant 0 : index
      %c0_78 = arith.constant 0 : index
      %79 = vector.load %arg3[%c3_75, %c0_76, %c0_77, %c0_78] : memref<4x4x16x128xbf16, #tpu.memory_space<vmem>>, vector<1x1x16x128xbf16>
      %80 = vector.shape_cast %79 : vector<1x1x16x128xbf16> to vector<16x128xbf16>
      %cst_79 = arith.constant dense<0.000000e+00> : vector<16x128xf32>
      %81 = tpu.matmul %78, %80, %cst_79 {dimension_numbers = #tpu.dot_dimension_numbers<[1], [0], [0], [1], [0, 0, 1, 1], [], []>} : vector<16x16xbf16>, vector<16x128xbf16>, vector<16x128xf32> -> vector<16x128xf32>
      %82 = arith.addf %73, %81 : vector<16x128xf32>
      %83 = vector.extract_strided_slice %77 {offsets = [1, 0], sizes = [16, 16], strides = [1, 1]} : vector<19x16xbf16> to vector<16x16xbf16>
      %c3_80 = arith.constant 3 : index
      %c1_81 = arith.constant 1 : index
      %c0_82 = arith.constant 0 : index
      %c0_83 = arith.constant 0 : index
      %84 = vector.load %arg3[%c3_80, %c1_81, %c0_82, %c0_83] : memref<4x4x16x128xbf16, #tpu.memory_space<vmem>>, vector<1x1x16x128xbf16>
      %85 = vector.shape_cast %84 : vector<1x1x16x128xbf16> to vector<16x128xbf16>
      %cst_84 = arith.constant dense<0.000000e+00> : vector<16x128xf32>
      %86 = tpu.matmul %83, %85, %cst_84 {dimension_numbers = #tpu.dot_dimension_numbers<[1], [0], [0], [1], [0, 0, 1, 1], [], []>} : vector<16x16xbf16>, vector<16x128xbf16>, vector<16x128xf32> -> vector<16x128xf32>
      %87 = arith.addf %82, %86 : vector<16x128xf32>
      %88 = vector.extract_strided_slice %77 {offsets = [2, 0], sizes = [16, 16], strides = [1, 1]} : vector<19x16xbf16> to vector<16x16xbf16>
      %c3_85 = arith.constant 3 : index
      %c2_86 = arith.constant 2 : index
      %c0_87 = arith.constant 0 : index
      %c0_88 = arith.constant 0 : index
      %89 = vector.load %arg3[%c3_85, %c2_86, %c0_87, %c0_88] : memref<4x4x16x128xbf16, #tpu.memory_space<vmem>>, vector<1x1x16x128xbf16>
      %90 = vector.shape_cast %89 : vector<1x1x16x128xbf16> to vector<16x128xbf16>
      %cst_89 = arith.constant dense<0.000000e+00> : vector<16x128xf32>
      %91 = tpu.matmul %88, %90, %cst_89 {dimension_numbers = #tpu.dot_dimension_numbers<[1], [0], [0], [1], [0, 0, 1, 1], [], []>} : vector<16x16xbf16>, vector<16x128xbf16>, vector<16x128xf32> -> vector<16x128xf32>
      %92 = arith.addf %87, %91 : vector<16x128xf32>
      %93 = vector.extract_strided_slice %77 {offsets = [3, 0], sizes = [16, 16], strides = [1, 1]} : vector<19x16xbf16> to vector<16x16xbf16>
      %c3_90 = arith.constant 3 : index
      %c3_91 = arith.constant 3 : index
      %c0_92 = arith.constant 0 : index
      %c0_93 = arith.constant 0 : index
      %94 = vector.load %arg3[%c3_90, %c3_91, %c0_92, %c0_93] : memref<4x4x16x128xbf16, #tpu.memory_space<vmem>>, vector<1x1x16x128xbf16>
      %95 = vector.shape_cast %94 : vector<1x1x16x128xbf16> to vector<16x128xbf16>
      %cst_94 = arith.constant dense<0.000000e+00> : vector<16x128xf32>
      %96 = tpu.matmul %93, %95, %cst_94 {dimension_numbers = #tpu.dot_dimension_numbers<[1], [0], [0], [1], [0, 0, 1, 1], [], []>} : vector<16x16xbf16>, vector<16x128xbf16>, vector<16x128xf32> -> vector<16x128xf32>
      %97 = arith.addf %92, %96 : vector<16x128xf32>
      %c0_95 = arith.constant 0 : index
      %c0_96 = arith.constant 0 : index
      %98 = vector.load %arg4[%c0_95, %c0_96] : memref<1x128xf32, #tpu.memory_space<vmem>>, vector<1x128xf32>
      %99 = vector.broadcast %98 : vector<1x128xf32> to vector<16x128xf32>
      %100 = arith.addf %97, %99 : vector<16x128xf32>
      %cst_97 = arith.constant 0.000000e+00 : f32
      %101 = vector.broadcast %cst_97 : f32 to vector<16x128xf32>
      %102 = arith.maximumf %100, %101 : vector<16x128xf32>
      %103 = arith.truncf %102 : vector<16x128xf32> to vector<16x128xbf16>
      %c0_98 = arith.constant 0 : index
      %c0_99 = arith.constant 0 : index
      %104 = arith.index_cast %arg6 : i32 to index
      %c0_100 = arith.constant 0 : index
      %c0_101 = arith.constant 0 : index
      %105 = vector.load %arg5[%c0_98, %c0_99, %104, %c0_100, %c0_101] : memref<1x1x16x16x128xbf16, #tpu.memory_space<vmem>>, vector<1x1x1x16x128xbf16>
      %106 = vector.shape_cast %105 : vector<1x1x1x16x128xbf16> to vector<16x128xbf16>
      %107 = vector.shape_cast %103 : vector<16x128xbf16> to vector<1x1x1x16x128xbf16>
      tpu.vector_store %arg5[%c0_98, %c0_99, %104, %c0_100, %c0_101], %107 {strides = array<i32>} : memref<1x1x16x16x128xbf16, #tpu.memory_space<vmem>>, vector<1x1x1x16x128xbf16>,
    }
    %c16_i32_0 = arith.constant 16 : i32
    return
  }
  func.func @transform_0(%arg0: i32, %arg1: i32) -> (i32, i32, i32, i32, i32) {
    %c0_i32 = arith.constant 0 : i32
    %c0_i32_0 = arith.constant 0 : i32
    %c0_i32_1 = arith.constant 0 : i32
    %c0_i32_2 = arith.constant 0 : i32
    return %arg0, %arg1, %c0_i32, %c0_i32_0, %c0_i32_1 : i32, i32, i32, i32, i32
  }
  func.func @transform_1(%arg0: i32, %arg1: i32) -> (i32, i32, i32, i32) {
    %c0_i32 = arith.constant 0 : i32
    %c0_i32_0 = arith.constant 0 : i32
    %c0_i32_1 = arith.constant 0 : i32
    %c0_i32_2 = arith.constant 0 : i32
    %c0_i32_3 = arith.constant 0 : i32
    return %c0_i32, %c0_i32_0, %c0_i32_1, %c0_i32_2 : i32, i32, i32, i32
  }
  func.func @transform_2(%arg0: i32, %arg1: i32) -> (i32, i32) {
    %c0_i32 = arith.constant 0 : i32
    %c0_i32_0 = arith.constant 0 : i32
    %c0_i32_1 = arith.constant 0 : i32
    return %c0_i32, %c0_i32_0 : i32, i32
  }
  func.func @transform_3(%arg0: i32, %arg1: i32) -> (i32, i32, i32, i32, i32) {
    %c0_i32 = arith.constant 0 : i32
    %c0_i32_0 = arith.constant 0 : i32
    %c0_i32_1 = arith.constant 0 : i32
    %c0_i32_2 = arith.constant 0 : i32
    return %arg0, %arg1, %c0_i32, %c0_i32_0, %c0_i32_1 : i32, i32, i32, i32, i32
  }
}

module attributes {stable_mosaic.version = 11 : i64} {
  func.func @_direct_conv_kernel(%arg0: i32, %arg1: i32, %arg2: memref<1x1x18x18x8xbf16, #tpu.memory_space<vmem>>, %arg3: memref<3x3x8x128xbf16, #tpu.memory_space<vmem>>, %arg4: memref<1x128xf32, #tpu.memory_space<vmem>>, %arg5: memref<1x1x16x16x128xbf16, #tpu.memory_space<vmem>>) attributes {dimension_semantics = [#tpu.dimension_semantics<parallel>, #tpu.dimension_semantics<parallel>], iteration_bounds = array<i64: 2, 1>, scalar_prefetch = 0 : i64, scratch_operands = 0 : i64, tpu.core_type = #tpu.core_type<tc>, window_params = [{transform_indices = @transform_0, window_bounds = array<i64: 1, 1, 18, 18, 8>}, {pipeline_mode = #tpu.pipeline_mode<synchronous>, transform_indices = @transform_1, window_bounds = array<i64: 3, 3, 8, 128>}, {pipeline_mode = #tpu.pipeline_mode<synchronous>, transform_indices = @transform_2, window_bounds = array<i64: 1, 128>}, {transform_indices = @transform_3, window_bounds = array<i64: 1, 1, 16, 16, 128>}]} {
    %c0_i32 = arith.constant 0 : i32
    %c16_i32 = arith.constant 16 : i32
    %0 = arith.addi %c0_i32, %c16_i32 : i32
    %c1_i32 = arith.constant 1 : i32
    scf.for %arg6 = %c0_i32 to %0 step %c1_i32  : i32 {
      %cst = arith.constant 0.000000e+00 : f32
      %1 = vector.broadcast %cst : f32 to vector<16x128xf32>
      %c0_i32_1 = arith.constant 0 : i32
      %2 = arith.addi %arg6, %c0_i32_1 : i32
      %c0 = arith.constant 0 : index
      %c0_2 = arith.constant 0 : index
      %3 = arith.index_cast %2 : i32 to index
      %c0_3 = arith.constant 0 : index
      %c0_4 = arith.constant 0 : index
      %4 = vector.load %arg2[%c0, %c0_2, %3, %c0_3, %c0_4] : memref<1x1x18x18x8xbf16, #tpu.memory_space<vmem>>, vector<1x1x1x18x8xbf16>
      %5 = vector.shape_cast %4 : vector<1x1x1x18x8xbf16> to vector<18x8xbf16>
      %6 = vector.extract_strided_slice %5 {offsets = [0, 0], sizes = [16, 8], strides = [1, 1]} : vector<18x8xbf16> to vector<16x8xbf16>
      %c0_5 = arith.constant 0 : index
      %c0_6 = arith.constant 0 : index
      %c0_7 = arith.constant 0 : index
      %c0_8 = arith.constant 0 : index
      %7 = vector.load %arg3[%c0_5, %c0_6, %c0_7, %c0_8] : memref<3x3x8x128xbf16, #tpu.memory_space<vmem>>, vector<1x1x8x128xbf16>
      %8 = vector.shape_cast %7 : vector<1x1x8x128xbf16> to vector<8x128xbf16>
      %cst_9 = arith.constant dense<0.000000e+00> : vector<16x128xf32>
      %9 = tpu.matmul %6, %8, %cst_9 {dimension_numbers = #tpu.dot_dimension_numbers<[1], [0], [0], [1], [0, 0, 1, 1], [], []>} : vector<16x8xbf16>, vector<8x128xbf16>, vector<16x128xf32> -> vector<16x128xf32>
      %10 = arith.addf %1, %9 : vector<16x128xf32>
      %11 = vector.extract_strided_slice %5 {offsets = [1, 0], sizes = [16, 8], strides = [1, 1]} : vector<18x8xbf16> to vector<16x8xbf16>
      %c0_10 = arith.constant 0 : index
      %c1 = arith.constant 1 : index
      %c0_11 = arith.constant 0 : index
      %c0_12 = arith.constant 0 : index
      %12 = vector.load %arg3[%c0_10, %c1, %c0_11, %c0_12] : memref<3x3x8x128xbf16, #tpu.memory_space<vmem>>, vector<1x1x8x128xbf16>
      %13 = vector.shape_cast %12 : vector<1x1x8x128xbf16> to vector<8x128xbf16>
      %cst_13 = arith.constant dense<0.000000e+00> : vector<16x128xf32>
      %14 = tpu.matmul %11, %13, %cst_13 {dimension_numbers = #tpu.dot_dimension_numbers<[1], [0], [0], [1], [0, 0, 1, 1], [], []>} : vector<16x8xbf16>, vector<8x128xbf16>, vector<16x128xf32> -> vector<16x128xf32>
      %15 = arith.addf %10, %14 : vector<16x128xf32>
      %16 = vector.extract_strided_slice %5 {offsets = [2, 0], sizes = [16, 8], strides = [1, 1]} : vector<18x8xbf16> to vector<16x8xbf16>
      %c0_14 = arith.constant 0 : index
      %c2 = arith.constant 2 : index
      %c0_15 = arith.constant 0 : index
      %c0_16 = arith.constant 0 : index
      %17 = vector.load %arg3[%c0_14, %c2, %c0_15, %c0_16] : memref<3x3x8x128xbf16, #tpu.memory_space<vmem>>, vector<1x1x8x128xbf16>
      %18 = vector.shape_cast %17 : vector<1x1x8x128xbf16> to vector<8x128xbf16>
      %cst_17 = arith.constant dense<0.000000e+00> : vector<16x128xf32>
      %19 = tpu.matmul %16, %18, %cst_17 {dimension_numbers = #tpu.dot_dimension_numbers<[1], [0], [0], [1], [0, 0, 1, 1], [], []>} : vector<16x8xbf16>, vector<8x128xbf16>, vector<16x128xf32> -> vector<16x128xf32>
      %20 = arith.addf %15, %19 : vector<16x128xf32>
      %c1_i32_18 = arith.constant 1 : i32
      %21 = arith.addi %arg6, %c1_i32_18 : i32
      %c0_19 = arith.constant 0 : index
      %c0_20 = arith.constant 0 : index
      %22 = arith.index_cast %21 : i32 to index
      %c0_21 = arith.constant 0 : index
      %c0_22 = arith.constant 0 : index
      %23 = vector.load %arg2[%c0_19, %c0_20, %22, %c0_21, %c0_22] : memref<1x1x18x18x8xbf16, #tpu.memory_space<vmem>>, vector<1x1x1x18x8xbf16>
      %24 = vector.shape_cast %23 : vector<1x1x1x18x8xbf16> to vector<18x8xbf16>
      %25 = vector.extract_strided_slice %24 {offsets = [0, 0], sizes = [16, 8], strides = [1, 1]} : vector<18x8xbf16> to vector<16x8xbf16>
      %c1_23 = arith.constant 1 : index
      %c0_24 = arith.constant 0 : index
      %c0_25 = arith.constant 0 : index
      %c0_26 = arith.constant 0 : index
      %26 = vector.load %arg3[%c1_23, %c0_24, %c0_25, %c0_26] : memref<3x3x8x128xbf16, #tpu.memory_space<vmem>>, vector<1x1x8x128xbf16>
      %27 = vector.shape_cast %26 : vector<1x1x8x128xbf16> to vector<8x128xbf16>
      %cst_27 = arith.constant dense<0.000000e+00> : vector<16x128xf32>
      %28 = tpu.matmul %25, %27, %cst_27 {dimension_numbers = #tpu.dot_dimension_numbers<[1], [0], [0], [1], [0, 0, 1, 1], [], []>} : vector<16x8xbf16>, vector<8x128xbf16>, vector<16x128xf32> -> vector<16x128xf32>
      %29 = arith.addf %20, %28 : vector<16x128xf32>
      %30 = vector.extract_strided_slice %24 {offsets = [1, 0], sizes = [16, 8], strides = [1, 1]} : vector<18x8xbf16> to vector<16x8xbf16>
      %c1_28 = arith.constant 1 : index
      %c1_29 = arith.constant 1 : index
      %c0_30 = arith.constant 0 : index
      %c0_31 = arith.constant 0 : index
      %31 = vector.load %arg3[%c1_28, %c1_29, %c0_30, %c0_31] : memref<3x3x8x128xbf16, #tpu.memory_space<vmem>>, vector<1x1x8x128xbf16>
      %32 = vector.shape_cast %31 : vector<1x1x8x128xbf16> to vector<8x128xbf16>
      %cst_32 = arith.constant dense<0.000000e+00> : vector<16x128xf32>
      %33 = tpu.matmul %30, %32, %cst_32 {dimension_numbers = #tpu.dot_dimension_numbers<[1], [0], [0], [1], [0, 0, 1, 1], [], []>} : vector<16x8xbf16>, vector<8x128xbf16>, vector<16x128xf32> -> vector<16x128xf32>
      %34 = arith.addf %29, %33 : vector<16x128xf32>
      %35 = vector.extract_strided_slice %24 {offsets = [2, 0], sizes = [16, 8], strides = [1, 1]} : vector<18x8xbf16> to vector<16x8xbf16>
      %c1_33 = arith.constant 1 : index
      %c2_34 = arith.constant 2 : index
      %c0_35 = arith.constant 0 : index
      %c0_36 = arith.constant 0 : index
      %36 = vector.load %arg3[%c1_33, %c2_34, %c0_35, %c0_36] : memref<3x3x8x128xbf16, #tpu.memory_space<vmem>>, vector<1x1x8x128xbf16>
      %37 = vector.shape_cast %36 : vector<1x1x8x128xbf16> to vector<8x128xbf16>
      %cst_37 = arith.constant dense<0.000000e+00> : vector<16x128xf32>
      %38 = tpu.matmul %35, %37, %cst_37 {dimension_numbers = #tpu.dot_dimension_numbers<[1], [0], [0], [1], [0, 0, 1, 1], [], []>} : vector<16x8xbf16>, vector<8x128xbf16>, vector<16x128xf32> -> vector<16x128xf32>
      %39 = arith.addf %34, %38 : vector<16x128xf32>
      %c2_i32 = arith.constant 2 : i32
      %40 = arith.addi %arg6, %c2_i32 : i32
      %c0_38 = arith.constant 0 : index
      %c0_39 = arith.constant 0 : index
      %41 = arith.index_cast %40 : i32 to index
      %c0_40 = arith.constant 0 : index
      %c0_41 = arith.constant 0 : index
      %42 = vector.load %arg2[%c0_38, %c0_39, %41, %c0_40, %c0_41] : memref<1x1x18x18x8xbf16, #tpu.memory_space<vmem>>, vector<1x1x1x18x8xbf16>
      %43 = vector.shape_cast %42 : vector<1x1x1x18x8xbf16> to vector<18x8xbf16>
      %44 = vector.extract_strided_slice %43 {offsets = [0, 0], sizes = [16, 8], strides = [1, 1]} : vector<18x8xbf16> to vector<16x8xbf16>
      %c2_42 = arith.constant 2 : index
      %c0_43 = arith.constant 0 : index
      %c0_44 = arith.constant 0 : index
      %c0_45 = arith.constant 0 : index
      %45 = vector.load %arg3[%c2_42, %c0_43, %c0_44, %c0_45] : memref<3x3x8x128xbf16, #tpu.memory_space<vmem>>, vector<1x1x8x128xbf16>
      %46 = vector.shape_cast %45 : vector<1x1x8x128xbf16> to vector<8x128xbf16>
      %cst_46 = arith.constant dense<0.000000e+00> : vector<16x128xf32>
      %47 = tpu.matmul %44, %46, %cst_46 {dimension_numbers = #tpu.dot_dimension_numbers<[1], [0], [0], [1], [0, 0, 1, 1], [], []>} : vector<16x8xbf16>, vector<8x128xbf16>, vector<16x128xf32> -> vector<16x128xf32>
      %48 = arith.addf %39, %47 : vector<16x128xf32>
      %49 = vector.extract_strided_slice %43 {offsets = [1, 0], sizes = [16, 8], strides = [1, 1]} : vector<18x8xbf16> to vector<16x8xbf16>
      %c2_47 = arith.constant 2 : index
      %c1_48 = arith.constant 1 : index
      %c0_49 = arith.constant 0 : index
      %c0_50 = arith.constant 0 : index
      %50 = vector.load %arg3[%c2_47, %c1_48, %c0_49, %c0_50] : memref<3x3x8x128xbf16, #tpu.memory_space<vmem>>, vector<1x1x8x128xbf16>
      %51 = vector.shape_cast %50 : vector<1x1x8x128xbf16> to vector<8x128xbf16>
      %cst_51 = arith.constant dense<0.000000e+00> : vector<16x128xf32>
      %52 = tpu.matmul %49, %51, %cst_51 {dimension_numbers = #tpu.dot_dimension_numbers<[1], [0], [0], [1], [0, 0, 1, 1], [], []>} : vector<16x8xbf16>, vector<8x128xbf16>, vector<16x128xf32> -> vector<16x128xf32>
      %53 = arith.addf %48, %52 : vector<16x128xf32>
      %54 = vector.extract_strided_slice %43 {offsets = [2, 0], sizes = [16, 8], strides = [1, 1]} : vector<18x8xbf16> to vector<16x8xbf16>
      %c2_52 = arith.constant 2 : index
      %c2_53 = arith.constant 2 : index
      %c0_54 = arith.constant 0 : index
      %c0_55 = arith.constant 0 : index
      %55 = vector.load %arg3[%c2_52, %c2_53, %c0_54, %c0_55] : memref<3x3x8x128xbf16, #tpu.memory_space<vmem>>, vector<1x1x8x128xbf16>
      %56 = vector.shape_cast %55 : vector<1x1x8x128xbf16> to vector<8x128xbf16>
      %cst_56 = arith.constant dense<0.000000e+00> : vector<16x128xf32>
      %57 = tpu.matmul %54, %56, %cst_56 {dimension_numbers = #tpu.dot_dimension_numbers<[1], [0], [0], [1], [0, 0, 1, 1], [], []>} : vector<16x8xbf16>, vector<8x128xbf16>, vector<16x128xf32> -> vector<16x128xf32>
      %58 = arith.addf %53, %57 : vector<16x128xf32>
      %c0_57 = arith.constant 0 : index
      %c0_58 = arith.constant 0 : index
      %59 = vector.load %arg4[%c0_57, %c0_58] : memref<1x128xf32, #tpu.memory_space<vmem>>, vector<1x128xf32>
      %60 = vector.broadcast %59 : vector<1x128xf32> to vector<16x128xf32>
      %61 = arith.addf %58, %60 : vector<16x128xf32>
      %cst_59 = arith.constant 0.000000e+00 : f32
      %62 = vector.broadcast %cst_59 : f32 to vector<16x128xf32>
      %63 = arith.maximumf %61, %62 : vector<16x128xf32>
      %64 = arith.truncf %63 : vector<16x128xf32> to vector<16x128xbf16>
      %c0_60 = arith.constant 0 : index
      %c0_61 = arith.constant 0 : index
      %65 = arith.index_cast %arg6 : i32 to index
      %c0_62 = arith.constant 0 : index
      %c0_63 = arith.constant 0 : index
      %66 = vector.load %arg5[%c0_60, %c0_61, %65, %c0_62, %c0_63] : memref<1x1x16x16x128xbf16, #tpu.memory_space<vmem>>, vector<1x1x1x16x128xbf16>
      %67 = vector.shape_cast %66 : vector<1x1x1x16x128xbf16> to vector<16x128xbf16>
      %68 = vector.shape_cast %64 : vector<16x128xbf16> to vector<1x1x1x16x128xbf16>
      tpu.vector_store %arg5[%c0_60, %c0_61, %65, %c0_62, %c0_63], %68 {strides = array<i32>} : memref<1x1x16x16x128xbf16, #tpu.memory_space<vmem>>, vector<1x1x1x16x128xbf16>,
    }
    %c16_i32_0 = arith.constant 16 : i32
    return
  }
  func.func @transform_0(%arg0: i32, %arg1: i32) -> (i32, i32, i32, i32, i32) {
    %c0_i32 = arith.constant 0 : i32
    %c0_i32_0 = arith.constant 0 : i32
    %c0_i32_1 = arith.constant 0 : i32
    %c0_i32_2 = arith.constant 0 : i32
    return %arg0, %arg1, %c0_i32, %c0_i32_0, %c0_i32_1 : i32, i32, i32, i32, i32
  }
  func.func @transform_1(%arg0: i32, %arg1: i32) -> (i32, i32, i32, i32) {
    %c0_i32 = arith.constant 0 : i32
    %c0_i32_0 = arith.constant 0 : i32
    %c0_i32_1 = arith.constant 0 : i32
    %c0_i32_2 = arith.constant 0 : i32
    %c0_i32_3 = arith.constant 0 : i32
    return %c0_i32, %c0_i32_0, %c0_i32_1, %c0_i32_2 : i32, i32, i32, i32
  }
  func.func @transform_2(%arg0: i32, %arg1: i32) -> (i32, i32) {
    %c0_i32 = arith.constant 0 : i32
    %c0_i32_0 = arith.constant 0 : i32
    %c0_i32_1 = arith.constant 0 : i32
    return %c0_i32, %c0_i32_0 : i32, i32
  }
  func.func @transform_3(%arg0: i32, %arg1: i32) -> (i32, i32, i32, i32, i32) {
    %c0_i32 = arith.constant 0 : i32
    %c0_i32_0 = arith.constant 0 : i32
    %c0_i32_1 = arith.constant 0 : i32
    %c0_i32_2 = arith.constant 0 : i32
    return %arg0, %arg1, %c0_i32, %c0_i32_0, %c0_i32_1 : i32, i32, i32, i32, i32
  }
}

module attributes {stable_mosaic.version = 11 : i64} {
  func.func @_direct_conv_kernel(%arg0: i32, %arg1: i32, %arg2: memref<1x1x18x18x4xbf16, #tpu.memory_space<vmem>>, %arg3: memref<3x3x4x128xbf16, #tpu.memory_space<vmem>>, %arg4: memref<1x128xf32, #tpu.memory_space<vmem>>, %arg5: memref<1x1x16x16x128xf32, #tpu.memory_space<vmem>>) attributes {dimension_semantics = [#tpu.dimension_semantics<parallel>, #tpu.dimension_semantics<parallel>], iteration_bounds = array<i64: 2, 1>, scalar_prefetch = 0 : i64, scratch_operands = 0 : i64, tpu.core_type = #tpu.core_type<tc>, window_params = [{transform_indices = @transform_0, window_bounds = array<i64: 1, 1, 18, 18, 4>}, {pipeline_mode = #tpu.pipeline_mode<synchronous>, transform_indices = @transform_1, window_bounds = array<i64: 3, 3, 4, 128>}, {pipeline_mode = #tpu.pipeline_mode<synchronous>, transform_indices = @transform_2, window_bounds = array<i64: 1, 128>}, {transform_indices = @transform_3, window_bounds = array<i64: 1, 1, 16, 16, 128>}]} {
    %c0_i32 = arith.constant 0 : i32
    %c16_i32 = arith.constant 16 : i32
    %0 = arith.addi %c0_i32, %c16_i32 : i32
    %c1_i32 = arith.constant 1 : i32
    scf.for %arg6 = %c0_i32 to %0 step %c1_i32  : i32 {
      %cst = arith.constant 0.000000e+00 : f32
      %1 = vector.broadcast %cst : f32 to vector<16x128xf32>
      %c0_i32_1 = arith.constant 0 : i32
      %2 = arith.addi %arg6, %c0_i32_1 : i32
      %c0 = arith.constant 0 : index
      %c0_2 = arith.constant 0 : index
      %3 = arith.index_cast %2 : i32 to index
      %c0_3 = arith.constant 0 : index
      %c0_4 = arith.constant 0 : index
      %4 = vector.load %arg2[%c0, %c0_2, %3, %c0_3, %c0_4] : memref<1x1x18x18x4xbf16, #tpu.memory_space<vmem>>, vector<1x1x1x18x4xbf16>
      %5 = vector.shape_cast %4 : vector<1x1x1x18x4xbf16> to vector<18x4xbf16>
      %6 = vector.extract_strided_slice %5 {offsets = [0, 0], sizes = [16, 4], strides = [1, 1]} : vector<18x4xbf16> to vector<16x4xbf16>
      %c0_5 = arith.constant 0 : index
      %c0_6 = arith.constant 0 : index
      %c0_7 = arith.constant 0 : index
      %c0_8 = arith.constant 0 : index
      %7 = vector.load %arg3[%c0_5, %c0_6, %c0_7, %c0_8] : memref<3x3x4x128xbf16, #tpu.memory_space<vmem>>, vector<1x1x4x128xbf16>
      %8 = vector.shape_cast %7 : vector<1x1x4x128xbf16> to vector<4x128xbf16>
      %cst_9 = arith.constant dense<0.000000e+00> : vector<16x128xf32>
      %9 = tpu.matmul %6, %8, %cst_9 {dimension_numbers = #tpu.dot_dimension_numbers<[1], [0], [0], [1], [0, 0, 1, 1], [], []>} : vector<16x4xbf16>, vector<4x128xbf16>, vector<16x128xf32> -> vector<16x128xf32>
      %10 = arith.addf %1, %9 : vector<16x128xf32>
      %11 = vector.extract_strided_slice %5 {offsets = [1, 0], sizes = [16, 4], strides = [1, 1]} : vector<18x4xbf16> to vector<16x4xbf16>
      %c0_10 = arith.constant 0 : index
      %c1 = arith.constant 1 : index
      %c0_11 = arith.constant 0 : index
      %c0_12 = arith.constant 0 : index
      %12 = vector.load %arg3[%c0_10, %c1, %c0_11, %c0_12] : memref<3x3x4x128xbf16, #tpu.memory_space<vmem>>, vector<1x1x4x128xbf16>
      %13 = vector.shape_cast %12 : vector<1x1x4x128xbf16> to vector<4x128xbf16>
      %cst_13 = arith.constant dense<0.000000e+00> : vector<16x128xf32>
      %14 = tpu.matmul %11, %13, %cst_13 {dimension_numbers = #tpu.dot_dimension_numbers<[1], [0], [0], [1], [0, 0, 1, 1], [], []>} : vector<16x4xbf16>, vector<4x128xbf16>, vector<16x128xf32> -> vector<16x128xf32>
      %15 = arith.addf %10, %14 : vector<16x128xf32>
      %16 = vector.extract_strided_slice %5 {offsets = [2, 0], sizes = [16, 4], strides = [1, 1]} : vector<18x4xbf16> to vector<16x4xbf16>
      %c0_14 = arith.constant 0 : index
      %c2 = arith.constant 2 : index
      %c0_15 = arith.constant 0 : index
      %c0_16 = arith.constant 0 : index
      %17 = vector.load %arg3[%c0_14, %c2, %c0_15, %c0_16] : memref<3x3x4x128xbf16, #tpu.memory_space<vmem>>, vector<1x1x4x128xbf16>
      %18 = vector.shape_cast %17 : vector<1x1x4x128xbf16> to vector<4x128xbf16>
      %cst_17 = arith.constant dense<0.000000e+00> : vector<16x128xf32>
      %19 = tpu.matmul %16, %18, %cst_17 {dimension_numbers = #tpu.dot_dimension_numbers<[1], [0], [0], [1], [0, 0, 1, 1], [], []>} : vector<16x4xbf16>, vector<4x128xbf16>, vector<16x128xf32> -> vector<16x128xf32>
      %20 = arith.addf %15, %19 : vector<16x128xf32>
      %c1_i32_18 = arith.constant 1 : i32
      %21 = arith.addi %arg6, %c1_i32_18 : i32
      %c0_19 = arith.constant 0 : index
      %c0_20 = arith.constant 0 : index
      %22 = arith.index_cast %21 : i32 to index
      %c0_21 = arith.constant 0 : index
      %c0_22 = arith.constant 0 : index
      %23 = vector.load %arg2[%c0_19, %c0_20, %22, %c0_21, %c0_22] : memref<1x1x18x18x4xbf16, #tpu.memory_space<vmem>>, vector<1x1x1x18x4xbf16>
      %24 = vector.shape_cast %23 : vector<1x1x1x18x4xbf16> to vector<18x4xbf16>
      %25 = vector.extract_strided_slice %24 {offsets = [0, 0], sizes = [16, 4], strides = [1, 1]} : vector<18x4xbf16> to vector<16x4xbf16>
      %c1_23 = arith.constant 1 : index
      %c0_24 = arith.constant 0 : index
      %c0_25 = arith.constant 0 : index
      %c0_26 = arith.constant 0 : index
      %26 = vector.load %arg3[%c1_23, %c0_24, %c0_25, %c0_26] : memref<3x3x4x128xbf16, #tpu.memory_space<vmem>>, vector<1x1x4x128xbf16>
      %27 = vector.shape_cast %26 : vector<1x1x4x128xbf16> to vector<4x128xbf16>
      %cst_27 = arith.constant dense<0.000000e+00> : vector<16x128xf32>
      %28 = tpu.matmul %25, %27, %cst_27 {dimension_numbers = #tpu.dot_dimension_numbers<[1], [0], [0], [1], [0, 0, 1, 1], [], []>} : vector<16x4xbf16>, vector<4x128xbf16>, vector<16x128xf32> -> vector<16x128xf32>
      %29 = arith.addf %20, %28 : vector<16x128xf32>
      %30 = vector.extract_strided_slice %24 {offsets = [1, 0], sizes = [16, 4], strides = [1, 1]} : vector<18x4xbf16> to vector<16x4xbf16>
      %c1_28 = arith.constant 1 : index
      %c1_29 = arith.constant 1 : index
      %c0_30 = arith.constant 0 : index
      %c0_31 = arith.constant 0 : index
      %31 = vector.load %arg3[%c1_28, %c1_29, %c0_30, %c0_31] : memref<3x3x4x128xbf16, #tpu.memory_space<vmem>>, vector<1x1x4x128xbf16>
      %32 = vector.shape_cast %31 : vector<1x1x4x128xbf16> to vector<4x128xbf16>
      %cst_32 = arith.constant dense<0.000000e+00> : vector<16x128xf32>
      %33 = tpu.matmul %30, %32, %cst_32 {dimension_numbers = #tpu.dot_dimension_numbers<[1], [0], [0], [1], [0, 0, 1, 1], [], []>} : vector<16x4xbf16>, vector<4x128xbf16>, vector<16x128xf32> -> vector<16x128xf32>
      %34 = arith.addf %29, %33 : vector<16x128xf32>
      %35 = vector.extract_strided_slice %24 {offsets = [2, 0], sizes = [16, 4], strides = [1, 1]} : vector<18x4xbf16> to vector<16x4xbf16>
      %c1_33 = arith.constant 1 : index
      %c2_34 = arith.constant 2 : index
      %c0_35 = arith.constant 0 : index
      %c0_36 = arith.constant 0 : index
      %36 = vector.load %arg3[%c1_33, %c2_34, %c0_35, %c0_36] : memref<3x3x4x128xbf16, #tpu.memory_space<vmem>>, vector<1x1x4x128xbf16>
      %37 = vector.shape_cast %36 : vector<1x1x4x128xbf16> to vector<4x128xbf16>
      %cst_37 = arith.constant dense<0.000000e+00> : vector<16x128xf32>
      %38 = tpu.matmul %35, %37, %cst_37 {dimension_numbers = #tpu.dot_dimension_numbers<[1], [0], [0], [1], [0, 0, 1, 1], [], []>} : vector<16x4xbf16>, vector<4x128xbf16>, vector<16x128xf32> -> vector<16x128xf32>
      %39 = arith.addf %34, %38 : vector<16x128xf32>
      %c2_i32 = arith.constant 2 : i32
      %40 = arith.addi %arg6, %c2_i32 : i32
      %c0_38 = arith.constant 0 : index
      %c0_39 = arith.constant 0 : index
      %41 = arith.index_cast %40 : i32 to index
      %c0_40 = arith.constant 0 : index
      %c0_41 = arith.constant 0 : index
      %42 = vector.load %arg2[%c0_38, %c0_39, %41, %c0_40, %c0_41] : memref<1x1x18x18x4xbf16, #tpu.memory_space<vmem>>, vector<1x1x1x18x4xbf16>
      %43 = vector.shape_cast %42 : vector<1x1x1x18x4xbf16> to vector<18x4xbf16>
      %44 = vector.extract_strided_slice %43 {offsets = [0, 0], sizes = [16, 4], strides = [1, 1]} : vector<18x4xbf16> to vector<16x4xbf16>
      %c2_42 = arith.constant 2 : index
      %c0_43 = arith.constant 0 : index
      %c0_44 = arith.constant 0 : index
      %c0_45 = arith.constant 0 : index
      %45 = vector.load %arg3[%c2_42, %c0_43, %c0_44, %c0_45] : memref<3x3x4x128xbf16, #tpu.memory_space<vmem>>, vector<1x1x4x128xbf16>
      %46 = vector.shape_cast %45 : vector<1x1x4x128xbf16> to vector<4x128xbf16>
      %cst_46 = arith.constant dense<0.000000e+00> : vector<16x128xf32>
      %47 = tpu.matmul %44, %46, %cst_46 {dimension_numbers = #tpu.dot_dimension_numbers<[1], [0], [0], [1], [0, 0, 1, 1], [], []>} : vector<16x4xbf16>, vector<4x128xbf16>, vector<16x128xf32> -> vector<16x128xf32>
      %48 = arith.addf %39, %47 : vector<16x128xf32>
      %49 = vector.extract_strided_slice %43 {offsets = [1, 0], sizes = [16, 4], strides = [1, 1]} : vector<18x4xbf16> to vector<16x4xbf16>
      %c2_47 = arith.constant 2 : index
      %c1_48 = arith.constant 1 : index
      %c0_49 = arith.constant 0 : index
      %c0_50 = arith.constant 0 : index
      %50 = vector.load %arg3[%c2_47, %c1_48, %c0_49, %c0_50] : memref<3x3x4x128xbf16, #tpu.memory_space<vmem>>, vector<1x1x4x128xbf16>
      %51 = vector.shape_cast %50 : vector<1x1x4x128xbf16> to vector<4x128xbf16>
      %cst_51 = arith.constant dense<0.000000e+00> : vector<16x128xf32>
      %52 = tpu.matmul %49, %51, %cst_51 {dimension_numbers = #tpu.dot_dimension_numbers<[1], [0], [0], [1], [0, 0, 1, 1], [], []>} : vector<16x4xbf16>, vector<4x128xbf16>, vector<16x128xf32> -> vector<16x128xf32>
      %53 = arith.addf %48, %52 : vector<16x128xf32>
      %54 = vector.extract_strided_slice %43 {offsets = [2, 0], sizes = [16, 4], strides = [1, 1]} : vector<18x4xbf16> to vector<16x4xbf16>
      %c2_52 = arith.constant 2 : index
      %c2_53 = arith.constant 2 : index
      %c0_54 = arith.constant 0 : index
      %c0_55 = arith.constant 0 : index
      %55 = vector.load %arg3[%c2_52, %c2_53, %c0_54, %c0_55] : memref<3x3x4x128xbf16, #tpu.memory_space<vmem>>, vector<1x1x4x128xbf16>
      %56 = vector.shape_cast %55 : vector<1x1x4x128xbf16> to vector<4x128xbf16>
      %cst_56 = arith.constant dense<0.000000e+00> : vector<16x128xf32>
      %57 = tpu.matmul %54, %56, %cst_56 {dimension_numbers = #tpu.dot_dimension_numbers<[1], [0], [0], [1], [0, 0, 1, 1], [], []>} : vector<16x4xbf16>, vector<4x128xbf16>, vector<16x128xf32> -> vector<16x128xf32>
      %58 = arith.addf %53, %57 : vector<16x128xf32>
      %c0_57 = arith.constant 0 : index
      %c0_58 = arith.constant 0 : index
      %59 = vector.load %arg4[%c0_57, %c0_58] : memref<1x128xf32, #tpu.memory_space<vmem>>, vector<1x128xf32>
      %60 = vector.broadcast %59 : vector<1x128xf32> to vector<16x128xf32>
      %61 = arith.addf %58, %60 : vector<16x128xf32>
      %62 = arith.negf %61 : vector<16x128xf32>
      %63 = math.exp %62 : vector<16x128xf32>
      %cst_59 = arith.constant 1.000000e+00 : f32
      %64 = vector.broadcast %cst_59 : f32 to vector<16x128xf32>
      %65 = arith.addf %64, %63 : vector<16x128xf32>
      %66 = arith.divf %64, %65 : vector<16x128xf32>
      %c0_60 = arith.constant 0 : index
      %c0_61 = arith.constant 0 : index
      %67 = arith.index_cast %arg6 : i32 to index
      %c0_62 = arith.constant 0 : index
      %c0_63 = arith.constant 0 : index
      %68 = vector.load %arg5[%c0_60, %c0_61, %67, %c0_62, %c0_63] : memref<1x1x16x16x128xf32, #tpu.memory_space<vmem>>, vector<1x1x1x16x128xf32>
      %69 = vector.shape_cast %68 : vector<1x1x1x16x128xf32> to vector<16x128xf32>
      %70 = vector.shape_cast %66 : vector<16x128xf32> to vector<1x1x1x16x128xf32>
      tpu.vector_store %arg5[%c0_60, %c0_61, %67, %c0_62, %c0_63], %70 {strides = array<i32>} : memref<1x1x16x16x128xf32, #tpu.memory_space<vmem>>, vector<1x1x1x16x128xf32>,
    }
    %c16_i32_0 = arith.constant 16 : i32
    return
  }
  func.func @transform_0(%arg0: i32, %arg1: i32) -> (i32, i32, i32, i32, i32) {
    %c0_i32 = arith.constant 0 : i32
    %c0_i32_0 = arith.constant 0 : i32
    %c0_i32_1 = arith.constant 0 : i32
    %c0_i32_2 = arith.constant 0 : i32
    return %arg0, %arg1, %c0_i32, %c0_i32_0, %c0_i32_1 : i32, i32, i32, i32, i32
  }
  func.func @transform_1(%arg0: i32, %arg1: i32) -> (i32, i32, i32, i32) {
    %c0_i32 = arith.constant 0 : i32
    %c0_i32_0 = arith.constant 0 : i32
    %c0_i32_1 = arith.constant 0 : i32
    %c0_i32_2 = arith.constant 0 : i32
    %c0_i32_3 = arith.constant 0 : i32
    return %c0_i32, %c0_i32_0, %c0_i32_1, %c0_i32_2 : i32, i32, i32, i32
  }
  func.func @transform_2(%arg0: i32, %arg1: i32) -> (i32, i32) {
    %c0_i32 = arith.constant 0 : i32
    %c0_i32_0 = arith.constant 0 : i32
    %c0_i32_1 = arith.constant 0 : i32
    return %c0_i32, %c0_i32_0 : i32, i32
  }
  func.func @transform_3(%arg0: i32, %arg1: i32) -> (i32, i32, i32, i32, i32) {
    %c0_i32 = arith.constant 0 : i32
    %c0_i32_0 = arith.constant 0 : i32
    %c0_i32_1 = arith.constant 0 : i32
    %c0_i32_2 = arith.constant 0 : i32
    return %arg0, %arg1, %c0_i32, %c0_i32_0, %c0_i32_1 : i32, i32, i32, i32, i32
  }
}

</mosaic_0001>

<bundles_post_ra>
// kernel: _lambda_.17
= control target key start
LH: loop header
LB: loop body
LE: loop exit
PB: predicated region body
PF: predicated region fallthrough
CT: control target
= control target key end

     0   :  { %s1340_s12 = smov 0   ;;  %s1342_s13 = smov 0   ;;  %s1583_s0 = inlined_call_operand.vmem [shape: bf16[2,1,20,20,4], index: 0, kind: input, shape index: {}]   ;;  %s1584_s1 = inlined_call_operand.vmem [shape: bf16[5,5,4,128], index: 1, kind: input, shape index: {}]   ;;  %s1585_s2 = inlined_call_operand.vmem [shape: f32[1,128], index: 2, kind: input, shape index: {}]   ;;  %s1586_s3 = inlined_call_operand.vmem [shape: bf16[2,1,16,16,128], index: 3, kind: output, shape index: {}]  }
   0x1   :  { %s1344_s14 = smov 0  }
   0x2 LB: > { %s25_s15 = sadd.s32 1, %s1310_s13  ;;  %p1151_p0 = scmp.ge.s32.totalorder %s1314_s14, 1  ;;  %s1314_s14 = sphi %s1344_s14, %s13_s14   ;;  %s1310_s13 = sphi %s1342_s13, %s1588_s13   ;;  %s1306_s12 = sphi %s1340_s12, %s1587_s12  }
   0x3   : > { %p27_p1 = scmp.ge.s32.totalorder %s25_s15, 2  ;;  %p157_p2 = scmp.lt.s32.totalorder %s1314_s14, 3 }
   0x5   : > { %s1590_s15 = smov (%p27_p1, %s25_s15), 0  ;;  %p158_p3 = pnand %p1151_p0, %p157_p2 }
   0x6   : > { %p189_p4 = scmp.lt.s32.totalorder (!%p158_p3), %s1306_s12, 1  ;;  %s1368_s24 = smov (!%p158_p3), 0  }
   0x7   : > { %161 = sbr.rel (%p158_p3) target bundleno = 268 (0x10c), region = 32 }
   0xc   : > { %s1592_s12 = smov (!%p189_p4, %s1306_s12), 1 }
   0xd   : > { %s1254_s16 = smul.u32 240, %s1592_s12  ;;  %s1241_s17 = sshll.u32 %s1592_s12, 7 }
   0xe   : > { %s1361_s20 = scalar_lea.vmem %s1586_s3, %s1241_s17 }
   0xf   : > { %s1366_s23 = scalar_lea.vmem %s1583_s0, %s1254_s16 }
  0x10 LB: >> { %vm248_vm0 = vcmask 1041408   ;;  %v1163_v0 = vld [vmem:[%s1584_s1 + $0x4] sm:$0x3]  ;;  %v1156_v1 = vld [vmem:[%s1584_s1 + $0x2] sm:$0x3]  ;;  %s1242_s4 = smul.u32 12, %s1318_s24  ;;  %s1318_s24 = sphi %s1368_s24, %s213_s24  }
  0x11   : >> { %v295_v2 = vsel %vm248_vm0, %v1163_v0, 0  ;;  %v250_v3 = vsel %vm248_vm0, %v1156_v1, 0  ;;  %v220_v4 = vld [vmem:[%s1584_s1] sm:$0x3]  ;;  %v1165_v6 = vld [vmem:[%s1584_s1 + $0x6] sm:$0x3] }
  0x12   : >> { %304 = vmatpush.bf16.msra.mxu2 %v295_v2  ;;  %259 = vmatpush.bf16.msra.mxu0 %v250_v3  ;;  %v269_v5 = vsel %vm248_vm0, %v220_v4, 0  ;;  %v329_v7 = vsel %vm248_vm0, %v1165_v6, 0  ;;  %v1167_v8 = vld [vmem:[%s1584_s1 + $0x8] sm:$0x3]  ;;  %s1394_s9 = scalar_lea.vmem %s1366_s23, %s1242_s4  ;;  %v1178_v10 = vld [vmem:[%s1584_s1 + $0xc] sm:$0x3] }
  0x13   : >> { %278 = vmatpush.bf16.msra.mxu1 %v269_v5  ;;  %338 = vmatpush.bf16.msra.mxu3 %v329_v7  ;;  %v357_v9 = vsel %vm248_vm0, %v1167_v8, 0  ;;  %v1180_v11 = vld [vmem:[%s1584_s1 + $0xe] sm:$0x3]  ;;  %v1404_v12 = vld [vmem:[%s1394_s9] sm:$0xff]  ;;  %v219_v13 = vld [vmem:[%s1394_s9 + $0x8] sm:$0x3] }
  0x14   : >> { %v431_v14 = vsel %vm248_vm0, %v1178_v10, 0  ;;  %v458_v15 = vsel %vm248_vm0, %v1180_v11, 0  ;;  %v228_v16 = vunpack.c.l.b16 %v219_v13  ;;  %vm244_vm1 = vcmask 31744   ;;  %v1172_v17 = vld [vmem:[%s1584_s1 + $0xa] sm:$0x3]  ;;  %v1420_v30 = vld [vmem:[%s1394_s9 + $0xc] sm:$0xff] }
  0x15   : >> { %v233_v18 = vshrl.u32 %v1404_v12, 16  ;;  %v235_v19 = vshll.u32 %v1404_v12, 16  ;;  %v393_v20 = vsel %vm248_vm0, %v1172_v17, 0  ;;  %v1171_v21 = vld [vmem:[%s1394_s9 + $0x14] sm:$0x3]  ;;  %v288_v23 = vrot.slane %v1404_v12, 1 }
  0x16   : >> { %366 = vmatpush.bf16.msrb.mxu0 %v357_v9  ;;  %440 = vmatpush.bf16.msrb.mxu2 %v431_v14  ;;  %v230_v22 = vpack.c.b16 %v228_v16, %v228_v16  ;;  %vm287_vm2 = vcmask 1046528   ;;  %v414_v31 = vunpack.c.l.b16 %v1171_v21  ;;  %v1182_v32 = vld [vmem:[%s1584_s1 + $0x10] sm:$0x3]  ;;  %vm231_vm3 = vsmask.f32 7424  ;;  %v1471_v7 = vld [vmem:[%s1394_s9 + $0x18] sm:$0xff] }
  0x17   : >> { %467 = vmatpush.bf16.msrb.mxu3 %v458_v15  ;;  %1162 = vmatmul.msk.bf16.vlgmr.msra.gmra.mxu1 %vm244_vm1, %v1404_v12  ;;  %v237_v24 = vrot.slane %v235_v19, 1  ;;  %v316_v25 = vrot.slane %v233_v18, 1  ;;  %v317_v26 = vrot.slane %v235_v19, 2  ;;  %vm315_vm4 = vsmask.f32 6400  ;;  %s1248_s11 = sshll.u32 %s1318_s24, 3 }
  0x18   : >> { %402 = vmatpush.bf16.msrb.mxu1 %v393_v20  ;;  %v289_v27 = vrot.slane %v230_v22, 1  ;;  %v240_v28 = vshll.u32 %v230_v22, 16  ;;  %v319_v29 = vshrl.u32 %v230_v22, 16  ;;  %v1189_v39 = vld [vmem:[%s1584_s1 + $0x14] sm:$0x3]  ;;  %v491_v40 = vsel %vm248_vm0, %v1182_v32, 0  ;;  %s1031_s12 = scalar_lea.vmem %s1361_s20, %s1248_s11 }
  0x19   : >> { %v238_v33 = vor.u32 %v237_v24, %v233_v18  ;;  %v318_v34 = vor.u32 %v317_v26, %v316_v25  ;;  %v1195_v41 = vld [vmem:[%s1584_s1 + $0x16] sm:$0x3]  ;;  %v1184_v42 = vld [vmem:[%s1584_s1 + $0x12] sm:$0x3]  ;;  %v415_v45 = vpack.c.b16 %v414_v31, %v414_v31  ;;  %v418_v46 = vshll.u32 %v1420_v30, 16  ;;  %s213_s24 = sadd.s32 1, %s1318_s24  }
  0x1a   : >> { %v290_v35 = vsel %vm287_vm2, %v288_v23, %v289_v27  ;;  %v242_v36 = vrot.slane %v240_v28, 1  ;;  %v321_v37 = vrot.slane %v319_v29, 1  ;;  %v322_v38 = vrot.slane %v240_v28, 2  ;;  %v1199_v54 = vld [vmem:[%s1584_s1 + $0x1a] sm:$0x3]  ;;  %p210_p5 = scmp.ge.s32.totalorder %s213_s24, 16  }
  0x1b   : >> { %1164 = vmatmul.msk.bf16.vlgmr.msra.gmra.mxu2 %vm244_vm1, %v290_v35  ;;  %v554_v47 = vsel %vm248_vm0, %v1189_v39, 0  ;;  %v592_v49 = vsel %vm248_vm0, %v1195_v41, 0  ;;  %v518_v50 = vsel %vm248_vm0, %v1184_v42, 0  ;;  %v416_v51 = vshrl.u32 %v1420_v30, 16  ;;  %v1201_v60 = vld [vmem:[%s1584_s1 + $0x1c] sm:$0x3] }
  0x1c   : >> { %v243_v43 = vsel %vm231_vm3, %v238_v33, %v242_v36  ;;  %v323_v44 = vor.u32 %v322_v38, %v321_v37  ;;  %563 = vmatpush.bf16.msra.mxu2 %v554_v47  ;;  %527 = vmatpush.bf16.msra.mxu1 %v518_v50  ;;  %v420_v52 = vrot.slane %v418_v46, 1  ;;  %v423_v53 = vshll.u32 %v415_v45, 16  ;;  %v1197_v0 = vld [vmem:[%s1584_s1 + $0x18] sm:$0x3]  ;;  %v1188_v1 = vld [vmem:[%s1394_s9 + $0x20] sm:$0x3] }
  0x1d   : >> { %1161 = vmatmul.msk.bf16.vlgmr.msra.gmra.mxu0 %vm244_vm1, %v243_v43  ;;  %v652_v55 = vsel %vm248_vm0, %v1199_v54, 0  ;;  %v350_v58 = vrot.slane %v1404_v12, 2  ;;  %v351_v59 = vrot.slane %v230_v22, 2  ;;  %vm349_vm5 = vcmask 1045504   ;;  %v1206_v4 = vld [vmem:[%s1584_s1 + $0x1e] sm:$0x3] }
  0x1e   : >> { %v324_v48 = vsel %vm315_vm4, %v318_v34, %v323_v44  ;;  %500 = vmatpush.bf16.msra.mxu0 %v491_v40  ;;  %v421_v56 = vor.u32 %v420_v52, %v416_v51  ;;  %v425_v57 = vrot.slane %v423_v53, 1  ;;  %v451_v62 = vrot.slane %v1420_v30, 1  ;;  %v1214_v15 = vld [vmem:[%s1584_s1 + $0x22] sm:$0x3]  ;;  %v1216_v28 = vld [vmem:[%s1584_s1 + $0x24] sm:$0x3] }
  0x1f   : >> { %1166 = vmatmul.msk.bf16.vlgmr.msra.gmra.mxu3 %vm244_vm1, %v324_v48  ;;  %v452_v63 = vrot.slane %v415_v45, 1  ;;  %v679_v2 = vsel %vm248_vm0, %v1201_v60, 0  ;;  %v352_v3 = vsel %vm349_vm5, %v350_v58, %v351_v59  ;;  %v619_v5 = vsel %vm248_vm0, %v1197_v0, 0  ;;  %v1212_v31 = vld [vmem:[%s1584_s1 + $0x20] sm:$0x3] }
  0x20   : >> { %601 = vmatpush.bf16.msra.mxu3 %v592_v49  ;;  %v426_v61 = vsel %vm231_vm3, %v421_v56, %v425_v57  ;;  %v575_v8 = vunpack.c.l.b16 %v1188_v1  ;;  %v481_v9 = vshrl.u32 %v415_v45, 16  ;;  %v715_v10 = vsel %vm248_vm0, %v1206_v4, 0  ;;  %v1218_v38 = vld [vmem:[%s1584_s1 + $0x26] sm:$0x3]  ;;  %v1205_v44 = vld [vmem:[%s1394_s9 + $0x2c] sm:$0x3] }
  0x21   : >> { %v453_v6 = vsel %vm287_vm2, %v451_v62, %v452_v63  ;;  %v511_v11 = vrot.slane %v1420_v30, 2  ;;  %v512_v12 = vrot.slane %v415_v45, 2  ;;  %v579_v14 = vshll.u32 %v1471_v7, 16  ;;  %v1229_v45 = vld [vmem:[%s1584_s1 + $0x2a] sm:$0x3] }
  0x22   : >> { %v1477_v13 = vpack.c.b16 %v575_v8, %v575_v8  ;;  %v478_v16 = vrot.slane %v416_v51, 1  ;;  %v484_v17 = vrot.slane %v423_v53, 2  ;;  %v479_v18 = vrot.slane %v418_v46, 2  ;;  %v1512_v46 = vld [vmem:[%s1394_s9 + $0x30] sm:$0xff]  ;;  %v1222_v47 = vld [vmem:[%s1394_s9 + $0x38] sm:$0x3] }
  0x23   : >> { %v483_v19 = vrot.slane %v481_v9, 1  ;;  %v513_v20 = vsel %vm349_vm5, %v511_v11, %v512_v12  ;;  %v780_v21 = vsel %vm248_vm0, %v1214_v15, 0  ;;  %v577_v22 = vshrl.u32 %v1471_v7, 16  ;;  %v1231_v59 = vld [vmem:[%s1584_s1 + $0x2c] sm:$0x3] }
  0x24   : >> { %v581_v23 = vrot.slane %v579_v14, 1  ;;  %v584_v24 = vshll.u32 %v1477_v13, 16  ;;  %v480_v25 = vor.u32 %v479_v18, %v478_v16  ;;  %v642_v27 = vshrl.u32 %v1477_v13, 16  ;;  %v1223_v0 = vld [vmem:[%s1584_s1 + $0x28] sm:$0x3] }
  0x25   : >> { %v485_v26 = vor.u32 %v484_v17, %v483_v19  ;;  %v813_v33 = vsel %vm248_vm0, %v1216_v28, 0  ;;  %v639_v34 = vrot.slane %v577_v22, 1  ;;  %v640_v35 = vrot.slane %v579_v14, 2  ;;  %v1233_v8 = vld [vmem:[%s1584_s1 + $0x2e] sm:$0x3] }
  0x26   : >> { %v582_v29 = vor.u32 %v581_v23, %v577_v22  ;;  %v644_v36 = vrot.slane %v642_v27, 1  ;;  %v645_v37 = vrot.slane %v584_v24, 2  ;;  %v753_v39 = vsel %vm248_vm0, %v1212_v31, 0 }
  0x27   : >> { %1177 = vmatmul.msk.bf16.vlgmr.msrb.gmra.mxu1 %vm244_vm1, %v1420_v30  ;;  %v586_v30 = vrot.slane %v584_v24, 1  ;;  %v486_v32 = vsel %vm315_vm4, %v480_v25, %v485_v26  ;;  %v840_v41 = vsel %vm248_vm0, %v1218_v38, 0  ;;  %v641_v42 = vor.u32 %v640_v35, %v639_v34 }
  0x28   : >> { %661 = vmatpush.bf16.msrb.mxu1 %v652_v55  ;;  %v646_v43 = vor.u32 %v645_v37, %v644_v36  ;;  %v897_v48 = vunpack.c.l.b16 %v1222_v47  ;;  %v672_v49 = vrot.slane %v1471_v7, 2  ;;  %v673_v50 = vrot.slane %v1477_v13, 2 }
  0x29   : >> { %v587_v40 = vsel %vm231_vm3, %v582_v29, %v586_v30  ;;  %v736_v52 = vunpack.c.l.b16 %v1205_v44  ;;  %v914_v53 = vsel %vm248_vm0, %v1229_v45, 0  ;;  %v934_v55 = vrot.slane %v1512_v46, 1 }
  0x2a   : >> { %v647_v51 = vsel %vm315_vm4, %v641_v42, %v646_v43  ;;  %v898_v54 = vpack.c.b16 %v897_v48, %v897_v48  ;;  %v612_v56 = vrot.slane %v1471_v7, 1  ;;  %v613_v57 = vrot.slane %v1477_v13, 1  ;;  %v1235_v43 = vld [vmem:[%s1584_s1 + $0x30] sm:$0x3] }
  0x2b   : >> { %1179 = vmatmul.msk.bf16.vlgmr.msrb.gmra.mxu2 %vm244_vm1, %v426_v61  ;;  %v674_v60 = vsel %vm349_vm5, %v672_v49, %v673_v50  ;;  %v1246_v61 = vld [vmem:[%s1394_s9 + $0x24] sm:$0xff]  ;;  %v737_v62 = vpack.c.b16 %v736_v52, %v736_v52  ;;  %v899_v1 = vshrl.u32 %v1512_v46, 16  ;;  %v876_v15 = vsel %vm248_vm0, %v1223_v0, 0 }
  0x2c   : >> { %688 = vmatpush.bf16.msrb.mxu2 %v679_v2  ;;  %v935_v58 = vrot.slane %v898_v54, 1  ;;  %v901_v2 = vshll.u32 %v1512_v46, 16  ;;  %v964_v4 = vshrl.u32 %v898_v54, 16  ;;  %v740_v13 = vshll.u32 %v1246_v61, 16 }
  0x2d   : >> { %1168 = vmatmul.msk.bf16.vlgmr.msrb.gmra.mxu0 %vm244_vm1, %v352_v3  ;;  %v906_v3 = vshll.u32 %v898_v54, 16  ;;  %v745_v14 = vshll.u32 %v737_v62, 16  ;;  %v803_v17 = vshrl.u32 %v737_v62, 16  ;;  %v773_v23 = vrot.slane %v1246_v61, 1 }
  0x2e   : >> { %628 = vmatpush.bf16.msrb.mxu0 %v619_v5  ;;  %v936_v63 = vsel %vm287_vm2, %v934_v55, %v935_v58  ;;  %v614_v5 = vsel %vm287_vm2, %v612_v56, %v613_v57  ;;  %v903_v9 = vrot.slane %v901_v2, 1  ;;  %v962_v11 = vrot.slane %v901_v2, 2 }
  0x2f   : >> { %1181 = vmatmul.msk.bf16.vlgmr.msrb.gmra.mxu3 %vm244_vm1, %v453_v6  ;;  %v738_v6 = vshrl.u32 %v1246_v61, 16  ;;  %v966_v12 = vrot.slane %v964_v4, 1  ;;  %v967_v16 = vrot.slane %v906_v3, 2  ;;  %v908_v19 = vrot.slane %v906_v3, 1 }
  0x30   : >> { %724 = vmatpush.bf16.msrb.mxu3 %v715_v10  ;;  %v961_v10 = vrot.slane %v899_v1, 1  ;;  %v904_v18 = vor.u32 %v903_v9, %v899_v1  ;;  %v774_v24 = vrot.slane %v737_v62, 1  ;;  %v994_v27 = vrot.slane %v1512_v46, 2 }
  0x31   : >> { %v968_v22 = vor.u32 %v967_v16, %v966_v12  ;;  %v995_v28 = vrot.slane %v898_v54, 2  ;;  %v800_v29 = vrot.slane %v738_v6, 1  ;;  %v801_v30 = vrot.slane %v740_v13, 2 }
  0x32   : >> { %v909_v25 = vsel %vm231_vm3, %v904_v18, %v908_v19  ;;  %v805_v31 = vrot.slane %v803_v17, 1  ;;  %v742_v34 = vrot.slane %v740_v13, 1  ;;  %v775_v35 = vsel %vm287_vm2, %v773_v23, %v774_v24 }
  0x33   : >> { %v802_v36 = vor.u32 %v801_v30, %v800_v29  ;;  %v834_v42 = vrot.slane %v737_v62, 2  ;;  %v1001_v45 = vsel %vm248_vm0, %v1235_v43, 0 }
  0x34   : >> { %v743_v38 = vor.u32 %v742_v34, %v738_v6 }
  0x37   : >> { %1185 = vmatmul.msk.bf16.vlgmr.msra.gmra.mxu1 %vm244_vm1, %v513_v20  ;;  %v963_v20 = vor.u32 %v962_v11, %v961_v10 }
  0x38   : >> { %789 = vmatpush.bf16.msra.mxu1 %v780_v21  ;;  %v974_v21 = vsel %vm248_vm0, %v1233_v8, 0 }
  0x39   : >> { %v969_v26 = vsel %vm315_vm4, %v963_v20, %v968_v22 }
  0x3b   : >> { %1194 = vmatmul.msk.bf16.vlgmr.msra.gmra.mxu2 %vm244_vm1, %v1471_v7  ;;  %v941_v7 = vsel %vm248_vm0, %v1231_v59, 0 }
  0x3c   : >> { %822 = vmatpush.bf16.msra.mxu2 %v813_v33  ;;  %v996_v33 = vsel %vm349_vm5, %v994_v27, %v995_v28 }
  0x3d   : >> { %1183 = vmatmul.msk.bf16.vlgmr.msra.gmra.mxu0 %vm244_vm1, %v486_v32  ;;  %v806_v32 = vrot.slane %v745_v14, 2 }
  0x3e   : >> { %762 = vmatpush.bf16.msra.mxu0 %v753_v39  ;;  %v747_v39 = vrot.slane %v745_v14, 1 }
  0x3f   : >> { %1196 = vmatmul.msk.bf16.vlgmr.msra.gmra.mxu3 %vm244_vm1, %v587_v40  ;;  %v807_v37 = vor.u32 %v806_v32, %v805_v31 }
  0x40   : >> { %849 = vmatpush.bf16.msra.mxu3 %v840_v41  ;;  %v833_v41 = vrot.slane %v1246_v61, 2  ;;  %v748_v44 = vsel %vm231_vm3, %v743_v38, %v747_v39 }
  0x41   : >> { %v808_v40 = vsel %vm315_vm4, %v802_v36, %v807_v37 }
  0x42   : >> { %v835_v47 = vsel %vm349_vm5, %v833_v41, %v834_v42 }
  0x47   : >> { %1200 = vmatmul.msk.bf16.vlgmr.msrb.gmra.mxu1 %vm244_vm1, %v647_v51 }
  0x48   : >> { %923 = vmatpush.bf16.msrb.mxu1 %v914_v53 }
  0x4b   : >> { %1202 = vmatmul.msk.bf16.vlgmr.msrb.gmra.mxu2 %vm244_vm1, %v674_v60 }
  0x4c   : >> { %950 = vmatpush.bf16.msrb.mxu2 %v941_v7 }
  0x4d   : >> { %1198 = vmatmul.msk.bf16.vlgmr.msrb.gmra.mxu0 %vm244_vm1, %v614_v5 }
  0x4e   : >> { %885 = vmatpush.bf16.msrb.mxu0 %v876_v15 }
  0x4f   : >> { %1211 = vmatmul.msk.bf16.vlgmr.msrb.gmra.mxu3 %vm244_vm1, %v1246_v61 }
  0x50   : >> { %983 = vmatpush.bf16.msrb.mxu3 %v974_v21 }
  0x57   : >> { %1215 = vmatmul.msk.bf16.vlgmr.msra.gmra.mxu1 %vm244_vm1, %v775_v35 }
  0x5b   : >> { %1217 = vmatmul.msk.bf16.vlgmr.msra.gmra.mxu2 %vm244_vm1, %v808_v40 }
  0x5d   : >> { %1213 = vmatmul.msk.bf16.vlgmr.msra.gmra.mxu0 %vm244_vm1, %v748_v44 }
  0x5e   : >> { %1010 = vmatpush.bf16.msra.mxu0 %v1001_v45 }
  0x5f   : >> { %1219 = vmatmul.msk.bf16.vlgmr.msra.gmra.mxu3 %vm244_vm1, %v835_v47 }
  0x67   : >> { %1230 = vmatmul.msk.bf16.vlgmr.msrb.gmra.mxu1 %vm244_vm1, %v909_v25 }
  0x6b   : >> { %1232 = vmatmul.msk.bf16.vlgmr.msrb.gmra.mxu2 %vm244_vm1, %v936_v63 }
  0x6d   : >> { %1228 = vmatmul.msk.bf16.vlgmr.msrb.gmra.mxu0 %vm244_vm1, %v1512_v46 }
  0x6f   : >> { %1234 = vmatmul.msk.bf16.vlgmr.msrb.gmra.mxu3 %vm244_vm1, %v969_v26 }
  0x7d   : >> { %1236 = vmatmul.msk.bf16.vlgmr.msra.gmra.mxu0 %vm244_vm1, %v996_v33 }
  0x94   : >> { %v280_v48 = vpop.f32.mrf.mxu1 }
  0x9a   : >> { %v261_v49 = vpop.f32.mrf.mxu0 }
  0x9b   : >> { %v281_v2 = vadd.f32 %v280_v48, %v261_v49 }
  0x9c   : >> { %v282_v50 = vpop.f32.mrf.mxu1 }
  0x9e   : >> { %v306_v51 = vpop.f32.mrf.mxu2 }
  0x9f   : >> { %v311_v4 = vadd.f32 %v306_v51, %v281_v2 }
  0xa2   : >> { %v263_v52 = vpop.f32.mrf.mxu0  ;;  %v340_v53 = vpop.f32.mrf.mxu3 }
  0xa3   : >> { %v283_v5 = vadd.f32 %v282_v50, %v263_v52  ;;  %v345_v6 = vadd.f32 %v340_v53, %v311_v4 }
  0xa4   : >> { %v404_v54 = vpop.f32.mrf.mxu1 }
  0xa6   : >> { %v308_v55 = vpop.f32.mrf.mxu2 }
  0xa7   : >> { %v312_v9 = vadd.f32 %v308_v55, %v283_v5 }
  0xaa   : >> { %v342_v56 = vpop.f32.mrf.mxu3  ;;  %v368_v57 = vpop.f32.mrf.mxu0 }
  0xab   : >> { %v373_v10 = vadd.f32 %v368_v57, %v345_v6  ;;  %v346_v11 = vadd.f32 %v342_v56, %v312_v9 }
  0xac   : >> { %v406_v58 = vpop.f32.mrf.mxu1 }
  0xad   : >> { %v409_v14 = vadd.f32 %v404_v54, %v373_v10 }
  0xae   : >> { %v442_v59 = vpop.f32.mrf.mxu2 }
  0xaf   : >> { %v447_v18 = vadd.f32 %v442_v59, %v409_v14  ;;  %v1287_v14 = vld [vmem:[%s1585_s2] ss:$0 sm:$0xff] }
  0xb2   : >> { %v370_v60 = vpop.f32.mrf.mxu0  ;;  %v469_v61 = vpop.f32.mrf.mxu3 }
  0xb3   : >> { %v374_v15 = vadd.f32 %v370_v60, %v346_v11  ;;  %v474_v20 = vadd.f32 %v469_v61, %v447_v18 }
  0xb4   : >> { %v529_v62 = vpop.f32.mrf.mxu1 }
  0xb5   : >> { %v410_v19 = vadd.f32 %v406_v58, %v374_v15 }
  0xb6   : >> { %v444_v46 = vpop.f32.mrf.mxu2 }
  0xb7   : >> { %v448_v22 = vadd.f32 %v444_v46, %v410_v19 }
  0xba   : >> { %v471_v63 = vpop.f32.mrf.mxu3  ;;  %v502_v0 = vpop.f32.mrf.mxu0 }
  0xbb   : >> { %v507_v23 = vadd.f32 %v502_v0, %v474_v20  ;;  %v475_v25 = vadd.f32 %v471_v63, %v448_v22 }
  0xbc   : >> { %v531_v1 = vpop.f32.mrf.mxu1 }
  0xbd   : >> { %v534_v28 = vadd.f32 %v529_v62, %v507_v23 }
  0xbe   : >> { %v565_v3 = vpop.f32.mrf.mxu2 }
  0xbf   : >> { %v570_v31 = vadd.f32 %v565_v3, %v534_v28 }
  0xc2   : >> { %v504_v7 = vpop.f32.mrf.mxu0  ;;  %v603_v8 = vpop.f32.mrf.mxu3 }
  0xc3   : >> { %v508_v29 = vadd.f32 %v504_v7, %v475_v25  ;;  %v608_v33 = vadd.f32 %v603_v8, %v570_v31 }
  0xc4   : >> { %v663_v12 = vpop.f32.mrf.mxu1 }
  0xc5   : >> { %v535_v32 = vadd.f32 %v531_v1, %v508_v29 }
  0xc6   : >> { %v567_v13 = vpop.f32.mrf.mxu2 }
  0xc7   : >> { %v571_v37 = vadd.f32 %v567_v13, %v535_v32 }
  0xca   : >> { %v605_v16 = vpop.f32.mrf.mxu3  ;;  %v630_v17 = vpop.f32.mrf.mxu0 }
  0xcb   : >> { %v635_v38 = vadd.f32 %v630_v17, %v608_v33  ;;  %v609_v39 = vadd.f32 %v605_v16, %v571_v37 }
  0xcc   : >> { %v665_v24 = vpop.f32.mrf.mxu1 }
  0xcd   : >> { %v668_v41 = vadd.f32 %v663_v12, %v635_v38 }
  0xce   : >> { %v690_v21 = vpop.f32.mrf.mxu2 }
  0xcf   : >> { %v695_v45 = vadd.f32 %v690_v21, %v668_v41 }
  0xd2   : >> { %v632_v26 = vpop.f32.mrf.mxu0  ;;  %v726_v27 = vpop.f32.mrf.mxu3 }
  0xd3   : >> { %v636_v42 = vadd.f32 %v632_v26, %v609_v39  ;;  %v731_v49 = vadd.f32 %v726_v27, %v695_v45 }
  0xd4   : >> { %v791_v34 = vpop.f32.mrf.mxu1 }
  0xd5   : >> { %v669_v47 = vadd.f32 %v665_v24, %v636_v42 }
  0xd6   : >> { %v692_v30 = vpop.f32.mrf.mxu2 }
  0xd7   : >> { %v696_v50 = vadd.f32 %v692_v30, %v669_v47 }
  0xda   : >> { %v728_v35 = vpop.f32.mrf.mxu3  ;;  %v764_v36 = vpop.f32.mrf.mxu0 }
  0xdb   : >> { %v769_v51 = vadd.f32 %v764_v36, %v731_v49  ;;  %v732_v53 = vadd.f32 %v728_v35, %v696_v50 }
  0xdc   : >> { %v793_v48 = vpop.f32.mrf.mxu1 }
  0xdd   : >> { %v796_v56 = vadd.f32 %v791_v34, %v769_v51 }
  0xde   : >> { %v824_v40 = vpop.f32.mrf.mxu2 }
  0xdf   : >> { %v829_v59 = vadd.f32 %v824_v40, %v796_v56 }
  0xe2   : >> { %v766_v43 = vpop.f32.mrf.mxu0  ;;  %v851_v44 = vpop.f32.mrf.mxu3 }
  0xe3   : >> { %v770_v57 = vadd.f32 %v766_v43, %v732_v53  ;;  %v856_v61 = vadd.f32 %v851_v44, %v829_v59 }
  0xe4   : >> { %v925_v58 = vpop.f32.mrf.mxu1 }
  0xe5   : >> { %v797_v60 = vadd.f32 %v793_v48, %v770_v57 }
  0xe6   : >> { %v826_v52 = vpop.f32.mrf.mxu2 }
  0xe7   : >> { %v830_v63 = vadd.f32 %v826_v52, %v797_v60 }
  0xea   : >> { %v853_v54 = vpop.f32.mrf.mxu3  ;;  %v887_v55 = vpop.f32.mrf.mxu0 }
  0xeb   : >> { %v892_v0 = vadd.f32 %v887_v55, %v856_v61  ;;  %v857_v2 = vadd.f32 %v853_v54, %v830_v63 }
  0xec   : >> { %v927_v5 = vpop.f32.mrf.mxu1 }
  0xed   : >> { %v930_v3 = vadd.f32 %v925_v58, %v892_v0 }
  0xee   : >> { %v952_v62 = vpop.f32.mrf.mxu2 }
  0xef   : >> { %v957_v7 = vadd.f32 %v952_v62, %v930_v3 }
  0xf2   : >> { %v889_v46 = vpop.f32.mrf.mxu0  ;;  %v985_v1 = vpop.f32.mrf.mxu3 }
  0xf3   : >> { %v893_v4 = vadd.f32 %v889_v46, %v857_v2  ;;  %v990_v10 = vadd.f32 %v985_v1, %v957_v7 }
  0xf5   : >> { %v931_v8 = vadd.f32 %v927_v5, %v893_v4 }
  0xf6   : >> { %v954_v9 = vpop.f32.mrf.mxu2 }
  0xf7   : >> { %v958_v12 = vadd.f32 %v954_v9, %v931_v8 }
  0xfa   : >> { %v1012_v6 = vpop.f32.mrf.mxu0  ;;  %v987_v11 = vpop.f32.mrf.mxu3 }
  0xfb   : >> { %v1017_v13 = vadd.f32 %v1012_v6, %v990_v10  ;;  %v991_v15 = vadd.f32 %v987_v11, %v958_v12 }
  0xfd   : >> { %v1023_v17 = vadd.f32 %v1287_v14, %v1017_v13 }
  0xff   : >> { %v1025_v20 = vmax.f32 %v1023_v17, 0.0 }
 0x102   : >> { %v1014_v16 = vpop.f32.mrf.mxu0 }
 0x103   : >> { %v1018_v18 = vadd.f32 %v1014_v16, %v991_v15 }
 0x105   : >> { %v1024_v19 = vadd.f32 %v1287_v14, %v1018_v18 }
 0x107   : >> { %v1026_v21 = vmax.f32 %v1024_v19, 0.0  ;;  %212 = sbr.rel (!%p210_p5) target bundleno = 16 (0x10), region = 99 }
 0x109   : >> { %v1252_v22 = vpack.c.bf16 %v1026_v21, %v1025_v20 }
 0x10b   : >> { %1253 = vst [vmem:[%s1031_s12] sm:$0xff] %v1252_v22  }
 0x10c PF: > { %s13_s14 = sadd.s32 1, %s1314_s14   ;;  %s1587_s12 = smov %s1310_s13 }
 0x10d   : > { %p10_p6 = scmp.ge.s32.totalorder %s13_s14, 4   ;;  %s1588_s13 = smov %s1590_s15 }
 0x10f   :  { %12 = sbr.rel (!%p10_p6) target bundleno = 2 (0x2), region = 110 }

// kernel: _lambda_.18
= control target key start
LH: loop header
LB: loop body
LE: loop exit
PB: predicated region body
PF: predicated region fallthrough
CT: control target
= control target key end

     0   :  { %s499_s12 = smov 0   ;;  %s541_s0 = inlined_call_operand.vmem [shape: bf16[128,72], index: 0, kind: input, shape index: {}]   ;;  %s542_s1 = inlined_call_operand.vmem [shape: bf16[72,128], index: 1, kind: input, shape index: {}]   ;;  %s543_s2 = inlined_call_operand.vmem [shape: f32[1,128], index: 2, kind: input, shape index: {}]   ;;  %s544_s3 = inlined_call_operand.vmem [shape: bf16[128,128], index: 3, kind: output, shape index: {}]  }
   0x1 LB: > { %s369_s13 = sadd.s32 4294967295, %s477_s12   ;;  %p373_p0 = scmp.ge.s32.totalorder %s477_s12, 1  ;;  %s477_s12 = sphi %s499_s12, %s13_s12  }
   0x2   : > { %p138_p1 = scmp.lt.s32.totalorder %s477_s12, 3 }
   0x4   : > { %p139_p2 = pnand %p373_p0, %p138_p1 }
   0x5   : > { %s374_s16 = sshll.u32 (!%p139_p2), %s369_s13, 3 }
   0x6   : > { %142 = sbr.rel (%p139_p2) target bundleno = 185 (0xb9), region = 32  ;;  %p163_p3 = scmp.lt.s32.totalorder (!%p139_p2), %s374_s16, 15 }
   0xb   : > { %v191_v0 = vld [vmem:[%s542_s1 + $0x20] sm:$0xf]  ;;  %vm256_vm0 = vcmask 1043456   ;;  %v423_v4 = vld [vmem:[%s542_s1 + $0x18] sm:$0xff]  ;;  %v422_v5 = vld [vmem:[%s542_s1 + $0x10] sm:$0xff]  ;;  %s546_s16 = smov (!%p163_p3, %s374_s16), 15 }
   0xc   : > { %v233_v1 = vunpack.c.l.b16 %v191_v0  ;;  %v421_v6 = vld [vmem:[%s542_s1 + $0x8] sm:$0xff]  ;;  %s375_s23 = sshll.u32 %s546_s16, 2  ;;  %v420_v7 = vld [vmem:[%s542_s1] sm:$0xff]  ;;  %vm243_vm1 = vcmask 588800  }
   0xd   : > { %s166_s28 = scalar_lea.vmem %s541_s0, %s375_s23  ;;  %v470_v14 = vld [vmem:[%s543_s2] ss:$0 sm:$0xff]  ;;  %s172_s6 = scalar_lea.vmem %s544_s3, %s375_s23 }
   0xe   : > { %v238_v2 = vpack.c.b16 %v233_v1, %v233_v1  ;;  %v416_v8 = vld [vmem:[%s166_s28] sm:$0xff]  ;;  %v417_v9 = vld [vmem:[%s166_s28 + $0x8] sm:$0xff]  ;;  %v418_v10 = vld [vmem:[%s166_s28 + $0x10] sm:$0xff] }
   0xf   : > { %v419_v11 = vld [vmem:[%s166_s28 + $0x18] sm:$0xff] }
  0x10   : > { %v258_v3 = vsel %vm256_vm0, %v238_v2, 0 }
  0x11   : > { %263 = vmatpush.bf16.msra.mxu0 %v258_v3  ;;  %447 = vmatpush.bf16.msra.mxu1 %v258_v3 }
  0x12   : > { %448 = vmatpush.bf16.msra.mxu2 %v258_v3  ;;  %449 = vmatpush.bf16.msra.mxu3 %v258_v3 }
  0x15   : > { %264 = vmatpush.bf16.msra.mxu0 %v423_v4  ;;  %450 = vmatpush.bf16.msra.mxu1 %v423_v4 }
  0x16   : > { %451 = vmatpush.bf16.msra.mxu2 %v423_v4  ;;  %452 = vmatpush.bf16.msra.mxu3 %v423_v4 }
  0x19   : > { %265 = vmatpush.bf16.msra.mxu0 %v422_v5  ;;  %453 = vmatpush.bf16.msra.mxu1 %v422_v5 }
  0x1a   : > { %454 = vmatpush.bf16.msra.mxu2 %v422_v5  ;;  %455 = vmatpush.bf16.msra.mxu3 %v422_v5 }
  0x1d   : > { %266 = vmatpush.bf16.msra.mxu0 %v421_v6  ;;  %456 = vmatpush.bf16.msra.mxu1 %v421_v6 }
  0x1e   : > { %457 = vmatpush.bf16.msra.mxu2 %v421_v6  ;;  %458 = vmatpush.bf16.msra.mxu3 %v421_v6 }
  0x21   : > { %267 = vmatpush.bf16.msra.mxu0 %v420_v7  ;;  %459 = vmatpush.bf16.msra.mxu1 %v420_v7 }
  0x22   : > { %460 = vmatpush.bf16.msra.mxu2 %v420_v7  ;;  %461 = vmatpush.bf16.msra.mxu3 %v420_v7 }
  0x24   : > { %410 = vmatmul.msk.bf16.vlgmr.msra.gmra.mxu0 %vm243_vm1, %v416_v8  ;;  %411 = vmatmul.msk.bf16.vlgmr.msra.gmra.mxu1 %vm243_vm1, %v417_v9 }
  0x25   : > { %412 = vmatmul.msk.bf16.vlgmr.msra.gmra.mxu2 %vm243_vm1, %v418_v10  ;;  %413 = vmatmul.msk.bf16.vlgmr.msra.gmra.mxu3 %vm243_vm1, %v419_v11 }
  0xa1   : > { %v269_v12 = vpop.f32.mrf.mxu0  ;;  %v274_v13 = vpop.f32.mrf.mxu1 }
  0xa2   : > { %v270_v15 = vadd.f32 %v470_v14, %v269_v12  ;;  %v275_v16 = vadd.f32 %v470_v14, %v274_v13 }
  0xa4   : > { %v289_v23 = vmax.f32 %v270_v15, 0.0  ;;  %v291_v24 = vmax.f32 %v275_v16, 0.0 }
  0xa8   : > { %v279_v17 = vpop.f32.mrf.mxu2  ;;  %v284_v18 = vpop.f32.mrf.mxu3 }
  0xa9   : > { %v271_v19 = vpop.f32.mrf.mxu0  ;;  %v276_v20 = vpop.f32.mrf.mxu1  ;;  %v280_v29 = vadd.f32 %v470_v14, %v279_v17  ;;  %v285_v30 = vadd.f32 %v470_v14, %v284_v18 }
  0xaa   : > { %v272_v21 = vadd.f32 %v470_v14, %v271_v19  ;;  %v277_v22 = vadd.f32 %v470_v14, %v276_v20 }
  0xab   : > { %v293_v35 = vmax.f32 %v280_v29, 0.0  ;;  %v295_v36 = vmax.f32 %v285_v30, 0.0 }
  0xac   : > { %v290_v25 = vmax.f32 %v272_v21, 0.0  ;;  %v292_v26 = vmax.f32 %v277_v22, 0.0 }
  0xae   : > { %v427_v27 = vpack.c.bf16 %v290_v25, %v289_v23  ;;  %v432_v28 = vpack.c.bf16 %v292_v26, %v291_v24 }
  0xb0   : > { %428 = vst [vmem:[%s172_s6] sm:$0xff] %v427_v27   ;;  %v281_v31 = vpop.f32.mrf.mxu2  ;;  %v286_v32 = vpop.f32.mrf.mxu3 }
  0xb1   : > { %444 = vst [vmem:[%s172_s6 + $0x8] sm:$0xff] %v432_v28   ;;  %v282_v33 = vadd.f32 %v470_v14, %v281_v31  ;;  %v287_v34 = vadd.f32 %v470_v14, %v286_v32 }
  0xb3   : > { %v294_v37 = vmax.f32 %v282_v33, 0.0  ;;  %v296_v38 = vmax.f32 %v287_v34, 0.0 }
  0xb5   : > { %v437_v39 = vpack.c.bf16 %v294_v37, %v293_v35  ;;  %v442_v40 = vpack.c.bf16 %v296_v38, %v295_v36 }
  0xb7   : > { %445 = vst [vmem:[%s172_s6 + $0x10] sm:$0xff] %v437_v39  }
  0xb8   : > { %446 = vst [vmem:[%s172_s6 + $0x18] sm:$0xff] %v442_v40  }
  0xb9 PF: > { %s13_s12 = sadd.s32 1, %s477_s12  }
  0xba   : > { %p10_p4 = scmp.ge.s32.totalorder %s13_s12, 4  }
  0xbc   :  { %12 = sbr.rel (!%p10_p4) target bundleno = 1 (0x1), region = 62 }

// kernel: _lambda_.19
= control target key start
LH: loop header
LB: loop body
LE: loop exit
PB: predicated region body
PF: predicated region fallthrough
CT: control target
= control target key end

     0   :  { %s811_s12 = smov 0   ;;  %s813_s13 = smov 0   ;;  %s910_s0 = inlined_call_operand.vmem [shape: bf16[2,1,10,10,16], index: 0, kind: input, shape index: {}]   ;;  %s911_s1 = inlined_call_operand.vmem [shape: bf16[3,3,16,128], index: 1, kind: input, shape index: {}]   ;;  %s912_s2 = inlined_call_operand.vmem [shape: f32[1,128], index: 2, kind: input, shape index: {}]   ;;  %s913_s3 = inlined_call_operand.vmem [shape: bf16[2,1,8,8,128], index: 3, kind: output, shape index: {}]  }
   0x1   :  { %s815_s14 = smov 0  }
   0x2 LB: > { %s25_s15 = sadd.s32 1, %s781_s13  ;;  %p623_p0 = scmp.ge.s32.totalorder %s785_s14, 1  ;;  %s785_s14 = sphi %s815_s14, %s13_s14   ;;  %s781_s13 = sphi %s813_s13, %s915_s13   ;;  %s777_s12 = sphi %s811_s12, %s914_s12  }
   0x3   : > { %p27_p1 = scmp.ge.s32.totalorder %s25_s15, 2  ;;  %p157_p2 = scmp.lt.s32.totalorder %s785_s14, 3 }
   0x5   : > { %s917_s15 = smov (%p27_p1, %s25_s15), 0  ;;  %p158_p3 = pnand %p623_p0, %p157_p2 }
   0x6   : > { %p189_p4 = scmp.lt.s32.totalorder (!%p158_p3), %s777_s12, 1  ;;  %s839_s24 = smov (!%p158_p3), 0  }
   0x7   : > { %161 = sbr.rel (%p158_p3) target bundleno = 195 (0xc3), region = 32 }
   0xc   : > { %s919_s12 = smov (!%p189_p4, %s777_s12), 1 }
   0xd   : > { %s725_s16 = smul.u32 80, %s919_s12  ;;  %s711_s17 = sshll.u32 %s919_s12, 5 }
   0xe   : > { %s832_s20 = scalar_lea.vmem %s913_s3, %s711_s17 }
   0xf   : > { %s837_s23 = scalar_lea.vmem %s910_s0, %s725_s16 }
  0x10 LB: >> { %v716_v0 = vld [vmem:[%s911_s1 + $0x10] sm:$0xff]  ;;  %v718_v1 = vld [vmem:[%s911_s1 + $0x18] sm:$0xff]  ;;  %v715_v2 = vld [vmem:[%s911_s1 + $0x8] sm:$0xff]  ;;  %s712_s10 = sshll.u32 %s789_s24, 3  ;;  %vm242_vm0 = vcmask 130048   ;;  %s708_s26 = sshll.u32 %s789_s24, 2  ;;  %s789_s24 = sphi %s839_s24, %s213_s24  }
  0x11   : >> { %v714_v3 = vld [vmem:[%s911_s1] sm:$0xff]  ;;  %v722_v5 = vld [vmem:[%s911_s1 + $0x30] sm:$0xff]  ;;  %301 = vmatpush.bf16.msra.mxu2 %v716_v0  ;;  %333 = vmatpush.bf16.msra.mxu3 %v718_v1  ;;  %v723_v6 = vld [vmem:[%s911_s1 + $0x38] sm:$0xff]  ;;  %s870_s18 = scalar_lea.vmem %s837_s23, %s712_s10  ;;  %s510_s27 = scalar_lea.vmem %s832_s20, %s708_s26 }
  0x12   : >> { %v719_v4 = vld [vmem:[%s911_s1 + $0x20] sm:$0xff]  ;;  %v720_v7 = vld [vmem:[%s911_s1 + $0x28] sm:$0xff]  ;;  %253 = vmatpush.bf16.msra.mxu0 %v715_v2  ;;  %275 = vmatpush.bf16.msra.mxu1 %v714_v3  ;;  %v694_v13 = vld [vmem:[%s870_s18 + $0x10] sm:$0xf]  ;;  %s213_s24 = sadd.s32 1, %s789_s24  }
  0x13   : >> { %v633_v8 = vld [vmem:[%s870_s18] sm:$0xf]  ;;  %v713_v9 = vld [vmem:[%s870_s18] sm:$0x10]  ;;  %v653_v10 = vld [vmem:[%s870_s18 + $0x8] sm:$0xf] }
  0x14   : >> { %v634_v11 = vor.u32 %v713_v9, %v633_v8  ;;  %661 = vmatmul.msk.bf16.vlgmr.msra.gmra.mxu3 %vm242_vm0, %v653_v10  ;;  %v217_v12 = vld [vmem:[%s870_s18] sm:$0xf]  ;;  %v721_v14 = vld [vmem:[%s870_s18 + $0x10] sm:$0x10]  ;;  %v666_v20 = vld [vmem:[%s870_s18 + $0x8] sm:$0xf] }
  0x15   : >> { %430 = vmatpush.bf16.msrb.mxu2 %v722_v5  ;;  %644 = vmatmul.msk.bf16.vlgmr.msra.gmra.mxu1 %vm242_vm0, %v217_v12  ;;  %v695_v18 = vor.u32 %v721_v14, %v694_v13  ;;  %v717_v21 = vld [vmem:[%s870_s18 + $0x8] sm:$0x10]  ;;  %v724_v23 = vld [vmem:[%s911_s1 + $0x40] sm:$0xff]  ;;  %v681_v33 = vld [vmem:[%s870_s18 + $0x10] sm:$0xf]  ;;  %p210_p5 = scmp.ge.s32.totalorder %s213_s24, 8  }
  0x16   : >> { %371 = vmatpush.bf16.msrb.mxu0 %v719_v4  ;;  %398 = vmatpush.bf16.msrb.mxu1 %v720_v7  ;;  %v284_v15 = vrot.slane %v634_v11, 1  ;;  %v230_v16 = vshrl.u32 %v634_v11, 16  ;;  %v232_v17 = vshll.u32 %v634_v11, 16  ;;  %v667_v25 = vor.u32 %v717_v21, %v666_v20  ;;  %v758_v59 = vld [vmem:[%s912_s2] ss:$0 sm:$0xff] }
  0x17   : >> { %468 = vmatpush.bf16.msrb.mxu3 %v723_v6  ;;  %v448_v22 = vshll.u32 %v695_v18, 16  ;;  %v446_v26 = vshrl.u32 %v695_v18, 16  ;;  %v478_v35 = vrot.slane %v695_v18, 1 }
  0x18   : >> { %651 = vmatmul.msk.bf16.vlgmr.msra.gmra.mxu2 %vm242_vm0, %v284_v15  ;;  %v234_v19 = vrot.slane %v232_v17, 1  ;;  %v351_v28 = vshll.u32 %v667_v25, 16  ;;  %v381_v30 = vrot.slane %v667_v25, 1  ;;  %v349_v31 = vshrl.u32 %v667_v25, 16 }
  0x19   : >> { %v450_v27 = vrot.slane %v448_v22, 1 }
  0x1a   : >> { %v235_v24 = vor.u32 %v234_v19, %v230_v16  ;;  %v353_v32 = vrot.slane %v351_v28, 1 }
  0x1b   : >> { %v451_v29 = vor.u32 %v450_v27, %v446_v26 }
  0x1c   : >> { %639 = vmatmul.msk.bf16.vlgmr.msra.gmra.mxu0 %vm242_vm0, %v235_v24  ;;  %v354_v34 = vor.u32 %v353_v32, %v349_v31 }
  0x1d   : >> { %495 = vmatpush.bf16.msra.mxu0 %v724_v23 }
  0x24   : >> { %700 = vmatmul.msk.bf16.vlgmr.msrb.gmra.mxu3 %vm242_vm0, %v451_v29 }
  0x25   : >> { %679 = vmatmul.msk.bf16.vlgmr.msrb.gmra.mxu1 %vm242_vm0, %v381_v30 }
  0x28   : >> { %689 = vmatmul.msk.bf16.vlgmr.msrb.gmra.mxu2 %vm242_vm0, %v681_v33 }
  0x2c   : >> { %672 = vmatmul.msk.bf16.vlgmr.msrb.gmra.mxu0 %vm242_vm0, %v354_v34 }
  0x3c   : >> { %707 = vmatmul.msk.bf16.vlgmr.msra.gmra.mxu0 %vm242_vm0, %v478_v35 }
  0x92   : >> { %v277_v36 = vpop.f32.mrf.mxu1 }
  0x97   : >> { %v335_v37 = vpop.f32.mrf.mxu3 }
  0x99   : >> { %v255_v38 = vpop.f32.mrf.mxu0 }
  0x9a   : >> { %v279_v39 = vpop.f32.mrf.mxu1  ;;  %v278_v43 = vadd.f32 %v277_v36, %v255_v38 }
  0x9b   : >> { %v303_v40 = vpop.f32.mrf.mxu2 }
  0x9c   : >> { %v307_v46 = vadd.f32 %v303_v40, %v278_v43 }
  0x9e   : >> { %v339_v49 = vadd.f32 %v335_v37, %v307_v46 }
  0x9f   : >> { %v337_v41 = vpop.f32.mrf.mxu3 }
  0xa1   : >> { %v257_v42 = vpop.f32.mrf.mxu0 }
  0xa2   : >> { %v400_v44 = vpop.f32.mrf.mxu1 }
  0xa3   : >> { %v305_v45 = vpop.f32.mrf.mxu2 }
  0xa7   : >> { %v470_v47 = vpop.f32.mrf.mxu3 }
  0xa9   : >> { %v373_v48 = vpop.f32.mrf.mxu0 }
  0xaa   : >> { %v402_v50 = vpop.f32.mrf.mxu1  ;;  %v377_v52 = vadd.f32 %v373_v48, %v339_v49 }
  0xab   : >> { %v432_v51 = vpop.f32.mrf.mxu2 }
  0xac   : >> { %v404_v54 = vadd.f32 %v400_v44, %v377_v52 }
  0xae   : >> { %v436_v57 = vadd.f32 %v432_v51, %v404_v54 }
  0xaf   : >> { %v472_v53 = vpop.f32.mrf.mxu3 }
  0xb0   : >> { %v474_v58 = vadd.f32 %v470_v47, %v436_v57 }
  0xb1   : >> { %v375_v55 = vpop.f32.mrf.mxu0 }
  0xb3   : >> { %v434_v56 = vpop.f32.mrf.mxu2 }
  0xb9   : >> { %v497_v60 = vpop.f32.mrf.mxu0 }
  0xba   : >> { %v501_v61 = vadd.f32 %v497_v60, %v474_v58 }
  0xbc   : >> { %v506_v62 = vadd.f32 %v758_v59, %v501_v61 }
  0xbe   : >> { %v507_v63 = vmax.f32 %v506_v62, 0.0  ;;  %212 = sbr.rel (!%p210_p5) target bundleno = 16 (0x10), region = 81 }
  0xc0   : >> { %v508_v0 = vpack.c.bf16 %v507_v63, %v507_v63 }
  0xc1   : >> { %v499_v1 = vpop.f32.mrf.mxu0 }
  0xc2   : >> { %511 = vst [vmem:[%s510_s27] sm:$0xf] %v508_v0 }
  0xc3 PF: > { %s13_s14 = sadd.s32 1, %s785_s14   ;;  %s914_s12 = smov %s781_s13 }
  0xc4   : > { %p10_p6 = scmp.ge.s32.totalorder %s13_s14, 4   ;;  %s915_s13 = smov %s917_s15 }
  0xc6   :  { %12 = sbr.rel (!%p10_p6) target bundleno = 2 (0x2), region = 92 }

// kernel: _lambda_.20
= control target key start
LH: loop header
LB: loop body
LE: loop exit
PB: predicated region body
PF: predicated region fallthrough
CT: control target
= control target key end

     0   :  { %s470_s12 = smov 0   ;;  %s521_s0 = inlined_call_operand.vmem [shape: bf16[32,144], index: 0, kind: input, shape index: {}]   ;;  %s522_s1 = inlined_call_operand.vmem [shape: bf16[144,128], index: 1, kind: input, shape index: {}]   ;;  %s523_s2 = inlined_call_operand.vmem [shape: f32[1,128], index: 2, kind: input, shape index: {}]   ;;  %s524_s3 = inlined_call_operand.vmem [shape: bf16[32,128], index: 3, kind: output, shape index: {}]  }
   0x1 LB: > { %s359_s13 = sadd.s32 4294967295, %s448_s12   ;;  %p363_p0 = scmp.ge.s32.totalorder %s448_s12, 1  ;;  %s448_s12 = sphi %s470_s12, %s13_s12  }
   0x2   : > { %p139_p1 = scmp.lt.s32.totalorder %s448_s12, 3 }
   0x4   : > { %p140_p2 = pnand %p363_p0, %p139_p1 }
   0x5   : > { %s364_s16 = sshll.u32 (!%p140_p2), %s359_s13, 1 }
   0x6   : > { %143 = sbr.rel (%p140_p2) target bundleno = 186 (0xba), region = 32  ;;  %p165_p3 = scmp.lt.s32.totalorder (!%p140_p2), %s364_s16, 3 }
   0xb   : > { %v426_v0 = vld [vmem:[%s522_s1 + $0x38] sm:$0xff]  ;;  %v425_v1 = vld [vmem:[%s522_s1 + $0x30] sm:$0xff]  ;;  %v427_v2 = vld [vmem:[%s522_s1 + $0x40] sm:$0xff]  ;;  %s526_s16 = smov (!%p165_p3, %s364_s16), 3  ;;  %vm265_vm0 = vcmask 130048  }
   0xc   : > { %269 = vmatpush.bf16.msra.mxu0 %v426_v0  ;;  %290 = vmatpush.bf16.msra.mxu1 %v427_v2  ;;  %s416_s21 = sshll.u32 %s526_s16, 3  ;;  %v424_v3 = vld [vmem:[%s522_s1 + $0x28] sm:$0xff]  ;;  %v423_v7 = vld [vmem:[%s522_s1 + $0x20] sm:$0xff]  ;;  %v422_v8 = vld [vmem:[%s522_s1 + $0x18] sm:$0xff]  ;;  %s368_s13 = sshll.u32 %s526_s16, 2 }
   0xd   : > { %s169_s26 = scalar_lea.vmem %s521_s0, %s416_s21  ;;  %v421_v9 = vld [vmem:[%s522_s1 + $0x10] sm:$0xff]  ;;  %v420_v10 = vld [vmem:[%s522_s1 + $0x8] sm:$0xff]  ;;  %v419_v11 = vld [vmem:[%s522_s1] sm:$0xff]  ;;  %s175_s17 = scalar_lea.vmem %s524_s3, %s368_s13 }
   0xe   : > { %v417_v4 = vld [vmem:[%s169_s26 + $0x4] sm:$0xf]  ;;  %v373_v5 = vld [vmem:[%s169_s26 + $0x8] sm:$0xf0]  ;;  %v371_v12 = vld [vmem:[%s169_s26] sm:$0xf] }
   0xf   : > { %v376_v6 = vor.u32 %v417_v4, %v373_v5  ;;  %v418_v13 = vld [vmem:[%s169_s26 + $0x4] sm:$0xf0]  ;;  %v441_v17 = vld [vmem:[%s523_s2] ss:$0 sm:$0xff] }
  0x10   : > { %270 = vmatpush.bf16.msra.mxu0 %v425_v1  ;;  %v372_v14 = vor.u32 %v418_v13, %v371_v12 }
  0x11   : > { %413 = vmatmul.msk.bf16.vlgmr.msra.gmra.mxu1 %vm265_vm0, %v376_v6 }
  0x14   : > { %271 = vmatpush.bf16.msra.mxu0 %v424_v3 }
  0x18   : > { %272 = vmatpush.bf16.msra.mxu0 %v423_v7 }
  0x1c   : > { %273 = vmatpush.bf16.msra.mxu0 %v422_v8 }
  0x20   : > { %274 = vmatpush.bf16.msra.mxu0 %v421_v9 }
  0x24   : > { %275 = vmatpush.bf16.msra.mxu0 %v420_v10 }
  0x28   : > { %276 = vmatpush.bf16.msra.mxu0 %v419_v11 }
  0x2b   : > { %277 = vmatmul.bf16.vlgmr.msra.gmra.mxu0 %v372_v14 }
  0x8e   : > { %v292_v15 = vpop.f32.mrf.mxu1 }
  0x96   : > { %v294_v22 = vpop.f32.mrf.mxu1 }
  0xa8   : > { %v278_v16 = vpop.f32.mrf.mxu0 }
  0xa9   : > { %v279_v18 = vadd.f32 %v441_v17, %v278_v16 }
  0xab   : > { %v293_v20 = vadd.f32 %v292_v15, %v279_v18 }
  0xad   : > { %v297_v24 = vmax.f32 %v293_v20, 0.0 }
  0xb0   : > { %v280_v19 = vpop.f32.mrf.mxu0 }
  0xb1   : > { %v281_v21 = vadd.f32 %v441_v17, %v280_v19 }
  0xb3   : > { %v295_v23 = vadd.f32 %v294_v22, %v281_v21 }
  0xb5   : > { %v298_v25 = vmax.f32 %v295_v23, 0.0 }
  0xb7   : > { %v431_v26 = vpack.c.bf16 %v298_v25, %v297_v24 }
  0xb9   : > { %432 = vst [vmem:[%s175_s17] sm:$0xff] %v431_v26  }
  0xba PF: > { %s13_s12 = sadd.s32 1, %s448_s12  }
  0xbb   : > { %p10_p4 = scmp.ge.s32.totalorder %s13_s12, 4  }
  0xbd   :  { %12 = sbr.rel (!%p10_p4) target bundleno = 1 (0x1), region = 62 }

// kernel: _lambda_.21
= control target key start
LH: loop header
LB: loop body
LE: loop exit
PB: predicated region body
PF: predicated region fallthrough
CT: control target
= control target key end

     0   :  { %s913_s12 = smov 0   ;;  %s915_s13 = smov 0   ;;  %s1028_s0 = inlined_call_operand.vmem [shape: bf16[2,1,6,6,32], index: 0, kind: input, shape index: {}]   ;;  %s1029_s1 = inlined_call_operand.vmem [shape: bf16[3,3,32,128], index: 1, kind: input, shape index: {}]   ;;  %s1030_s2 = inlined_call_operand.vmem [shape: f32[1,128], index: 2, kind: input, shape index: {}]   ;;  %s1031_s3 = inlined_call_operand.vmem [shape: bf16[2,1,4,4,128], index: 3, kind: output, shape index: {}]  }
   0x1   :  { %s917_s14 = smov 0  }
   0x2 LB: > { %s25_s15 = sadd.s32 1, %s883_s13  ;;  %p683_p0 = scmp.ge.s32.totalorder %s887_s14, 1  ;;  %s887_s14 = sphi %s917_s14, %s13_s14   ;;  %s883_s13 = sphi %s915_s13, %s1033_s13   ;;  %s879_s12 = sphi %s913_s12, %s1032_s12  }
   0x3   : > { %p27_p1 = scmp.ge.s32.totalorder %s25_s15, 2  ;;  %p157_p2 = scmp.lt.s32.totalorder %s887_s14, 3 }
   0x5   : > { %s1035_s15 = smov (%p27_p1, %s25_s15), 0  ;;  %p158_p3 = pnand %p683_p0, %p157_p2 }
   0x6   : > { %p189_p4 = scmp.lt.s32.totalorder (!%p158_p3), %s879_s12, 1  ;;  %s941_s24 = smov (!%p158_p3), 0  }
   0x7   : > { %161 = sbr.rel (%p158_p3) target bundleno = 198 (0xc6), region = 32 }
   0xc   : > { %s1037_s12 = smov (!%p189_p4, %s879_s12), 1 }
   0xd   : > { %s827_s16 = smul.u32 24, %s1037_s12  ;;  %s808_s17 = sshll.u32 %s1037_s12, 3 }
   0xe   : > { %s934_s20 = scalar_lea.vmem %s1031_s3, %s808_s17 }
   0xf   : > { %s939_s23 = scalar_lea.vmem %s1028_s0, %s827_s16 }
  0x10 LB: >> { %v814_v0 = vld [vmem:[%s1029_s1 + $0x28] sm:$0xff]  ;;  %v816_v1 = vld [vmem:[%s1029_s1 + $0x38] sm:$0xff]  ;;  %v813_v4 = vld [vmem:[%s1029_s1 + $0x20] sm:$0xff]  ;;  %s687_s10 = sshll.u32 %s891_s24, 2  ;;  %vm248_vm0 = vcmask 261120   ;;  %s805_s21 = sshll.u32 %s891_s24, 1  ;;  %s891_s24 = sphi %s941_s24, %s213_s24  }
  0x11   : >> { %v812_v2 = vld [vmem:[%s1029_s1 + $0x18] sm:$0xff]  ;;  %v810_v3 = vld [vmem:[%s1029_s1 + $0x8] sm:$0xff]  ;;  %320 = vmatpush.bf16.msra.mxu2 %v814_v0  ;;  %358 = vmatpush.bf16.msra.mxu3 %v816_v1  ;;  %v815_v5 = vld [vmem:[%s1029_s1 + $0x30] sm:$0xff]  ;;  %s215_s11 = scalar_lea.vmem %s939_s23, %s687_s10  ;;  %s570_s22 = scalar_lea.vmem %s934_s20, %s805_s21 }
  0x12   : >> { %258 = vmatpush.bf16.msra.mxu0 %v812_v2  ;;  %286 = vmatpush.bf16.msra.mxu1 %v810_v3  ;;  %v811_v6 = vld [vmem:[%s1029_s1 + $0x10] sm:$0xff]  ;;  %v809_v7 = vld [vmem:[%s1029_s1] sm:$0xff]  ;;  %v818_v9 = vld [vmem:[%s1029_s1 + $0x48] sm:$0xff]  ;;  %s213_s24 = sadd.s32 1, %s891_s24  }
  0x13   : >> { %v216_v8 = vld [vmem:[%s215_s11] sm:$0x7]  ;;  %v822_v10 = vld [vmem:[%s1029_s1 + $0x68] sm:$0xff]  ;;  %v820_v12 = vld [vmem:[%s1029_s1 + $0x58] sm:$0xff]  ;;  %p210_p5 = scmp.ge.s32.totalorder %s213_s24, 4  }
  0x14   : >> { %v227_v11 = vunpack.c.l.b16 %v216_v8  ;;  %v765_v13 = vld [vmem:[%s215_s11 + $0x8] sm:$0x7]  ;;  %v724_v14 = vld [vmem:[%s215_s11 + $0x4] sm:$0x7]  ;;  %v824_v15 = vld [vmem:[%s1029_s1 + $0x78] sm:$0xff] }
  0x15   : >> { %321 = vmatpush.bf16.msra.mxu2 %v813_v4  ;;  %359 = vmatpush.bf16.msra.mxu3 %v815_v5  ;;  %v489_v16 = vunpack.c.l.b16 %v765_v13  ;;  %v817_v18 = vld [vmem:[%s1029_s1 + $0x40] sm:$0xff]  ;;  %v819_v22 = vld [vmem:[%s1029_s1 + $0x50] sm:$0xff]  ;;  %v372_v26 = vunpack.c.l.b16 %v724_v14  ;;  %v826_v29 = vld [vmem:[%s1029_s1 + $0x88] sm:$0xff] }
  0x16   : >> { %v228_v17 = vpack.c.b16 %v227_v11, %v227_v11  ;;  %259 = vmatpush.bf16.msra.mxu0 %v811_v6  ;;  %287 = vmatpush.bf16.msra.mxu1 %v809_v7  ;;  %v821_v19 = vld [vmem:[%s1029_s1 + $0x60] sm:$0xff]  ;;  %v823_v25 = vld [vmem:[%s1029_s1 + $0x70] sm:$0xff] }
  0x17   : >> { %v490_v21 = vpack.c.b16 %v489_v16, %v489_v16  ;;  %v373_v31 = vpack.c.b16 %v372_v26, %v372_v26  ;;  %v825_v34 = vld [vmem:[%s1029_s1 + $0x80] sm:$0xff] }
  0x18   : >> { %v298_v20 = vrot.slane %v228_v17, 1  ;;  %737 = vmatmul.msk.bf16.vlgmr.msra.gmra.mxu3 %vm248_vm0, %v724_v14  ;;  %v230_v23 = vshrl.u32 %v228_v17, 16  ;;  %v232_v24 = vshll.u32 %v228_v17, 16  ;;  %v860_v1 = vld [vmem:[%s1030_s2] ss:$0 sm:$0xff] }
  0x19   : >> { %475 = vmatpush.bf16.msrb.mxu2 %v822_v10  ;;  %709 = vmatmul.msk.bf16.vlgmr.msra.gmra.mxu1 %vm248_vm0, %v216_v8  ;;  %v494_v28 = vshll.u32 %v490_v21, 16  ;;  %v492_v32 = vshrl.u32 %v490_v21, 16  ;;  %v377_v35 = vshll.u32 %v373_v31, 16  ;;  %v415_v37 = vrot.slane %v373_v31, 1 }
  0x1a   : >> { %402 = vmatpush.bf16.msrb.mxu0 %v818_v9  ;;  %437 = vmatpush.bf16.msrb.mxu1 %v820_v12  ;;  %v234_v27 = vrot.slane %v232_v24, 1  ;;  %v375_v38 = vshrl.u32 %v373_v31, 16  ;;  %v532_v41 = vrot.slane %v490_v21, 1 }
  0x1b   : >> { %519 = vmatpush.bf16.msrb.mxu3 %v824_v15  ;;  %722 = vmatmul.msk.bf16.vlgmr.msra.gmra.mxu2 %vm248_vm0, %v298_v20  ;;  %v496_v33 = vrot.slane %v494_v28, 1  ;;  %v379_v39 = vrot.slane %v377_v35, 1 }
  0x1c   : >> { %v235_v30 = vor.u32 %v234_v27, %v230_v23 }
  0x1d   : >> { %476 = vmatpush.bf16.msrb.mxu2 %v821_v19  ;;  %v497_v36 = vor.u32 %v496_v33, %v492_v32  ;;  %v380_v40 = vor.u32 %v379_v39, %v375_v38 }
  0x1e   : >> { %403 = vmatpush.bf16.msrb.mxu0 %v817_v18  ;;  %438 = vmatpush.bf16.msrb.mxu1 %v819_v22 }
  0x1f   : >> { %520 = vmatpush.bf16.msrb.mxu3 %v823_v25  ;;  %700 = vmatmul.msk.bf16.vlgmr.msra.gmra.mxu0 %vm248_vm0, %v235_v30 }
  0x22   : >> { %554 = vmatpush.bf16.msra.mxu0 %v826_v29 }
  0x26   : >> { %555 = vmatpush.bf16.msra.mxu0 %v825_v34 }
  0x28   : >> { %791 = vmatmul.msk.bf16.vlgmr.msrb.gmra.mxu3 %vm248_vm0, %v497_v36 }
  0x29   : >> { %763 = vmatmul.msk.bf16.vlgmr.msrb.gmra.mxu1 %vm248_vm0, %v415_v37 }
  0x2b   : >> { %778 = vmatmul.msk.bf16.vlgmr.msrb.gmra.mxu2 %vm248_vm0, %v765_v13 }
  0x2f   : >> { %750 = vmatmul.msk.bf16.vlgmr.msrb.gmra.mxu0 %vm248_vm0, %v380_v40 }
  0x3f   : >> { %804 = vmatmul.msk.bf16.vlgmr.msra.gmra.mxu0 %vm248_vm0, %v532_v41 }
  0x96   : >> { %v289_v42 = vpop.f32.mrf.mxu1 }
  0x9b   : >> { %v361_v43 = vpop.f32.mrf.mxu3 }
  0x9c   : >> { %v261_v44 = vpop.f32.mrf.mxu0 }
  0x9d   : >> { %v290_v49 = vadd.f32 %v289_v42, %v261_v44 }
  0x9e   : >> { %v323_v45 = vpop.f32.mrf.mxu2  ;;  %v291_v46 = vpop.f32.mrf.mxu1 }
  0x9f   : >> { %v327_v52 = vadd.f32 %v323_v45, %v290_v49 }
  0xa1   : >> { %v365_v55 = vadd.f32 %v361_v43, %v327_v52 }
  0xa3   : >> { %v363_v47 = vpop.f32.mrf.mxu3 }
  0xa4   : >> { %v263_v48 = vpop.f32.mrf.mxu0 }
  0xa6   : >> { %v325_v50 = vpop.f32.mrf.mxu2  ;;  %v440_v51 = vpop.f32.mrf.mxu1 }
  0xab   : >> { %v522_v53 = vpop.f32.mrf.mxu3 }
  0xac   : >> { %v405_v54 = vpop.f32.mrf.mxu0 }
  0xad   : >> { %v409_v58 = vadd.f32 %v405_v54, %v365_v55 }
  0xae   : >> { %v478_v56 = vpop.f32.mrf.mxu2  ;;  %v442_v57 = vpop.f32.mrf.mxu1 }
  0xaf   : >> { %v444_v59 = vadd.f32 %v440_v51, %v409_v58 }
  0xb1   : >> { %v482_v63 = vadd.f32 %v478_v56, %v444_v59 }
  0xb3   : >> { %v524_v60 = vpop.f32.mrf.mxu3  ;;  %v526_v0 = vadd.f32 %v522_v53, %v482_v63 }
  0xb4   : >> { %v407_v61 = vpop.f32.mrf.mxu0 }
  0xb6   : >> { %v480_v62 = vpop.f32.mrf.mxu2 }
  0xbc   : >> { %v557_v2 = vpop.f32.mrf.mxu0 }
  0xbd   : >> { %v561_v3 = vadd.f32 %v557_v2, %v526_v0 }
  0xbf   : >> { %v566_v4 = vadd.f32 %v860_v1, %v561_v3 }
  0xc1   : >> { %v567_v5 = vmax.f32 %v566_v4, 0.0  ;;  %212 = sbr.rel (!%p210_p5) target bundleno = 16 (0x10), region = 81 }
  0xc3   : >> { %v568_v6 = vpack.c.bf16 %v567_v5, %v567_v5 }
  0xc4   : >> { %v559_v7 = vpop.f32.mrf.mxu0 }
  0xc5   : >> { %571 = vst [vmem:[%s570_s22] sm:$0x3] %v568_v6 }
  0xc6 PF: > { %s13_s14 = sadd.s32 1, %s887_s14   ;;  %s1032_s12 = smov %s883_s13 }
  0xc7   : > { %p10_p6 = scmp.ge.s32.totalorder %s13_s14, 4   ;;  %s1033_s13 = smov %s1035_s15 }
  0xc9   :  { %12 = sbr.rel (!%p10_p6) target bundleno = 2 (0x2), region = 92 }

// kernel: _lambda_.23
= control target key start
LH: loop header
LB: loop body
LE: loop exit
PB: predicated region body
PF: predicated region fallthrough
CT: control target
= control target key end

     0   :  { %s896_s12 = smov 0   ;;  %s898_s13 = smov 0   ;;  %s1011_s0 = inlined_call_operand.vmem [shape: bf16[2,1,8,8,32], index: 0, kind: input, shape index: {}]   ;;  %s1012_s1 = inlined_call_operand.vmem [shape: bf16[3,3,32,128], index: 1, kind: input, shape index: {}]   ;;  %s1013_s2 = inlined_call_operand.vmem [shape: f32[1,128], index: 2, kind: input, shape index: {}]   ;;  %s1014_s3 = inlined_call_operand.vmem [shape: bf16[2,1,4,4,128], index: 3, kind: output, shape index: {}]  }
   0x1   :  { %s900_s14 = smov 0  }
   0x2 LB: > { %s25_s15 = sadd.s32 1, %s866_s13  ;;  %p665_p0 = scmp.ge.s32.totalorder %s870_s14, 1  ;;  %s870_s14 = sphi %s900_s14, %s13_s14   ;;  %s866_s13 = sphi %s898_s13, %s1016_s13   ;;  %s862_s12 = sphi %s896_s12, %s1015_s12  }
   0x3   : > { %p27_p1 = scmp.ge.s32.totalorder %s25_s15, 2  ;;  %p157_p2 = scmp.lt.s32.totalorder %s870_s14, 3 }
   0x5   : > { %s1018_s15 = smov (%p27_p1, %s25_s15), 0  ;;  %p158_p3 = pnand %p665_p0, %p157_p2 }
   0x6   : > { %p189_p4 = scmp.lt.s32.totalorder (!%p158_p3), %s862_s12, 1  ;;  %s924_s24 = smov (!%p158_p3), 0  }
   0x7   : > { %161 = sbr.rel (%p158_p3) target bundleno = 193 (0xc1), region = 32 }
   0xc   : > { %s1020_s12 = smov (!%p189_p4, %s862_s12), 1 }
   0xd   : > { %s791_s16 = sshll.u32 %s1020_s12, 5  ;;  %s792_s17 = sshll.u32 %s1020_s12, 3 }
   0xe   : > { %s917_s20 = scalar_lea.vmem %s1011_s0, %s791_s16  ;;  %s922_s23 = scalar_lea.vmem %s1014_s3, %s792_s17 }
   0xf LB: >> { %v796_v0 = vld [vmem:[%s1012_s1 + $0x18] sm:$0xff]  ;;  %v794_v1 = vld [vmem:[%s1012_s1 + $0x8] sm:$0xff]  ;;  %v795_v4 = vld [vmem:[%s1012_s1 + $0x10] sm:$0xff]  ;;  %s670_s10 = sshll.u32 %s874_s24, 2  ;;  %vm242_vm0 = vcmask 261120   ;;  %s788_s21 = sshll.u32 %s874_s24, 1  ;;  %s874_s24 = sphi %s924_s24, %s213_s24  }
  0x10   : >> { %v798_v2 = vld [vmem:[%s1012_s1 + $0x28] sm:$0xff]  ;;  %v800_v3 = vld [vmem:[%s1012_s1 + $0x38] sm:$0xff]  ;;  %252 = vmatpush.bf16.msra.mxu0 %v796_v0  ;;  %280 = vmatpush.bf16.msra.mxu1 %v794_v1  ;;  %v793_v5 = vld [vmem:[%s1012_s1] sm:$0xff]  ;;  %s215_s18 = scalar_lea.vmem %s917_s20, %s670_s10  ;;  %s552_s22 = scalar_lea.vmem %s922_s23, %s788_s21 }
  0x11   : >> { %314 = vmatpush.bf16.msra.mxu2 %v798_v2  ;;  %352 = vmatpush.bf16.msra.mxu3 %v800_v3  ;;  %v797_v6 = vld [vmem:[%s1012_s1 + $0x20] sm:$0xff]  ;;  %v799_v7 = vld [vmem:[%s1012_s1 + $0x30] sm:$0xff]  ;;  %v802_v9 = vld [vmem:[%s1012_s1 + $0x48] sm:$0xff]  ;;  %s213_s24 = sadd.s32 1, %s874_s24  }
  0x12   : >> { %v216_v8 = vld [vmem:[%s215_s18] sm:$0xf]  ;;  %v806_v10 = vld [vmem:[%s1012_s1 + $0x68] sm:$0xff]  ;;  %v808_v12 = vld [vmem:[%s1012_s1 + $0x78] sm:$0xff]  ;;  %p210_p5 = scmp.ge.s32.totalorder %s213_s24, 4  }
  0x13   : >> { %v227_v11 = vunpack.c.l.b16 %v216_v8  ;;  %v804_v13 = vld [vmem:[%s1012_s1 + $0x58] sm:$0xff]  ;;  %v707_v15 = vld [vmem:[%s215_s18 + $0x8] sm:$0xf]  ;;  %v801_v16 = vld [vmem:[%s1012_s1 + $0x40] sm:$0xff] }
  0x14   : >> { %253 = vmatpush.bf16.msra.mxu0 %v795_v4  ;;  %281 = vmatpush.bf16.msra.mxu1 %v793_v5  ;;  %v805_v17 = vld [vmem:[%s1012_s1 + $0x60] sm:$0xff]  ;;  %v807_v20 = vld [vmem:[%s1012_s1 + $0x70] sm:$0xff]  ;;  %v810_v21 = vld [vmem:[%s1012_s1 + $0x88] sm:$0xff]  ;;  %v366_v26 = vunpack.c.l.b16 %v707_v15 }
  0x15   : >> { %315 = vmatpush.bf16.msra.mxu2 %v797_v6  ;;  %353 = vmatpush.bf16.msra.mxu3 %v799_v7  ;;  %v228_v14 = vpack.c.b16 %v227_v11, %v227_v11  ;;  %v803_v22 = vld [vmem:[%s1012_s1 + $0x50] sm:$0xff]  ;;  %v809_v24 = vld [vmem:[%s1012_s1 + $0x80] sm:$0xff] }
  0x16   : >> { %v748_v23 = vld [vmem:[%s215_s18 + $0x10] sm:$0xf]  ;;  %v367_v28 = vpack.c.b16 %v366_v26, %v366_v26  ;;  %v843_v56 = vld [vmem:[%s1013_s2] ss:$0 sm:$0xff] }
  0x17   : >> { %v229_v18 = vrot.slane %v228_v14, 1  ;;  %692 = vmatmul.msk.bf16.vlgmr.msra.gmra.mxu1 %vm242_vm0, %v216_v8  ;;  %v292_v19 = vrot.slane %v228_v14, 2  ;;  %v477_v25 = vunpack.c.l.b16 %v748_v23 }
  0x18   : >> { %390 = vmatpush.bf16.msrb.mxu0 %v802_v9  ;;  %720 = vmatmul.msk.bf16.vlgmr.msra.gmra.mxu3 %vm242_vm0, %v707_v15  ;;  %v403_v29 = vrot.slane %v367_v28, 2  ;;  %v368_v31 = vrot.slane %v367_v28, 1 }
  0x19   : >> { %463 = vmatpush.bf16.msrb.mxu2 %v806_v10  ;;  %501 = vmatpush.bf16.msrb.mxu3 %v808_v12  ;;  %v478_v27 = vpack.c.b16 %v477_v25, %v477_v25 }
  0x1a   : >> { %425 = vmatpush.bf16.msrb.mxu1 %v804_v13  ;;  %683 = vmatmul.msk.bf16.vlgmr.msra.gmra.mxu0 %vm242_vm0, %v229_v18 }
  0x1b   : >> { %705 = vmatmul.msk.bf16.vlgmr.msra.gmra.mxu2 %vm242_vm0, %v292_v19  ;;  %v479_v30 = vrot.slane %v478_v27, 1  ;;  %v514_v32 = vrot.slane %v478_v27, 2 }
  0x1c   : >> { %391 = vmatpush.bf16.msrb.mxu0 %v801_v16 }
  0x1d   : >> { %464 = vmatpush.bf16.msrb.mxu2 %v805_v17  ;;  %502 = vmatpush.bf16.msrb.mxu3 %v807_v20 }
  0x1e   : >> { %426 = vmatpush.bf16.msrb.mxu1 %v803_v22 }
  0x20   : >> { %536 = vmatpush.bf16.msra.mxu0 %v810_v21 }
  0x24   : >> { %537 = vmatpush.bf16.msra.mxu0 %v809_v24 }
  0x27   : >> { %746 = vmatmul.msk.bf16.vlgmr.msrb.gmra.mxu1 %vm242_vm0, %v403_v29 }
  0x28   : >> { %774 = vmatmul.msk.bf16.vlgmr.msrb.gmra.mxu3 %vm242_vm0, %v479_v30 }
  0x2a   : >> { %733 = vmatmul.msk.bf16.vlgmr.msrb.gmra.mxu0 %vm242_vm0, %v368_v31 }
  0x2b   : >> { %761 = vmatmul.msk.bf16.vlgmr.msrb.gmra.mxu2 %vm242_vm0, %v748_v23 }
  0x3a   : >> { %787 = vmatmul.msk.bf16.vlgmr.msra.gmra.mxu0 %vm242_vm0, %v514_v32 }
  0x94   : >> { %v283_v33 = vpop.f32.mrf.mxu1 }
  0x97   : >> { %v255_v34 = vpop.f32.mrf.mxu0 }
  0x98   : >> { %v284_v39 = vadd.f32 %v283_v33, %v255_v34 }
  0x9b   : >> { %v355_v35 = vpop.f32.mrf.mxu3 }
  0x9c   : >> { %v285_v37 = vpop.f32.mrf.mxu1 }
  0x9e   : >> { %v317_v36 = vpop.f32.mrf.mxu2 }
  0x9f   : >> { %v257_v38 = vpop.f32.mrf.mxu0  ;;  %v321_v43 = vadd.f32 %v317_v36, %v284_v39 }
  0xa1   : >> { %v359_v45 = vadd.f32 %v355_v35, %v321_v43 }
  0xa3   : >> { %v357_v40 = vpop.f32.mrf.mxu3 }
  0xa4   : >> { %v428_v42 = vpop.f32.mrf.mxu1 }
  0xa6   : >> { %v319_v41 = vpop.f32.mrf.mxu2 }
  0xa7   : >> { %v393_v44 = vpop.f32.mrf.mxu0 }
  0xa8   : >> { %v397_v46 = vadd.f32 %v393_v44, %v359_v45 }
  0xaa   : >> { %v432_v51 = vadd.f32 %v428_v42, %v397_v46 }
  0xab   : >> { %v504_v47 = vpop.f32.mrf.mxu3 }
  0xac   : >> { %v430_v49 = vpop.f32.mrf.mxu1 }
  0xae   : >> { %v466_v48 = vpop.f32.mrf.mxu2 }
  0xaf   : >> { %v395_v50 = vpop.f32.mrf.mxu0  ;;  %v470_v52 = vadd.f32 %v466_v48, %v432_v51 }
  0xb1   : >> { %v508_v55 = vadd.f32 %v504_v47, %v470_v52 }
  0xb3   : >> { %v506_v53 = vpop.f32.mrf.mxu3 }
  0xb6   : >> { %v468_v54 = vpop.f32.mrf.mxu2 }
  0xb7   : >> { %v539_v57 = vpop.f32.mrf.mxu0 }
  0xb8   : >> { %v543_v58 = vadd.f32 %v539_v57, %v508_v55 }
  0xba   : >> { %v548_v59 = vadd.f32 %v843_v56, %v543_v58 }
  0xbc   : >> { %v549_v60 = vmax.f32 %v548_v59, 0.0  ;;  %212 = sbr.rel (!%p210_p5) target bundleno = 15 (0xf), region = 81 }
  0xbe   : >> { %v550_v61 = vpack.c.bf16 %v549_v60, %v549_v60 }
  0xbf   : >> { %v541_v62 = vpop.f32.mrf.mxu0 }
  0xc0   : >> { %553 = vst [vmem:[%s552_s22] sm:$0x3] %v550_v61 }
  0xc1 PF: > { %s13_s14 = sadd.s32 1, %s870_s14   ;;  %s1015_s12 = smov %s866_s13 }
  0xc2   : > { %p10_p6 = scmp.ge.s32.totalorder %s13_s14, 4   ;;  %s1016_s13 = smov %s1018_s15 }
  0xc4   :  { %12 = sbr.rel (!%p10_p6) target bundleno = 2 (0x2), region = 92 }

// kernel: _lambda_.24
= control target key start
LH: loop header
LB: loop body
LE: loop exit
PB: predicated region body
PF: predicated region fallthrough
CT: control target
= control target key end

     0   :  { %s902_s12 = smov 0   ;;  %s904_s13 = smov 0   ;;  %s1025_s0 = inlined_call_operand.vmem [shape: bf16[2,1,12,12,32], index: 0, kind: input, shape index: {}]   ;;  %s1026_s1 = inlined_call_operand.vmem [shape: bf16[3,3,32,128], index: 1, kind: input, shape index: {}]   ;;  %s1027_s2 = inlined_call_operand.vmem [shape: f32[1,128], index: 2, kind: input, shape index: {}]   ;;  %s1028_s3 = inlined_call_operand.vmem [shape: bf16[2,1,4,4,128], index: 3, kind: output, shape index: {}]  }
   0x1   :  { %s906_s14 = smov 0  }
   0x2 LB: > { %s25_s15 = sadd.s32 1, %s872_s13  ;;  %p668_p0 = scmp.ge.s32.totalorder %s876_s14, 1  ;;  %s876_s14 = sphi %s906_s14, %s13_s14   ;;  %s872_s13 = sphi %s904_s13, %s1030_s13   ;;  %s868_s12 = sphi %s902_s12, %s1029_s12  }
   0x3   : > { %p27_p1 = scmp.ge.s32.totalorder %s25_s15, 2  ;;  %p157_p2 = scmp.lt.s32.totalorder %s876_s14, 3 }
   0x5   : > { %s1032_s15 = smov (%p27_p1, %s25_s15), 0  ;;  %p158_p3 = pnand %p668_p0, %p157_p2 }
   0x6   : > { %p189_p4 = scmp.lt.s32.totalorder (!%p158_p3), %s868_s12, 1  ;;  %s930_s24 = smov (!%p158_p3), 0  }
   0x7   : > { %161 = sbr.rel (%p158_p3) target bundleno = 194 (0xc2), region = 32 }
   0xc   : > { %s1034_s12 = smov (!%p189_p4, %s868_s12), 1 }
   0xd   : > { %s816_s16 = smul.u32 96, %s1034_s12  ;;  %s796_s17 = sshll.u32 %s1034_s12, 3 }
   0xe   : > { %s923_s20 = scalar_lea.vmem %s1028_s3, %s796_s17 }
   0xf   : > { %s928_s23 = scalar_lea.vmem %s1025_s0, %s816_s16 }
  0x10 LB: >> { %v803_v0 = vld [vmem:[%s1026_s1 + $0x28] sm:$0xff]  ;;  %v801_v1 = vld [vmem:[%s1026_s1 + $0x18] sm:$0xff]  ;;  %v802_v4 = vld [vmem:[%s1026_s1 + $0x20] sm:$0xff]  ;;  %s797_s10 = sshll.u32 %s880_s24, 3  ;;  %vm244_vm0 = vcmask 261120   ;;  %s793_s21 = sshll.u32 %s880_s24, 1  ;;  %s880_s24 = sphi %s930_s24, %s213_s24  }
  0x11   : >> { %v799_v2 = vld [vmem:[%s1026_s1 + $0x8] sm:$0xff]  ;;  %v805_v3 = vld [vmem:[%s1026_s1 + $0x38] sm:$0xff]  ;;  %315 = vmatpush.bf16.msra.mxu2 %v803_v0  ;;  %254 = vmatpush.bf16.msra.mxu0 %v801_v1  ;;  %v800_v5 = vld [vmem:[%s1026_s1 + $0x10] sm:$0xff]  ;;  %s961_s18 = scalar_lea.vmem %s928_s23, %s797_s10  ;;  %s555_s22 = scalar_lea.vmem %s923_s20, %s793_s21 }
  0x12   : >> { %282 = vmatpush.bf16.msra.mxu1 %v799_v2  ;;  %355 = vmatpush.bf16.msra.mxu3 %v805_v3  ;;  %v798_v6 = vld [vmem:[%s1026_s1] sm:$0xff]  ;;  %v804_v7 = vld [vmem:[%s1026_s1 + $0x30] sm:$0xff]  ;;  %v807_v9 = vld [vmem:[%s1026_s1 + $0x48] sm:$0xff]  ;;  %s213_s24 = sadd.s32 1, %s880_s24  }
  0x13   : >> { %v217_v8 = vld [vmem:[%s961_s18] sm:$0xf]  ;;  %v811_v10 = vld [vmem:[%s1026_s1 + $0x68] sm:$0xff]  ;;  %v813_v12 = vld [vmem:[%s1026_s1 + $0x78] sm:$0xff]  ;;  %p210_p5 = scmp.ge.s32.totalorder %s213_s24, 4  }
  0x14   : >> { %v229_v11 = vunpack.c.l.b16 %v217_v8  ;;  %v218_v13 = vld [vmem:[%s961_s18 + $0x4] sm:$0x3]  ;;  %v710_v15 = vld [vmem:[%s961_s18 + $0x20] sm:$0xf]  ;;  %v809_v16 = vld [vmem:[%s1026_s1 + $0x58] sm:$0xff] }
  0x15   : >> { %316 = vmatpush.bf16.msra.mxu2 %v802_v4  ;;  %255 = vmatpush.bf16.msra.mxu0 %v800_v5  ;;  %v806_v17 = vld [vmem:[%s1026_s1 + $0x40] sm:$0xff]  ;;  %v812_v20 = vld [vmem:[%s1026_s1 + $0x70] sm:$0xff]  ;;  %v815_v21 = vld [vmem:[%s1026_s1 + $0x88] sm:$0xff]  ;;  %v369_v26 = vunpack.c.l.b16 %v710_v15 }
  0x16   : >> { %283 = vmatpush.bf16.msra.mxu1 %v798_v6  ;;  %356 = vmatpush.bf16.msra.mxu3 %v804_v7  ;;  %v230_v14 = vpack.c.b16 %v229_v11, %v229_v11  ;;  %v810_v18 = vld [vmem:[%s1026_s1 + $0x60] sm:$0xff]  ;;  %v808_v22 = vld [vmem:[%s1026_s1 + $0x50] sm:$0xff] }
  0x17   : >> { %v752_v23 = vld [vmem:[%s961_s18 + $0x40] sm:$0xf]  ;;  %v370_v28 = vpack.c.b16 %v369_v26, %v369_v26  ;;  %v711_v31 = vld [vmem:[%s961_s18 + $0x24] sm:$0x3] }
  0x18   : >> { %708 = vmatmul.msk.bf16.vlgmr.msra.gmra.mxu2 %vm244_vm0, %v218_v13  ;;  %v231_v19 = vrot.slane %v230_v14, 2  ;;  %v814_v24 = vld [vmem:[%s1026_s1 + $0x80] sm:$0xff]  ;;  %v481_v25 = vunpack.c.l.b16 %v752_v23 }
  0x19   : >> { %393 = vmatpush.bf16.msrb.mxu0 %v807_v9  ;;  %467 = vmatpush.bf16.msrb.mxu2 %v811_v10  ;;  %v371_v30 = vrot.slane %v370_v28, 2  ;;  %v753_v32 = vld [vmem:[%s961_s18 + $0x44] sm:$0x3]  ;;  %v849_v56 = vld [vmem:[%s1027_s2] ss:$0 sm:$0xff] }
  0x1a   : >> { %505 = vmatpush.bf16.msrb.mxu3 %v813_v12  ;;  %695 = vmatmul.msk.bf16.vlgmr.msra.gmra.mxu1 %vm244_vm0, %v217_v8  ;;  %v482_v27 = vpack.c.b16 %v481_v25, %v481_v25 }
  0x1b   : >> { %724 = vmatmul.msk.bf16.vlgmr.msra.gmra.mxu3 %vm244_vm0, %v710_v15  ;;  %686 = vmatmul.msk.bf16.vlgmr.msra.gmra.mxu0 %vm244_vm0, %v231_v19 }
  0x1c   : >> { %427 = vmatpush.bf16.msrb.mxu1 %v809_v16  ;;  %v483_v29 = vrot.slane %v482_v27, 2 }
  0x1d   : >> { %394 = vmatpush.bf16.msrb.mxu0 %v806_v17  ;;  %468 = vmatpush.bf16.msrb.mxu2 %v810_v18 }
  0x1e   : >> { %506 = vmatpush.bf16.msrb.mxu3 %v812_v20 }
  0x20   : >> { %428 = vmatpush.bf16.msrb.mxu1 %v808_v22 }
  0x21   : >> { %539 = vmatpush.bf16.msra.mxu0 %v815_v21 }
  0x25   : >> { %540 = vmatpush.bf16.msra.mxu0 %v814_v24 }
  0x28   : >> { %766 = vmatmul.msk.bf16.vlgmr.msrb.gmra.mxu2 %vm244_vm0, %v752_v23 }
  0x2a   : >> { %750 = vmatmul.msk.bf16.vlgmr.msrb.gmra.mxu1 %vm244_vm0, %v711_v31 }
  0x2b   : >> { %779 = vmatmul.msk.bf16.vlgmr.msrb.gmra.mxu3 %vm244_vm0, %v483_v29  ;;  %737 = vmatmul.msk.bf16.vlgmr.msrb.gmra.mxu0 %vm244_vm0, %v371_v30 }
  0x3b   : >> { %792 = vmatmul.msk.bf16.vlgmr.msra.gmra.mxu0 %vm244_vm0, %v753_v32 }
  0x97   : >> { %v285_v33 = vpop.f32.mrf.mxu1 }
  0x98   : >> { %v257_v34 = vpop.f32.mrf.mxu0 }
  0x99   : >> { %v286_v39 = vadd.f32 %v285_v33, %v257_v34 }
  0x9b   : >> { %v318_v35 = vpop.f32.mrf.mxu2 }
  0x9c   : >> { %v322_v41 = vadd.f32 %v318_v35, %v286_v39 }
  0x9e   : >> { %v358_v36 = vpop.f32.mrf.mxu3 }
  0x9f   : >> { %v287_v37 = vpop.f32.mrf.mxu1  ;;  %v362_v45 = vadd.f32 %v358_v36, %v322_v41 }
  0xa0   : >> { %v259_v38 = vpop.f32.mrf.mxu0 }
  0xa3   : >> { %v320_v40 = vpop.f32.mrf.mxu2 }
  0xa6   : >> { %v360_v42 = vpop.f32.mrf.mxu3 }
  0xa7   : >> { %v430_v43 = vpop.f32.mrf.mxu1 }
  0xa8   : >> { %v396_v44 = vpop.f32.mrf.mxu0 }
  0xa9   : >> { %v400_v46 = vadd.f32 %v396_v44, %v362_v45 }
  0xab   : >> { %v470_v47 = vpop.f32.mrf.mxu2  ;;  %v434_v49 = vadd.f32 %v430_v43, %v400_v46 }
  0xad   : >> { %v474_v52 = vadd.f32 %v470_v47, %v434_v49 }
  0xae   : >> { %v508_v48 = vpop.f32.mrf.mxu3 }
  0xaf   : >> { %v432_v50 = vpop.f32.mrf.mxu1  ;;  %v512_v55 = vadd.f32 %v508_v48, %v474_v52 }
  0xb0   : >> { %v398_v51 = vpop.f32.mrf.mxu0 }
  0xb3   : >> { %v472_v53 = vpop.f32.mrf.mxu2 }
  0xb6   : >> { %v510_v54 = vpop.f32.mrf.mxu3 }
  0xb8   : >> { %v542_v57 = vpop.f32.mrf.mxu0 }
  0xb9   : >> { %v546_v58 = vadd.f32 %v542_v57, %v512_v55 }
  0xbb   : >> { %v551_v59 = vadd.f32 %v849_v56, %v546_v58 }
  0xbd   : >> { %v552_v60 = vmax.f32 %v551_v59, 0.0  ;;  %212 = sbr.rel (!%p210_p5) target bundleno = 16 (0x10), region = 81 }
  0xbf   : >> { %v553_v61 = vpack.c.bf16 %v552_v60, %v552_v60 }
  0xc0   : >> { %v544_v62 = vpop.f32.mrf.mxu0 }
  0xc1   : >> { %556 = vst [vmem:[%s555_s22] sm:$0x3] %v553_v61 }
  0xc2 PF: > { %s13_s14 = sadd.s32 1, %s876_s14   ;;  %s1029_s12 = smov %s872_s13 }
  0xc3   : > { %p10_p6 = scmp.ge.s32.totalorder %s13_s14, 4   ;;  %s1030_s13 = smov %s1032_s15 }
  0xc5   :  { %12 = sbr.rel (!%p10_p6) target bundleno = 2 (0x2), region = 92 }

// kernel: _lambda_.25
= control target key start
LH: loop header
LB: loop body
LE: loop exit
PB: predicated region body
PF: predicated region fallthrough
CT: control target
= control target key end

     0   :  { %s892_s12 = smov 0   ;;  %s894_s13 = smov 0   ;;  %s1018_s0 = inlined_call_operand.vmem [shape: bf16[2,1,20,20,32], index: 0, kind: input, shape index: {}]   ;;  %s1019_s1 = inlined_call_operand.vmem [shape: bf16[3,3,32,128], index: 1, kind: input, shape index: {}]   ;;  %s1020_s2 = inlined_call_operand.vmem [shape: f32[1,128], index: 2, kind: input, shape index: {}]   ;;  %s1021_s3 = inlined_call_operand.vmem [shape: bf16[2,1,4,4,128], index: 3, kind: output, shape index: {}]  }
   0x1   :  { %s896_s14 = smov 0  }
   0x2 LB: > { %s25_s15 = sadd.s32 1, %s862_s13  ;;  %p659_p0 = scmp.ge.s32.totalorder %s866_s14, 1  ;;  %s866_s14 = sphi %s896_s14, %s13_s14   ;;  %s862_s13 = sphi %s894_s13, %s1023_s13   ;;  %s858_s12 = sphi %s892_s12, %s1022_s12  }
   0x3   : > { %p27_p1 = scmp.ge.s32.totalorder %s25_s15, 2  ;;  %p157_p2 = scmp.lt.s32.totalorder %s866_s14, 3 }
   0x5   : > { %s1025_s15 = smov (%p27_p1, %s25_s15), 0  ;;  %p158_p3 = pnand %p659_p0, %p157_p2 }
   0x6   : > { %p189_p4 = scmp.lt.s32.totalorder (!%p158_p3), %s858_s12, 1  ;;  %s920_s24 = smov (!%p158_p3), 0  }
   0x7   : > { %161 = sbr.rel (%p158_p3) target bundleno = 191 (0xbf), region = 32 }
   0xc   : > { %s1027_s12 = smov (!%p189_p4, %s858_s12), 1 }
   0xd   : > { %s806_s16 = smul.u32 240, %s1027_s12  ;;  %s786_s17 = sshll.u32 %s1027_s12, 3 }
   0xe   : > { %s913_s20 = scalar_lea.vmem %s1021_s3, %s786_s17 }
   0xf   : > { %s918_s23 = scalar_lea.vmem %s1018_s0, %s806_s16 }
  0x10 LB: >> { %v791_v0 = vld [vmem:[%s1019_s1 + $0x18] sm:$0xff]  ;;  %v789_v1 = vld [vmem:[%s1019_s1 + $0x8] sm:$0xff]  ;;  %v790_v4 = vld [vmem:[%s1019_s1 + $0x10] sm:$0xff]  ;;  %s787_s10 = smul.u32 12, %s870_s24  ;;  %vm241_vm0 = vcmask 261120   ;;  %s783_s21 = sshll.u32 %s870_s24, 1  ;;  %s870_s24 = sphi %s920_s24, %s213_s24  }
  0x11   : >> { %v793_v2 = vld [vmem:[%s1019_s1 + $0x28] sm:$0xff]  ;;  %v795_v3 = vld [vmem:[%s1019_s1 + $0x38] sm:$0xff]  ;;  %251 = vmatpush.bf16.msra.mxu0 %v791_v0  ;;  %279 = vmatpush.bf16.msra.mxu1 %v789_v1  ;;  %v788_v5 = vld [vmem:[%s1019_s1] sm:$0xff]  ;;  %s546_s22 = scalar_lea.vmem %s913_s20, %s783_s21  ;;  %s213_s24 = sadd.s32 1, %s870_s24  }
  0x12   : >> { %312 = vmatpush.bf16.msra.mxu2 %v793_v2  ;;  %353 = vmatpush.bf16.msra.mxu3 %v795_v3  ;;  %v792_v6 = vld [vmem:[%s1019_s1 + $0x20] sm:$0xff]  ;;  %v794_v7 = vld [vmem:[%s1019_s1 + $0x30] sm:$0xff]  ;;  %s951_s18 = scalar_lea.vmem %s918_s23, %s787_s10  ;;  %v797_v8 = vld [vmem:[%s1019_s1 + $0x48] sm:$0xff]  ;;  %p210_p5 = scmp.ge.s32.totalorder %s213_s24, 4  }
  0x13   : >> { %v801_v9 = vld [vmem:[%s1019_s1 + $0x68] sm:$0xff]  ;;  %v218_v10 = vld [vmem:[%s951_s18 + $0x4] sm:$0xf]  ;;  %v217_v11 = vld [vmem:[%s951_s18] sm:$0xf] }
  0x14   : >> { %v803_v12 = vld [vmem:[%s1019_s1 + $0x78] sm:$0xff]  ;;  %v219_v13 = vld [vmem:[%s951_s18 + $0x8] sm:$0x3]  ;;  %v699_v14 = vld [vmem:[%s951_s18 + $0x60] sm:$0xf] }
  0x15   : >> { %252 = vmatpush.bf16.msra.mxu0 %v790_v4  ;;  %280 = vmatpush.bf16.msra.mxu1 %v788_v5  ;;  %v799_v15 = vld [vmem:[%s1019_s1 + $0x58] sm:$0xff]  ;;  %v796_v16 = vld [vmem:[%s1019_s1 + $0x40] sm:$0xff]  ;;  %v805_v18 = vld [vmem:[%s1019_s1 + $0x88] sm:$0xff] }
  0x16   : >> { %313 = vmatpush.bf16.msra.mxu2 %v792_v6  ;;  %354 = vmatpush.bf16.msra.mxu3 %v794_v7  ;;  %v800_v17 = vld [vmem:[%s1019_s1 + $0x60] sm:$0xff]  ;;  %v802_v19 = vld [vmem:[%s1019_s1 + $0x70] sm:$0xff]  ;;  %v701_v23 = vld [vmem:[%s951_s18 + $0x68] sm:$0x3] }
  0x17   : >> { %v798_v20 = vld [vmem:[%s1019_s1 + $0x50] sm:$0xff]  ;;  %v804_v21 = vld [vmem:[%s1019_s1 + $0x80] sm:$0xff]  ;;  %v743_v26 = vld [vmem:[%s951_s18 + $0xc8] sm:$0x3] }
  0x18   : >> { %676 = vmatmul.msk.bf16.vlgmr.msra.gmra.mxu0 %vm241_vm0, %v218_v10  ;;  %685 = vmatmul.msk.bf16.vlgmr.msra.gmra.mxu1 %vm241_vm0, %v217_v11  ;;  %v700_v22 = vld [vmem:[%s951_s18 + $0x64] sm:$0xf]  ;;  %v741_v24 = vld [vmem:[%s951_s18 + $0xc0] sm:$0xf] }
  0x19   : >> { %387 = vmatpush.bf16.msrb.mxu0 %v797_v8  ;;  %698 = vmatmul.msk.bf16.vlgmr.msra.gmra.mxu2 %vm241_vm0, %v219_v13  ;;  %v742_v25 = vld [vmem:[%s951_s18 + $0xc4] sm:$0xf]  ;;  %v839_v50 = vld [vmem:[%s1020_s2] ss:$0 sm:$0xff] }
  0x1a   : >> { %462 = vmatpush.bf16.msrb.mxu2 %v801_v9  ;;  %714 = vmatmul.msk.bf16.vlgmr.msra.gmra.mxu3 %vm241_vm0, %v699_v14 }
  0x1b   : >> { %496 = vmatpush.bf16.msrb.mxu3 %v803_v12  ;;  %421 = vmatpush.bf16.msrb.mxu1 %v799_v15 }
  0x1d   : >> { %388 = vmatpush.bf16.msrb.mxu0 %v796_v16 }
  0x1e   : >> { %463 = vmatpush.bf16.msrb.mxu2 %v800_v17 }
  0x1f   : >> { %497 = vmatpush.bf16.msrb.mxu3 %v802_v19  ;;  %422 = vmatpush.bf16.msrb.mxu1 %v798_v20 }
  0x21   : >> { %530 = vmatpush.bf16.msra.mxu0 %v805_v18 }
  0x25   : >> { %531 = vmatpush.bf16.msra.mxu0 %v804_v21 }
  0x28   : >> { %727 = vmatmul.msk.bf16.vlgmr.msrb.gmra.mxu0 %vm241_vm0, %v700_v22  ;;  %740 = vmatmul.msk.bf16.vlgmr.msrb.gmra.mxu1 %vm241_vm0, %v701_v23 }
  0x29   : >> { %756 = vmatmul.msk.bf16.vlgmr.msrb.gmra.mxu2 %vm241_vm0, %v741_v24 }
  0x2a   : >> { %769 = vmatmul.msk.bf16.vlgmr.msrb.gmra.mxu3 %vm241_vm0, %v742_v25 }
  0x38   : >> { %782 = vmatmul.msk.bf16.vlgmr.msra.gmra.mxu0 %vm241_vm0, %v743_v26 }
  0x95   : >> { %v254_v27 = vpop.f32.mrf.mxu0  ;;  %v282_v28 = vpop.f32.mrf.mxu1 }
  0x96   : >> { %v283_v33 = vadd.f32 %v282_v28, %v254_v27 }
  0x9c   : >> { %v315_v29 = vpop.f32.mrf.mxu2 }
  0x9d   : >> { %v356_v30 = vpop.f32.mrf.mxu3  ;;  %v256_v31 = vpop.f32.mrf.mxu0  ;;  %v319_v34 = vadd.f32 %v315_v29, %v283_v33 }
  0x9e   : >> { %v284_v32 = vpop.f32.mrf.mxu1 }
  0x9f   : >> { %v360_v39 = vadd.f32 %v356_v30, %v319_v34 }
  0xa4   : >> { %v317_v35 = vpop.f32.mrf.mxu2 }
  0xa5   : >> { %v358_v36 = vpop.f32.mrf.mxu3  ;;  %v390_v37 = vpop.f32.mrf.mxu0 }
  0xa6   : >> { %v424_v38 = vpop.f32.mrf.mxu1  ;;  %v394_v40 = vadd.f32 %v390_v37, %v360_v39 }
  0xa8   : >> { %v428_v45 = vadd.f32 %v424_v38, %v394_v40 }
  0xac   : >> { %v465_v41 = vpop.f32.mrf.mxu2 }
  0xad   : >> { %v499_v42 = vpop.f32.mrf.mxu3  ;;  %v392_v43 = vpop.f32.mrf.mxu0  ;;  %v469_v46 = vadd.f32 %v465_v41, %v428_v45 }
  0xae   : >> { %v426_v44 = vpop.f32.mrf.mxu1 }
  0xaf   : >> { %v503_v47 = vadd.f32 %v499_v42, %v469_v46 }
  0xb4   : >> { %v467_v48 = vpop.f32.mrf.mxu2 }
  0xb5   : >> { %v501_v49 = vpop.f32.mrf.mxu3  ;;  %v533_v51 = vpop.f32.mrf.mxu0 }
  0xb6   : >> { %v537_v52 = vadd.f32 %v533_v51, %v503_v47 }
  0xb8   : >> { %v542_v53 = vadd.f32 %v839_v50, %v537_v52 }
  0xba   : >> { %v543_v54 = vmax.f32 %v542_v53, 0.0  ;;  %212 = sbr.rel (!%p210_p5) target bundleno = 16 (0x10), region = 81 }
  0xbc   : >> { %v544_v55 = vpack.c.bf16 %v543_v54, %v543_v54 }
  0xbd   : >> { %v535_v56 = vpop.f32.mrf.mxu0 }
  0xbe   : >> { %547 = vst [vmem:[%s546_s22] sm:$0x3] %v544_v55 }
  0xbf PF: > { %s13_s14 = sadd.s32 1, %s866_s14   ;;  %s1022_s12 = smov %s862_s13 }
  0xc0   : > { %p10_p6 = scmp.ge.s32.totalorder %s13_s14, 4   ;;  %s1023_s13 = smov %s1025_s15 }
  0xc2   :  { %12 = sbr.rel (!%p10_p6) target bundleno = 2 (0x2), region = 92 }

// kernel: _lambda_.26
= control target key start
LH: loop header
LB: loop body
LE: loop exit
PB: predicated region body
PF: predicated region fallthrough
CT: control target
= control target key end

     0   :  { %s892_s12 = smov 0   ;;  %s894_s13 = smov 0   ;;  %s1018_s0 = inlined_call_operand.vmem [shape: bf16[2,1,36,36,32], index: 0, kind: input, shape index: {}]   ;;  %s1019_s1 = inlined_call_operand.vmem [shape: bf16[3,3,32,128], index: 1, kind: input, shape index: {}]   ;;  %s1020_s2 = inlined_call_operand.vmem [shape: f32[1,128], index: 2, kind: input, shape index: {}]   ;;  %s1021_s3 = inlined_call_operand.vmem [shape: bf16[2,1,4,4,128], index: 3, kind: output, shape index: {}]  }
   0x1   :  { %s896_s14 = smov 0  }
   0x2 LB: > { %s25_s15 = sadd.s32 1, %s862_s13  ;;  %p659_p0 = scmp.ge.s32.totalorder %s866_s14, 1  ;;  %s866_s14 = sphi %s896_s14, %s13_s14   ;;  %s862_s13 = sphi %s894_s13, %s1023_s13   ;;  %s858_s12 = sphi %s892_s12, %s1022_s12  }
   0x3   : > { %p27_p1 = scmp.ge.s32.totalorder %s25_s15, 2  ;;  %p157_p2 = scmp.lt.s32.totalorder %s866_s14, 3 }
   0x5   : > { %s1025_s15 = smov (%p27_p1, %s25_s15), 0  ;;  %p158_p3 = pnand %p659_p0, %p157_p2 }
   0x6   : > { %p189_p4 = scmp.lt.s32.totalorder (!%p158_p3), %s858_s12, 1  ;;  %s920_s24 = smov (!%p158_p3), 0  }
   0x7   : > { %161 = sbr.rel (%p158_p3) target bundleno = 191 (0xbf), region = 32 }
   0xc   : > { %s1027_s12 = smov (!%p189_p4, %s858_s12), 1 }
   0xd   : > { %s806_s16 = smul.u32 720, %s1027_s12  ;;  %s786_s17 = sshll.u32 %s1027_s12, 3 }
   0xe   : > { %s913_s20 = scalar_lea.vmem %s1021_s3, %s786_s17 }
   0xf   : > { %s918_s23 = scalar_lea.vmem %s1018_s0, %s806_s16 }
  0x10 LB: >> { %v791_v0 = vld [vmem:[%s1019_s1 + $0x18] sm:$0xff]  ;;  %v789_v1 = vld [vmem:[%s1019_s1 + $0x8] sm:$0xff]  ;;  %v790_v4 = vld [vmem:[%s1019_s1 + $0x10] sm:$0xff]  ;;  %s787_s10 = smul.u32 20, %s870_s24  ;;  %vm241_vm0 = vcmask 261120   ;;  %s783_s21 = sshll.u32 %s870_s24, 1  ;;  %s870_s24 = sphi %s920_s24, %s213_s24  }
  0x11   : >> { %v793_v2 = vld [vmem:[%s1019_s1 + $0x28] sm:$0xff]  ;;  %v795_v3 = vld [vmem:[%s1019_s1 + $0x38] sm:$0xff]  ;;  %251 = vmatpush.bf16.msra.mxu0 %v791_v0  ;;  %279 = vmatpush.bf16.msra.mxu1 %v789_v1  ;;  %v788_v5 = vld [vmem:[%s1019_s1] sm:$0xff]  ;;  %s546_s22 = scalar_lea.vmem %s913_s20, %s783_s21  ;;  %s213_s24 = sadd.s32 1, %s870_s24  }
  0x12   : >> { %312 = vmatpush.bf16.msra.mxu2 %v793_v2  ;;  %353 = vmatpush.bf16.msra.mxu3 %v795_v3  ;;  %v792_v6 = vld [vmem:[%s1019_s1 + $0x20] sm:$0xff]  ;;  %v794_v7 = vld [vmem:[%s1019_s1 + $0x30] sm:$0xff]  ;;  %s951_s18 = scalar_lea.vmem %s918_s23, %s787_s10  ;;  %v797_v8 = vld [vmem:[%s1019_s1 + $0x48] sm:$0xff]  ;;  %p210_p5 = scmp.ge.s32.totalorder %s213_s24, 4  }
  0x13   : >> { %v801_v9 = vld [vmem:[%s1019_s1 + $0x68] sm:$0xff]  ;;  %v217_v11 = vld [vmem:[%s951_s18] sm:$0xf]  ;;  %v803_v12 = vld [vmem:[%s1019_s1 + $0x78] sm:$0xff] }
  0x14   : >> { %v218_v10 = vld [vmem:[%s951_s18 + $0x8] sm:$0xf]  ;;  %v219_v13 = vld [vmem:[%s951_s18 + $0x10] sm:$0x3]  ;;  %v699_v14 = vld [vmem:[%s951_s18 + $0x140] sm:$0xf] }
  0x15   : >> { %252 = vmatpush.bf16.msra.mxu0 %v790_v4  ;;  %280 = vmatpush.bf16.msra.mxu1 %v788_v5  ;;  %v799_v15 = vld [vmem:[%s1019_s1 + $0x58] sm:$0xff]  ;;  %v796_v16 = vld [vmem:[%s1019_s1 + $0x40] sm:$0xff]  ;;  %v805_v18 = vld [vmem:[%s1019_s1 + $0x88] sm:$0xff] }
  0x16   : >> { %313 = vmatpush.bf16.msra.mxu2 %v792_v6  ;;  %354 = vmatpush.bf16.msra.mxu3 %v794_v7  ;;  %v800_v17 = vld [vmem:[%s1019_s1 + $0x60] sm:$0xff]  ;;  %v802_v19 = vld [vmem:[%s1019_s1 + $0x70] sm:$0xff]  ;;  %v700_v22 = vld [vmem:[%s951_s18 + $0x148] sm:$0xf] }
  0x17   : >> { %v798_v20 = vld [vmem:[%s1019_s1 + $0x50] sm:$0xff]  ;;  %v804_v21 = vld [vmem:[%s1019_s1 + $0x80] sm:$0xff]  ;;  %v742_v25 = vld [vmem:[%s951_s18 + $0x288] sm:$0xf] }
  0x18   : >> { %676 = vmatmul.msk.bf16.vlgmr.msra.gmra.mxu0 %vm241_vm0, %v218_v10  ;;  %685 = vmatmul.msk.bf16.vlgmr.msra.gmra.mxu1 %vm241_vm0, %v217_v11  ;;  %v701_v23 = vld [vmem:[%s951_s18 + $0x150] sm:$0x3]  ;;  %v741_v24 = vld [vmem:[%s951_s18 + $0x280] sm:$0xf] }
  0x19   : >> { %387 = vmatpush.bf16.msrb.mxu0 %v797_v8  ;;  %698 = vmatmul.msk.bf16.vlgmr.msra.gmra.mxu2 %vm241_vm0, %v219_v13  ;;  %v743_v26 = vld [vmem:[%s951_s18 + $0x290] sm:$0x3]  ;;  %v839_v50 = vld [vmem:[%s1020_s2] ss:$0 sm:$0xff] }
  0x1a   : >> { %462 = vmatpush.bf16.msrb.mxu2 %v801_v9  ;;  %714 = vmatmul.msk.bf16.vlgmr.msra.gmra.mxu3 %vm241_vm0, %v699_v14 }
  0x1b   : >> { %496 = vmatpush.bf16.msrb.mxu3 %v803_v12  ;;  %421 = vmatpush.bf16.msrb.mxu1 %v799_v15 }
  0x1d   : >> { %388 = vmatpush.bf16.msrb.mxu0 %v796_v16 }
  0x1e   : >> { %463 = vmatpush.bf16.msrb.mxu2 %v800_v17 }
  0x1f   : >> { %497 = vmatpush.bf16.msrb.mxu3 %v802_v19  ;;  %422 = vmatpush.bf16.msrb.mxu1 %v798_v20 }
  0x21   : >> { %530 = vmatpush.bf16.msra.mxu0 %v805_v18 }
  0x25   : >> { %531 = vmatpush.bf16.msra.mxu0 %v804_v21 }
  0x28   : >> { %727 = vmatmul.msk.bf16.vlgmr.msrb.gmra.mxu0 %vm241_vm0, %v700_v22  ;;  %740 = vmatmul.msk.bf16.vlgmr.msrb.gmra.mxu1 %vm241_vm0, %v701_v23 }
  0x29   : >> { %756 = vmatmul.msk.bf16.vlgmr.msrb.gmra.mxu2 %vm241_vm0, %v741_v24 }
  0x2a   : >> { %769 = vmatmul.msk.bf16.vlgmr.msrb.gmra.mxu3 %vm241_vm0, %v742_v25 }
  0x38   : >> { %782 = vmatmul.msk.bf16.vlgmr.msra.gmra.mxu0 %vm241_vm0, %v743_v26 }
  0x95   : >> { %v254_v27 = vpop.f32.mrf.mxu0  ;;  %v282_v28 = vpop.f32.mrf.mxu1 }
  0x96   : >> { %v283_v33 = vadd.f32 %v282_v28, %v254_v27 }
  0x9c   : >> { %v315_v29 = vpop.f32.mrf.mxu2 }
  0x9d   : >> { %v356_v30 = vpop.f32.mrf.mxu3  ;;  %v256_v31 = vpop.f32.mrf.mxu0  ;;  %v319_v34 = vadd.f32 %v315_v29, %v283_v33 }
  0x9e   : >> { %v284_v32 = vpop.f32.mrf.mxu1 }
  0x9f   : >> { %v360_v39 = vadd.f32 %v356_v30, %v319_v34 }
  0xa4   : >> { %v317_v35 = vpop.f32.mrf.mxu2 }
  0xa5   : >> { %v358_v36 = vpop.f32.mrf.mxu3  ;;  %v390_v37 = vpop.f32.mrf.mxu0 }
  0xa6   : >> { %v424_v38 = vpop.f32.mrf.mxu1  ;;  %v394_v40 = vadd.f32 %v390_v37, %v360_v39 }
  0xa8   : >> { %v428_v45 = vadd.f32 %v424_v38, %v394_v40 }
  0xac   : >> { %v465_v41 = vpop.f32.mrf.mxu2 }
  0xad   : >> { %v499_v42 = vpop.f32.mrf.mxu3  ;;  %v392_v43 = vpop.f32.mrf.mxu0  ;;  %v469_v46 = vadd.f32 %v465_v41, %v428_v45 }
  0xae   : >> { %v426_v44 = vpop.f32.mrf.mxu1 }
  0xaf   : >> { %v503_v47 = vadd.f32 %v499_v42, %v469_v46 }
  0xb4   : >> { %v467_v48 = vpop.f32.mrf.mxu2 }
  0xb5   : >> { %v501_v49 = vpop.f32.mrf.mxu3  ;;  %v533_v51 = vpop.f32.mrf.mxu0 }
  0xb6   : >> { %v537_v52 = vadd.f32 %v533_v51, %v503_v47 }
  0xb8   : >> { %v542_v53 = vadd.f32 %v839_v50, %v537_v52 }
  0xba   : >> { %v543_v54 = vmax.f32 %v542_v53, 0.0  ;;  %212 = sbr.rel (!%p210_p5) target bundleno = 16 (0x10), region = 81 }
  0xbc   : >> { %v544_v55 = vpack.c.bf16 %v543_v54, %v543_v54 }
  0xbd   : >> { %v535_v56 = vpop.f32.mrf.mxu0 }
  0xbe   : >> { %547 = vst [vmem:[%s546_s22] sm:$0x3] %v544_v55 }
  0xbf PF: > { %s13_s14 = sadd.s32 1, %s866_s14   ;;  %s1022_s12 = smov %s862_s13 }
  0xc0   : > { %p10_p6 = scmp.ge.s32.totalorder %s13_s14, 4   ;;  %s1023_s13 = smov %s1025_s15 }
  0xc2   :  { %12 = sbr.rel (!%p10_p6) target bundleno = 2 (0x2), region = 92 }

// kernel: _lambda_.29
= control target key start
LH: loop header
LB: loop body
LE: loop exit
PB: predicated region body
PF: predicated region fallthrough
CT: control target
= control target key end

     0   :  { %s1329_s12 = smov 0   ;;  %s1331_s13 = smov 0   ;;  %s1507_s0 = inlined_call_operand.vmem [shape: bf16[2,1,11,11,32], index: 0, kind: input, shape index: {}]   ;;  %s1508_s1 = inlined_call_operand.vmem [shape: bf16[4,4,32,128], index: 1, kind: input, shape index: {}]   ;;  %s1509_s2 = inlined_call_operand.vmem [shape: f32[1,128], index: 2, kind: input, shape index: {}]   ;;  %s1510_s3 = inlined_call_operand.vmem [shape: bf16[2,1,8,8,128], index: 3, kind: output, shape index: {}]  }
   0x1   :  { %s1333_s14 = smov 0  }
   0x2 LB: > { %s25_s15 = sadd.s32 1, %s1299_s13  ;;  %p967_p0 = scmp.ge.s32.totalorder %s1303_s14, 1  ;;  %s1303_s14 = sphi %s1333_s14, %s13_s14   ;;  %s1299_s13 = sphi %s1331_s13, %s1512_s13   ;;  %s1295_s12 = sphi %s1329_s12, %s1511_s12  }
   0x3   : > { %p27_p1 = scmp.ge.s32.totalorder %s25_s15, 2  ;;  %p157_p2 = scmp.lt.s32.totalorder %s1303_s14, 3 }
   0x5   : > { %s1514_s15 = smov (%p27_p1, %s25_s15), 0  ;;  %p158_p3 = pnand %p967_p0, %p157_p2 }
   0x6   : > { %p189_p4 = scmp.lt.s32.totalorder (!%p158_p3), %s1295_s12, 1  ;;  %s1357_s24 = smov (!%p158_p3), 0  }
   0x7   : > { %161 = sbr.rel (%p158_p3) target bundleno = 217 (0xd9), region = 32 }
   0xc   : > { %s1516_s12 = smov (!%p189_p4, %s1295_s12), 1 }
   0xd   : > { %s1243_s16 = smul.u32 88, %s1516_s12  ;;  %s1205_s17 = sshll.u32 %s1516_s12, 5 }
   0xe   : > { %s1350_s20 = scalar_lea.vmem %s1510_s3, %s1205_s17 }
   0xf   : > { %s1355_s23 = scalar_lea.vmem %s1507_s0, %s1243_s16 }
  0x10 LB: >> { %v1209_v0 = vld [vmem:[%s1508_s1 + $0x8] sm:$0xff]  ;;  %v1211_v2 = vld [vmem:[%s1508_s1 + $0x18] sm:$0xff]  ;;  %v1208_v4 = vld [vmem:[%s1508_s1] sm:$0xff]  ;;  %s1206_s10 = sshll.u32 %s1307_s24, 3  ;;  %vm252_vm0 = vcmask 261120   ;;  %s1202_s4 = sshll.u32 %s1307_s24, 2  ;;  %s1307_s24 = sphi %s1357_s24, %s213_s24  }
  0x11   : >> { %v1213_v1 = vld [vmem:[%s1508_s1 + $0x28] sm:$0xff]  ;;  %v1215_v3 = vld [vmem:[%s1508_s1 + $0x38] sm:$0xff]  ;;  %290 = vmatpush.bf16.msra.mxu1 %v1209_v0  ;;  %v1212_v5 = vld [vmem:[%s1508_s1 + $0x20] sm:$0xff]  ;;  %262 = vmatpush.bf16.msra.mxu0 %v1211_v2  ;;  %s1385_s16 = scalar_lea.vmem %s1355_s23, %s1206_s10  ;;  %s851_s5 = scalar_lea.vmem %s1350_s20, %s1202_s4 }
  0x12   : >> { %324 = vmatpush.bf16.msra.mxu2 %v1213_v1  ;;  %361 = vmatpush.bf16.msra.mxu3 %v1215_v3  ;;  %v1210_v6 = vld [vmem:[%s1508_s1 + $0x10] sm:$0xff]  ;;  %v1222_v8 = vld [vmem:[%s1508_s1 + $0x68] sm:$0xff]  ;;  %v979_v9 = vld [vmem:[%s1385_s16] sm:$0xf]  ;;  %s213_s24 = sadd.s32 1, %s1307_s24  }
  0x13   : >> { %v1214_v7 = vld [vmem:[%s1508_s1 + $0x30] sm:$0xff]  ;;  %v1207_v10 = vld [vmem:[%s1385_s16] sm:$0x30]  ;;  %v1218_v11 = vld [vmem:[%s1508_s1 + $0x48] sm:$0xff]  ;;  %p210_p5 = scmp.ge.s32.totalorder %s213_s24, 8  }
  0x14   : >> { %v980_v12 = vor.u32 %v1207_v10, %v979_v9  ;;  %v1224_v13 = vld [vmem:[%s1508_s1 + $0x78] sm:$0xff]  ;;  %v217_v15 = vld [vmem:[%s1385_s16] sm:$0xf]  ;;  %v1047_v16 = vld [vmem:[%s1385_s16 + $0x8] sm:$0xf] }
  0x15   : >> { %v1220_v14 = vld [vmem:[%s1508_s1 + $0x58] sm:$0xff]  ;;  %291 = vmatpush.bf16.msra.mxu1 %v1208_v4  ;;  %v1216_v17 = vld [vmem:[%s1385_s16 + $0x8] sm:$0x30]  ;;  %263 = vmatpush.bf16.msra.mxu0 %v1210_v6  ;;  %v1221_v21 = vld [vmem:[%s1508_s1 + $0x60] sm:$0xff] }
  0x16   : >> { %325 = vmatpush.bf16.msra.mxu2 %v1212_v5  ;;  %v302_v18 = vrot.slane %v980_v12, 1  ;;  %362 = vmatpush.bf16.msra.mxu3 %v1214_v7  ;;  %v234_v19 = vshrl.u32 %v980_v12, 16  ;;  %v236_v20 = vshll.u32 %v980_v12, 16  ;;  %v1217_v22 = vld [vmem:[%s1508_s1 + $0x40] sm:$0xff]  ;;  %v1048_v26 = vor.u32 %v1216_v17, %v1047_v16  ;;  %v1223_v27 = vld [vmem:[%s1508_s1 + $0x70] sm:$0xff]  ;;  %v1231_v31 = vld [vmem:[%s1508_s1 + $0xa8] sm:$0xff] }
  0x17   : >> { %v1219_v28 = vld [vmem:[%s1508_s1 + $0x50] sm:$0xff]  ;;  %v1227_v32 = vld [vmem:[%s1508_s1 + $0x88] sm:$0xff]  ;;  %v1233_v33 = vld [vmem:[%s1508_s1 + $0xb8] sm:$0xff] }
  0x18   : >> { %998 = vmatmul.msk.bf16.vlgmr.msra.gmra.mxu1 %vm252_vm0, %v217_v15  ;;  %v238_v23 = vrot.slane %v236_v20, 1  ;;  %v337_v24 = vrot.slane %v234_v19, 1  ;;  %v338_v25 = vrot.slane %v236_v20, 2  ;;  %v1229_v34 = vld [vmem:[%s1508_s1 + $0x98] sm:$0xff]  ;;  %v422_v35 = vshll.u32 %v1048_v26, 16  ;;  %v1230_v36 = vld [vmem:[%s1508_s1 + $0xa0] sm:$0xff] }
  0x19   : >> { %401 = vmatpush.bf16.msrb.mxu0 %v1218_v11  ;;  %1011 = vmatmul.msk.bf16.vlgmr.msra.gmra.mxu2 %vm252_vm0, %v302_v18  ;;  %v1226_v37 = vld [vmem:[%s1508_s1 + $0x80] sm:$0xff]  ;;  %v1232_v38 = vld [vmem:[%s1508_s1 + $0xb0] sm:$0xff]  ;;  %v420_v40 = vshrl.u32 %v1048_v26, 16  ;;  %v460_v43 = vrot.slane %v1048_v26, 1  ;;  %v1240_v48 = vld [vmem:[%s1508_s1 + $0xe8] sm:$0xff] }
  0x1a   : >> { %482 = vmatpush.bf16.msrb.mxu2 %v1222_v8  ;;  %519 = vmatpush.bf16.msrb.mxu3 %v1224_v13  ;;  %v239_v29 = vor.u32 %v238_v23, %v234_v19  ;;  %v339_v30 = vor.u32 %v338_v25, %v337_v24  ;;  %v1228_v39 = vld [vmem:[%s1508_s1 + $0x90] sm:$0xff]  ;;  %v424_v41 = vrot.slane %v422_v35, 1  ;;  %v496_v45 = vrot.slane %v422_v35, 2  ;;  %v1238_v49 = vld [vmem:[%s1508_s1 + $0xd8] sm:$0xff]  ;;  %v1026_v52 = vld [vmem:[%s1385_s16 + $0x8] sm:$0xf] }
  0x1b   : >> { %447 = vmatpush.bf16.msrb.mxu1 %v1220_v14  ;;  %v495_v44 = vrot.slane %v420_v40, 1  ;;  %v1106_v46 = vld [vmem:[%s1385_s16 + $0x10] sm:$0xf]  ;;  %v1225_v47 = vld [vmem:[%s1385_s16 + $0x10] sm:$0x30]  ;;  %v1236_v53 = vld [vmem:[%s1508_s1 + $0xc8] sm:$0xff] }
  0x1c   : >> { %989 = vmatmul.msk.bf16.vlgmr.msra.gmra.mxu0 %vm252_vm0, %v239_v29  ;;  %1024 = vmatmul.msk.bf16.vlgmr.msra.gmra.mxu3 %vm252_vm0, %v339_v30  ;;  %v425_v42 = vor.u32 %v424_v41, %v420_v40  ;;  %v1107_v51 = vor.u32 %v1225_v47, %v1106_v46  ;;  %v1242_v54 = vld [vmem:[%s1508_s1 + $0xf8] sm:$0xff]  ;;  %v1239_v55 = vld [vmem:[%s1508_s1 + $0xe0] sm:$0xff]  ;;  %v1237_v56 = vld [vmem:[%s1508_s1 + $0xd0] sm:$0xff] }
  0x1d   : >> { %402 = vmatpush.bf16.msrb.mxu0 %v1217_v22  ;;  %v497_v50 = vor.u32 %v496_v45, %v495_v44  ;;  %v1235_v58 = vld [vmem:[%s1508_s1 + $0xc0] sm:$0xff]  ;;  %v1241_v59 = vld [vmem:[%s1508_s1 + $0xf0] sm:$0xff]  ;;  %v1165_v2 = vld [vmem:[%s1385_s16 + $0x18] sm:$0xf] }
  0x1e   : >> { %483 = vmatpush.bf16.msrb.mxu2 %v1221_v21  ;;  %520 = vmatpush.bf16.msrb.mxu3 %v1223_v27  ;;  %v580_v57 = vshll.u32 %v1107_v51, 16  ;;  %v578_v60 = vshrl.u32 %v1107_v51, 16  ;;  %v618_v63 = vrot.slane %v1107_v51, 1  ;;  %v1234_v3 = vld [vmem:[%s1385_s16 + $0x18] sm:$0x30] }
  0x1f   : >> { %448 = vmatpush.bf16.msrb.mxu1 %v1219_v28  ;;  %v1166_v5 = vor.u32 %v1234_v3, %v1165_v2  ;;  %v1085_v6 = vld [vmem:[%s1385_s16 + $0x10] sm:$0xf]  ;;  %v1144_v15 = vld [vmem:[%s1385_s16 + $0x18] sm:$0xf] }
  0x20   : >> { %v582_v61 = vrot.slane %v580_v57, 1  ;;  %v653_v0 = vrot.slane %v578_v60, 1  ;;  %v654_v1 = vrot.slane %v580_v57, 2 }
  0x21   : >> { %559 = vmatpush.bf16.msra.mxu0 %v1227_v32  ;;  %v738_v7 = vshll.u32 %v1166_v5, 16  ;;  %v736_v8 = vshrl.u32 %v1166_v5, 16  ;;  %v776_v11 = vrot.slane %v1166_v5, 1 }
  0x22   : >> { %640 = vmatpush.bf16.msra.mxu2 %v1231_v31  ;;  %677 = vmatpush.bf16.msra.mxu3 %v1233_v33  ;;  %v583_v62 = vor.u32 %v582_v61, %v578_v60  ;;  %v655_v4 = vor.u32 %v654_v1, %v653_v0 }
  0x23   : >> { %605 = vmatpush.bf16.msra.mxu1 %v1229_v34  ;;  %v740_v9 = vrot.slane %v738_v7, 1  ;;  %v811_v12 = vrot.slane %v736_v8, 1  ;;  %v812_v13 = vrot.slane %v738_v7, 2 }
  0x25   : >> { %560 = vmatpush.bf16.msra.mxu0 %v1226_v37  ;;  %v741_v10 = vor.u32 %v740_v9, %v736_v8  ;;  %v813_v14 = vor.u32 %v812_v13, %v811_v12 }
  0x26   : >> { %641 = vmatpush.bf16.msra.mxu2 %v1230_v36  ;;  %678 = vmatpush.bf16.msra.mxu3 %v1232_v38 }
  0x27   : >> { %606 = vmatpush.bf16.msra.mxu1 %v1228_v39 }
  0x28   : >> { %1057 = vmatmul.msk.bf16.vlgmr.msrb.gmra.mxu1 %vm252_vm0, %v425_v42 }
  0x29   : >> { %1070 = vmatmul.msk.bf16.vlgmr.msrb.gmra.mxu2 %vm252_vm0, %v460_v43 }
  0x2a   : >> { %798 = vmatpush.bf16.msrb.mxu2 %v1240_v48 }
  0x2b   : >> { %763 = vmatpush.bf16.msrb.mxu1 %v1238_v49 }
  0x2c   : >> { %1040 = vmatmul.msk.bf16.vlgmr.msrb.gmra.mxu0 %vm252_vm0, %v1026_v52  ;;  %1083 = vmatmul.msk.bf16.vlgmr.msrb.gmra.mxu3 %vm252_vm0, %v497_v50 }
  0x2d   : >> { %717 = vmatpush.bf16.msrb.mxu0 %v1236_v53  ;;  %835 = vmatpush.bf16.msrb.mxu3 %v1242_v54 }
  0x2e   : >> { %799 = vmatpush.bf16.msrb.mxu2 %v1239_v55 }
  0x2f   : >> { %764 = vmatpush.bf16.msrb.mxu1 %v1237_v56 }
  0x31   : >> { %718 = vmatpush.bf16.msrb.mxu0 %v1235_v58  ;;  %836 = vmatpush.bf16.msrb.mxu3 %v1241_v59  ;;  %v1276_v58 = vld [vmem:[%s1509_s2] ss:$0 sm:$0xff] }
  0x38   : >> { %1116 = vmatmul.msk.bf16.vlgmr.msra.gmra.mxu1 %vm252_vm0, %v583_v62 }
  0x39   : >> { %1129 = vmatmul.msk.bf16.vlgmr.msra.gmra.mxu2 %vm252_vm0, %v618_v63 }
  0x3c   : >> { %1099 = vmatmul.msk.bf16.vlgmr.msra.gmra.mxu0 %vm252_vm0, %v1085_v6  ;;  %1142 = vmatmul.msk.bf16.vlgmr.msra.gmra.mxu3 %vm252_vm0, %v655_v4 }
  0x48   : >> { %1175 = vmatmul.msk.bf16.vlgmr.msrb.gmra.mxu1 %vm252_vm0, %v741_v10 }
  0x49   : >> { %1188 = vmatmul.msk.bf16.vlgmr.msrb.gmra.mxu2 %vm252_vm0, %v776_v11 }
  0x4c   : >> { %1158 = vmatmul.msk.bf16.vlgmr.msrb.gmra.mxu0 %vm252_vm0, %v1144_v15  ;;  %1201 = vmatmul.msk.bf16.vlgmr.msrb.gmra.mxu3 %vm252_vm0, %v813_v14 }
  0x95   : >> { %v293_v16 = vpop.f32.mrf.mxu1 }
  0x99   : >> { %v265_v17 = vpop.f32.mrf.mxu0 }
  0x9a   : >> { %v294_v24 = vadd.f32 %v293_v16, %v265_v17 }
  0x9c   : >> { %v327_v18 = vpop.f32.mrf.mxu2 }
  0x9d   : >> { %v295_v19 = vpop.f32.mrf.mxu1  ;;  %v331_v27 = vadd.f32 %v327_v18, %v294_v24 }
  0x9f   : >> { %v364_v20 = vpop.f32.mrf.mxu3 }
  0xa0   : >> { %v368_v29 = vadd.f32 %v364_v20, %v331_v27 }
  0xa1   : >> { %v267_v21 = vpop.f32.mrf.mxu0 }
  0xa4   : >> { %v329_v22 = vpop.f32.mrf.mxu2 }
  0xa5   : >> { %v450_v23 = vpop.f32.mrf.mxu1 }
  0xa7   : >> { %v366_v25 = vpop.f32.mrf.mxu3 }
  0xa9   : >> { %v404_v26 = vpop.f32.mrf.mxu0 }
  0xaa   : >> { %v408_v31 = vadd.f32 %v404_v26, %v368_v29 }
  0xac   : >> { %v485_v28 = vpop.f32.mrf.mxu2  ;;  %v454_v34 = vadd.f32 %v450_v23, %v408_v31 }
  0xad   : >> { %v452_v30 = vpop.f32.mrf.mxu1 }
  0xae   : >> { %v489_v37 = vadd.f32 %v485_v28, %v454_v34 }
  0xaf   : >> { %v522_v32 = vpop.f32.mrf.mxu3 }
  0xb0   : >> { %v526_v40 = vadd.f32 %v522_v32, %v489_v37 }
  0xb1   : >> { %v406_v33 = vpop.f32.mrf.mxu0 }
  0xb4   : >> { %v487_v35 = vpop.f32.mrf.mxu2 }
  0xb5   : >> { %v608_v36 = vpop.f32.mrf.mxu1 }
  0xb7   : >> { %v524_v38 = vpop.f32.mrf.mxu3 }
  0xb9   : >> { %v562_v39 = vpop.f32.mrf.mxu0 }
  0xba   : >> { %v566_v42 = vadd.f32 %v562_v39, %v526_v40 }
  0xbc   : >> { %v643_v41 = vpop.f32.mrf.mxu2  ;;  %v612_v45 = vadd.f32 %v608_v36, %v566_v42 }
  0xbd   : >> { %v610_v43 = vpop.f32.mrf.mxu1 }
  0xbe   : >> { %v647_v48 = vadd.f32 %v643_v41, %v612_v45 }
  0xbf   : >> { %v680_v44 = vpop.f32.mrf.mxu3 }
  0xc0   : >> { %v684_v51 = vadd.f32 %v680_v44, %v647_v48 }
  0xc1   : >> { %v564_v46 = vpop.f32.mrf.mxu0 }
  0xc4   : >> { %v645_v47 = vpop.f32.mrf.mxu2 }
  0xc5   : >> { %v766_v49 = vpop.f32.mrf.mxu1 }
  0xc7   : >> { %v682_v50 = vpop.f32.mrf.mxu3 }
  0xc9   : >> { %v720_v52 = vpop.f32.mrf.mxu0 }
  0xca   : >> { %v724_v53 = vadd.f32 %v720_v52, %v684_v51 }
  0xcc   : >> { %v801_v54 = vpop.f32.mrf.mxu2  ;;  %v770_v55 = vadd.f32 %v766_v49, %v724_v53 }
  0xcd   : >> { %v768_v56 = vpop.f32.mrf.mxu1 }
  0xce   : >> { %v805_v57 = vadd.f32 %v801_v54, %v770_v55 }
  0xcf   : >> { %v838_v59 = vpop.f32.mrf.mxu3 }
  0xd0   : >> { %v842_v60 = vadd.f32 %v838_v59, %v805_v57 }
  0xd1   : >> { %v722_v61 = vpop.f32.mrf.mxu0 }
  0xd2   : >> { %v847_v62 = vadd.f32 %v1276_v58, %v842_v60 }
  0xd4   : >> { %v803_v63 = vpop.f32.mrf.mxu2  ;;  %v848_v0 = vmax.f32 %v847_v62, 0.0  ;;  %212 = sbr.rel (!%p210_p5) target bundleno = 16 (0x10), region = 89 }
  0xd6   : >> { %v849_v1 = vpack.c.bf16 %v848_v0, %v848_v0 }
  0xd7   : >> { %v840_v2 = vpop.f32.mrf.mxu3 }
  0xd8   : >> { %852 = vst [vmem:[%s851_s5] sm:$0xf] %v849_v1 }
  0xd9 PF: > { %s13_s14 = sadd.s32 1, %s1303_s14   ;;  %s1511_s12 = smov %s1299_s13 }
  0xda   : > { %p10_p6 = scmp.ge.s32.totalorder %s13_s14, 4   ;;  %s1512_s13 = smov %s1514_s15 }
  0xdc   :  { %12 = sbr.rel (!%p10_p6) target bundleno = 2 (0x2), region = 100 }

// kernel: _lambda_.31
= control target key start
LH: loop header
LB: loop body
LE: loop exit
PB: predicated region body
PF: predicated region fallthrough
CT: control target
= control target key end

     0   :  { %s1199_s12 = smov 0   ;;  %s1201_s13 = smov 0   ;;  %s1343_s0 = inlined_call_operand.vmem [shape: bf16[2,1,19,19,16], index: 0, kind: input, shape index: {}]   ;;  %s1344_s1 = inlined_call_operand.vmem [shape: bf16[4,4,16,128], index: 1, kind: input, shape index: {}]   ;;  %s1345_s2 = inlined_call_operand.vmem [shape: f32[1,128], index: 2, kind: input, shape index: {}]   ;;  %s1346_s3 = inlined_call_operand.vmem [shape: bf16[2,1,16,16,128], index: 3, kind: output, shape index: {}]  }
   0x1   :  { %s1203_s14 = smov 0  }
   0x2 LB: > { %s25_s15 = sadd.s32 1, %s1169_s13  ;;  %p941_p0 = scmp.ge.s32.totalorder %s1173_s14, 1  ;;  %s1173_s14 = sphi %s1203_s14, %s13_s14   ;;  %s1169_s13 = sphi %s1201_s13, %s1348_s13   ;;  %s1165_s12 = sphi %s1199_s12, %s1347_s12  }
   0x3   : > { %p27_p1 = scmp.ge.s32.totalorder %s25_s15, 2  ;;  %p157_p2 = scmp.lt.s32.totalorder %s1173_s14, 3 }
   0x5   : > { %s1350_s15 = smov (%p27_p1, %s25_s15), 0  ;;  %p158_p3 = pnand %p941_p0, %p157_p2 }
   0x6   : > { %p189_p4 = scmp.lt.s32.totalorder (!%p158_p3), %s1165_s12, 1  ;;  %s1227_s24 = smov (!%p158_p3), 0  }
   0x7   : > { %161 = sbr.rel (%p158_p3) target bundleno = 229 (0xe5), region = 32 }
   0xc   : > { %s1352_s12 = smov (!%p189_p4, %s1165_s12), 1 }
   0xd   : > { %s1113_s16 = smul.u32 228, %s1352_s12  ;;  %s1085_s17 = sshll.u32 %s1352_s12, 7 }
   0xe   : > { %s1220_s20 = scalar_lea.vmem %s1346_s3, %s1085_s17 }
   0xf   : > { %s1225_s23 = scalar_lea.vmem %s1343_s0, %s1113_s16 }
  0x10 LB: >> { %v1088_v0 = vld [vmem:[%s1344_s1] sm:$0xff]  ;;  %v1090_v1 = vld [vmem:[%s1344_s1 + $0x10] sm:$0xff]  ;;  %v1089_v2 = vld [vmem:[%s1344_s1 + $0x8] sm:$0xff]  ;;  %s1086_s8 = smul.u32 12, %s1177_s24  ;;  %vm252_vm0 = vcmask 130048   ;;  %vm295_vm1 = vcmask 1046528   ;;  %s1177_s24 = sphi %s1227_s24, %s213_s24  }
  0x11   : >> { %v1091_v3 = vld [vmem:[%s1344_s1 + $0x18] sm:$0xff]  ;;  %v1095_v4 = vld [vmem:[%s1344_s1 + $0x30] sm:$0xff]  ;;  %285 = vmatpush.bf16.msra.mxu1 %v1088_v0  ;;  %315 = vmatpush.bf16.msra.mxu2 %v1090_v1  ;;  %v1093_v5 = vld [vmem:[%s1344_s1 + $0x20] sm:$0xff]  ;;  %vm233_vm2 = vsmask.f32 7424  ;;  %s1107_s16 = sshll.u32 %s1177_s24, 3 }
  0x12   : >> { %v1096_v6 = vld [vmem:[%s1344_s1 + $0x38] sm:$0xff]  ;;  %v1094_v7 = vld [vmem:[%s1344_s1 + $0x28] sm:$0xff]  ;;  %263 = vmatpush.bf16.msra.mxu0 %v1089_v2  ;;  %353 = vmatpush.bf16.msra.mxu3 %v1091_v3  ;;  %s1258_s18 = scalar_lea.vmem %s1225_s23, %s1086_s8  ;;  %v1100_v28 = vld [vmem:[%s1344_s1 + $0x50] sm:$0xff]  ;;  %vm327_vm3 = vsmask.f32 6400  ;;  %s824_s17 = scalar_lea.vmem %s1220_s20, %s1107_s16 }
  0x13   : >> { %v1099_v8 = vld [vmem:[%s1344_s1 + $0x48] sm:$0xff]  ;;  %v1087_v9 = vld [vmem:[%s1258_s18] sm:$0xff]  ;;  %v978_v13 = vld [vmem:[%s1258_s18 + $0x14] sm:$0x3]  ;;  %s213_s24 = sadd.s32 1, %s1177_s24  }
  0x14   : >> { %v219_v10 = vld [vmem:[%s1258_s18 + $0x8] sm:$0x3]  ;;  %v1266_v11 = vld [vmem:[%s1258_s18 + $0xc] sm:$0xff]  ;;  %961 = vmatmul.msk.bf16.vlgmr.msra.gmra.mxu1 %vm252_vm0, %v1087_v9  ;;  %v235_v14 = vshrl.u32 %v1087_v9, 16  ;;  %v237_v15 = vshll.u32 %v1087_v9, 16  ;;  %v406_v16 = vunpack.c.l.b16 %v978_v13  ;;  %v296_v18 = vrot.slane %v1087_v9, 1 }
  0x15   : >> { %466 = vmatpush.bf16.msrb.mxu2 %v1095_v4  ;;  %435 = vmatpush.bf16.msrb.mxu1 %v1094_v7  ;;  %v230_v12 = vunpack.c.l.b16 %v219_v10  ;;  %v410_v19 = vshll.u32 %v1266_v11, 16  ;;  %v408_v27 = vshrl.u32 %v1266_v11, 16  ;;  %v1098_v37 = vld [vmem:[%s1344_s1 + $0x40] sm:$0xff]  ;;  %v1101_v40 = vld [vmem:[%s1344_s1 + $0x58] sm:$0xff]  ;;  %v1104_v49 = vld [vmem:[%s1344_s1 + $0x68] sm:$0xff]  ;;  %v447_v50 = vrot.slane %v1266_v11, 1 }
  0x16   : >> { %393 = vmatpush.bf16.msrb.mxu0 %v1093_v5  ;;  %503 = vmatpush.bf16.msrb.mxu3 %v1096_v6  ;;  %v239_v20 = vrot.slane %v237_v15, 1  ;;  %v328_v21 = vrot.slane %v235_v14, 1  ;;  %v329_v22 = vrot.slane %v237_v15, 2  ;;  %v407_v23 = vpack.c.b16 %v406_v16, %v406_v16  ;;  %v1013_v44 = vld [vmem:[%s1258_s18 + $0x20] sm:$0x3]  ;;  %v1097_v47 = vld [vmem:[%s1258_s18 + $0x18] sm:$0xff] }
  0x17   : >> { %v232_v17 = vpack.c.b16 %v230_v12, %v230_v12  ;;  %v412_v31 = vrot.slane %v410_v19, 1  ;;  %v556_v48 = vunpack.c.l.b16 %v1013_v44  ;;  %v478_v52 = vrot.slane %v408_v27, 1  ;;  %v1105_v61 = vld [vmem:[%s1344_s1 + $0x70] sm:$0xff]  ;;  %v1103_v1 = vld [vmem:[%s1344_s1 + $0x60] sm:$0xff]  ;;  %v1106_v3 = vld [vmem:[%s1344_s1 + $0x78] sm:$0xff]  ;;  %p210_p5 = scmp.ge.s32.totalorder %s213_s24, 16  }
  0x18   : >> { %v240_v29 = vor.u32 %v239_v20, %v235_v14  ;;  %v330_v30 = vor.u32 %v329_v22, %v328_v21  ;;  %v415_v32 = vshll.u32 %v407_v23, 16  ;;  %v481_v45 = vshrl.u32 %v407_v23, 16  ;;  %v1048_v6 = vld [vmem:[%s1258_s18 + $0x2c] sm:$0x3]  ;;  %v1102_v9 = vld [vmem:[%s1258_s18 + $0x24] sm:$0xff] }
  0x19   : >> { %585 = vmatpush.bf16.msra.mxu1 %v1099_v8  ;;  %v297_v24 = vrot.slane %v232_v17, 1  ;;  %v242_v25 = vshll.u32 %v232_v17, 16  ;;  %v331_v26 = vshrl.u32 %v232_v17, 16  ;;  %v413_v42 = vor.u32 %v412_v31, %v408_v27 }
  0x1a   : >> { %v417_v43 = vrot.slane %v415_v32, 1  ;;  %v448_v51 = vrot.slane %v407_v23, 1  ;;  %v479_v53 = vrot.slane %v410_v19, 2  ;;  %v483_v54 = vrot.slane %v481_v45, 1 }
  0x1b   : >> { %v298_v33 = vsel %vm295_vm1, %v296_v18, %v297_v24  ;;  %v244_v34 = vrot.slane %v242_v25, 1  ;;  %v333_v35 = vrot.slane %v331_v26, 1  ;;  %v334_v36 = vrot.slane %v242_v25, 2 }
  0x1c   : >> { %968 = vmatmul.msk.bf16.vlgmr.msra.gmra.mxu2 %vm252_vm0, %v298_v33  ;;  %v418_v46 = vsel %vm233_vm2, %v413_v42, %v417_v43  ;;  %v484_v55 = vrot.slane %v415_v32, 2  ;;  %v557_v56 = vpack.c.b16 %v556_v48, %v556_v48  ;;  %v560_v57 = vshll.u32 %v1097_v47, 16 }
  0x1d   : >> { %v245_v38 = vsel %vm233_vm2, %v240_v29, %v244_v34  ;;  %v335_v39 = vor.u32 %v334_v36, %v333_v35  ;;  %616 = vmatpush.bf16.msra.mxu2 %v1100_v28  ;;  %v449_v58 = vsel %vm295_vm1, %v447_v50, %v448_v51  ;;  %v480_v59 = vor.u32 %v479_v53, %v478_v52 }
  0x1e   : >> { %956 = vmatmul.msk.bf16.vlgmr.msra.gmra.mxu0 %vm252_vm0, %v245_v38  ;;  %v485_v60 = vor.u32 %v484_v55, %v483_v54  ;;  %v558_v62 = vshrl.u32 %v1097_v47, 16  ;;  %v562_v63 = vrot.slane %v560_v57, 1  ;;  %v565_v0 = vshll.u32 %v557_v56, 16 }
  0x1f   : >> { %v336_v41 = vsel %vm327_vm3, %v330_v30, %v335_v39  ;;  %543 = vmatpush.bf16.msra.mxu0 %v1098_v37  ;;  %v631_v7 = vshrl.u32 %v557_v56, 16  ;;  %v706_v10 = vunpack.c.l.b16 %v1048_v6  ;;  %v597_v12 = vrot.slane %v1097_v47, 1 }
  0x20   : >> { %975 = vmatmul.msk.bf16.vlgmr.msra.gmra.mxu3 %vm252_vm0, %v336_v41  ;;  %v486_v2 = vsel %vm327_vm3, %v480_v59, %v485_v60  ;;  %v563_v4 = vor.u32 %v562_v63, %v558_v62  ;;  %v567_v5 = vrot.slane %v565_v0, 1  ;;  %v628_v13 = vrot.slane %v558_v62, 1 }
  0x21   : >> { %653 = vmatpush.bf16.msra.mxu3 %v1101_v40  ;;  %v598_v14 = vrot.slane %v557_v56, 1  ;;  %v629_v15 = vrot.slane %v560_v57, 2  ;;  %v633_v16 = vrot.slane %v631_v7, 1  ;;  %v634_v17 = vrot.slane %v565_v0, 2 }
  0x22   : >> { %v568_v8 = vsel %vm233_vm2, %v563_v4, %v567_v5  ;;  %v710_v18 = vshll.u32 %v1102_v9, 16  ;;  %v708_v22 = vshrl.u32 %v1102_v9, 16  ;;  %v747_v30 = vrot.slane %v1102_v9, 1 }
  0x23   : >> { %v599_v19 = vsel %vm295_vm1, %v597_v12, %v598_v14  ;;  %v630_v20 = vor.u32 %v629_v15, %v628_v13  ;;  %v635_v21 = vor.u32 %v634_v17, %v633_v16 }
  0x24   : >> { %996 = vmatmul.msk.bf16.vlgmr.msrb.gmra.mxu1 %vm252_vm0, %v418_v46  ;;  %v712_v23 = vrot.slane %v710_v18, 1  ;;  %v778_v32 = vrot.slane %v708_v22, 1  ;;  %v779_v33 = vrot.slane %v710_v18, 2 }
  0x25   : >> { %735 = vmatpush.bf16.msrb.mxu1 %v1104_v49  ;;  %v636_v25 = vsel %vm327_vm3, %v630_v20, %v635_v21 }
  0x26   : >> { %v713_v26 = vor.u32 %v712_v23, %v708_v22  ;;  %v780_v37 = vor.u32 %v779_v33, %v778_v32 }
  0x2c   : >> { %1003 = vmatmul.msk.bf16.vlgmr.msrb.gmra.mxu2 %vm252_vm0, %v449_v58 }
  0x2d   : >> { %766 = vmatpush.bf16.msrb.mxu2 %v1105_v61 }
  0x2e   : >> { %989 = vmatmul.msk.bf16.vlgmr.msrb.gmra.mxu0 %vm252_vm0, %v1266_v11  ;;  %v707_v11 = vpack.c.b16 %v706_v10, %v706_v10 }
  0x2f   : >> { %693 = vmatpush.bf16.msrb.mxu0 %v1103_v1 }
  0x30   : >> { %1010 = vmatmul.msk.bf16.vlgmr.msrb.gmra.mxu3 %vm252_vm0, %v486_v2  ;;  %v715_v24 = vshll.u32 %v707_v11, 16  ;;  %v781_v28 = vshrl.u32 %v707_v11, 16  ;;  %v748_v31 = vrot.slane %v707_v11, 1 }
  0x31   : >> { %803 = vmatpush.bf16.msrb.mxu3 %v1106_v3 }
  0x32   : >> { %v717_v27 = vrot.slane %v715_v24, 1  ;;  %v783_v34 = vrot.slane %v781_v28, 1  ;;  %v784_v35 = vrot.slane %v715_v24, 2  ;;  %v749_v36 = vsel %vm295_vm1, %v747_v30, %v748_v31 }
  0x34   : >> { %1031 = vmatmul.msk.bf16.vlgmr.msra.gmra.mxu1 %vm252_vm0, %v568_v8  ;;  %v718_v29 = vsel %vm233_vm2, %v713_v26, %v717_v27  ;;  %v785_v38 = vor.u32 %v784_v35, %v783_v34  ;;  %v1146_v35 = vld [vmem:[%s1345_s2] ss:$0 sm:$0xff] }
  0x36   : >> { %v786_v39 = vsel %vm327_vm3, %v780_v37, %v785_v38 }
  0x3c   : >> { %1038 = vmatmul.msk.bf16.vlgmr.msra.gmra.mxu2 %vm252_vm0, %v599_v19 }
  0x3e   : >> { %1024 = vmatmul.msk.bf16.vlgmr.msra.gmra.mxu0 %vm252_vm0, %v1097_v47 }
  0x40   : >> { %1045 = vmatmul.msk.bf16.vlgmr.msra.gmra.mxu3 %vm252_vm0, %v636_v25 }
  0x44   : >> { %1066 = vmatmul.msk.bf16.vlgmr.msrb.gmra.mxu1 %vm252_vm0, %v718_v29 }
  0x4c   : >> { %1073 = vmatmul.msk.bf16.vlgmr.msrb.gmra.mxu2 %vm252_vm0, %v749_v36 }
  0x4e   : >> { %1059 = vmatmul.msk.bf16.vlgmr.msrb.gmra.mxu0 %vm252_vm0, %v1102_v9 }
  0x50   : >> { %1080 = vmatmul.msk.bf16.vlgmr.msrb.gmra.mxu3 %vm252_vm0, %v786_v39 }
  0x91   : >> { %v287_v40 = vpop.f32.mrf.mxu1 }
  0x99   : >> { %v289_v42 = vpop.f32.mrf.mxu1 }
  0x9b   : >> { %v265_v41 = vpop.f32.mrf.mxu0 }
  0x9c   : >> { %v288_v51 = vadd.f32 %v287_v40, %v265_v41 }
  0x9f   : >> { %v317_v43 = vpop.f32.mrf.mxu2 }
  0xa0   : >> { %v322_v53 = vadd.f32 %v317_v43, %v288_v51 }
  0xa1   : >> { %v437_v46 = vpop.f32.mrf.mxu1 }
  0xa3   : >> { %v267_v44 = vpop.f32.mrf.mxu0  ;;  %v355_v45 = vpop.f32.mrf.mxu3 }
  0xa4   : >> { %v360_v56 = vadd.f32 %v355_v45, %v322_v53  ;;  %v290_v57 = vadd.f32 %v289_v42, %v267_v44 }
  0xa7   : >> { %v319_v47 = vpop.f32.mrf.mxu2 }
  0xa8   : >> { %v323_v61 = vadd.f32 %v319_v47, %v290_v57 }
  0xa9   : >> { %v439_v50 = vpop.f32.mrf.mxu1 }
  0xab   : >> { %v357_v48 = vpop.f32.mrf.mxu3  ;;  %v395_v49 = vpop.f32.mrf.mxu0 }
  0xac   : >> { %v400_v58 = vadd.f32 %v395_v49, %v360_v56  ;;  %v361_v62 = vadd.f32 %v357_v48, %v323_v61 }
  0xae   : >> { %v442_v63 = vadd.f32 %v437_v46, %v400_v58 }
  0xaf   : >> { %v468_v52 = vpop.f32.mrf.mxu2 }
  0xb0   : >> { %v473_v3 = vadd.f32 %v468_v52, %v442_v63 }
  0xb1   : >> { %v587_v59 = vpop.f32.mrf.mxu1 }
  0xb3   : >> { %v397_v54 = vpop.f32.mrf.mxu0  ;;  %v505_v55 = vpop.f32.mrf.mxu3 }
  0xb4   : >> { %v401_v2 = vadd.f32 %v397_v54, %v361_v62  ;;  %v510_v5 = vadd.f32 %v505_v55, %v473_v3 }
  0xb6   : >> { %v443_v6 = vadd.f32 %v439_v50, %v401_v2 }
  0xb7   : >> { %v470_v60 = vpop.f32.mrf.mxu2 }
  0xb8   : >> { %v474_v12 = vadd.f32 %v470_v60, %v443_v6 }
  0xb9   : >> { %v589_v7 = vpop.f32.mrf.mxu1 }
  0xbb   : >> { %v507_v0 = vpop.f32.mrf.mxu3  ;;  %v545_v1 = vpop.f32.mrf.mxu0 }
  0xbc   : >> { %v550_v8 = vadd.f32 %v545_v1, %v510_v5  ;;  %v511_v13 = vadd.f32 %v507_v0, %v474_v12 }
  0xbe   : >> { %v592_v14 = vadd.f32 %v587_v59, %v550_v8 }
  0xbf   : >> { %v618_v4 = vpop.f32.mrf.mxu2 }
  0xc0   : >> { %v623_v17 = vadd.f32 %v618_v4, %v592_v14 }
  0xc1   : >> { %v737_v11 = vpop.f32.mrf.mxu1 }
  0xc3   : >> { %v547_v9 = vpop.f32.mrf.mxu0  ;;  %v655_v10 = vpop.f32.mrf.mxu3 }
  0xc4   : >> { %v551_v16 = vadd.f32 %v547_v9, %v511_v13  ;;  %v660_v20 = vadd.f32 %v655_v10, %v623_v17 }
  0xc6   : >> { %v593_v21 = vadd.f32 %v589_v7, %v551_v16 }
  0xc7   : >> { %v620_v15 = vpop.f32.mrf.mxu2 }
  0xc8   : >> { %v624_v24 = vadd.f32 %v620_v15, %v593_v21 }
  0xc9   : >> { %v739_v30 = vpop.f32.mrf.mxu1 }
  0xcb   : >> { %v657_v18 = vpop.f32.mrf.mxu3  ;;  %v695_v19 = vpop.f32.mrf.mxu0 }
  0xcc   : >> { %v700_v22 = vadd.f32 %v695_v19, %v660_v20  ;;  %v661_v25 = vadd.f32 %v657_v18, %v624_v24 }
  0xce   : >> { %v742_v26 = vadd.f32 %v737_v11, %v700_v22 }
  0xcf   : >> { %v768_v23 = vpop.f32.mrf.mxu2 }
  0xd0   : >> { %v773_v31 = vadd.f32 %v768_v23, %v742_v26 }
  0xd3   : >> { %v697_v27 = vpop.f32.mrf.mxu0  ;;  %v805_v28 = vpop.f32.mrf.mxu3 }
  0xd4   : >> { %v701_v29 = vadd.f32 %v697_v27, %v661_v25  ;;  %v810_v34 = vadd.f32 %v805_v28, %v773_v31 }
  0xd6   : >> { %v743_v32 = vadd.f32 %v739_v30, %v701_v29  ;;  %v816_v38 = vadd.f32 %v1146_v35, %v810_v34 }
  0xd7   : >> { %v770_v33 = vpop.f32.mrf.mxu2 }
  0xd8   : >> { %v774_v36 = vadd.f32 %v770_v33, %v743_v32  ;;  %v818_v41 = vmax.f32 %v816_v38, 0.0 }
  0xdb   : >> { %v807_v37 = vpop.f32.mrf.mxu3 }
  0xdc   : >> { %v811_v39 = vadd.f32 %v807_v37, %v774_v36 }
  0xde   : >> { %v817_v40 = vadd.f32 %v1146_v35, %v811_v39 }
  0xe0   : >> { %v819_v42 = vmax.f32 %v817_v40, 0.0  ;;  %212 = sbr.rel (!%p210_p5) target bundleno = 16 (0x10), region = 89 }
  0xe2   : >> { %v1111_v43 = vpack.c.bf16 %v819_v42, %v818_v41 }
  0xe4   : >> { %1112 = vst [vmem:[%s824_s17] sm:$0xff] %v1111_v43  }
  0xe5 PF: > { %s13_s14 = sadd.s32 1, %s1173_s14   ;;  %s1347_s12 = smov %s1169_s13 }
  0xe6   : > { %p10_p6 = scmp.ge.s32.totalorder %s13_s14, 4   ;;  %s1348_s13 = smov %s1350_s15 }
  0xe8   :  { %12 = sbr.rel (!%p10_p6) target bundleno = 2 (0x2), region = 100 }

// kernel: _lambda_.32
= control target key start
LH: loop header
LB: loop body
LE: loop exit
PB: predicated region body
PF: predicated region fallthrough
CT: control target
= control target key end

     0   :  { %s782_s12 = smov 0   ;;  %s784_s13 = smov 0   ;;  %s885_s0 = inlined_call_operand.vmem [shape: bf16[2,1,18,18,8], index: 0, kind: input, shape index: {}]   ;;  %s886_s1 = inlined_call_operand.vmem [shape: bf16[3,3,8,128], index: 1, kind: input, shape index: {}]   ;;  %s887_s2 = inlined_call_operand.vmem [shape: f32[1,128], index: 2, kind: input, shape index: {}]   ;;  %s888_s3 = inlined_call_operand.vmem [shape: bf16[2,1,16,16,128], index: 3, kind: output, shape index: {}]  }
   0x1   :  { %s786_s14 = smov 0  }
   0x2 LB: > { %s25_s15 = sadd.s32 1, %s752_s13  ;;  %p641_p0 = scmp.ge.s32.totalorder %s756_s14, 1  ;;  %s756_s14 = sphi %s786_s14, %s13_s14   ;;  %s752_s13 = sphi %s784_s13, %s890_s13   ;;  %s748_s12 = sphi %s782_s12, %s889_s12  }
   0x3   : > { %p27_p1 = scmp.ge.s32.totalorder %s25_s15, 2  ;;  %p157_p2 = scmp.lt.s32.totalorder %s756_s14, 3 }
   0x5   : > { %s892_s15 = smov (%p27_p1, %s25_s15), 0  ;;  %p158_p3 = pnand %p641_p0, %p157_p2 }
   0x6   : > { %p189_p4 = scmp.lt.s32.totalorder (!%p158_p3), %s748_s12, 1  ;;  %s810_s24 = smov (!%p158_p3), 0  }
   0x7   : > { %161 = sbr.rel (%p158_p3) target bundleno = 205 (0xcd), region = 32 }
   0xc   : > { %s894_s12 = smov (!%p189_p4, %s748_s12), 1 }
   0xd   : > { %s696_s16 = smul.u32 216, %s894_s12  ;;  %s685_s17 = sshll.u32 %s894_s12, 7 }
   0xe   : > { %s803_s20 = scalar_lea.vmem %s888_s3, %s685_s17 }
   0xf   : > { %s808_s23 = scalar_lea.vmem %s885_s0, %s696_s16 }
  0x10 LB: >> { %vm248_vm0 = vcmask 1043456   ;;  %v653_v0 = vld [vmem:[%s886_s1 + $0x8] sm:$0xf]  ;;  %v646_v1 = vld [vmem:[%s886_s1 + $0x4] sm:$0xf]  ;;  %s686_s6 = smul.u32 12, %s760_s24  ;;  %s760_s24 = sphi %s810_s24, %s213_s24  }
  0x11   : >> { %v295_v2 = vsel %vm248_vm0, %v653_v0, 0  ;;  %v250_v3 = vsel %vm248_vm0, %v646_v1, 0  ;;  %v220_v4 = vld [vmem:[%s886_s1] sm:$0xf]  ;;  %v658_v5 = vld [vmem:[%s886_s1 + $0xc] sm:$0xf] }
  0x12   : >> { %304 = vmatpush.bf16.msra.mxu2 %v295_v2  ;;  %259 = vmatpush.bf16.msra.mxu0 %v250_v3  ;;  %v269_v6 = vsel %vm248_vm0, %v220_v4, 0  ;;  %v331_v7 = vsel %vm248_vm0, %v658_v5, 0  ;;  %v664_v8 = vld [vmem:[%s886_s1 + $0x10] sm:$0xf]  ;;  %v671_v9 = vld [vmem:[%s886_s1 + $0x18] sm:$0xf]  ;;  %s216_s16 = scalar_lea.vmem %s808_s23, %s686_s6 }
  0x13   : >> { %278 = vmatpush.bf16.msra.mxu1 %v269_v6  ;;  %340 = vmatpush.bf16.msra.mxu3 %v331_v7  ;;  %v677_v10 = vld [vmem:[%s886_s1 + $0x1c] sm:$0xf]  ;;  %v369_v11 = vsel %vm248_vm0, %v664_v8, 0  ;;  %v432_v12 = vsel %vm248_vm0, %v671_v9, 0  ;;  %v666_v14 = vld [vmem:[%s886_s1 + $0x14] sm:$0xf] }
  0x14   : >> { %v470_v13 = vsel %vm248_vm0, %v677_v10, 0  ;;  %v687_v15 = vld [vmem:[%s216_s16] sm:$0xff]  ;;  %v219_v16 = vld [vmem:[%s216_s16 + $0x8] sm:$0x1]  ;;  %v688_v17 = vld [vmem:[%s216_s16 + $0xc] sm:$0xff]  ;;  %v396_v18 = vsel %vm248_vm0, %v666_v14, 0 }
  0x15   : >> { %v228_v19 = vunpack.c.l.b16 %v219_v16  ;;  %vm244_vm1 = vcmask 64512   ;;  %v689_v20 = vld [vmem:[%s216_s16 + $0x18] sm:$0xff]  ;;  %v670_v21 = vld [vmem:[%s216_s16 + $0x20] sm:$0x1]  ;;  %v233_v22 = vshrl.u32 %v687_v15, 16  ;;  %v235_v23 = vshll.u32 %v687_v15, 16 }
  0x16   : >> { %378 = vmatpush.bf16.msrb.mxu0 %v369_v11  ;;  %441 = vmatpush.bf16.msrb.mxu2 %v432_v12  ;;  %v657_v24 = vld [vmem:[%s216_s16 + $0x14] sm:$0x1]  ;;  %v288_v26 = vrot.slane %v687_v15, 1  ;;  %v453_v27 = vunpack.c.l.b16 %v670_v21  ;;  %vm287_vm2 = vcmask 1046528   ;;  %v457_v29 = vshll.u32 %v689_v20, 16  ;;  %s690_s26 = sshll.u32 %s760_s24, 3 }
  0x17   : >> { %479 = vmatpush.bf16.msrb.mxu3 %v470_v13  ;;  %405 = vmatpush.bf16.msrb.mxu1 %v396_v18  ;;  %v230_v25 = vpack.c.b16 %v228_v19, %v228_v19  ;;  %v237_v28 = vrot.slane %v235_v23, 1  ;;  %v352_v32 = vunpack.c.l.b16 %v657_v24  ;;  %v679_v34 = vld [vmem:[%s886_s1 + $0x20] sm:$0xf]  ;;  %vm231_vm3 = vsmask.f32 7424  ;;  %s527_s27 = scalar_lea.vmem %s803_s20, %s690_s26  ;;  %s213_s24 = sadd.s32 1, %s760_s24  }
  0x18   : >> { %652 = vmatmul.msk.bf16.vlgmr.msra.gmra.mxu1 %vm244_vm1, %v687_v15  ;;  %663 = vmatmul.msk.bf16.vlgmr.msra.gmra.mxu3 %vm244_vm1, %v688_v17  ;;  %v454_v33 = vpack.c.b16 %v453_v27, %v453_v27  ;;  %v455_v36 = vshrl.u32 %v689_v20, 16  ;;  %v459_v39 = vrot.slane %v457_v29, 1  ;;  %v497_v41 = vsel %vm248_vm0, %v679_v34, 0  ;;  %v729_v27 = vld [vmem:[%s887_s2] ss:$0 sm:$0xff]  ;;  %p210_p5 = scmp.ge.s32.totalorder %s213_s24, 16  }
  0x19   : >> { %v289_v30 = vrot.slane %v230_v25, 1  ;;  %v240_v31 = vshll.u32 %v230_v25, 16  ;;  %v238_v35 = vor.u32 %v237_v28, %v233_v22  ;;  %v353_v43 = vpack.c.b16 %v352_v32, %v352_v32 }
  0x1a   : >> { %v462_v40 = vshll.u32 %v454_v33, 16  ;;  %v356_v44 = vshll.u32 %v688_v17, 16  ;;  %v460_v45 = vor.u32 %v459_v39, %v455_v36  ;;  %v389_v47 = vrot.slane %v688_v17, 1 }
  0x1b   : >> { %v290_v37 = vsel %vm287_vm2, %v288_v26, %v289_v30  ;;  %v242_v38 = vrot.slane %v240_v31, 1  ;;  %v390_v48 = vrot.slane %v353_v43, 1  ;;  %v354_v49 = vshrl.u32 %v688_v17, 16 }
  0x1c   : >> { %654 = vmatmul.msk.bf16.vlgmr.msra.gmra.mxu2 %vm244_vm1, %v290_v37  ;;  %v464_v46 = vrot.slane %v462_v40, 1  ;;  %v358_v50 = vrot.slane %v356_v44, 1  ;;  %v361_v51 = vshll.u32 %v353_v43, 16  ;;  %v490_v57 = vrot.slane %v689_v20, 1 }
  0x1d   : >> { %v243_v42 = vsel %vm231_vm3, %v238_v35, %v242_v38  ;;  %v391_v53 = vsel %vm287_vm2, %v389_v47, %v390_v48  ;;  %v491_v58 = vrot.slane %v454_v33, 1 }
  0x1e   : >> { %651 = vmatmul.msk.bf16.vlgmr.msra.gmra.mxu0 %vm244_vm1, %v243_v42  ;;  %v465_v52 = vsel %vm231_vm3, %v460_v45, %v464_v46  ;;  %v359_v54 = vor.u32 %v358_v50, %v354_v49  ;;  %v363_v55 = vrot.slane %v361_v51, 1 }
  0x1f   : >> { %506 = vmatpush.bf16.msra.mxu0 %v497_v41  ;;  %v492_v59 = vsel %vm287_vm2, %v490_v57, %v491_v58 }
  0x20   : >> { %v364_v56 = vsel %vm231_vm3, %v359_v54, %v363_v55 }
  0x28   : >> { %678 = vmatmul.msk.bf16.vlgmr.msrb.gmra.mxu3 %vm244_vm1, %v465_v52  ;;  %667 = vmatmul.msk.bf16.vlgmr.msrb.gmra.mxu1 %vm244_vm1, %v391_v53 }
  0x2c   : >> { %676 = vmatmul.msk.bf16.vlgmr.msrb.gmra.mxu2 %vm244_vm1, %v689_v20 }
  0x2e   : >> { %665 = vmatmul.msk.bf16.vlgmr.msrb.gmra.mxu0 %vm244_vm1, %v364_v56 }
  0x3e   : >> { %680 = vmatmul.msk.bf16.vlgmr.msra.gmra.mxu0 %vm244_vm1, %v492_v59 }
  0x95   : >> { %v280_v61 = vpop.f32.mrf.mxu1 }
  0x9b   : >> { %v261_v60 = vpop.f32.mrf.mxu0  ;;  %v342_v63 = vpop.f32.mrf.mxu3 }
  0x9c   : >> { %v281_v3 = vadd.f32 %v280_v61, %v261_v60 }
  0x9d   : >> { %v282_v1 = vpop.f32.mrf.mxu1 }
  0x9f   : >> { %v306_v62 = vpop.f32.mrf.mxu2 }
  0xa0   : >> { %v311_v6 = vadd.f32 %v306_v62, %v281_v3 }
  0xa2   : >> { %v347_v9 = vadd.f32 %v342_v63, %v311_v6 }
  0xa3   : >> { %v263_v0 = vpop.f32.mrf.mxu0  ;;  %v344_v4 = vpop.f32.mrf.mxu3 }
  0xa4   : >> { %v283_v8 = vadd.f32 %v282_v1, %v263_v0 }
  0xa5   : >> { %v407_v7 = vpop.f32.mrf.mxu1 }
  0xa7   : >> { %v308_v2 = vpop.f32.mrf.mxu2 }
  0xa8   : >> { %v312_v10 = vadd.f32 %v308_v2, %v283_v8 }
  0xaa   : >> { %v348_v14 = vadd.f32 %v344_v4, %v312_v10 }
  0xab   : >> { %v380_v5 = vpop.f32.mrf.mxu0  ;;  %v481_v15 = vpop.f32.mrf.mxu3 }
  0xac   : >> { %v385_v12 = vadd.f32 %v380_v5, %v347_v9 }
  0xad   : >> { %v409_v18 = vpop.f32.mrf.mxu1 }
  0xae   : >> { %v412_v16 = vadd.f32 %v407_v7, %v385_v12 }
  0xaf   : >> { %v443_v11 = vpop.f32.mrf.mxu2 }
  0xb0   : >> { %v448_v19 = vadd.f32 %v443_v11, %v412_v16 }
  0xb2   : >> { %v486_v23 = vadd.f32 %v481_v15, %v448_v19 }
  0xb3   : >> { %v382_v13 = vpop.f32.mrf.mxu0  ;;  %v483_v25 = vpop.f32.mrf.mxu3 }
  0xb4   : >> { %v386_v17 = vadd.f32 %v382_v13, %v348_v14 }
  0xb6   : >> { %v413_v20 = vadd.f32 %v409_v18, %v386_v17 }
  0xb7   : >> { %v445_v21 = vpop.f32.mrf.mxu2 }
  0xb8   : >> { %v449_v24 = vadd.f32 %v445_v21, %v413_v20 }
  0xba   : >> { %v487_v28 = vadd.f32 %v483_v25, %v449_v24 }
  0xbb   : >> { %v508_v22 = vpop.f32.mrf.mxu0 }
  0xbc   : >> { %v513_v26 = vadd.f32 %v508_v22, %v486_v23 }
  0xbe   : >> { %v519_v30 = vadd.f32 %v729_v27, %v513_v26 }
  0xc0   : >> { %v521_v33 = vmax.f32 %v519_v30, 0.0 }
  0xc3   : >> { %v510_v29 = vpop.f32.mrf.mxu0 }
  0xc4   : >> { %v514_v31 = vadd.f32 %v510_v29, %v487_v28 }
  0xc6   : >> { %v520_v32 = vadd.f32 %v729_v27, %v514_v31 }
  0xc8   : >> { %v522_v34 = vmax.f32 %v520_v32, 0.0  ;;  %212 = sbr.rel (!%p210_p5) target bundleno = 16 (0x10), region = 81 }
  0xca   : >> { %v694_v35 = vpack.c.bf16 %v522_v34, %v521_v33 }
  0xcc   : >> { %695 = vst [vmem:[%s527_s27] sm:$0xff] %v694_v35  }
  0xcd PF: > { %s13_s14 = sadd.s32 1, %s756_s14   ;;  %s889_s12 = smov %s752_s13 }
  0xce   : > { %p10_p6 = scmp.ge.s32.totalorder %s13_s14, 4   ;;  %s890_s13 = smov %s892_s15 }
  0xd0   :  { %12 = sbr.rel (!%p10_p6) target bundleno = 2 (0x2), region = 92 }

// kernel: _lambda_.33
= control target key start
LH: loop header
LB: loop body
LE: loop exit
PB: predicated region body
PF: predicated region fallthrough
CT: control target
= control target key end

     0   :  { %s818_s12 = smov 0   ;;  %s820_s13 = smov 0   ;;  %s921_s0 = inlined_call_operand.vmem [shape: bf16[2,1,18,18,4], index: 0, kind: input, shape index: {}]   ;;  %s922_s1 = inlined_call_operand.vmem [shape: bf16[3,3,4,128], index: 1, kind: input, shape index: {}]   ;;  %s923_s2 = inlined_call_operand.vmem [shape: f32[1,128], index: 2, kind: input, shape index: {}]   ;;  %s924_s3 = inlined_call_operand.vmem [shape: f32[2,1,16,16,128], index: 3, kind: output, shape index: {}]  }
   0x1   :  { %s822_s14 = smov 0  }
   0x2 LB: > { %s25_s15 = sadd.s32 1, %s788_s13  ;;  %p674_p0 = scmp.ge.s32.totalorder %s792_s14, 1  ;;  %s792_s14 = sphi %s822_s14, %s13_s14   ;;  %s788_s13 = sphi %s820_s13, %s926_s13   ;;  %s784_s12 = sphi %s818_s12, %s925_s12  }
   0x3   : > { %p27_p1 = scmp.ge.s32.totalorder %s25_s15, 2  ;;  %p157_p2 = scmp.lt.s32.totalorder %s792_s14, 3 }
   0x5   : > { %s928_s15 = smov (%p27_p1, %s25_s15), 0  ;;  %p158_p3 = pnand %p674_p0, %p157_p2 }
   0x6   : > { %p189_p4 = scmp.lt.s32.totalorder (!%p158_p3), %s784_s12, 1  ;;  %s846_s24 = smov (!%p158_p3), 0  }
   0x7   : > { %161 = sbr.rel (%p158_p3) target bundleno = 229 (0xe5), region = 32 }
   0xc   : > { %s930_s12 = smov (!%p189_p4, %s784_s12), 1 }
   0xd   : > { %s724_s16 = smul.u32 216, %s930_s12  ;;  %s719_s17 = sshll.u32 %s930_s12, 8 }
   0xe   : > { %s839_s20 = scalar_lea.vmem %s924_s3, %s719_s17 }
   0xf   : > { %s844_s23 = scalar_lea.vmem %s921_s0, %s724_s16 }
  0x10 LB: >> { %vm248_vm0 = vcmask 1041408   ;;  %v686_v0 = vld [vmem:[%s922_s1 + $0x4] sm:$0x3]  ;;  %v679_v1 = vld [vmem:[%s922_s1 + $0x2] sm:$0x3]  ;;  %s720_s6 = smul.u32 12, %s796_s24  ;;  %s796_s24 = sphi %s846_s24, %s213_s24  }
  0x11   : >> { %v295_v2 = vsel %vm248_vm0, %v686_v0, 0  ;;  %v250_v3 = vsel %vm248_vm0, %v679_v1, 0  ;;  %v220_v4 = vld [vmem:[%s922_s1] sm:$0x3]  ;;  %v691_v5 = vld [vmem:[%s922_s1 + $0x6] sm:$0x3] }
  0x12   : >> { %304 = vmatpush.bf16.msra.mxu2 %v295_v2  ;;  %259 = vmatpush.bf16.msra.mxu0 %v250_v3  ;;  %v269_v6 = vsel %vm248_vm0, %v220_v4, 0  ;;  %v331_v7 = vsel %vm248_vm0, %v691_v5, 0  ;;  %v697_v8 = vld [vmem:[%s922_s1 + $0x8] sm:$0x3]  ;;  %v704_v9 = vld [vmem:[%s922_s1 + $0xc] sm:$0x3]  ;;  %s216_s16 = scalar_lea.vmem %s844_s23, %s720_s6 }
  0x13   : >> { %278 = vmatpush.bf16.msra.mxu1 %v269_v6  ;;  %340 = vmatpush.bf16.msra.mxu3 %v331_v7  ;;  %v710_v10 = vld [vmem:[%s922_s1 + $0xe] sm:$0x3]  ;;  %v369_v11 = vsel %vm248_vm0, %v697_v8, 0  ;;  %v432_v12 = vsel %vm248_vm0, %v704_v9, 0  ;;  %v699_v14 = vld [vmem:[%s922_s1 + $0xa] sm:$0x3] }
  0x14   : >> { %v470_v13 = vsel %vm248_vm0, %v710_v10, 0  ;;  %v721_v15 = vld [vmem:[%s216_s16] sm:$0xff]  ;;  %v219_v16 = vld [vmem:[%s216_s16 + $0x8] sm:$0x1]  ;;  %v722_v17 = vld [vmem:[%s216_s16 + $0xc] sm:$0xff]  ;;  %v396_v18 = vsel %vm248_vm0, %v699_v14, 0 }
  0x15   : >> { %v228_v19 = vunpack.c.l.b16 %v219_v16  ;;  %vm244_vm1 = vcmask 31744   ;;  %v723_v20 = vld [vmem:[%s216_s16 + $0x18] sm:$0xff]  ;;  %v703_v21 = vld [vmem:[%s216_s16 + $0x20] sm:$0x1]  ;;  %v233_v22 = vshrl.u32 %v721_v15, 16  ;;  %v235_v23 = vshll.u32 %v721_v15, 16 }
  0x16   : >> { %378 = vmatpush.bf16.msrb.mxu0 %v369_v11  ;;  %441 = vmatpush.bf16.msrb.mxu2 %v432_v12  ;;  %v690_v24 = vld [vmem:[%s216_s16 + $0x14] sm:$0x1]  ;;  %v288_v26 = vrot.slane %v721_v15, 1  ;;  %v453_v27 = vunpack.c.l.b16 %v703_v21  ;;  %vm287_vm2 = vcmask 1046528   ;;  %v457_v29 = vshll.u32 %v723_v20, 16  ;;  %s716_s26 = sshll.u32 %s796_s24, 4 }
  0x17   : >> { %479 = vmatpush.bf16.msrb.mxu3 %v470_v13  ;;  %405 = vmatpush.bf16.msrb.mxu1 %v396_v18  ;;  %v230_v25 = vpack.c.b16 %v228_v19, %v228_v19  ;;  %v237_v28 = vrot.slane %v235_v23, 1  ;;  %v352_v32 = vunpack.c.l.b16 %v690_v24  ;;  %v712_v34 = vld [vmem:[%s922_s1 + $0x10] sm:$0x3]  ;;  %vm231_vm3 = vsmask.f32 7424  ;;  %s560_s27 = scalar_lea.vmem %s839_s20, %s716_s26  ;;  %s213_s24 = sadd.s32 1, %s796_s24  }
  0x18   : >> { %685 = vmatmul.msk.bf16.vlgmr.msra.gmra.mxu1 %vm244_vm1, %v721_v15  ;;  %696 = vmatmul.msk.bf16.vlgmr.msra.gmra.mxu3 %vm244_vm1, %v722_v17  ;;  %v454_v33 = vpack.c.b16 %v453_v27, %v453_v27  ;;  %v455_v36 = vshrl.u32 %v723_v20, 16  ;;  %v459_v39 = vrot.slane %v457_v29, 1  ;;  %v497_v41 = vsel %vm248_vm0, %v712_v34, 0  ;;  %p210_p5 = scmp.ge.s32.totalorder %s213_s24, 16  }
  0x19   : >> { %v289_v30 = vrot.slane %v230_v25, 1  ;;  %v240_v31 = vshll.u32 %v230_v25, 16  ;;  %v238_v35 = vor.u32 %v237_v28, %v233_v22  ;;  %v353_v43 = vpack.c.b16 %v352_v32, %v352_v32  ;;  %v757_v22 = vld [vmem:[%s923_s2] ss:$0 sm:$0xff] }
  0x1a   : >> { %v462_v40 = vshll.u32 %v454_v33, 16  ;;  %v356_v44 = vshll.u32 %v722_v17, 16  ;;  %v460_v45 = vor.u32 %v459_v39, %v455_v36  ;;  %v389_v47 = vrot.slane %v722_v17, 1 }
  0x1b   : >> { %v290_v37 = vsel %vm287_vm2, %v288_v26, %v289_v30  ;;  %v242_v38 = vrot.slane %v240_v31, 1  ;;  %v390_v48 = vrot.slane %v353_v43, 1  ;;  %v354_v49 = vshrl.u32 %v722_v17, 16 }
  0x1c   : >> { %687 = vmatmul.msk.bf16.vlgmr.msra.gmra.mxu2 %vm244_vm1, %v290_v37  ;;  %v464_v46 = vrot.slane %v462_v40, 1  ;;  %v358_v50 = vrot.slane %v356_v44, 1  ;;  %v361_v51 = vshll.u32 %v353_v43, 16  ;;  %v490_v57 = vrot.slane %v723_v20, 1 }
  0x1d   : >> { %v243_v42 = vsel %vm231_vm3, %v238_v35, %v242_v38  ;;  %v391_v53 = vsel %vm287_vm2, %v389_v47, %v390_v48  ;;  %v491_v58 = vrot.slane %v454_v33, 1 }
  0x1e   : >> { %684 = vmatmul.msk.bf16.vlgmr.msra.gmra.mxu0 %vm244_vm1, %v243_v42  ;;  %v465_v52 = vsel %vm231_vm3, %v460_v45, %v464_v46  ;;  %v359_v54 = vor.u32 %v358_v50, %v354_v49  ;;  %v363_v55 = vrot.slane %v361_v51, 1 }
  0x1f   : >> { %506 = vmatpush.bf16.msra.mxu0 %v497_v41  ;;  %v492_v59 = vsel %vm287_vm2, %v490_v57, %v491_v58 }
  0x20   : >> { %v364_v56 = vsel %vm231_vm3, %v359_v54, %v363_v55 }
  0x28   : >> { %711 = vmatmul.msk.bf16.vlgmr.msrb.gmra.mxu3 %vm244_vm1, %v465_v52  ;;  %700 = vmatmul.msk.bf16.vlgmr.msrb.gmra.mxu1 %vm244_vm1, %v391_v53 }
  0x2c   : >> { %709 = vmatmul.msk.bf16.vlgmr.msrb.gmra.mxu2 %vm244_vm1, %v723_v20 }
  0x2e   : >> { %698 = vmatmul.msk.bf16.vlgmr.msrb.gmra.mxu0 %vm244_vm1, %v364_v56 }
  0x3e   : >> { %713 = vmatmul.msk.bf16.vlgmr.msra.gmra.mxu0 %vm244_vm1, %v492_v59 }
  0x95   : >> { %v280_v61 = vpop.f32.mrf.mxu1 }
  0x9b   : >> { %v261_v60 = vpop.f32.mrf.mxu0  ;;  %v342_v63 = vpop.f32.mrf.mxu3 }
  0x9c   : >> { %v281_v2 = vadd.f32 %v280_v61, %v261_v60 }
  0x9d   : >> { %v282_v1 = vpop.f32.mrf.mxu1 }
  0x9f   : >> { %v306_v62 = vpop.f32.mrf.mxu2 }
  0xa0   : >> { %v311_v4 = vadd.f32 %v306_v62, %v281_v2 }
  0xa2   : >> { %v347_v7 = vadd.f32 %v342_v63, %v311_v4 }
  0xa3   : >> { %v263_v0 = vpop.f32.mrf.mxu0  ;;  %v344_v5 = vpop.f32.mrf.mxu3 }
  0xa4   : >> { %v283_v9 = vadd.f32 %v282_v1, %v263_v0 }
  0xa5   : >> { %v407_v8 = vpop.f32.mrf.mxu1 }
  0xa7   : >> { %v308_v3 = vpop.f32.mrf.mxu2 }
  0xa8   : >> { %v312_v11 = vadd.f32 %v308_v3, %v283_v9 }
  0xaa   : >> { %v348_v15 = vadd.f32 %v344_v5, %v312_v11 }
  0xab   : >> { %v380_v6 = vpop.f32.mrf.mxu0  ;;  %v481_v16 = vpop.f32.mrf.mxu3 }
  0xac   : >> { %v385_v10 = vadd.f32 %v380_v6, %v347_v7 }
  0xad   : >> { %v409_v19 = vpop.f32.mrf.mxu1 }
  0xae   : >> { %v412_v13 = vadd.f32 %v407_v8, %v385_v10 }
  0xaf   : >> { %v443_v12 = vpop.f32.mrf.mxu2 }
  0xb0   : >> { %v448_v17 = vadd.f32 %v443_v12, %v412_v13 }
  0xb2   : >> { %v486_v20 = vadd.f32 %v481_v16, %v448_v17 }
  0xb3   : >> { %v382_v14 = vpop.f32.mrf.mxu0  ;;  %v483_v28 = vpop.f32.mrf.mxu3 }
  0xb4   : >> { %v386_v18 = vadd.f32 %v382_v14, %v348_v15 }
  0xb6   : >> { %v413_v21 = vadd.f32 %v409_v19, %v386_v18 }
  0xb7   : >> { %v445_v23 = vpop.f32.mrf.mxu2 }
  0xb8   : >> { %v449_v26 = vadd.f32 %v445_v23, %v413_v21 }
  0xba   : >> { %v487_v30 = vadd.f32 %v483_v28, %v449_v26 }
  0xbb   : >> { %v508_v24 = vpop.f32.mrf.mxu0 }
  0xbc   : >> { %v513_v25 = vadd.f32 %v508_v24, %v486_v20 }
  0xbe   : >> { %v519_v27 = vadd.f32 %v757_v22, %v513_v25 }
  0xc0   : >> { %v714_v29 = vmul.f32 -1.442695, %v519_v27 }
  0xc2   : >> { %758 = vpow2.f32 %v714_v29 }
  0xc3   : >> { %v510_v31 = vpop.f32.mrf.mxu0 }
  0xc4   : >> { %v514_v32 = vadd.f32 %v510_v31, %v487_v30 }
  0xc6   : >> { %v520_v33 = vadd.f32 %v757_v22, %v514_v32 }
  0xc8   : >> { %v759_v34 = vpop.eup %758  ;;  %v715_v35 = vmul.f32 -1.442695, %v520_v33 }
  0xc9   : >> { %v527_v36 = vadd.f32 1.0, %v759_v34 }
  0xca   : >> { %760 = vpow2.f32 %v715_v35 }
  0xcb   : >> { %762 = vrcp.f32 %v527_v36  ;;  %v540_v42 = vand.u32 2147483648, %v527_v36  ;;  %v538_v44 = vand.u32 2147483647, %v527_v36  ;;  %vm534_vm5 = vweird.f32 %v527_v36 }
  0xcd   : >> { %v541_v47 = vor.u32 1.1754944e-38, %v540_v42  ;;  %vm539_vm7 = vcmp.eq.f32.partialorder %v538_v44, 8.507059e+37 }
  0xd0   : >> { %v761_v37 = vpop.eup %760 }
  0xd1   : >> { %v763_v38 = vpop.eup %762  ;;  %v528_v39 = vadd.f32 1.0, %v761_v37 }
  0xd2   : >> { %v530_v40 = vmul.f32 %v763_v38, %v527_v36  ;;  %vm535_vm4 = vweird.f32 %v763_v38 }
  0xd3   : >> { %764 = vrcp.f32 %v528_v39  ;;  %vm536_vm6 = vmor %vm534_vm5, %vm535_vm4  ;;  %v555_v52 = vand.u32 2147483648, %v528_v39  ;;  %v553_v54 = vand.u32 2147483647, %v528_v39  ;;  %vm549_vm9 = vweird.f32 %v528_v39 }
  0xd4   : >> { %v531_v41 = vsub.f32 1.0, %v530_v40 }
  0xd5   : >> { %v556_v56 = vor.u32 1.1754944e-38, %v555_v52  ;;  %vm554_vm11 = vcmp.eq.f32.partialorder %v553_v54, 8.507059e+37 }
  0xd6   : >> { %v532_v43 = vmul.f32 %v763_v38, %v531_v41 }
  0xd8   : >> { %v533_v45 = vadd.f32 %v763_v38, %v532_v43 }
  0xd9   : >> { %v765_v46 = vpop.eup %764 }
  0xda   : >> { %v537_v48 = vsel %vm536_vm6, %v763_v38, %v533_v45  ;;  %v545_v49 = vmul.f32 %v765_v46, %v528_v39  ;;  %vm550_vm8 = vweird.f32 %v765_v46 }
  0xdb   : >> { %v542_v50 = vsel %vm539_vm7, %v541_v47, %v537_v48  ;;  %vm551_vm10 = vmor %vm549_vm9, %vm550_vm8 }
  0xdc   : >> { %561 = vst [vmem:[%s560_s27] sm:$0xff] %v542_v50  ;;  %v546_v51 = vsub.f32 1.0, %v545_v49 }
  0xde   : >> { %v547_v53 = vmul.f32 %v765_v46, %v546_v51 }
  0xe0   : >> { %v548_v55 = vadd.f32 %v765_v46, %v547_v53  ;;  %212 = sbr.rel (!%p210_p5) target bundleno = 16 (0x10), region = 81 }
  0xe2   : >> { %v552_v57 = vsel %vm551_vm10, %v765_v46, %v548_v55 }
  0xe3   : >> { %v557_v58 = vsel %vm554_vm11, %v556_v56, %v552_v57 }
  0xe4   : >> { %562 = vst [vmem:[%s560_s27 + $0x8] sm:$0xff] %v557_v58 }
  0xe5 PF: > { %s13_s14 = sadd.s32 1, %s792_s14   ;;  %s925_s12 = smov %s788_s13 }
  0xe6   : > { %p10_p6 = scmp.ge.s32.totalorder %s13_s14, 4   ;;  %s926_s13 = smov %s928_s15 }
  0xe8   :  { %12 = sbr.rel (!%p10_p6) target bundleno = 2 (0x2), region = 92 }

</bundles_post_ra>
